<compile_context>
chip_gen: v7x
topology: tpu7x:2x2x1
jax: 0.10.0
libtpu: 0.0.40
codegen_flags: <defaults>
</compile_context>

<pallas_src>
import numpy as np
import jax
import jax.numpy as jnp
from jax import lax
from jax.experimental import pallas as pl
from jax.experimental.pallas import tpu as pltpu

CIN = 3      # RGB input channels
CMID = 64    # hidden width of conv1..conv3
COUT = 3     # RGB output channels
K2 = 9       # 3x3 taps


# ----------------------------------------------------------------------------
# Bilinear 2x upsample matrices (torch Upsample(scale=2, bilinear,
# align_corners=False) semantics: half-pixel centers, clamped at borders).
# ----------------------------------------------------------------------------
def _up2x_matrix(n):
    """(2n, n) bilinear interpolation matrix."""
    m = np.zeros((2 * n, n), dtype=np.float32)
    for i in range(2 * n):
        src = (i + 0.5) / 2.0 - 0.5
        src = max(src, 0.0)
        i0 = int(np.floor(src))
        i1 = min(i0 + 1, n - 1)
        w1 = src - i0
        m[i, i0] += 1.0 - w1
        m[i, i1] += w1
    return m


def _upsample_kron_t(h, w):
    """(H*W, 4*H*W) matrix B^T with vec_row(up2x(X)) = B @ vec_row(X)."""
    b = np.kron(_up2x_matrix(h), _up2x_matrix(w))     # (2H*2W, H*W)
    return np.ascontiguousarray(b.T)


# ----------------------------------------------------------------------------
# Fused kernel: conv1..conv4 (+ReLU) + bilinear 2x upsample, one frame / step.
# ----------------------------------------------------------------------------
def _fused_vsr_kernel(x_ref, w1_ref, b1_ref, w2_ref, b2_ref, w3_ref, b3_ref,
                      w4t_ref, b4_ref, bt_ref, o_ref, pad_scr, patch_scr):
    # x_ref:     (1, H, W, 3)      one NHWC input frame
    # w{1,2,3}:  (9*64, 64)        im2col weights (conv1 zero-embedded)
    # b{1,2,3}:  (1, 64)
    # w4t_ref:   (3, 9*64)         conv4 weights, output-channel major
    # b4_ref:    (3, 1)
    # bt_ref:    (H*W, 4*H*W)      Kronecker bilinear-2x matrix, transposed
    # o_ref:     (1, 3, 4*H*W)     lane-dense output slab (N, C, H*W layout)
    # pad_scr:   (H+2, W+2, 64)    zero-haloed activation buffer (VMEM)
    # patch_scr: (H*W, 9*64)       im2col slab (VMEM)
    _, h, w, _ = x_ref.shape
    c = pad_scr.shape[-1]
    hw = h * w

    # Zero the halo (and the unused conv1 input channels) once per frame.
    pad_scr[...] = jnp.zeros_like(pad_scr)
    # conv1 input -> channels [0:3] of the interior.
    pad_scr[1:h + 1, 1:w + 1, 0:CIN] = x_ref[0].astype(jnp.float32)

    def im2col():
        # One copy pass: 9 shifted (H, W, 64) views -> (H*W, 9*64) slab.
        for t in range(K2):
            dy, dx = divmod(t, 3)
            tap = pad_scr[dy:dy + h, dx:dx + w, :].reshape(hw, c)
            patch_scr[:, t * c:(t + 1) * c] = tap

    # conv1..conv3: one (H*W, 576) @ (576, 64) matmul each, ReLU, and the
    # result goes straight back into the halo buffer's interior (all in VMEM).
    for w_ref, b_ref in ((w1_ref, b1_ref), (w2_ref, b2_ref), (w3_ref, b3_ref)):
        im2col()
        act = jnp.dot(patch_scr[...], w_ref[...],
                      preferred_element_type=jnp.float32)       # (H*W, 64)
        act = jnp.maximum(act + b_ref[...], 0.0)
        pad_scr[1:h + 1, 1:w + 1, :] = act.reshape(h, w, c)

    # conv4, computed output-channel-major: (3, 576) x (H*W, 576)^T -> (3, HW)
    im2col()
    a4 = lax.dot_general(w4t_ref[...], patch_scr[...],
                         (((1,), (1,)), ((), ())),
                         preferred_element_type=jnp.float32)     # (3, H*W)
    a4 = a4 + b4_ref[...]                                        # (3,1) bcast

    # Bilinear 2x upsample == one matmul with the Kronecker matrix:
    # (3, H*W) @ (H*W, 4*H*W) -> (3, 4*H*W), already lane-dense for the store.
    up = jnp.dot(a4, bt_ref[...], preferred_element_type=jnp.float32)
    o_ref[0] = up.astype(o_ref.dtype)


# ----------------------------------------------------------------------------
# Parameter init (matches PyTorch Conv2d default init; weights kept in HWIO).
# ----------------------------------------------------------------------------
def init_params(key):
    def conv_init(k, cout, cin, ksz=3):
        fan_in = cin * ksz * ksz
        bound = 1.0 / np.sqrt(fan_in)
        kw, kb = jax.random.split(k)
        w_oihw = jax.random.uniform(kw, (cout, cin, ksz, ksz), jnp.float32,
                                    -bound, bound)
        b = jax.random.uniform(kb, (cout,), jnp.float32, -bound, bound)
        return jnp.transpose(w_oihw, (2, 3, 1, 0)), b   # -> HWIO

    keys = jax.random.split(key, 4)
    specs = [(CMID, CIN), (CMID, CMID), (CMID, CMID), (COUT, CMID)]
    params = {}
    for idx, ((cout, cin), k) in enumerate(zip(specs, keys), start=1):
        w, b = conv_init(k, cout, cin)
        params[f"w{idx}"] = w
        params[f"b{idx}"] = b
    return params


def _im2col_weights(params):
    """Reshape HWIO conv weights into the kernel's im2col layouts."""
    # conv1: (3,3,3,64) zero-embedded into (3,3,64,64) -> (576, 64)
    w1 = jnp.zeros((3, 3, CMID, CMID), jnp.float32)
    w1 = w1.at[:, :, 0:CIN, :].set(params["w1"]).reshape(K2 * CMID, CMID)
    w2 = params["w2"].reshape(K2 * CMID, CMID)
    w3 = params["w3"].reshape(K2 * CMID, CMID)
    # conv4: (3,3,64,3) -> (576, 3) -> (3, 576) (output-channel major)
    w4t = jnp.transpose(params["w4"].reshape(K2 * CMID, COUT))
    return (w1, params["b1"].reshape(1, CMID),
            w2, params["b2"].reshape(1, CMID),
            w3, params["b3"].reshape(1, CMID),
            w4t, params["b4"].reshape(COUT, 1))


# ----------------------------------------------------------------------------
# Public forward (NCHW in, NCHW out) — one fused pallas_call.
# ----------------------------------------------------------------------------
@jax.jit
def basic_vsr_net_forward(x_nchw, params):
    n, cin, h, w = x_nchw.shape
    assert cin == CIN
    hw, hw4 = h * w, 4 * h * w

    x_nhwc = jnp.transpose(x_nchw, (0, 2, 3, 1))          # tiny one-off reformat
    bt = jnp.asarray(_upsample_kron_t(h, w))              # (H*W, 4*H*W) const
    w1, b1, w2, b2, w3, b3, w4t, b4 = _im2col_weights(params)

    flops = n * (3 * 2 * hw * K2 * CMID * CMID            # conv1..conv3
                 + 2 * hw * K2 * CMID * COUT               # conv4
                 + 2 * COUT * hw * hw4)                    # upsample
    bytes_accessed = 4 * (n * cin * hw                     # input
                          + 3 * K2 * CMID * CMID + K2 * CMID * COUT
                          + 3 * CMID + COUT                # weights + biases
                          + hw * hw4                       # upsample matrix
                          + n * COUT * hw4)                # output

    rep = lambda i: (0, 0)                                 # grid-constant blocks
    out_flat = pl.pallas_call(
        _fused_vsr_kernel,
        out_shape=jax.ShapeDtypeStruct((n, COUT, hw4), x_nchw.dtype),
        grid=(n,),
        in_specs=[
            pl.BlockSpec((1, h, w, CIN), lambda i: (i, 0, 0, 0)),
            pl.BlockSpec((K2 * CMID, CMID), rep),
            pl.BlockSpec((1, CMID), rep),
            pl.BlockSpec((K2 * CMID, CMID), rep),
            pl.BlockSpec((1, CMID), rep),
            pl.BlockSpec((K2 * CMID, CMID), rep),
            pl.BlockSpec((1, CMID), rep),
            pl.BlockSpec((COUT, K2 * CMID), rep),
            pl.BlockSpec((COUT, 1), rep),
            pl.BlockSpec((hw, hw4), rep),
        ],
        out_specs=pl.BlockSpec((1, COUT, hw4), lambda i: (i, 0, 0)),
        scratch_shapes=[
            pltpu.VMEM((h + 2, w + 2, CMID), jnp.float32),   # haloed activation
            pltpu.VMEM((hw, K2 * CMID), jnp.float32),        # im2col slab
        ],
        compiler_params=pltpu.CompilerParams(
            dimension_semantics=("parallel",),               # 2 frames -> 2 TCs on v7x
            vmem_limit_bytes=32 * 1024 * 1024),
        cost_estimate=pl.CostEstimate(flops=flops, transcendentals=0,
                                      bytes_accessed=bytes_accessed),
    )(x_nhwc, w1, b1, w2, b2, w3, b3, w4t, b4, bt)

    # (N, 3, 4*H*W) lane-dense slab -> NCHW; contiguous (free) reshape.
    return out_flat.reshape(n, COUT, 2 * h, 2 * w)


# ----------------------------------------------------------------------------
# Pure-JAX reference (lax conv + interpolation matrices).
# Note: upsample matrices implement torch's half-pixel, align_corners=False
# formula; a torch-parity check would require torch at test time.
# ----------------------------------------------------------------------------
def _reference_forward(x_nchw, params):
    def conv(x, w_hwio, b, relu):
        y = lax.conv_general_dilated(
            x, w_hwio, (1, 1), "SAME",
            dimension_numbers=("NCHW", "HWIO", "NCHW"))
        y = y + b[None, :, None, None]
        return jnp.maximum(y, 0.0) if relu else y

    x = conv(x_nchw, params["w1"], params["b1"], True)
    x = conv(x, params["w2"], params["b2"], True)
    x = conv(x, params["w3"], params["b3"], True)
    x = conv(x, params["w4"], params["b4"], False)
    h, w = x.shape[2], x.shape[3]
    ah = jnp.asarray(_up2x_matrix(h))
    aw = jnp.asarray(_up2x_matrix(w))
    y = jnp.einsum("ph,nchw->ncpw", ah, x)
    y = jnp.einsum("ncpw,qw->ncpq", y, aw)
    return y


if __name__ == "__main__":
    key = jax.random.PRNGKey(0)
    k_param, k_x = jax.random.split(key)

    params = init_params(k_param)
    x = jax.random.normal(k_x, (2, 3, 16, 16), jnp.float32)   # NCHW like torch

    out = basic_vsr_net_forward(x, params)
    out = jax.block_until_ready(out)

    assert out.shape == (2, 3, 32, 32), out.shape

    ref = jax.block_until_ready(_reference_forward(x, params))
    np.testing.assert_allclose(np.asarray(out), np.asarray(ref),
                               rtol=1e-2, atol=1e-2)

    print("KERNEL_OK")
</pallas_src>

<mosaic_0001>
module attributes {stable_mosaic.version = 11 : i64} {
  func.func @_fused_vsr_kernel(%arg0: i32, %arg1: memref<1x16x16x3xf32, #tpu.memory_space<vmem>>, %arg2: memref<576x64xf32, #tpu.memory_space<vmem>>, %arg3: memref<1x64xf32, #tpu.memory_space<vmem>>, %arg4: memref<576x64xf32, #tpu.memory_space<vmem>>, %arg5: memref<1x64xf32, #tpu.memory_space<vmem>>, %arg6: memref<576x64xf32, #tpu.memory_space<vmem>>, %arg7: memref<1x64xf32, #tpu.memory_space<vmem>>, %arg8: memref<3x576xf32, #tpu.memory_space<vmem>>, %arg9: memref<3x1xf32, #tpu.memory_space<vmem>>, %arg10: memref<256x1024xf32, #tpu.memory_space<vmem>>, %arg11: memref<1x3x1024xf32, #tpu.memory_space<vmem>>, %arg12: memref<18x18x64xf32, #tpu.memory_space<vmem>>, %arg13: memref<256x576xf32, #tpu.memory_space<vmem>>) attributes {dimension_semantics = [#tpu.dimension_semantics<parallel>], iteration_bounds = array<i64: 2>, scalar_prefetch = 0 : i64, scratch_operands = 2 : i64, tpu.core_type = #tpu.core_type<tc>, window_params = [{transform_indices = @transform_0, window_bounds = array<i64: 1, 16, 16, 3>}, {pipeline_mode = #tpu.pipeline_mode<synchronous>, transform_indices = @transform_1, window_bounds = array<i64: 576, 64>}, {pipeline_mode = #tpu.pipeline_mode<synchronous>, transform_indices = @transform_2, window_bounds = array<i64: 1, 64>}, {pipeline_mode = #tpu.pipeline_mode<synchronous>, transform_indices = @transform_3, window_bounds = array<i64: 576, 64>}, {pipeline_mode = #tpu.pipeline_mode<synchronous>, transform_indices = @transform_4, window_bounds = array<i64: 1, 64>}, {pipeline_mode = #tpu.pipeline_mode<synchronous>, transform_indices = @transform_5, window_bounds = array<i64: 576, 64>}, {pipeline_mode = #tpu.pipeline_mode<synchronous>, transform_indices = @transform_6, window_bounds = array<i64: 1, 64>}, {pipeline_mode = #tpu.pipeline_mode<synchronous>, transform_indices = @transform_7, window_bounds = array<i64: 3, 576>}, {pipeline_mode = #tpu.pipeline_mode<synchronous>, transform_indices = @transform_8, window_bounds = array<i64: 3, 1>}, {pipeline_mode = #tpu.pipeline_mode<synchronous>, transform_indices = @transform_9, window_bounds = array<i64: 256, 1024>}, {transform_indices = @transform_10, window_bounds = array<i64: 1, 3, 1024>}]} {
    %cst = arith.constant 0.000000e+00 : f32
    %0 = vector.broadcast %cst : f32 to vector<18x18x64xf32>
    %c0 = arith.constant 0 : index
    %c0_0 = arith.constant 0 : index
    %c0_1 = arith.constant 0 : index
    %1 = vector.load %arg12[%c0, %c0_0, %c0_1] : memref<18x18x64xf32, #tpu.memory_space<vmem>>, vector<18x18x64xf32>
    tpu.vector_store %arg12[%c0, %c0_0, %c0_1], %0 {strides = array<i32>} : memref<18x18x64xf32, #tpu.memory_space<vmem>>, vector<18x18x64xf32>,
    %c0_2 = arith.constant 0 : index
    %c0_3 = arith.constant 0 : index
    %c0_4 = arith.constant 0 : index
    %c0_5 = arith.constant 0 : index
    %2 = vector.load %arg1[%c0_2, %c0_3, %c0_4, %c0_5] : memref<1x16x16x3xf32, #tpu.memory_space<vmem>>, vector<1x16x16x3xf32>
    %3 = vector.shape_cast %2 : vector<1x16x16x3xf32> to vector<16x16x3xf32>
    %c1 = arith.constant 1 : index
    %c1_6 = arith.constant 1 : index
    %c0_7 = arith.constant 0 : index
    %4 = vector.load %arg12[%c1, %c1_6, %c0_7] : memref<18x18x64xf32, #tpu.memory_space<vmem>>, vector<16x16x3xf32>
    tpu.vector_store %arg12[%c1, %c1_6, %c0_7], %3 {strides = array<i32>} : memref<18x18x64xf32, #tpu.memory_space<vmem>>, vector<16x16x3xf32>,
    %c0_8 = arith.constant 0 : index
    %c0_9 = arith.constant 0 : index
    %c0_10 = arith.constant 0 : index
    %5 = vector.load %arg12[%c0_8, %c0_9, %c0_10] : memref<18x18x64xf32, #tpu.memory_space<vmem>>, vector<16x16x64xf32>
    %6 = vector.shape_cast %5 : vector<16x16x64xf32> to vector<256x64xf32>
    %c0_11 = arith.constant 0 : index
    %c0_12 = arith.constant 0 : index
    %7 = vector.load %arg13[%c0_11, %c0_12] : memref<256x576xf32, #tpu.memory_space<vmem>>, vector<256x64xf32>
    tpu.vector_store %arg13[%c0_11, %c0_12], %6 {strides = array<i32>} : memref<256x576xf32, #tpu.memory_space<vmem>>, vector<256x64xf32>,
    %c0_13 = arith.constant 0 : index
    %c1_14 = arith.constant 1 : index
    %c0_15 = arith.constant 0 : index
    %8 = vector.load %arg12[%c0_13, %c1_14, %c0_15] : memref<18x18x64xf32, #tpu.memory_space<vmem>>, vector<16x16x64xf32>
    %9 = vector.shape_cast %8 : vector<16x16x64xf32> to vector<256x64xf32>
    %c0_16 = arith.constant 0 : index
    %c64 = arith.constant 64 : index
    %10 = vector.load %arg13[%c0_16, %c64] : memref<256x576xf32, #tpu.memory_space<vmem>>, vector<256x64xf32>
    tpu.vector_store %arg13[%c0_16, %c64], %9 {strides = array<i32>} : memref<256x576xf32, #tpu.memory_space<vmem>>, vector<256x64xf32>,
    %c0_17 = arith.constant 0 : index
    %c2 = arith.constant 2 : index
    %c0_18 = arith.constant 0 : index
    %11 = vector.load %arg12[%c0_17, %c2, %c0_18] : memref<18x18x64xf32, #tpu.memory_space<vmem>>, vector<16x16x64xf32>
    %12 = vector.shape_cast %11 : vector<16x16x64xf32> to vector<256x64xf32>
    %c0_19 = arith.constant 0 : index
    %c128 = arith.constant 128 : index
    %13 = vector.load %arg13[%c0_19, %c128] : memref<256x576xf32, #tpu.memory_space<vmem>>, vector<256x64xf32>
    tpu.vector_store %arg13[%c0_19, %c128], %12 {strides = array<i32>} : memref<256x576xf32, #tpu.memory_space<vmem>>, vector<256x64xf32>,
    %c1_20 = arith.constant 1 : index
    %c0_21 = arith.constant 0 : index
    %c0_22 = arith.constant 0 : index
    %14 = vector.load %arg12[%c1_20, %c0_21, %c0_22] : memref<18x18x64xf32, #tpu.memory_space<vmem>>, vector<16x16x64xf32>
    %15 = vector.shape_cast %14 : vector<16x16x64xf32> to vector<256x64xf32>
    %c0_23 = arith.constant 0 : index
    %c192 = arith.constant 192 : index
    %16 = vector.load %arg13[%c0_23, %c192] : memref<256x576xf32, #tpu.memory_space<vmem>>, vector<256x64xf32>
    tpu.vector_store %arg13[%c0_23, %c192], %15 {strides = array<i32>} : memref<256x576xf32, #tpu.memory_space<vmem>>, vector<256x64xf32>,
    %c1_24 = arith.constant 1 : index
    %c1_25 = arith.constant 1 : index
    %c0_26 = arith.constant 0 : index
    %17 = vector.load %arg12[%c1_24, %c1_25, %c0_26] : memref<18x18x64xf32, #tpu.memory_space<vmem>>, vector<16x16x64xf32>
    %18 = vector.shape_cast %17 : vector<16x16x64xf32> to vector<256x64xf32>
    %c0_27 = arith.constant 0 : index
    %c256 = arith.constant 256 : index
    %19 = vector.load %arg13[%c0_27, %c256] : memref<256x576xf32, #tpu.memory_space<vmem>>, vector<256x64xf32>
    tpu.vector_store %arg13[%c0_27, %c256], %18 {strides = array<i32>} : memref<256x576xf32, #tpu.memory_space<vmem>>, vector<256x64xf32>,
    %c1_28 = arith.constant 1 : index
    %c2_29 = arith.constant 2 : index
    %c0_30 = arith.constant 0 : index
    %20 = vector.load %arg12[%c1_28, %c2_29, %c0_30] : memref<18x18x64xf32, #tpu.memory_space<vmem>>, vector<16x16x64xf32>
    %21 = vector.shape_cast %20 : vector<16x16x64xf32> to vector<256x64xf32>
    %c0_31 = arith.constant 0 : index
    %c320 = arith.constant 320 : index
    %22 = vector.load %arg13[%c0_31, %c320] : memref<256x576xf32, #tpu.memory_space<vmem>>, vector<256x64xf32>
    tpu.vector_store %arg13[%c0_31, %c320], %21 {strides = array<i32>} : memref<256x576xf32, #tpu.memory_space<vmem>>, vector<256x64xf32>,
    %c2_32 = arith.constant 2 : index
    %c0_33 = arith.constant 0 : index
    %c0_34 = arith.constant 0 : index
    %23 = vector.load %arg12[%c2_32, %c0_33, %c0_34] : memref<18x18x64xf32, #tpu.memory_space<vmem>>, vector<16x16x64xf32>
    %24 = vector.shape_cast %23 : vector<16x16x64xf32> to vector<256x64xf32>
    %c0_35 = arith.constant 0 : index
    %c384 = arith.constant 384 : index
    %25 = vector.load %arg13[%c0_35, %c384] : memref<256x576xf32, #tpu.memory_space<vmem>>, vector<256x64xf32>
    tpu.vector_store %arg13[%c0_35, %c384], %24 {strides = array<i32>} : memref<256x576xf32, #tpu.memory_space<vmem>>, vector<256x64xf32>,
    %c2_36 = arith.constant 2 : index
    %c1_37 = arith.constant 1 : index
    %c0_38 = arith.constant 0 : index
    %26 = vector.load %arg12[%c2_36, %c1_37, %c0_38] : memref<18x18x64xf32, #tpu.memory_space<vmem>>, vector<16x16x64xf32>
    %27 = vector.shape_cast %26 : vector<16x16x64xf32> to vector<256x64xf32>
    %c0_39 = arith.constant 0 : index
    %c448 = arith.constant 448 : index
    %28 = vector.load %arg13[%c0_39, %c448] : memref<256x576xf32, #tpu.memory_space<vmem>>, vector<256x64xf32>
    tpu.vector_store %arg13[%c0_39, %c448], %27 {strides = array<i32>} : memref<256x576xf32, #tpu.memory_space<vmem>>, vector<256x64xf32>,
    %c2_40 = arith.constant 2 : index
    %c2_41 = arith.constant 2 : index
    %c0_42 = arith.constant 0 : index
    %29 = vector.load %arg12[%c2_40, %c2_41, %c0_42] : memref<18x18x64xf32, #tpu.memory_space<vmem>>, vector<16x16x64xf32>
    %30 = vector.shape_cast %29 : vector<16x16x64xf32> to vector<256x64xf32>
    %c0_43 = arith.constant 0 : index
    %c512 = arith.constant 512 : index
    %31 = vector.load %arg13[%c0_43, %c512] : memref<256x576xf32, #tpu.memory_space<vmem>>, vector<256x64xf32>
    tpu.vector_store %arg13[%c0_43, %c512], %30 {strides = array<i32>} : memref<256x576xf32, #tpu.memory_space<vmem>>, vector<256x64xf32>,
    %c0_44 = arith.constant 0 : index
    %c0_45 = arith.constant 0 : index
    %32 = vector.load %arg13[%c0_44, %c0_45] : memref<256x576xf32, #tpu.memory_space<vmem>>, vector<256x576xf32>
    %c0_46 = arith.constant 0 : index
    %c0_47 = arith.constant 0 : index
    %33 = vector.load %arg2[%c0_46, %c0_47] : memref<576x64xf32, #tpu.memory_space<vmem>>, vector<576x64xf32>
    %cst_48 = arith.constant dense<0.000000e+00> : vector<256x64xf32>
    %34 = tpu.matmul %32, %33, %cst_48 {dimension_numbers = #tpu.dot_dimension_numbers<[1], [0], [0], [1], [0, 0, 1, 1], [], []>} : vector<256x576xf32>, vector<576x64xf32>, vector<256x64xf32> -> vector<256x64xf32>
    %c0_49 = arith.constant 0 : index
    %c0_50 = arith.constant 0 : index
    %35 = vector.load %arg3[%c0_49, %c0_50] : memref<1x64xf32, #tpu.memory_space<vmem>>, vector<1x64xf32>
    %36 = vector.broadcast %35 : vector<1x64xf32> to vector<256x64xf32>
    %37 = arith.addf %34, %36 : vector<256x64xf32>
    %cst_51 = arith.constant 0.000000e+00 : f32
    %38 = vector.broadcast %cst_51 : f32 to vector<256x64xf32>
    %39 = arith.maximumf %37, %38 : vector<256x64xf32>
    %40 = vector.shape_cast %39 : vector<256x64xf32> to vector<16x16x64xf32>
    %c1_52 = arith.constant 1 : index
    %c1_53 = arith.constant 1 : index
    %c0_54 = arith.constant 0 : index
    %41 = vector.load %arg12[%c1_52, %c1_53, %c0_54] : memref<18x18x64xf32, #tpu.memory_space<vmem>>, vector<16x16x64xf32>
    tpu.vector_store %arg12[%c1_52, %c1_53, %c0_54], %40 {strides = array<i32>} : memref<18x18x64xf32, #tpu.memory_space<vmem>>, vector<16x16x64xf32>,
    %c0_55 = arith.constant 0 : index
    %c0_56 = arith.constant 0 : index
    %c0_57 = arith.constant 0 : index
    %42 = vector.load %arg12[%c0_55, %c0_56, %c0_57] : memref<18x18x64xf32, #tpu.memory_space<vmem>>, vector<16x16x64xf32>
    %43 = vector.shape_cast %42 : vector<16x16x64xf32> to vector<256x64xf32>
    %c0_58 = arith.constant 0 : index
    %c0_59 = arith.constant 0 : index
    %44 = vector.load %arg13[%c0_58, %c0_59] : memref<256x576xf32, #tpu.memory_space<vmem>>, vector<256x64xf32>
    tpu.vector_store %arg13[%c0_58, %c0_59], %43 {strides = array<i32>} : memref<256x576xf32, #tpu.memory_space<vmem>>, vector<256x64xf32>,
    %c0_60 = arith.constant 0 : index
    %c1_61 = arith.constant 1 : index
    %c0_62 = arith.constant 0 : index
    %45 = vector.load %arg12[%c0_60, %c1_61, %c0_62] : memref<18x18x64xf32, #tpu.memory_space<vmem>>, vector<16x16x64xf32>
    %46 = vector.shape_cast %45 : vector<16x16x64xf32> to vector<256x64xf32>
    %c0_63 = arith.constant 0 : index
    %c64_64 = arith.constant 64 : index
    %47 = vector.load %arg13[%c0_63, %c64_64] : memref<256x576xf32, #tpu.memory_space<vmem>>, vector<256x64xf32>
    tpu.vector_store %arg13[%c0_63, %c64_64], %46 {strides = array<i32>} : memref<256x576xf32, #tpu.memory_space<vmem>>, vector<256x64xf32>,
    %c0_65 = arith.constant 0 : index
    %c2_66 = arith.constant 2 : index
    %c0_67 = arith.constant 0 : index
    %48 = vector.load %arg12[%c0_65, %c2_66, %c0_67] : memref<18x18x64xf32, #tpu.memory_space<vmem>>, vector<16x16x64xf32>
    %49 = vector.shape_cast %48 : vector<16x16x64xf32> to vector<256x64xf32>
    %c0_68 = arith.constant 0 : index
    %c128_69 = arith.constant 128 : index
    %50 = vector.load %arg13[%c0_68, %c128_69] : memref<256x576xf32, #tpu.memory_space<vmem>>, vector<256x64xf32>
    tpu.vector_store %arg13[%c0_68, %c128_69], %49 {strides = array<i32>} : memref<256x576xf32, #tpu.memory_space<vmem>>, vector<256x64xf32>,
    %c1_70 = arith.constant 1 : index
    %c0_71 = arith.constant 0 : index
    %c0_72 = arith.constant 0 : index
    %51 = vector.load %arg12[%c1_70, %c0_71, %c0_72] : memref<18x18x64xf32, #tpu.memory_space<vmem>>, vector<16x16x64xf32>
    %52 = vector.shape_cast %51 : vector<16x16x64xf32> to vector<256x64xf32>
    %c0_73 = arith.constant 0 : index
    %c192_74 = arith.constant 192 : index
    %53 = vector.load %arg13[%c0_73, %c192_74] : memref<256x576xf32, #tpu.memory_space<vmem>>, vector<256x64xf32>
    tpu.vector_store %arg13[%c0_73, %c192_74], %52 {strides = array<i32>} : memref<256x576xf32, #tpu.memory_space<vmem>>, vector<256x64xf32>,
    %c1_75 = arith.constant 1 : index
    %c1_76 = arith.constant 1 : index
    %c0_77 = arith.constant 0 : index
    %54 = vector.load %arg12[%c1_75, %c1_76, %c0_77] : memref<18x18x64xf32, #tpu.memory_space<vmem>>, vector<16x16x64xf32>
    %55 = vector.shape_cast %54 : vector<16x16x64xf32> to vector<256x64xf32>
    %c0_78 = arith.constant 0 : index
    %c256_79 = arith.constant 256 : index
    %56 = vector.load %arg13[%c0_78, %c256_79] : memref<256x576xf32, #tpu.memory_space<vmem>>, vector<256x64xf32>
    tpu.vector_store %arg13[%c0_78, %c256_79], %55 {strides = array<i32>} : memref<256x576xf32, #tpu.memory_space<vmem>>, vector<256x64xf32>,
    %c1_80 = arith.constant 1 : index
    %c2_81 = arith.constant 2 : index
    %c0_82 = arith.constant 0 : index
    %57 = vector.load %arg12[%c1_80, %c2_81, %c0_82] : memref<18x18x64xf32, #tpu.memory_space<vmem>>, vector<16x16x64xf32>
    %58 = vector.shape_cast %57 : vector<16x16x64xf32> to vector<256x64xf32>
    %c0_83 = arith.constant 0 : index
    %c320_84 = arith.constant 320 : index
    %59 = vector.load %arg13[%c0_83, %c320_84] : memref<256x576xf32, #tpu.memory_space<vmem>>, vector<256x64xf32>
    tpu.vector_store %arg13[%c0_83, %c320_84], %58 {strides = array<i32>} : memref<256x576xf32, #tpu.memory_space<vmem>>, vector<256x64xf32>,
    %c2_85 = arith.constant 2 : index
    %c0_86 = arith.constant 0 : index
    %c0_87 = arith.constant 0 : index
    %60 = vector.load %arg12[%c2_85, %c0_86, %c0_87] : memref<18x18x64xf32, #tpu.memory_space<vmem>>, vector<16x16x64xf32>
    %61 = vector.shape_cast %60 : vector<16x16x64xf32> to vector<256x64xf32>
    %c0_88 = arith.constant 0 : index
    %c384_89 = arith.constant 384 : index
    %62 = vector.load %arg13[%c0_88, %c384_89] : memref<256x576xf32, #tpu.memory_space<vmem>>, vector<256x64xf32>
    tpu.vector_store %arg13[%c0_88, %c384_89], %61 {strides = array<i32>} : memref<256x576xf32, #tpu.memory_space<vmem>>, vector<256x64xf32>,
    %c2_90 = arith.constant 2 : index
    %c1_91 = arith.constant 1 : index
    %c0_92 = arith.constant 0 : index
    %63 = vector.load %arg12[%c2_90, %c1_91, %c0_92] : memref<18x18x64xf32, #tpu.memory_space<vmem>>, vector<16x16x64xf32>
    %64 = vector.shape_cast %63 : vector<16x16x64xf32> to vector<256x64xf32>
    %c0_93 = arith.constant 0 : index
    %c448_94 = arith.constant 448 : index
    %65 = vector.load %arg13[%c0_93, %c448_94] : memref<256x576xf32, #tpu.memory_space<vmem>>, vector<256x64xf32>
    tpu.vector_store %arg13[%c0_93, %c448_94], %64 {strides = array<i32>} : memref<256x576xf32, #tpu.memory_space<vmem>>, vector<256x64xf32>,
    %c2_95 = arith.constant 2 : index
    %c2_96 = arith.constant 2 : index
    %c0_97 = arith.constant 0 : index
    %66 = vector.load %arg12[%c2_95, %c2_96, %c0_97] : memref<18x18x64xf32, #tpu.memory_space<vmem>>, vector<16x16x64xf32>
    %67 = vector.shape_cast %66 : vector<16x16x64xf32> to vector<256x64xf32>
    %c0_98 = arith.constant 0 : index
    %c512_99 = arith.constant 512 : index
    %68 = vector.load %arg13[%c0_98, %c512_99] : memref<256x576xf32, #tpu.memory_space<vmem>>, vector<256x64xf32>
    tpu.vector_store %arg13[%c0_98, %c512_99], %67 {strides = array<i32>} : memref<256x576xf32, #tpu.memory_space<vmem>>, vector<256x64xf32>,
    %c0_100 = arith.constant 0 : index
    %c0_101 = arith.constant 0 : index
    %69 = vector.load %arg13[%c0_100, %c0_101] : memref<256x576xf32, #tpu.memory_space<vmem>>, vector<256x576xf32>
    %c0_102 = arith.constant 0 : index
    %c0_103 = arith.constant 0 : index
    %70 = vector.load %arg4[%c0_102, %c0_103] : memref<576x64xf32, #tpu.memory_space<vmem>>, vector<576x64xf32>
    %cst_104 = arith.constant dense<0.000000e+00> : vector<256x64xf32>
    %71 = tpu.matmul %69, %70, %cst_104 {dimension_numbers = #tpu.dot_dimension_numbers<[1], [0], [0], [1], [0, 0, 1, 1], [], []>} : vector<256x576xf32>, vector<576x64xf32>, vector<256x64xf32> -> vector<256x64xf32>
    %c0_105 = arith.constant 0 : index
    %c0_106 = arith.constant 0 : index
    %72 = vector.load %arg5[%c0_105, %c0_106] : memref<1x64xf32, #tpu.memory_space<vmem>>, vector<1x64xf32>
    %73 = vector.broadcast %72 : vector<1x64xf32> to vector<256x64xf32>
    %74 = arith.addf %71, %73 : vector<256x64xf32>
    %cst_107 = arith.constant 0.000000e+00 : f32
    %75 = vector.broadcast %cst_107 : f32 to vector<256x64xf32>
    %76 = arith.maximumf %74, %75 : vector<256x64xf32>
    %77 = vector.shape_cast %76 : vector<256x64xf32> to vector<16x16x64xf32>
    %c1_108 = arith.constant 1 : index
    %c1_109 = arith.constant 1 : index
    %c0_110 = arith.constant 0 : index
    %78 = vector.load %arg12[%c1_108, %c1_109, %c0_110] : memref<18x18x64xf32, #tpu.memory_space<vmem>>, vector<16x16x64xf32>
    tpu.vector_store %arg12[%c1_108, %c1_109, %c0_110], %77 {strides = array<i32>} : memref<18x18x64xf32, #tpu.memory_space<vmem>>, vector<16x16x64xf32>,
    %c0_111 = arith.constant 0 : index
    %c0_112 = arith.constant 0 : index
    %c0_113 = arith.constant 0 : index
    %79 = vector.load %arg12[%c0_111, %c0_112, %c0_113] : memref<18x18x64xf32, #tpu.memory_space<vmem>>, vector<16x16x64xf32>
    %80 = vector.shape_cast %79 : vector<16x16x64xf32> to vector<256x64xf32>
    %c0_114 = arith.constant 0 : index
    %c0_115 = arith.constant 0 : index
    %81 = vector.load %arg13[%c0_114, %c0_115] : memref<256x576xf32, #tpu.memory_space<vmem>>, vector<256x64xf32>
    tpu.vector_store %arg13[%c0_114, %c0_115], %80 {strides = array<i32>} : memref<256x576xf32, #tpu.memory_space<vmem>>, vector<256x64xf32>,
    %c0_116 = arith.constant 0 : index
    %c1_117 = arith.constant 1 : index
    %c0_118 = arith.constant 0 : index
    %82 = vector.load %arg12[%c0_116, %c1_117, %c0_118] : memref<18x18x64xf32, #tpu.memory_space<vmem>>, vector<16x16x64xf32>
    %83 = vector.shape_cast %82 : vector<16x16x64xf32> to vector<256x64xf32>
    %c0_119 = arith.constant 0 : index
    %c64_120 = arith.constant 64 : index
    %84 = vector.load %arg13[%c0_119, %c64_120] : memref<256x576xf32, #tpu.memory_space<vmem>>, vector<256x64xf32>
    tpu.vector_store %arg13[%c0_119, %c64_120], %83 {strides = array<i32>} : memref<256x576xf32, #tpu.memory_space<vmem>>, vector<256x64xf32>,
    %c0_121 = arith.constant 0 : index
    %c2_122 = arith.constant 2 : index
    %c0_123 = arith.constant 0 : index
    %85 = vector.load %arg12[%c0_121, %c2_122, %c0_123] : memref<18x18x64xf32, #tpu.memory_space<vmem>>, vector<16x16x64xf32>
    %86 = vector.shape_cast %85 : vector<16x16x64xf32> to vector<256x64xf32>
    %c0_124 = arith.constant 0 : index
    %c128_125 = arith.constant 128 : index
    %87 = vector.load %arg13[%c0_124, %c128_125] : memref<256x576xf32, #tpu.memory_space<vmem>>, vector<256x64xf32>
    tpu.vector_store %arg13[%c0_124, %c128_125], %86 {strides = array<i32>} : memref<256x576xf32, #tpu.memory_space<vmem>>, vector<256x64xf32>,
    %c1_126 = arith.constant 1 : index
    %c0_127 = arith.constant 0 : index
    %c0_128 = arith.constant 0 : index
    %88 = vector.load %arg12[%c1_126, %c0_127, %c0_128] : memref<18x18x64xf32, #tpu.memory_space<vmem>>, vector<16x16x64xf32>
    %89 = vector.shape_cast %88 : vector<16x16x64xf32> to vector<256x64xf32>
    %c0_129 = arith.constant 0 : index
    %c192_130 = arith.constant 192 : index
    %90 = vector.load %arg13[%c0_129, %c192_130] : memref<256x576xf32, #tpu.memory_space<vmem>>, vector<256x64xf32>
    tpu.vector_store %arg13[%c0_129, %c192_130], %89 {strides = array<i32>} : memref<256x576xf32, #tpu.memory_space<vmem>>, vector<256x64xf32>,
    %c1_131 = arith.constant 1 : index
    %c1_132 = arith.constant 1 : index
    %c0_133 = arith.constant 0 : index
    %91 = vector.load %arg12[%c1_131, %c1_132, %c0_133] : memref<18x18x64xf32, #tpu.memory_space<vmem>>, vector<16x16x64xf32>
    %92 = vector.shape_cast %91 : vector<16x16x64xf32> to vector<256x64xf32>
    %c0_134 = arith.constant 0 : index
    %c256_135 = arith.constant 256 : index
    %93 = vector.load %arg13[%c0_134, %c256_135] : memref<256x576xf32, #tpu.memory_space<vmem>>, vector<256x64xf32>
    tpu.vector_store %arg13[%c0_134, %c256_135], %92 {strides = array<i32>} : memref<256x576xf32, #tpu.memory_space<vmem>>, vector<256x64xf32>,
    %c1_136 = arith.constant 1 : index
    %c2_137 = arith.constant 2 : index
    %c0_138 = arith.constant 0 : index
    %94 = vector.load %arg12[%c1_136, %c2_137, %c0_138] : memref<18x18x64xf32, #tpu.memory_space<vmem>>, vector<16x16x64xf32>
    %95 = vector.shape_cast %94 : vector<16x16x64xf32> to vector<256x64xf32>
    %c0_139 = arith.constant 0 : index
    %c320_140 = arith.constant 320 : index
    %96 = vector.load %arg13[%c0_139, %c320_140] : memref<256x576xf32, #tpu.memory_space<vmem>>, vector<256x64xf32>
    tpu.vector_store %arg13[%c0_139, %c320_140], %95 {strides = array<i32>} : memref<256x576xf32, #tpu.memory_space<vmem>>, vector<256x64xf32>,
    %c2_141 = arith.constant 2 : index
    %c0_142 = arith.constant 0 : index
    %c0_143 = arith.constant 0 : index
    %97 = vector.load %arg12[%c2_141, %c0_142, %c0_143] : memref<18x18x64xf32, #tpu.memory_space<vmem>>, vector<16x16x64xf32>
    %98 = vector.shape_cast %97 : vector<16x16x64xf32> to vector<256x64xf32>
    %c0_144 = arith.constant 0 : index
    %c384_145 = arith.constant 384 : index
    %99 = vector.load %arg13[%c0_144, %c384_145] : memref<256x576xf32, #tpu.memory_space<vmem>>, vector<256x64xf32>
    tpu.vector_store %arg13[%c0_144, %c384_145], %98 {strides = array<i32>} : memref<256x576xf32, #tpu.memory_space<vmem>>, vector<256x64xf32>,
    %c2_146 = arith.constant 2 : index
    %c1_147 = arith.constant 1 : index
    %c0_148 = arith.constant 0 : index
    %100 = vector.load %arg12[%c2_146, %c1_147, %c0_148] : memref<18x18x64xf32, #tpu.memory_space<vmem>>, vector<16x16x64xf32>
    %101 = vector.shape_cast %100 : vector<16x16x64xf32> to vector<256x64xf32>
    %c0_149 = arith.constant 0 : index
    %c448_150 = arith.constant 448 : index
    %102 = vector.load %arg13[%c0_149, %c448_150] : memref<256x576xf32, #tpu.memory_space<vmem>>, vector<256x64xf32>
    tpu.vector_store %arg13[%c0_149, %c448_150], %101 {strides = array<i32>} : memref<256x576xf32, #tpu.memory_space<vmem>>, vector<256x64xf32>,
    %c2_151 = arith.constant 2 : index
    %c2_152 = arith.constant 2 : index
    %c0_153 = arith.constant 0 : index
    %103 = vector.load %arg12[%c2_151, %c2_152, %c0_153] : memref<18x18x64xf32, #tpu.memory_space<vmem>>, vector<16x16x64xf32>
    %104 = vector.shape_cast %103 : vector<16x16x64xf32> to vector<256x64xf32>
    %c0_154 = arith.constant 0 : index
    %c512_155 = arith.constant 512 : index
    %105 = vector.load %arg13[%c0_154, %c512_155] : memref<256x576xf32, #tpu.memory_space<vmem>>, vector<256x64xf32>
    tpu.vector_store %arg13[%c0_154, %c512_155], %104 {strides = array<i32>} : memref<256x576xf32, #tpu.memory_space<vmem>>, vector<256x64xf32>,
    %c0_156 = arith.constant 0 : index
    %c0_157 = arith.constant 0 : index
    %106 = vector.load %arg13[%c0_156, %c0_157] : memref<256x576xf32, #tpu.memory_space<vmem>>, vector<256x576xf32>
    %c0_158 = arith.constant 0 : index
    %c0_159 = arith.constant 0 : index
    %107 = vector.load %arg6[%c0_158, %c0_159] : memref<576x64xf32, #tpu.memory_space<vmem>>, vector<576x64xf32>
    %cst_160 = arith.constant dense<0.000000e+00> : vector<256x64xf32>
    %108 = tpu.matmul %106, %107, %cst_160 {dimension_numbers = #tpu.dot_dimension_numbers<[1], [0], [0], [1], [0, 0, 1, 1], [], []>} : vector<256x576xf32>, vector<576x64xf32>, vector<256x64xf32> -> vector<256x64xf32>
    %c0_161 = arith.constant 0 : index
    %c0_162 = arith.constant 0 : index
    %109 = vector.load %arg7[%c0_161, %c0_162] : memref<1x64xf32, #tpu.memory_space<vmem>>, vector<1x64xf32>
    %110 = vector.broadcast %109 : vector<1x64xf32> to vector<256x64xf32>
    %111 = arith.addf %108, %110 : vector<256x64xf32>
    %cst_163 = arith.constant 0.000000e+00 : f32
    %112 = vector.broadcast %cst_163 : f32 to vector<256x64xf32>
    %113 = arith.maximumf %111, %112 : vector<256x64xf32>
    %114 = vector.shape_cast %113 : vector<256x64xf32> to vector<16x16x64xf32>
    %c1_164 = arith.constant 1 : index
    %c1_165 = arith.constant 1 : index
    %c0_166 = arith.constant 0 : index
    %115 = vector.load %arg12[%c1_164, %c1_165, %c0_166] : memref<18x18x64xf32, #tpu.memory_space<vmem>>, vector<16x16x64xf32>
    tpu.vector_store %arg12[%c1_164, %c1_165, %c0_166], %114 {strides = array<i32>} : memref<18x18x64xf32, #tpu.memory_space<vmem>>, vector<16x16x64xf32>,
    %c0_167 = arith.constant 0 : index
    %c0_168 = arith.constant 0 : index
    %c0_169 = arith.constant 0 : index
    %116 = vector.load %arg12[%c0_167, %c0_168, %c0_169] : memref<18x18x64xf32, #tpu.memory_space<vmem>>, vector<16x16x64xf32>
    %117 = vector.shape_cast %116 : vector<16x16x64xf32> to vector<256x64xf32>
    %c0_170 = arith.constant 0 : index
    %c0_171 = arith.constant 0 : index
    %118 = vector.load %arg13[%c0_170, %c0_171] : memref<256x576xf32, #tpu.memory_space<vmem>>, vector<256x64xf32>
    tpu.vector_store %arg13[%c0_170, %c0_171], %117 {strides = array<i32>} : memref<256x576xf32, #tpu.memory_space<vmem>>, vector<256x64xf32>,
    %c0_172 = arith.constant 0 : index
    %c1_173 = arith.constant 1 : index
    %c0_174 = arith.constant 0 : index
    %119 = vector.load %arg12[%c0_172, %c1_173, %c0_174] : memref<18x18x64xf32, #tpu.memory_space<vmem>>, vector<16x16x64xf32>
    %120 = vector.shape_cast %119 : vector<16x16x64xf32> to vector<256x64xf32>
    %c0_175 = arith.constant 0 : index
    %c64_176 = arith.constant 64 : index
    %121 = vector.load %arg13[%c0_175, %c64_176] : memref<256x576xf32, #tpu.memory_space<vmem>>, vector<256x64xf32>
    tpu.vector_store %arg13[%c0_175, %c64_176], %120 {strides = array<i32>} : memref<256x576xf32, #tpu.memory_space<vmem>>, vector<256x64xf32>,
    %c0_177 = arith.constant 0 : index
    %c2_178 = arith.constant 2 : index
    %c0_179 = arith.constant 0 : index
    %122 = vector.load %arg12[%c0_177, %c2_178, %c0_179] : memref<18x18x64xf32, #tpu.memory_space<vmem>>, vector<16x16x64xf32>
    %123 = vector.shape_cast %122 : vector<16x16x64xf32> to vector<256x64xf32>
    %c0_180 = arith.constant 0 : index
    %c128_181 = arith.constant 128 : index
    %124 = vector.load %arg13[%c0_180, %c128_181] : memref<256x576xf32, #tpu.memory_space<vmem>>, vector<256x64xf32>
    tpu.vector_store %arg13[%c0_180, %c128_181], %123 {strides = array<i32>} : memref<256x576xf32, #tpu.memory_space<vmem>>, vector<256x64xf32>,
    %c1_182 = arith.constant 1 : index
    %c0_183 = arith.constant 0 : index
    %c0_184 = arith.constant 0 : index
    %125 = vector.load %arg12[%c1_182, %c0_183, %c0_184] : memref<18x18x64xf32, #tpu.memory_space<vmem>>, vector<16x16x64xf32>
    %126 = vector.shape_cast %125 : vector<16x16x64xf32> to vector<256x64xf32>
    %c0_185 = arith.constant 0 : index
    %c192_186 = arith.constant 192 : index
    %127 = vector.load %arg13[%c0_185, %c192_186] : memref<256x576xf32, #tpu.memory_space<vmem>>, vector<256x64xf32>
    tpu.vector_store %arg13[%c0_185, %c192_186], %126 {strides = array<i32>} : memref<256x576xf32, #tpu.memory_space<vmem>>, vector<256x64xf32>,
    %c1_187 = arith.constant 1 : index
    %c1_188 = arith.constant 1 : index
    %c0_189 = arith.constant 0 : index
    %128 = vector.load %arg12[%c1_187, %c1_188, %c0_189] : memref<18x18x64xf32, #tpu.memory_space<vmem>>, vector<16x16x64xf32>
    %129 = vector.shape_cast %128 : vector<16x16x64xf32> to vector<256x64xf32>
    %c0_190 = arith.constant 0 : index
    %c256_191 = arith.constant 256 : index
    %130 = vector.load %arg13[%c0_190, %c256_191] : memref<256x576xf32, #tpu.memory_space<vmem>>, vector<256x64xf32>
    tpu.vector_store %arg13[%c0_190, %c256_191], %129 {strides = array<i32>} : memref<256x576xf32, #tpu.memory_space<vmem>>, vector<256x64xf32>,
    %c1_192 = arith.constant 1 : index
    %c2_193 = arith.constant 2 : index
    %c0_194 = arith.constant 0 : index
    %131 = vector.load %arg12[%c1_192, %c2_193, %c0_194] : memref<18x18x64xf32, #tpu.memory_space<vmem>>, vector<16x16x64xf32>
    %132 = vector.shape_cast %131 : vector<16x16x64xf32> to vector<256x64xf32>
    %c0_195 = arith.constant 0 : index
    %c320_196 = arith.constant 320 : index
    %133 = vector.load %arg13[%c0_195, %c320_196] : memref<256x576xf32, #tpu.memory_space<vmem>>, vector<256x64xf32>
    tpu.vector_store %arg13[%c0_195, %c320_196], %132 {strides = array<i32>} : memref<256x576xf32, #tpu.memory_space<vmem>>, vector<256x64xf32>,
    %c2_197 = arith.constant 2 : index
    %c0_198 = arith.constant 0 : index
    %c0_199 = arith.constant 0 : index
    %134 = vector.load %arg12[%c2_197, %c0_198, %c0_199] : memref<18x18x64xf32, #tpu.memory_space<vmem>>, vector<16x16x64xf32>
    %135 = vector.shape_cast %134 : vector<16x16x64xf32> to vector<256x64xf32>
    %c0_200 = arith.constant 0 : index
    %c384_201 = arith.constant 384 : index
    %136 = vector.load %arg13[%c0_200, %c384_201] : memref<256x576xf32, #tpu.memory_space<vmem>>, vector<256x64xf32>
    tpu.vector_store %arg13[%c0_200, %c384_201], %135 {strides = array<i32>} : memref<256x576xf32, #tpu.memory_space<vmem>>, vector<256x64xf32>,
    %c2_202 = arith.constant 2 : index
    %c1_203 = arith.constant 1 : index
    %c0_204 = arith.constant 0 : index
    %137 = vector.load %arg12[%c2_202, %c1_203, %c0_204] : memref<18x18x64xf32, #tpu.memory_space<vmem>>, vector<16x16x64xf32>
    %138 = vector.shape_cast %137 : vector<16x16x64xf32> to vector<256x64xf32>
    %c0_205 = arith.constant 0 : index
    %c448_206 = arith.constant 448 : index
    %139 = vector.load %arg13[%c0_205, %c448_206] : memref<256x576xf32, #tpu.memory_space<vmem>>, vector<256x64xf32>
    tpu.vector_store %arg13[%c0_205, %c448_206], %138 {strides = array<i32>} : memref<256x576xf32, #tpu.memory_space<vmem>>, vector<256x64xf32>,
    %c2_207 = arith.constant 2 : index
    %c2_208 = arith.constant 2 : index
    %c0_209 = arith.constant 0 : index
    %140 = vector.load %arg12[%c2_207, %c2_208, %c0_209] : memref<18x18x64xf32, #tpu.memory_space<vmem>>, vector<16x16x64xf32>
    %141 = vector.shape_cast %140 : vector<16x16x64xf32> to vector<256x64xf32>
    %c0_210 = arith.constant 0 : index
    %c512_211 = arith.constant 512 : index
    %142 = vector.load %arg13[%c0_210, %c512_211] : memref<256x576xf32, #tpu.memory_space<vmem>>, vector<256x64xf32>
    tpu.vector_store %arg13[%c0_210, %c512_211], %141 {strides = array<i32>} : memref<256x576xf32, #tpu.memory_space<vmem>>, vector<256x64xf32>,
    %c0_212 = arith.constant 0 : index
    %c0_213 = arith.constant 0 : index
    %143 = vector.load %arg8[%c0_212, %c0_213] : memref<3x576xf32, #tpu.memory_space<vmem>>, vector<3x576xf32>
    %c0_214 = arith.constant 0 : index
    %c0_215 = arith.constant 0 : index
    %144 = vector.load %arg13[%c0_214, %c0_215] : memref<256x576xf32, #tpu.memory_space<vmem>>, vector<256x576xf32>
    %cst_216 = arith.constant dense<0.000000e+00> : vector<3x256xf32>
    %145 = tpu.matmul %143, %144, %cst_216 {dimension_numbers = #tpu.dot_dimension_numbers<[1], [1], [0], [0], [0, 0, 1, 0], [], []>} : vector<3x576xf32>, vector<256x576xf32>, vector<3x256xf32> -> vector<3x256xf32>
    %c0_217 = arith.constant 0 : index
    %c0_218 = arith.constant 0 : index
    %146 = vector.load %arg9[%c0_217, %c0_218] : memref<3x1xf32, #tpu.memory_space<vmem>>, vector<3x1xf32>
    %147 = vector.broadcast %146 : vector<3x1xf32> to vector<3x256xf32>
    %148 = arith.addf %145, %147 : vector<3x256xf32>
    %c0_219 = arith.constant 0 : index
    %c0_220 = arith.constant 0 : index
    %149 = vector.load %arg10[%c0_219, %c0_220] : memref<256x1024xf32, #tpu.memory_space<vmem>>, vector<256x1024xf32>
    %cst_221 = arith.constant dense<0.000000e+00> : vector<3x1024xf32>
    %150 = tpu.matmul %148, %149, %cst_221 {dimension_numbers = #tpu.dot_dimension_numbers<[1], [0], [0], [1], [0, 0, 1, 1], [], []>} : vector<3x256xf32>, vector<256x1024xf32>, vector<3x1024xf32> -> vector<3x1024xf32>
    %c0_222 = arith.constant 0 : index
    %c0_223 = arith.constant 0 : index
    %c0_224 = arith.constant 0 : index
    %151 = vector.load %arg11[%c0_222, %c0_223, %c0_224] : memref<1x3x1024xf32, #tpu.memory_space<vmem>>, vector<1x3x1024xf32>
    %152 = vector.shape_cast %151 : vector<1x3x1024xf32> to vector<3x1024xf32>
    %153 = vector.shape_cast %150 : vector<3x1024xf32> to vector<1x3x1024xf32>
    tpu.vector_store %arg11[%c0_222, %c0_223, %c0_224], %153 {strides = array<i32>} : memref<1x3x1024xf32, #tpu.memory_space<vmem>>, vector<1x3x1024xf32>,
    return
  }
  func.func @transform_0(%arg0: i32) -> (i32, i32, i32, i32) {
    %c0_i32 = arith.constant 0 : i32
    %c0_i32_0 = arith.constant 0 : i32
    %c0_i32_1 = arith.constant 0 : i32
    %c0_i32_2 = arith.constant 0 : i32
    return %arg0, %c0_i32, %c0_i32_0, %c0_i32_1 : i32, i32, i32, i32
  }
  func.func @transform_1(%arg0: i32) -> (i32, i32) {
    %c0_i32 = arith.constant 0 : i32
    %c0_i32_0 = arith.constant 0 : i32
    %c0_i32_1 = arith.constant 0 : i32
    return %c0_i32, %c0_i32_0 : i32, i32
  }
  func.func @transform_2(%arg0: i32) -> (i32, i32) {
    %c0_i32 = arith.constant 0 : i32
    %c0_i32_0 = arith.constant 0 : i32
    %c0_i32_1 = arith.constant 0 : i32
    return %c0_i32, %c0_i32_0 : i32, i32
  }
  func.func @transform_3(%arg0: i32) -> (i32, i32) {
    %c0_i32 = arith.constant 0 : i32
    %c0_i32_0 = arith.constant 0 : i32
    %c0_i32_1 = arith.constant 0 : i32
    return %c0_i32, %c0_i32_0 : i32, i32
  }
  func.func @transform_4(%arg0: i32) -> (i32, i32) {
    %c0_i32 = arith.constant 0 : i32
    %c0_i32_0 = arith.constant 0 : i32
    %c0_i32_1 = arith.constant 0 : i32
    return %c0_i32, %c0_i32_0 : i32, i32
  }
  func.func @transform_5(%arg0: i32) -> (i32, i32) {
    %c0_i32 = arith.constant 0 : i32
    %c0_i32_0 = arith.constant 0 : i32
    %c0_i32_1 = arith.constant 0 : i32
    return %c0_i32, %c0_i32_0 : i32, i32
  }
  func.func @transform_6(%arg0: i32) -> (i32, i32) {
    %c0_i32 = arith.constant 0 : i32
    %c0_i32_0 = arith.constant 0 : i32
    %c0_i32_1 = arith.constant 0 : i32
    return %c0_i32, %c0_i32_0 : i32, i32
  }
  func.func @transform_7(%arg0: i32) -> (i32, i32) {
    %c0_i32 = arith.constant 0 : i32
    %c0_i32_0 = arith.constant 0 : i32
    %c0_i32_1 = arith.constant 0 : i32
    return %c0_i32, %c0_i32_0 : i32, i32
  }
  func.func @transform_8(%arg0: i32) -> (i32, i32) {
    %c0_i32 = arith.constant 0 : i32
    %c0_i32_0 = arith.constant 0 : i32
    %c0_i32_1 = arith.constant 0 : i32
    return %c0_i32, %c0_i32_0 : i32, i32
  }
  func.func @transform_9(%arg0: i32) -> (i32, i32) {
    %c0_i32 = arith.constant 0 : i32
    %c0_i32_0 = arith.constant 0 : i32
    %c0_i32_1 = arith.constant 0 : i32
    return %c0_i32, %c0_i32_0 : i32, i32
  }
  func.func @transform_10(%arg0: i32) -> (i32, i32, i32) {
    %c0_i32 = arith.constant 0 : i32
    %c0_i32_0 = arith.constant 0 : i32
    %c0_i32_1 = arith.constant 0 : i32
    return %arg0, %c0_i32, %c0_i32_0 : i32, i32, i32
  }
}

</mosaic_0001>

<bundles_post_ra>
// kernel: basic_vsr_net_forward.1
= control target key start
LH: loop header
LB: loop body
LE: loop exit
PB: predicated region body
PF: predicated region fallthrough
CT: control target
= control target key end

     0   :  { %15 = vsyncpa [#allocation5], 0  ;;  %s10884_s13 = smov 0   ;;  %s15107_s0 = inlined_call_operand.vmem [shape: f32[2,16,16,3], index: 0, kind: input, shape index: {}]   ;;  %s15108_s1 = inlined_call_operand.vmem [shape: f32[576,64], index: 1, kind: input, shape index: {}]   ;;  %s15109_s2 = inlined_call_operand.vmem [shape: f32[1,64], index: 2, kind: input, shape index: {}]   ;;  %s15110_s3 = inlined_call_operand.vmem [shape: f32[576,64], index: 3, kind: input, shape index: {}]   ;;  %s15111_s4 = inlined_call_operand.vmem [shape: f32[1,64], index: 4, kind: input, shape index: {}]   ;;  %s15112_s5 = inlined_call_operand.vmem [shape: f32[576,64], index: 5, kind: input, shape index: {}]   ;;  %s15113_s6 = inlined_call_operand.vmem [shape: f32[1,64], index: 6, kind: input, shape index: {}]   ;;  %s15114_s7 = inlined_call_operand.vmem [shape: f32[3,576], index: 7, kind: input, shape index: {}]   ;;  %s15115_s8 = inlined_call_operand.vmem [shape: f32[3,1], index: 8, kind: input, shape index: {}]   ;;  %s15116_s9 = inlined_call_operand.hbm [shape: f32[256,1024], index: 9, kind: input, shape index: {}]   ;;  %s15117_s10 = inlined_call_operand.vmem [shape: f32[2,3,1024], index: 10, kind: output, shape index: {}]  }
   0x1 LB: > { %s10890_s14 = sadd.s32 4294967295, %s10820_s13   ;;  %p9189_p0 = scmp.ge.s32.totalorder %s10820_s13, 1  ;;  %s10820_s13 = sphi %s10884_s13, %s21_s13  }
   0x2   : > { %p267_p1 = scmp.lt.s32.totalorder %s10820_s13, 3  ;;  %s10822_s15 = smov [#allocation4]  }
   0x3   : > { %s303_s16 = sshll.u32 %s10822_s15, 4  ;;  %p15118_p3 = scmp.eq.s32.totalorder %s10890_s14, 0  ;;  %s304_s16 = int_to_ptr.vmem [resolvable:$true] %s303_s16 }
   0x4   : > { %p10894_p2 = pnand %p9189_p0, %p267_p1  ;;  %s10782_s21 = scalar_lea.hbm %s15116_s9, 32768 }
   0x5   : > { %p10783_p6 = scmp.ne.s32.totalorder %s15116_s9, %s10782_s21  ;;  %p10789_p10 = scmp.lt.u32.totalorder %s10782_s21, %s15116_s9 }
   0x6   : > { %s15134_s17 = scalar_select %p10894_p2, 1, 0 }
   0x7   : > { %p10746_p4 = pneg %p10894_p2 }
   0x9   : > { %p10903_p5 = pnand %p15118_p3, %p10746_p4 }
   0xb   : > { %p10784_p7 = pneg %p10903_p5 }
   0xd   : > { %p10785_p8 = pnand %p10784_p7, %p10783_p6 }
   0xf   : > { %p10786_p9 = pneg %p10785_p8 }
  0x11   : > { %p10791_p11 = pnand %p10789_p10, %p10786_p9 }
  0x13   : > { %10794 = shalt.err (!%p10791_p11)
}
  0x14   : > { %s10795_s26 = scalar_lea.vmem %s304_s16, 32768  ;;  %p10803_p1 = scmp.lt.s32.totalorder %s304_s16, %s304_s16 }
  0x15   : > { %p10796_p12 = scmp.ne.s32.totalorder %s304_s16, %s10795_s26  ;;  %p10804_p4 = scmp.lt.s32.totalorder %s10795_s26, %s10795_s26 }
  0x17   : > { %p10798_p13 = pnand %p10796_p12, %p10784_p7  ;;  %p10805_p3 = por %p10804_p4, %p10803_p1 }
  0x19   : > { %p10799_p0 = pneg %p10798_p13 }
  0x1b   : > { %p10806_p2 = pnand %p10805_p3, %p10799_p0 }
  0x1d   : > { %10809 = shalt.err (!%p10806_p2)
}
  0x1e   : > { %s10823_s27 = smov 1024   ;;  %s10824_s28 = smov 64  }
  0x1f   : > { %10749 = dma.hbm_to_vmem [thread:$0]  (!%p10903_p5), %s15116_s9, 32768, %s304_s16, [#allocation5], %s10823_s27, %s10823_s27, %s10824_s28  }
  0x20   : > { %p15136_p6 = scmp.ne.s32.totalorder %s15134_s17, 0 }
  0x22   : > { %327 = sbr.rel (%p15136_p6) target bundleno = 2538 (0x9ea), region = 60 }
  0x29   : > { %p15137_p8 = scmp.eq.s32.totalorder %s10890_s14, 0 }
  0x2b   : > { %10815 = dma.done.wait (%p15137_p8), [#allocation5], 32768   ;;  %p15138_p7 = pmov %p15137_p8 }
  0x2c   : > { %p365_p3 = scmp.lt.s32.totalorder %s10890_s14, 1  ;;  %vm375_vm0 = vcmask 523264   ;;  %v10825_v0 = vmov 0.0   ;;  %vm378_vm1 = vcmask 517120   ;;  %v15120_v1 = vmov 0.0|0.0   ;;  %v1747_v17 = vld [vmem:[%s15108_s1] sm:$0xff] }
  0x2d   : > { %10817 = vsyncadd (%p15138_p7), [#allocation5], 4294934528  ;;  %380 = vst.msk [vmem:[#allocation2 + $0x18] sm:$0xff] %vm375_vm0, %v10825_v0  ;;  %9680 = vmatprep.subr.bf16.mxu0 %v15120_v1  ;;  %vm464_vm2 = vcmask 23552   ;;  %v1748_v18 = vld [vmem:[%s15108_s1 + $0x8] sm:$0xff]  ;;  %v1749_v21 = vld [vmem:[%s15108_s1 + $0x10] sm:$0xff] }
  0x2e   : > { %381 = vst.msk [vmem:[#allocation2 + $0x20] sm:$0xff] %vm375_vm0, %v10825_v0  ;;  %376 = vst.msk [vmem:[#allocation2] sm:$0xff] %vm375_vm0, %v10825_v0  ;;  %s15167_s14 = smov (!%p365_p3, %s10890_s14), 1  ;;  %v9681_v20 = vpack.c.bf16 %v1748_v18, %v1747_v17  ;;  %v1750_v22 = vld [vmem:[%s15108_s1 + $0x18] sm:$0xff]  ;;  %s10827_s25 = smov 64   ;;  %v1751_v43 = vld [vmem:[%s15108_s1 + $0x20] sm:$0xff] }
  0x2f   : > { %377 = vst.msk [vmem:[#allocation2 + $0x8] sm:$0xff] %vm375_vm0, %v10825_v0  ;;  %383 = vst.msk [vmem:[#allocation2 + $0x30] sm:$0xff] %vm375_vm0, %v10825_v0  ;;  %s9332_s11 = sshll.u32 %s15167_s14, 8  ;;  %v9684_v32 = vpack.c.bf16 %v1750_v22, %v1749_v21  ;;  %v1752_v47 = vld [vmem:[%s15108_s1 + $0x28] sm:$0xff]  ;;  %v1753_v50 = vld [vmem:[%s15108_s1 + $0x30] sm:$0xff]  ;;  %vm721_vm3 = vcmask 1048064  }
  0x30   : > { %384 = vst.msk [vmem:[#allocation2 + $0x38] sm:$0xff] %vm375_vm0, %v10825_v0  ;;  %386 = vst.msk [vmem:[#allocation2 + $0x48] sm:$0xff] %vm375_vm0, %v10825_v0  ;;  %s10994_s16 = scalar_lea.vmem %s15107_s0, %s9332_s11  ;;  %9682 = vmatpush1.bf16.msra.mxu0 %v9681_v20  ;;  %v9687_v48 = vpack.c.bf16 %v1752_v47, %v1751_v43  ;;  %v1754_v51 = vld [vmem:[%s15108_s1 + $0x38] sm:$0xff]  ;;  %v1755_v57 = vld [vmem:[%s15108_s1 + $0x40] sm:$0xff]  ;;  %s9333_s28 = sshll.u32 %s15167_s14, 5 }
  0x31   : > { %387 = vst.msk [vmem:[#allocation2 + $0x50] sm:$0xff] %vm375_vm0, %v10825_v0  ;;  %389 = vst.msk [vmem:[#allocation2 + $0x60] sm:$0xff] %vm375_vm0, %v10825_v0  ;;  %v431_v2 = vld [vmem:[%s10994_s16] sm:$0xff]  ;;  %v432_v3 = vld [vmem:[%s10994_s16 + $0x8] sm:$0xff]  ;;  %9683 = vmatprep.subr.bf16.mxu0 %v15120_v1  ;;  %v9690_v55 = vpack.c.bf16 %v1754_v51, %v1753_v50  ;;  %s374_s11 = scalar_lea.vmem %s15117_s10, %s9333_s28 }
  0x32   : > { %390 = vst.msk [vmem:[#allocation2 + $0x68] sm:$0xff] %vm375_vm0, %v10825_v0  ;;  %392 = vst.msk [vmem:[#allocation2 + $0x78] sm:$0xff] %vm375_vm0, %v10825_v0  ;;  %v433_v4 = vld [vmem:[%s10994_s16 + $0x10] sm:$0xff]  ;;  %v434_v5 = vld [vmem:[%s10994_s16 + $0x18] sm:$0xff] }
  0x33   : > { %393 = vst.msk [vmem:[#allocation2 + $0x80] sm:$0xff] %vm375_vm0, %v10825_v0  ;;  %395 = vst.msk [vmem:[#allocation2 + $0x90] sm:$0xff] %vm375_vm0, %v10825_v0  ;;  %v435_v6 = vld [vmem:[%s10994_s16 + $0x20] sm:$0xff]  ;;  %v436_v7 = vld [vmem:[%s10994_s16 + $0x28] sm:$0xff] }
  0x34   : > { %396 = vst.msk [vmem:[#allocation2 + $0x98] sm:$0xff] %vm375_vm0, %v10825_v0  ;;  %398 = vst.msk [vmem:[#allocation2 + $0xa8] sm:$0xff] %vm375_vm0, %v10825_v0  ;;  %v437_v8 = vld [vmem:[%s10994_s16 + $0x30] sm:$0xff]  ;;  %v438_v9 = vld [vmem:[%s10994_s16 + $0x38] sm:$0xff]  ;;  %9685 = vmatpush1.bf16.msra.mxu0 %v9684_v32 }
  0x35   : > { %399 = vst.msk [vmem:[#allocation2 + $0xb0] sm:$0xff] %vm375_vm0, %v10825_v0  ;;  %401 = vst.msk [vmem:[#allocation2 + $0xc0] sm:$0xff] %vm375_vm0, %v10825_v0  ;;  %v439_v10 = vld [vmem:[%s10994_s16 + $0x40] sm:$0xff]  ;;  %v440_v11 = vld [vmem:[%s10994_s16 + $0x48] sm:$0xff]  ;;  %9686 = vmatprep.subr.bf16.mxu0 %v15120_v1 }
  0x36   : > { %402 = vst.msk [vmem:[#allocation2 + $0xc8] sm:$0xff] %vm375_vm0, %v10825_v0  ;;  %404 = vst.msk [vmem:[#allocation2 + $0xd8] sm:$0xff] %vm375_vm0, %v10825_v0  ;;  %v441_v12 = vld [vmem:[%s10994_s16 + $0x50] sm:$0xff]  ;;  %v442_v13 = vld [vmem:[%s10994_s16 + $0x58] sm:$0xff] }
  0x37   : > { %405 = vst.msk [vmem:[#allocation2 + $0xe0] sm:$0xff] %vm375_vm0, %v10825_v0  ;;  %407 = vst.msk [vmem:[#allocation2 + $0xf0] sm:$0xff] %vm375_vm0, %v10825_v0  ;;  %v443_v14 = vld [vmem:[%s10994_s16 + $0x60] sm:$0xff]  ;;  %v444_v15 = vld [vmem:[%s10994_s16 + $0x68] sm:$0xff] }
  0x38   : > { %408 = vst.msk [vmem:[#allocation2 + $0xf8] sm:$0xff] %vm375_vm0, %v10825_v0  ;;  %410 = vst.msk [vmem:[#allocation2 + $0x108] sm:$0xff] %vm375_vm0, %v10825_v0  ;;  %v445_v16 = vld [vmem:[%s10994_s16 + $0x70] sm:$0xff]  ;;  %v446_v19 = vld [vmem:[%s10994_s16 + $0x78] sm:$0xff]  ;;  %9688 = vmatpush1.bf16.msra.mxu0 %v9687_v48 }
  0x39   : > { %411 = vst.msk [vmem:[#allocation2 + $0x110] sm:$0xff] %vm375_vm0, %v10825_v0  ;;  %413 = vst.msk [vmem:[#allocation2 + $0x120] sm:$0xff] %vm375_vm0, %v10825_v0  ;;  %v447_v23 = vld [vmem:[%s10994_s16 + $0x80] sm:$0xff]  ;;  %v448_v49 = vld [vmem:[%s10994_s16 + $0x88] sm:$0xff]  ;;  %9689 = vmatprep.subr.bf16.mxu0 %v15120_v1 }
  0x3a   : > { %414 = vst.msk [vmem:[#allocation2 + $0x128] sm:$0xff] %vm375_vm0, %v10825_v0  ;;  %416 = vst.msk [vmem:[#allocation2 + $0x138] sm:$0xff] %vm375_vm0, %v10825_v0  ;;  %v561_v27 = vld [vmem:[#allocation2 + $0x1] sm:$0xff]  ;;  %v449_v52 = vld [vmem:[%s10994_s16 + $0x90] sm:$0xff] }
  0x3b   : > { %417 = vst.msk [vmem:[#allocation2 + $0x140] sm:$0xff] %vm375_vm0, %v10825_v0  ;;  %419 = vst.msk [vmem:[#allocation2 + $0x150] sm:$0xff] %vm375_vm0, %v10825_v0  ;;  %v11121_v53 = vld [vmem:[#allocation2 + $0x2] sm:$0xff]  ;;  %v450_v56 = vld [vmem:[%s10994_s16 + $0x98] sm:$0xff] }
  0x3c   : > { %420 = vst.msk [vmem:[#allocation2 + $0x158] sm:$0xff] %vm375_vm0, %v10825_v0  ;;  %422 = vst.msk [vmem:[#allocation2 + $0x168] sm:$0xff] %vm375_vm0, %v10825_v0  ;;  %v1756_v58 = vld [vmem:[%s15108_s1 + $0x48] sm:$0xff]  ;;  %v451_v59 = vld [vmem:[%s10994_s16 + $0xa0] sm:$0xff]  ;;  %9691 = vmatpush1.bf16.msra.mxu0 %v9690_v55 }
  0x3d   : > { %423 = vst.msk [vmem:[#allocation2 + $0x170] sm:$0xff] %vm375_vm0, %v10825_v0  ;;  %425 = vst.msk [vmem:[#allocation2 + $0x180] sm:$0xff] %vm375_vm0, %v10825_v0  ;;  %v452_v60 = vld [vmem:[%s10994_s16 + $0xa8] sm:$0xff]  ;;  %v453_v61 = vld [vmem:[%s10994_s16 + $0xb0] sm:$0xff]  ;;  %9692 = vmatprep.subr.bf16.mxu0 %v15120_v1 }
  0x3e   : > { %426 = vst.msk [vmem:[#allocation2 + $0x188] sm:$0xff] %vm375_vm0, %v10825_v0  ;;  %428 = vst.msk [vmem:[#allocation2 + $0x198] sm:$0xff] %vm375_vm0, %v10825_v0  ;;  %v1762_v20 = vld [vmem:[%s15108_s1 + $0x78] sm:$0xff]  ;;  %v459_v22 = vld [vmem:[%s10994_s16 + $0xe0] sm:$0xff] }
  0x3f   : > { %429 = vst.msk [vmem:[#allocation2 + $0x1a0] sm:$0xff] %vm375_vm0, %v10825_v0  ;;  %786 = vst.msk [vmem:[#allocation3 + $0x8] sm:$0xff] %vm375_vm0, %v11121_v53  ;;  %v458_v21 = vld [vmem:[%s10994_s16 + $0xd8] sm:$0xff] }
  0x40   : > { %382 = vst.msk [vmem:[#allocation2 + $0x28] sm:$0x3] %vm378_vm1, %v10825_v0  ;;  %379 = vst.msk [vmem:[#allocation2 + $0x10] sm:$0x3] %vm378_vm1, %v10825_v0  ;;  %v1766_v43 = vld [vmem:[%s15108_s1 + $0x98] sm:$0xff] }
  0x41   : > { %385 = vst.msk [vmem:[#allocation2 + $0x40] sm:$0x3] %vm378_vm1, %v10825_v0  ;;  %388 = vst.msk [vmem:[#allocation2 + $0x58] sm:$0x3] %vm378_vm1, %v10825_v0 }
  0x42   : > { %391 = vst.msk [vmem:[#allocation2 + $0x70] sm:$0x3] %vm378_vm1, %v10825_v0  ;;  %394 = vst.msk [vmem:[#allocation2 + $0x88] sm:$0x3] %vm378_vm1, %v10825_v0 }
  0x43   : > { %397 = vst.msk [vmem:[#allocation2 + $0xa0] sm:$0x3] %vm378_vm1, %v10825_v0  ;;  %400 = vst.msk [vmem:[#allocation2 + $0xb8] sm:$0x3] %vm378_vm1, %v10825_v0 }
  0x44   : > { %403 = vst.msk [vmem:[#allocation2 + $0xd0] sm:$0x3] %vm378_vm1, %v10825_v0  ;;  %406 = vst.msk [vmem:[#allocation2 + $0xe8] sm:$0x3] %vm378_vm1, %v10825_v0 }
  0x45   : > { %409 = vst.msk [vmem:[#allocation2 + $0x100] sm:$0x3] %vm378_vm1, %v10825_v0  ;;  %412 = vst.msk [vmem:[#allocation2 + $0x118] sm:$0x3] %vm378_vm1, %v10825_v0 }
  0x46   : > { %415 = vst.msk [vmem:[#allocation2 + $0x130] sm:$0x3] %vm378_vm1, %v10825_v0  ;;  %418 = vst.msk [vmem:[#allocation2 + $0x148] sm:$0x3] %vm378_vm1, %v10825_v0 }
  0x47   : > { %421 = vst.msk [vmem:[#allocation2 + $0x160] sm:$0x3] %vm378_vm1, %v10825_v0  ;;  %424 = vst.msk [vmem:[#allocation2 + $0x178] sm:$0x3] %vm378_vm1, %v10825_v0  ;;  %v562_v29 = vld [vmem:[#allocation2 + $0x9] sm:$0xff] }
  0x48   : > { %427 = vst.msk [vmem:[#allocation2 + $0x190] sm:$0x3] %vm378_vm1, %v10825_v0  ;;  %430 = vst.msk [vmem:[#allocation2 + $0x1a8] sm:$0x3] %vm378_vm1, %v10825_v0  ;;  %v755_v62 = vld [vmem:[#allocation2 + $0xa] sm:$0xff]  ;;  %v9693_v0 = vpack.c.bf16 %v1756_v58, %v1755_v57 }
  0x49   : > { %465 = vst.msk [vmem:[#allocation2 + $0x19] sm:$0xff] %vm464_vm2, %v431_v2  ;;  %466 = vst.msk [vmem:[#allocation2 + $0x21] sm:$0xff] %vm464_vm2, %v432_v3  ;;  %v454_v2 = vld [vmem:[%s10994_s16 + $0xb8] sm:$0xff] }
  0x4a   : > { %467 = vst.msk [vmem:[#allocation2 + $0x31] sm:$0xff] %vm464_vm2, %v433_v4  ;;  %468 = vst.msk [vmem:[#allocation2 + $0x39] sm:$0xff] %vm464_vm2, %v434_v5  ;;  %v1757_v4 = vld [vmem:[%s15108_s1 + $0x50] sm:$0xff]  ;;  %v1758_v5 = vld [vmem:[%s15108_s1 + $0x58] sm:$0xff]  ;;  %9694 = vmatpush1.bf16.msra.mxu0 %v9693_v0 }
  0x4b   : > { %469 = vst.msk [vmem:[#allocation2 + $0x49] sm:$0xff] %vm464_vm2, %v435_v6  ;;  %470 = vst.msk [vmem:[#allocation2 + $0x51] sm:$0xff] %vm464_vm2, %v436_v7  ;;  %v455_v7 = vld [vmem:[%s10994_s16 + $0xc0] sm:$0xff]  ;;  %9695 = vmatprep.subr.bf16.mxu0 %v15120_v1 }
  0x4c   : > { %471 = vst.msk [vmem:[#allocation2 + $0x61] sm:$0xff] %vm464_vm2, %v437_v8  ;;  %472 = vst.msk [vmem:[#allocation2 + $0x69] sm:$0xff] %vm464_vm2, %v438_v9  ;;  %v497_v8 = vld [vmem:[#allocation2] sm:$0xff] }
  0x4d   : > { %473 = vst.msk [vmem:[#allocation2 + $0x79] sm:$0xff] %vm464_vm2, %v439_v10  ;;  %474 = vst.msk [vmem:[#allocation2 + $0x81] sm:$0xff] %vm464_vm2, %v440_v11  ;;  %v9696_v11 = vpack.c.bf16 %v1758_v5, %v1757_v4  ;;  %v1771_v5 = vld [vmem:[%s15108_s1 + $0xc0] sm:$0xff] }
  0x4e   : > { %475 = vst.msk [vmem:[#allocation2 + $0x91] sm:$0xff] %vm464_vm2, %v441_v12  ;;  %476 = vst.msk [vmem:[#allocation2 + $0x99] sm:$0xff] %vm464_vm2, %v442_v13  ;;  %v456_v12 = vld [vmem:[%s10994_s16 + $0xc8] sm:$0xff] }
  0x4f   : > { %477 = vst.msk [vmem:[#allocation2 + $0xa9] sm:$0xff] %vm464_vm2, %v443_v14  ;;  %478 = vst.msk [vmem:[#allocation2 + $0xb1] sm:$0xff] %vm464_vm2, %v444_v15  ;;  %v1759_v14 = vld [vmem:[%s15108_s1 + $0x60] sm:$0xff]  ;;  %v1760_v15 = vld [vmem:[%s15108_s1 + $0x68] sm:$0xff]  ;;  %9697 = vmatpush1.bf16.msra.mxu0 %v9696_v11 }
  0x50   : > { %479 = vst.msk [vmem:[#allocation2 + $0xc1] sm:$0xff] %vm464_vm2, %v445_v16  ;;  %480 = vst.msk [vmem:[#allocation2 + $0xc9] sm:$0xff] %vm464_vm2, %v446_v19  ;;  %v818_v24 = vld [vmem:[#allocation2 + $0x18] sm:$0xff]  ;;  %v819_v25 = vld [vmem:[#allocation2 + $0x20] sm:$0xff]  ;;  %v9699_v18 = vpack.c.bf16 %v1760_v15, %v1759_v14  ;;  %9698 = vmatprep.subr.bf16.mxu0 %v15120_v1 }
  0x51   : > { %v820_v26 = vld [vmem:[#allocation2 + $0x30] sm:$0xff]  ;;  %481 = vst.msk [vmem:[#allocation2 + $0xd9] sm:$0xff] %vm464_vm2, %v447_v23  ;;  %882 = vrot.lane.b32.xlu0 %v818_v24, %s10827_s25  ;;  %884 = vrot.lane.b32.xlu1 %v819_v25, %s10827_s25  ;;  %v821_v28 = vld [vmem:[#allocation2 + $0x38] sm:$0xff]  ;;  %v564_v45 = vld [vmem:[#allocation2 + $0x21] sm:$0xff] }
  0x52   : > { %531 = vst.msk [vmem:[#allocation3 + $0x50] sm:$0xff] %vm375_vm0, %v818_v24  ;;  %532 = vst.msk [vmem:[#allocation3 + $0x78] sm:$0xff] %vm375_vm0, %v819_v25  ;;  %v822_v30 = vld [vmem:[#allocation2 + $0x48] sm:$0xff]  ;;  %v11047_v31 = vld [vmem:[#allocation2 + $0x50] sm:$0xff] }
  0x53   : > { %533 = vst.msk [vmem:[#allocation3 + $0xa0] sm:$0xff] %vm375_vm0, %v820_v26  ;;  %534 = vst.msk [vmem:[#allocation3 + $0xc8] sm:$0xff] %vm375_vm0, %v821_v28  ;;  %v11050_v33 = vld [vmem:[#allocation2 + $0x60] sm:$0xff]  ;;  %v11056_v34 = vld [vmem:[#allocation2 + $0x68] sm:$0xff]  ;;  %9700 = vmatpush1.bf16.msra.mxu0 %v9699_v18 }
  0x54   : > { %535 = vst.msk [vmem:[#allocation3 + $0xf0] sm:$0xff] %vm375_vm0, %v822_v30  ;;  %536 = vst.msk [vmem:[#allocation3 + $0x118] sm:$0xff] %vm375_vm0, %v11047_v31  ;;  %v11058_v35 = vld [vmem:[#allocation2 + $0x78] sm:$0xff]  ;;  %v11064_v36 = vld [vmem:[#allocation2 + $0x80] sm:$0xff]  ;;  %9701 = vmatprep.subr.bf16.mxu0 %v15120_v1 }
  0x55   : > { %537 = vst.msk [vmem:[#allocation3 + $0x140] sm:$0xff] %vm375_vm0, %v11050_v33  ;;  %625 = vrot.lane.b32.xlu0 %v561_v27, %s10827_s25  ;;  %627 = vrot.lane.b32.xlu1 %v562_v29, %s10827_s25  ;;  %538 = vst.msk [vmem:[#allocation3 + $0x168] sm:$0xff] %vm375_vm0, %v11056_v34  ;;  %v563_v37 = vld [vmem:[#allocation2 + $0x19] sm:$0xff]  ;;  %v11070_v38 = vld [vmem:[#allocation2 + $0x90] sm:$0xff] }
  0x56   : > { %539 = vst.msk [vmem:[#allocation3 + $0x190] sm:$0xff] %vm375_vm0, %v11058_v35  ;;  %v11072_v39 = vld [vmem:[#allocation2 + $0x98] sm:$0xff]  ;;  %540 = vst.msk [vmem:[#allocation3 + $0x1b8] sm:$0xff] %vm375_vm0, %v11064_v36  ;;  %v11076_v40 = vld [vmem:[#allocation2 + $0xa8] sm:$0xff] }
  0x57   : > { %541 = vst.msk [vmem:[#allocation3 + $0x1e0] sm:$0xff] %vm375_vm0, %v11070_v38  ;;  %542 = vst.msk [vmem:[#allocation3 + $0x208] sm:$0xff] %vm375_vm0, %v11072_v39  ;;  %v11083_v41 = vld [vmem:[#allocation2 + $0xb0] sm:$0xff]  ;;  %v11085_v42 = vld [vmem:[#allocation2 + $0xc0] sm:$0xff] }
  0x58   : > { %543 = vst.msk [vmem:[#allocation3 + $0x230] sm:$0xff] %vm375_vm0, %v11076_v40  ;;  %v11094_v44 = vld [vmem:[#allocation2 + $0xc8] sm:$0xff]  ;;  %544 = vst.msk [vmem:[#allocation3 + $0x258] sm:$0xff] %vm375_vm0, %v11083_v41  ;;  %v11100_v46 = vld [vmem:[#allocation2 + $0xd8] sm:$0xff] }
  0x59   : > { %886 = vrot.lane.b32.xlu0 %v820_v26, %s10827_s25  ;;  %629 = vrot.lane.b32.xlu1 %v563_v37, %s10827_s25  ;;  %545 = vst.msk [vmem:[#allocation3 + $0x280] sm:$0xff] %vm375_vm0, %v11085_v42  ;;  %546 = vst.msk [vmem:[#allocation3 + $0x2a8] sm:$0xff] %vm375_vm0, %v11094_v44  ;;  %v11123_v54 = vld [vmem:[#allocation2 + $0x31] sm:$0xff]  ;;  %v11144_v63 = vld [vmem:[#allocation2 + $0x39] sm:$0xff] }
  0x5a   : > { %547 = vst.msk [vmem:[#allocation3 + $0x2d0] sm:$0xff] %vm375_vm0, %v11100_v46  ;;  %787 = vst.msk [vmem:[#allocation3 + $0x30] sm:$0xff] %vm375_vm0, %v755_v62  ;;  %v11171_v9 = vld [vmem:[#allocation2 + $0x49] sm:$0xff]  ;;  %v11196_v17 = vld [vmem:[#allocation2 + $0x51] sm:$0xff] }
  0x5b   : > { %482 = vst.msk [vmem:[#allocation2 + $0xe1] sm:$0xff] %vm464_vm2, %v448_v49  ;;  %483 = vst.msk [vmem:[#allocation2 + $0xf1] sm:$0xff] %vm464_vm2, %v449_v52  ;;  %v457_v16 = vld [vmem:[%s10994_s16 + $0xd0] sm:$0xff]  ;;  %v498_v23 = vld [vmem:[#allocation2 + $0x8] sm:$0xff] }
  0x5c   : > { %484 = vst.msk [vmem:[#allocation2 + $0xf9] sm:$0xff] %vm464_vm2, %v450_v56  ;;  %485 = vst.msk [vmem:[#allocation2 + $0x109] sm:$0xff] %vm464_vm2, %v451_v59  ;;  %v1761_v19 = vld [vmem:[%s15108_s1 + $0x70] sm:$0xff]  ;;  %v11213_v24 = vld [vmem:[#allocation2 + $0x61] sm:$0xff] }
  0x5d   : > { %888 = vrot.lane.b32.xlu0 %v821_v28, %s10827_s25  ;;  %631 = vrot.lane.b32.xlu1 %v564_v45, %s10827_s25  ;;  %486 = vst.msk [vmem:[#allocation2 + $0x111] sm:$0xff] %vm464_vm2, %v452_v60  ;;  %487 = vst.msk [vmem:[#allocation2 + $0x121] sm:$0xff] %vm464_vm2, %v453_v61  ;;  %v9702_v25 = vpack.c.bf16 %v1762_v20, %v1761_v19  ;;  %v1763_v26 = vld [vmem:[%s15108_s1 + $0x80] sm:$0xff]  ;;  %v1764_v27 = vld [vmem:[%s15108_s1 + $0x88] sm:$0xff] }
  0x5e   : > { %488 = vst.msk [vmem:[#allocation2 + $0x129] sm:$0xff] %vm464_vm2, %v454_v2  ;;  %489 = vst.msk [vmem:[#allocation2 + $0x139] sm:$0xff] %vm464_vm2, %v455_v7  ;;  %v460_v28 = vld [vmem:[%s10994_s16 + $0xe8] sm:$0xff]  ;;  %v461_v29 = vld [vmem:[%s10994_s16 + $0xf0] sm:$0xff] }
  0x5f   : > { %529 = vst.msk [vmem:[#allocation3] sm:$0xff] %vm375_vm0, %v497_v8  ;;  %530 = vst.msk [vmem:[#allocation3 + $0x28] sm:$0xff] %vm375_vm0, %v498_v23  ;;  %v11238_v32 = vld [vmem:[#allocation2 + $0x69] sm:$0xff]  ;;  %9703 = vmatpush1.bf16.msra.mxu0 %v9702_v25  ;;  %v11242_v37 = vld [vmem:[#allocation2 + $0x32] sm:$0xff] }
  0x60   : > { %490 = vst.msk [vmem:[#allocation2 + $0x141] sm:$0xff] %vm464_vm2, %v456_v12  ;;  %491 = vst.msk [vmem:[#allocation2 + $0x151] sm:$0xff] %vm464_vm2, %v457_v16  ;;  %9704 = vmatprep.subr.bf16.mxu0 %v15120_v1  ;;  %v11255_v45 = vld [vmem:[#allocation2 + $0x3a] sm:$0xff]  ;;  %v11257_v47 = vld [vmem:[#allocation2 + $0x4a] sm:$0xff] }
  0x61   : > { %890 = vrot.lane.b32.xlu0 %v822_v30, %s10827_s25  ;;  %633 = vrot.lane.b32.xlu1 %v11123_v54, %s10827_s25  ;;  %492 = vst.msk [vmem:[#allocation2 + $0x159] sm:$0xff] %vm464_vm2, %v458_v21  ;;  %493 = vst.msk [vmem:[#allocation2 + $0x169] sm:$0xff] %vm464_vm2, %v459_v22  ;;  %v11227_v30 = vld [vmem:[#allocation2 + $0x1a] sm:$0xff]  ;;  %v11269_v50 = vld [vmem:[#allocation2 + $0x52] sm:$0xff] }
  0x62   : > { %v11149_v3 = vld [vmem:[#allocation2 + $0xe0] sm:$0xff]  ;;  %v11159_v6 = vld [vmem:[#allocation2 + $0xf0] sm:$0xff]  ;;  %494 = vst.msk [vmem:[#allocation2 + $0x171] sm:$0xff] %vm464_vm2, %v460_v28  ;;  %495 = vst.msk [vmem:[#allocation2 + $0x181] sm:$0xff] %vm464_vm2, %v461_v29 }
  0x63   : > { %548 = vst.msk [vmem:[#allocation3 + $0x2f8] sm:$0xff] %vm375_vm0, %v11149_v3  ;;  %549 = vst.msk [vmem:[#allocation3 + $0x320] sm:$0xff] %vm375_vm0, %v11159_v6  ;;  %v11173_v10 = vld [vmem:[#allocation2 + $0xf8] sm:$0xff]  ;;  %v11178_v13 = vld [vmem:[#allocation2 + $0x108] sm:$0xff] }
  0x64   : > { %550 = vst.msk [vmem:[#allocation3 + $0x348] sm:$0xff] %vm375_vm0, %v11173_v10  ;;  %551 = vst.msk [vmem:[#allocation3 + $0x370] sm:$0xff] %vm375_vm0, %v11178_v13  ;;  %v11267_v48 = vld [vmem:[#allocation2 + $0x79] sm:$0xff]  ;;  %v11271_v51 = vld [vmem:[#allocation2 + $0x62] sm:$0xff] }
  0x65   : > { %892 = vrot.lane.b32.xlu0 %v11047_v31, %s10827_s25  ;;  %635 = vrot.lane.b32.xlu1 %v11144_v63, %s10827_s25  ;;  %v462_v31 = vld [vmem:[%s10994_s16 + $0xf8] sm:$0xff]  ;;  %788 = vst.msk [vmem:[#allocation3 + $0x58] sm:$0xff] %vm375_vm0, %v11227_v30  ;;  %790 = vst.msk [vmem:[#allocation3 + $0xa8] sm:$0xff] %vm375_vm0, %v11242_v37  ;;  %v1768_v52 = vld [vmem:[%s15108_s1 + $0xa8] sm:$0xff] }
  0x66   : > { %496 = vst.msk [vmem:[#allocation2 + $0x189] sm:$0xff] %vm464_vm2, %v462_v31  ;;  %v11288_v55 = vld [vmem:[#allocation2 + $0x6a] sm:$0xff]  ;;  %v11290_v56 = vld [vmem:[#allocation2 + $0x7a] sm:$0xff]  ;;  %v11298_v59 = vld [vmem:[#allocation2 + $0x82] sm:$0xff] }
  0x67   : > { %791 = vst.msk [vmem:[#allocation3 + $0xd0] sm:$0xff] %vm375_vm0, %v11255_v45  ;;  %792 = vst.msk [vmem:[#allocation3 + $0xf8] sm:$0xff] %vm375_vm0, %v11257_v47  ;;  %v11292_v57 = vld [vmem:[#allocation2 + $0x81] sm:$0xff]  ;;  %v1769_v60 = vld [vmem:[%s15108_s1 + $0xb0] sm:$0xff] }
  0x68   : > { %793 = vst.msk [vmem:[#allocation3 + $0x120] sm:$0xff] %vm375_vm0, %v11269_v50  ;;  %794 = vst.msk [vmem:[#allocation3 + $0x148] sm:$0xff] %vm375_vm0, %v11271_v51  ;;  %v1770_v61 = vld [vmem:[%s15108_s1 + $0xb8] sm:$0xff]  ;;  %v11317_v0 = vld [vmem:[#allocation2 + $0xaa] sm:$0xff] }
  0x69   : > { %894 = vrot.lane.b32.xlu0 %v11050_v33, %s10827_s25  ;;  %637 = vrot.lane.b32.xlu1 %v11171_v9, %s10827_s25  ;;  %v9705_v33 = vpack.c.bf16 %v1764_v27, %v1763_v26  ;;  %795 = vst.msk [vmem:[#allocation3 + $0x170] sm:$0xff] %vm375_vm0, %v11288_v55  ;;  %796 = vst.msk [vmem:[#allocation3 + $0x198] sm:$0xff] %vm375_vm0, %v11290_v56  ;;  %v11313_v62 = vld [vmem:[#allocation2 + $0x9a] sm:$0xff]  ;;  %v11325_v2 = vld [vmem:[#allocation2 + $0x91] sm:$0xff]  ;;  %v9714_v4 = vpack.c.bf16 %v1770_v61, %v1769_v60 }
  0x6a   : > { %797 = vst.msk [vmem:[#allocation3 + $0x1c0] sm:$0xff] %vm375_vm0, %v11298_v59  ;;  %799 = vst.msk [vmem:[#allocation3 + $0x210] sm:$0xff] %vm375_vm0, %v11313_v62  ;;  %v11334_v7 = vld [vmem:[#allocation2 + $0xb2] sm:$0xff]  ;;  %v11351_v14 = vld [vmem:[#allocation2 + $0xc2] sm:$0xff] }
  0x6b   : > { %9706 = vmatpush1.bf16.msra.mxu0 %v9705_v33  ;;  %800 = vst.msk [vmem:[#allocation3 + $0x238] sm:$0xff] %vm375_vm0, %v11317_v0  ;;  %801 = vst.msk [vmem:[#allocation3 + $0x260] sm:$0xff] %vm375_vm0, %v11334_v7  ;;  %v11342_v8 = vld [vmem:[#allocation2 + $0x99] sm:$0xff]  ;;  %v1773_v12 = vld [vmem:[%s15108_s1 + $0xd0] sm:$0xff] }
  0x6c   : > { %9707 = vmatprep.subr.bf16.mxu0 %v15120_v1  ;;  %802 = vst.msk [vmem:[#allocation3 + $0x288] sm:$0xff] %vm375_vm0, %v11351_v14  ;;  %v11359_v15 = vld [vmem:[#allocation2 + $0xa9] sm:$0xff]  ;;  %v1775_v18 = vld [vmem:[%s15108_s1 + $0xe0] sm:$0xff]  ;;  %v11376_v20 = vld [vmem:[#allocation2 + $0xb1] sm:$0xff] }
  0x6d   : > { %896 = vrot.lane.b32.xlu0 %v11056_v34, %s10827_s25  ;;  %639 = vrot.lane.b32.xlu1 %v11196_v17, %s10827_s25  ;;  %v11240_v34 = vld [vmem:[#allocation2 + $0x22] sm:$0xff]  ;;  %v11368_v19 = vld [vmem:[#allocation2 + $0xca] sm:$0xff]  ;;  %v11385_v23 = vld [vmem:[#allocation2 + $0xda] sm:$0xff] }
  0x6e   : > { %789 = vst.msk [vmem:[#allocation3 + $0x80] sm:$0xff] %vm375_vm0, %v11240_v34  ;;  %803 = vst.msk [vmem:[#allocation3 + $0x2b0] sm:$0xff] %vm375_vm0, %v11368_v19  ;;  %v1777_v22 = vld [vmem:[%s15108_s1 + $0xf0] sm:$0xff]  ;;  %v11393_v25 = vld [vmem:[#allocation2 + $0xc1] sm:$0xff] }
  0x6f   : > { %804 = vst.msk [vmem:[#allocation3 + $0x2d8] sm:$0xff] %vm375_vm0, %v11385_v23  ;;  %v11396_v27 = vld [vmem:[#allocation2 + $0xe2] sm:$0xff]  ;;  %v11407_v28 = vld [vmem:[#allocation2 + $0xf2] sm:$0xff]  ;;  %v11417_v29 = vld [vmem:[#allocation2 + $0xfa] sm:$0xff] }
  0x70   : > { %805 = vst.msk [vmem:[#allocation3 + $0x300] sm:$0xff] %vm375_vm0, %v11396_v27  ;;  %806 = vst.msk [vmem:[#allocation3 + $0x328] sm:$0xff] %vm375_vm0, %v11407_v28  ;;  %v11425_v31 = vld [vmem:[#allocation2 + $0x10a] sm:$0xff] }
  0x71   : > { %898 = vrot.lane.b32.xlu0 %v11058_v35, %s10827_s25  ;;  %641 = vrot.lane.b32.xlu1 %v11213_v24, %s10827_s25  ;;  %v1765_v35 = vld [vmem:[%s15108_s1 + $0x90] sm:$0xff]  ;;  %807 = vst.msk [vmem:[#allocation3 + $0x350] sm:$0xff] %vm375_vm0, %v11417_v29  ;;  %808 = vst.msk [vmem:[#allocation3 + $0x378] sm:$0xff] %vm375_vm0, %v11425_v31  ;;  %v522_v60 = vld [vmem:[#allocation2 + $0x128] sm:$0xff] }
  0x72   : > { %v9708_v49 = vpack.c.bf16 %v1766_v43, %v1765_v35  ;;  %v581_v33 = vld [vmem:[#allocation2 + $0xf1] sm:$0xff]  ;;  %v841_v61 = vld [vmem:[#allocation2 + $0x128] sm:$0xff]  ;;  %554 = vst.msk [vmem:[#allocation3 + $0x3e8] sm:$0xff] %vm375_vm0, %v522_v60  ;;  %1320 = vst.msk [vmem:[#allocation3 + $0x360] sm:$0xff] %vm375_vm0, %v522_v60 }
  0x73   : > { %v11432_v35 = vld [vmem:[#allocation2 + $0x112] sm:$0xff]  ;;  %v846_v60 = vld [vmem:[#allocation2 + $0x168] sm:$0xff]  ;;  %vm15042_vm4 = vmpackc.low %vm375_vm0, %vm375_vm0 }
  0x74   : > { %9709 = vmatpush1.bf16.msra.mxu0 %v9708_v49  ;;  %809 = vst.msk [vmem:[#allocation3 + $0x3a0] sm:$0xff] %vm375_vm0, %v11432_v35  ;;  %v839_v43 = vld [vmem:[#allocation2 + $0x110] sm:$0xff]  ;;  %v582_v49 = vld [vmem:[#allocation2 + $0xf9] sm:$0xff] }
  0x75   : > { %900 = vrot.lane.b32.xlu0 %v11064_v36, %s10827_s25  ;;  %643 = vrot.lane.b32.xlu1 %v11238_v32, %s10827_s25  ;;  %v1767_v36 = vld [vmem:[%s15108_s1 + $0xa0] sm:$0xff] }
  0x76   : > { %v9711_v58 = vpack.c.bf16 %v1768_v52, %v1767_v36  ;;  %9710 = vmatprep.subr.bf16.mxu0 %v15120_v1  ;;  %v521_v36 = vld [vmem:[#allocation2 + $0x120] sm:$0xff]  ;;  %v583_v52 = vld [vmem:[#allocation2 + $0x109] sm:$0xff] }
  0x77   : > { %553 = vst.msk [vmem:[#allocation3 + $0x3c0] sm:$0xff] %vm375_vm0, %v521_v36  ;;  %1319 = vst.msk [vmem:[#allocation3 + $0x338] sm:$0xff] %vm375_vm0, %v521_v36  ;;  %v527_v36 = vld [vmem:[#allocation2 + $0x168] sm:$0xff] }
  0x78   : > { %9712 = vmatpush1.bf16.msra.mxu0 %v9711_v58  ;;  %v11449_v58 = vld [vmem:[#allocation2 + $0x12a] sm:$0xff]  ;;  %559 = vst.msk [vmem:[#allocation3 + $0x4b0] sm:$0xff] %vm375_vm0, %v527_v36  ;;  %1325 = vst.msk [vmem:[#allocation3 + $0x428] sm:$0xff] %vm375_vm0, %v527_v36  ;;  %v1815_v36 = vld [vmem:[%s15108_s1 + $0x220] sm:$0xff] }
  0x79   : > { %902 = vrot.lane.b32.xlu0 %v11070_v38, %s10827_s25  ;;  %645 = vrot.lane.b32.xlu1 %v11267_v48, %s10827_s25  ;;  %v11300_v38 = vld [vmem:[#allocation2 + $0x92] sm:$0xff]  ;;  %811 = vst.msk [vmem:[#allocation3 + $0x3f0] sm:$0xff] %vm375_vm0, %v11449_v58 }
  0x7a   : > { %798 = vst.msk [vmem:[#allocation3 + $0x1e8] sm:$0xff] %vm375_vm0, %v11300_v38  ;;  %9713 = vmatprep.subr.bf16.mxu0 %v15120_v1 }
  0x7c   : > { %9715 = vmatpush1.bf16.msra.mxu0 %v9714_v4  ;;  %v584_v4 = vld [vmem:[#allocation2 + $0x111] sm:$0xff] }
  0x7d   : > { %904 = vrot.lane.b32.xlu0 %v11072_v39, %s10827_s25  ;;  %647 = vrot.lane.b32.xlu1 %v11292_v57, %s10827_s25  ;;  %v1772_v39 = vld [vmem:[%s15108_s1 + $0xc8] sm:$0xff] }
  0x7e   : > { %v9717_v11 = vpack.c.bf16 %v1772_v39, %v1771_v5  ;;  %9716 = vmatprep.subr.bf16.mxu0 %v15120_v1  ;;  %v11457_v5 = vld [vmem:[#allocation2 + $0x13a] sm:$0xff] }
  0x7f   : > { %v523_v39 = vld [vmem:[#allocation2 + $0x138] sm:$0xff]  ;;  %812 = vst.msk [vmem:[#allocation3 + $0x418] sm:$0xff] %vm375_vm0, %v11457_v5 }
  0x80   : > { %9718 = vmatpush1.bf16.msra.mxu0 %v9717_v11  ;;  %555 = vst.msk [vmem:[#allocation3 + $0x410] sm:$0xff] %vm375_vm0, %v523_v39  ;;  %1321 = vst.msk [vmem:[#allocation3 + $0x388] sm:$0xff] %vm375_vm0, %v523_v39  ;;  %v842_v11 = vld [vmem:[#allocation2 + $0x138] sm:$0xff] }
  0x81   : > { %906 = vrot.lane.b32.xlu0 %v11076_v40, %s10827_s25  ;;  %649 = vrot.lane.b32.xlu1 %v11325_v2, %s10827_s25  ;;  %v1774_v40 = vld [vmem:[%s15108_s1 + $0xd8] sm:$0xff] }
  0x82   : > { %v9720_v16 = vpack.c.bf16 %v1774_v40, %v1773_v12  ;;  %9719 = vmatprep.subr.bf16.mxu0 %v15120_v1  ;;  %v585_v12 = vld [vmem:[#allocation2 + $0x121] sm:$0xff]  ;;  %v11503_v39 = vld [vmem:[#allocation2 + $0x172] sm:$0xff] }
  0x83   : > { %v11465_v40 = vld [vmem:[#allocation2 + $0x142] sm:$0xff]  ;;  %817 = vst.msk [vmem:[#allocation3 + $0x4e0] sm:$0xff] %vm375_vm0, %v11503_v39  ;;  %1582 = vst.msk [vmem:[#allocation3 + $0x458] sm:$0xff] %vm375_vm0, %v11503_v39 }
  0x84   : > { %9721 = vmatpush1.bf16.msra.mxu0 %v9720_v16  ;;  %813 = vst.msk [vmem:[#allocation3 + $0x440] sm:$0xff] %vm375_vm0, %v11465_v40  ;;  %v524_v16 = vld [vmem:[#allocation2 + $0x140] sm:$0xff] }
  0x85   : > { %908 = vrot.lane.b32.xlu0 %v11083_v41, %s10827_s25  ;;  %651 = vrot.lane.b32.xlu1 %v11342_v8, %s10827_s25  ;;  %v1776_v41 = vld [vmem:[%s15108_s1 + $0xe8] sm:$0xff]  ;;  %556 = vst.msk [vmem:[#allocation3 + $0x438] sm:$0xff] %vm375_vm0, %v524_v16  ;;  %1322 = vst.msk [vmem:[#allocation3 + $0x3b0] sm:$0xff] %vm375_vm0, %v524_v16  ;;  %v1814_v16 = vld [vmem:[%s15108_s1 + $0x218] sm:$0xff] }
  0x86   : > { %v9723_v21 = vpack.c.bf16 %v1776_v41, %v1775_v18  ;;  %9722 = vmatprep.subr.bf16.mxu0 %v15120_v1  ;;  %v843_v18 = vld [vmem:[#allocation2 + $0x140] sm:$0xff]  ;;  %v586_v41 = vld [vmem:[#allocation2 + $0x129] sm:$0xff] }
  0x88   : > { %9724 = vmatpush1.bf16.msra.mxu0 %v9723_v21  ;;  %v11473_v21 = vld [vmem:[#allocation2 + $0x152] sm:$0xff] }
  0x89   : > { %910 = vrot.lane.b32.xlu0 %v11085_v42, %s10827_s25  ;;  %653 = vrot.lane.b32.xlu1 %v11359_v15, %s10827_s25  ;;  %v1778_v42 = vld [vmem:[%s15108_s1 + $0xf8] sm:$0xff]  ;;  %814 = vst.msk [vmem:[#allocation3 + $0x468] sm:$0xff] %vm375_vm0, %v11473_v21 }
  0x8a   : > { %v9726_v26 = vpack.c.bf16 %v1778_v42, %v1777_v22  ;;  %9725 = vmatprep.subr.bf16.mxu0 %v15120_v1  ;;  %v525_v22 = vld [vmem:[#allocation2 + $0x150] sm:$0xff] }
  0x8b   : > { %557 = vst.msk [vmem:[#allocation3 + $0x460] sm:$0xff] %vm375_vm0, %v525_v22  ;;  %1323 = vst.msk [vmem:[#allocation3 + $0x3d8] sm:$0xff] %vm375_vm0, %v525_v22  ;;  %v844_v42 = vld [vmem:[#allocation2 + $0x150] sm:$0xff] }
  0x8c   : > { %9727 = vmatpush1.bf16.msra.mxu0 %v9726_v26  ;;  %v587_v26 = vld [vmem:[#allocation2 + $0x139] sm:$0xff] }
  0x8d   : > { %912 = vrot.lane.b32.xlu0 %v11094_v44, %s10827_s25  ;;  %655 = vrot.lane.b32.xlu1 %v11376_v20, %s10827_s25  ;;  %v11404_v44 = vld [vmem:[#allocation2 + $0xc9] sm:$0xff] }
  0x8e   : > { %9728 = vmatprep.subr.bf16.mxu0 %v15120_v1 }
  0x91   : > { %914 = vrot.lane.b32.xlu0 %v11100_v46, %s10827_s25  ;;  %657 = vrot.lane.b32.xlu1 %v11393_v25, %s10827_s25  ;;  %v11415_v46 = vld [vmem:[#allocation2 + $0xd9] sm:$0xff] }
  0x95   : > { %916 = vrot.lane.b32.xlu0 %v11149_v3, %s10827_s25  ;;  %659 = vrot.lane.b32.xlu1 %v11404_v44, %s10827_s25  ;;  %v580_v3 = vld [vmem:[#allocation2 + $0xe1] sm:$0xff] }
  0x99   : > { %918 = vrot.lane.b32.xlu0 %v11159_v6, %s10827_s25  ;;  %661 = vrot.lane.b32.xlu1 %v11415_v46, %s10827_s25  ;;  %v520_v6 = vld [vmem:[#allocation2 + $0x110] sm:$0xff] }
  0x9a   : > { %552 = vst.msk [vmem:[#allocation3 + $0x398] sm:$0xff] %vm375_vm0, %v520_v6  ;;  %1318 = vst.msk [vmem:[#allocation3 + $0x310] sm:$0xff] %vm375_vm0, %v520_v6  ;;  %v845_v6 = vld [vmem:[#allocation2 + $0x158] sm:$0xff] }
  0x9d   : > { %920 = vrot.lane.b32.xlu0 %v11173_v10, %s10827_s25  ;;  %663 = vrot.lane.b32.xlu1 %v580_v3, %s10827_s25  ;;  %v11441_v10 = vld [vmem:[#allocation2 + $0x122] sm:$0xff]  ;;  %v11481_v3 = vld [vmem:[#allocation2 + $0x15a] sm:$0xff] }
  0x9e   : > { %810 = vst.msk [vmem:[#allocation3 + $0x3c8] sm:$0xff] %vm375_vm0, %v11441_v10  ;;  %815 = vst.msk [vmem:[#allocation3 + $0x490] sm:$0xff] %vm375_vm0, %v11481_v3 }
  0xa1   : > { %922 = vrot.lane.b32.xlu0 %v11178_v13, %s10827_s25  ;;  %665 = vrot.lane.b32.xlu1 %v581_v33, %s10827_s25  ;;  %v840_v13 = vld [vmem:[#allocation2 + $0x120] sm:$0xff]  ;;  %v526_v33 = vld [vmem:[#allocation2 + $0x158] sm:$0xff] }
  0xa2   : > { %558 = vst.msk [vmem:[#allocation3 + $0x488] sm:$0xff] %vm375_vm0, %v526_v33  ;;  %1324 = vst.msk [vmem:[#allocation3 + $0x400] sm:$0xff] %vm375_vm0, %v526_v33  ;;  %v591_v33 = vld [vmem:[#allocation2 + $0x169] sm:$0xff] }
  0xa5   : > { %924 = vrot.lane.b32.xlu0 %v839_v43, %s10827_s25  ;;  %667 = vrot.lane.b32.xlu1 %v582_v49, %s10827_s25  ;;  %v588_v43 = vld [vmem:[#allocation2 + $0x141] sm:$0xff]  ;;  %v11489_v49 = vld [vmem:[#allocation2 + $0x16a] sm:$0xff] }
  0xa6   : > { %816 = vst.msk [vmem:[#allocation3 + $0x4b8] sm:$0xff] %vm375_vm0, %v11489_v49 }
  0xa9   : > { %926 = vrot.lane.b32.xlu0 %v840_v13, %s10827_s25  ;;  %669 = vrot.lane.b32.xlu1 %v583_v52, %s10827_s25  ;;  %v1811_v13 = vld [vmem:[%s15108_s1 + $0x200] sm:$0xff]  ;;  %v1812_v52 = vld [vmem:[%s15108_s1 + $0x208] sm:$0xff] }
  0xad   : > { %928 = vrot.lane.b32.xlu0 %v841_v61, %s10827_s25  ;;  %671 = vrot.lane.b32.xlu1 %v584_v4, %s10827_s25  ;;  %v589_v61 = vld [vmem:[#allocation2 + $0x151] sm:$0xff]  ;;  %v9776_v4 = vpack.c.bf16 %v1812_v52, %v1811_v13  ;;  %v1816_v13 = vld [vmem:[%s15108_s1 + $0x228] sm:$0xff]  ;;  %v848_v52 = vld [vmem:[#allocation2 + $0x180] sm:$0xff] }
  0xaf   : > { %9777 = vmatprep.subr.bf16.mxu1 %v9776_v4 }
  0xb0   : > { %9779 = vmatpush3.bf16.msra.mxu1 %v9776_v4  ;;  %v1523_v4 = vld [vmem:[#allocation2 + $0x32] sm:$0xff] }
  0xb1   : > { %930 = vrot.lane.b32.xlu0 %v842_v11, %s10827_s25  ;;  %673 = vrot.lane.b32.xlu1 %v585_v12, %s10827_s25  ;;  %v528_v11 = vld [vmem:[#allocation2 + $0x170] sm:$0xff]  ;;  %1555 = vst.msk [vmem:[#allocation3 + $0x20] sm:$0xff] %vm375_vm0, %v1523_v4 }
  0xb2   : > { %v1813_v12 = vld [vmem:[%s15108_s1 + $0x210] sm:$0xff]  ;;  %560 = vst.msk [vmem:[#allocation3 + $0x4d8] sm:$0xff] %vm375_vm0, %v528_v11  ;;  %1326 = vst.msk [vmem:[#allocation3 + $0x450] sm:$0xff] %vm375_vm0, %v528_v11 }
  0xb3   : > { %v9780_v22 = vpack.c.bf16 %v1814_v16, %v1813_v12  ;;  %v1524_v16 = vld [vmem:[#allocation2 + $0x3a] sm:$0xff] }
  0xb4   : > { %1556 = vst.msk [vmem:[#allocation3 + $0x48] sm:$0xff] %vm375_vm0, %v1524_v16  ;;  %v1781_v16 = vld [vmem:[%s15108_s1 + $0x110] sm:$0xff] }
  0xb5   : > { %932 = vrot.lane.b32.xlu0 %v843_v18, %s10827_s25  ;;  %675 = vrot.lane.b32.xlu1 %v586_v41, %s10827_s25  ;;  %v847_v18 = vld [vmem:[#allocation2 + $0x170] sm:$0xff]  ;;  %v590_v41 = vld [vmem:[#allocation2 + $0x159] sm:$0xff] }
  0xb6   : > { %9781 = vmatprep.subr.bf16.mxu1 %v9780_v22 }
  0xb7   : > { %9783 = vmatpush3.bf16.msra.mxu1 %v9780_v22  ;;  %v1011_v22 = vld [vmem:[#allocation2 + $0x21] sm:$0xff] }
  0xb8   : > { %1043 = vst.msk [vmem:[#allocation3 + $0x38] sm:$0xff] %vm375_vm0, %v1011_v22 }
  0xb9   : > { %934 = vrot.lane.b32.xlu0 %v844_v42, %s10827_s25  ;;  %677 = vrot.lane.b32.xlu1 %v587_v26, %s10827_s25 }
  0xbd   : > { %936 = vrot.lane.b32.xlu0 %v845_v6, %s10827_s25  ;;  %679 = vrot.lane.b32.xlu1 %v588_v43, %s10827_s25  ;;  %v1267_v6 = vld [vmem:[#allocation2 + $0x30] sm:$0xff]  ;;  %v1010_v43 = vld [vmem:[#allocation2 + $0x19] sm:$0xff] }
  0xbe   : > { %1299 = vst.msk [vmem:[#allocation3 + $0x18] sm:$0xff] %vm375_vm0, %v1267_v6  ;;  %1042 = vst.msk [vmem:[#allocation3 + $0x10] sm:$0xff] %vm375_vm0, %v1010_v43  ;;  %v849_v6 = vld [vmem:[#allocation2 + $0x188] sm:$0xff] }
  0xbf   : > { %v1780_v43 = vld [vmem:[%s15108_s1 + $0x108] sm:$0xff] }
  0xc1   : > { %938 = vrot.lane.b32.xlu0 %v846_v60, %s10827_s25  ;;  %681 = vrot.lane.b32.xlu1 %v589_v61, %s10827_s25  ;;  %v9784_v60 = vpack.c.bf16 %v1816_v13, %v1815_v36  ;;  %v11531_v61 = vld [vmem:[#allocation2 + $0x189] sm:$0xff]  ;;  %v592_v36 = vld [vmem:[#allocation2 + $0x171] sm:$0xff] }
  0xc2   : > { %1073 = vst.msk [vmem:[#allocation3 + $0x4e8] sm:$0xff] %vm375_vm0, %v11531_v61 }
  0xc3   : > { %v883_v42 = vpop.permute.xlu0 %882  ;;  %v885_v26 = vpop.permute.xlu1 %884  ;;  %9785 = vmatprep.subr.bf16.mxu1 %v9784_v60 }
  0xc4   : > { %978 = vst.msk [vmem:[#allocation3 + $0x8] sm:$0xff] %vm721_vm3, %v883_v42  ;;  %979 = vst.msk [vmem:[#allocation3 + $0x30] sm:$0xff] %vm721_vm3, %v885_v26  ;;  %v1817_v42 = vld [vmem:[%s15108_s1 + $0x230] sm:$0xff]  ;;  %v1818_v26 = vld [vmem:[%s15108_s1 + $0x238] sm:$0xff]  ;;  %9787 = vmatpush3.bf16.msra.mxu1 %v9784_v60 }
  0xc5   : > { %940 = vrot.lane.b32.xlu0 %v847_v18, %s10827_s25  ;;  %683 = vrot.lane.b32.xlu1 %v590_v41, %s10827_s25  ;;  %v1779_v18 = vld [vmem:[%s15108_s1 + $0x100] sm:$0xff]  ;;  %v1268_v41 = vld [vmem:[#allocation2 + $0x38] sm:$0xff] }
  0xc6   : > { %1300 = vst.msk [vmem:[#allocation3 + $0x40] sm:$0xff] %vm375_vm0, %v1268_v41  ;;  %v9729_v60 = vpack.c.bf16 %v1780_v43, %v1779_v18  ;;  %v1012_v41 = vld [vmem:[#allocation2 + $0x31] sm:$0xff] }
  0xc7   : > { %v626_v11 = vpop.permute.xlu0 %625  ;;  %v628_v12 = vpop.permute.xlu1 %627  ;;  %1044 = vst.msk [vmem:[#allocation3 + $0x60] sm:$0xff] %vm375_vm0, %v1012_v41  ;;  %v1525_v18 = vld [vmem:[#allocation2 + $0x4a] sm:$0xff]  ;;  %v1013_v41 = vld [vmem:[#allocation2 + $0x39] sm:$0xff] }
  0xc8   : > { %722 = vst.msk [vmem:[#allocation3] sm:$0xff] %vm721_vm3, %v626_v11  ;;  %723 = vst.msk [vmem:[#allocation3 + $0x28] sm:$0xff] %vm721_vm3, %v628_v12  ;;  %v11559_v11 = vld [vmem:[#allocation2 + $0x182] sm:$0xff] }
  0xc9   : > { %942 = vrot.lane.b32.xlu0 %v848_v52, %s10827_s25  ;;  %685 = vrot.lane.b32.xlu1 %v591_v33, %s10827_s25  ;;  %v9788_v33 = vpack.c.bf16 %v1818_v26, %v1817_v42  ;;  %v1269_v12 = vld [vmem:[#allocation2 + $0x48] sm:$0xff]  ;;  %1583 = vst.msk [vmem:[#allocation3 + $0x480] sm:$0xff] %vm375_vm0, %v11559_v11  ;;  %v1591_v42 = vld [vmem:[#allocation3 + $0x20] sm:$0xff]  ;;  %1557 = vst.msk [vmem:[#allocation3 + $0x70] sm:$0xff] %vm375_vm0, %v1525_v18 }
  0xca   : > { %1301 = vst.msk [vmem:[#allocation3 + $0x68] sm:$0xff] %vm375_vm0, %v1269_v12  ;;  %9504 = vmatprep.mubr.msk.f32.mxu1 %vm375_vm0, %v1591_v42  ;;  %1045 = vst.msk [vmem:[#allocation3 + $0x88] sm:$0xff] %vm375_vm0, %v1013_v41  ;;  %v1272_v41 = vld [vmem:[#allocation2 + $0x68] sm:$0xff] }
  0xcb   : > { %v1588_v13 = vld [vmem:[#allocation3 + $0x8] sm:$0xff]  ;;  %v887_v52 = vpop.permute.xlu0 %886  ;;  %v630_v4 = vpop.permute.xlu1 %629  ;;  %9789 = vmatprep.subr.bf16.mxu1 %v9788_v33  ;;  %v1593_v22 = vld [vmem:[#allocation3 + $0x30] sm:$0xff]  ;;  %1304 = vst.msk [vmem:[#allocation3 + $0xe0] sm:$0xff] %vm375_vm0, %v1272_v41 }
  0xcc   : > { %1986 = vmatprep.mubr.f32.mxu0 %v1588_v13  ;;  %2949 = vst.msk [vmem:[#allocation3 + $0x8] sm:$0xff] %vm375_vm0, %v11121_v53  ;;  %v1782_v53 = vld [vmem:[%s15108_s1 + $0x118] sm:$0xff]  ;;  %9791 = vmatpush3.bf16.msra.mxu1 %v9788_v33  ;;  %v11578_v33 = vld [vmem:[#allocation2 + $0x18a] sm:$0xff] }
  0xcd   : > { %980 = vst.msk [vmem:[#allocation3 + $0x58] sm:$0xff] %vm721_vm3, %v887_v52  ;;  %724 = vst.msk [vmem:[#allocation3 + $0x50] sm:$0xff] %vm721_vm3, %v630_v4  ;;  %944 = vrot.lane.b32.xlu0 %v849_v6, %s10827_s25  ;;  %687 = vrot.lane.b32.xlu1 %v592_v36, %s10827_s25  ;;  %v1596_v36 = vld [vmem:[#allocation3 + $0x48] sm:$0xff]  ;;  %v1270_v13 = vld [vmem:[#allocation2 + $0x50] sm:$0xff]  ;;  %v9732_v12 = vpack.c.bf16 %v1782_v53, %v1781_v16 }
  0xce   : > { %9792 = vmatprep.subr.bf16.mxu1 %v15120_v1  ;;  %v1526_v52 = vld [vmem:[#allocation2 + $0x52] sm:$0xff]  ;;  %1302 = vst.msk [vmem:[#allocation3 + $0x90] sm:$0xff] %vm375_vm0, %v1270_v13  ;;  %1584 = vst.msk [vmem:[#allocation3 + $0x4a8] sm:$0xff] %vm375_vm0, %v11578_v33  ;;  %v1784_v16 = vld [vmem:[%s15108_s1 + $0x128] sm:$0xff] }
  0xcf   : > { %v1587_v26 = vld [vmem:[#allocation3] sm:$0xff]  ;;  %v889_v6 = vpop.permute.xlu0 %888  ;;  %v632_v43 = vpop.permute.xlu1 %631  ;;  %v1592_v4 = vld [vmem:[#allocation3 + $0x28] sm:$0xff]  ;;  %1558 = vst.msk [vmem:[#allocation3 + $0x98] sm:$0xff] %vm375_vm0, %v1526_v52  ;;  %9505 = vmatmul.mubr.msk.f32.vlgmr.msra.gmra.mrb[0].mxu1 %vm375_vm0, %v1596_v36  ;;  %v1527_v13 = vld [vmem:[#allocation2 + $0x62] sm:$0xff] }
  0xd0   : > { %1987 = vmatmul.mubr.f32.vlgmr.msra.gmra.mrb[0].mxu0 %v1587_v26  ;;  %981 = vst.msk [vmem:[#allocation3 + $0x80] sm:$0xff] %vm721_vm3, %v889_v6  ;;  %725 = vst.msk [vmem:[#allocation3 + $0x78] sm:$0xff] %vm721_vm3, %v632_v43  ;;  %v1785_v26 = vld [vmem:[%s15108_s1 + $0x130] sm:$0xff]  ;;  %v1786_v43 = vld [vmem:[%s15108_s1 + $0x138] sm:$0xff] }
  0xd1   : > { %9730 = vmatpush1.bf16.msra.mxu0 %v9729_v60  ;;  %1991 = vmatprep.mubr.f32.mxu0 %v1593_v22  ;;  %v1783_v60 = vld [vmem:[%s15108_s1 + $0x120] sm:$0xff]  ;;  %v1014_v6 = vld [vmem:[#allocation2 + $0x49] sm:$0xff]  ;;  %1559 = vst.msk [vmem:[#allocation3 + $0xc0] sm:$0xff] %vm375_vm0, %v1527_v13 }
  0xd2   : > { %1395 = vrot.lane.b32.xlu0 %v11123_v54, %s10827_s25  ;;  %1138 = vrot.lane.b32.xlu1 %v11227_v30, %s10827_s25  ;;  %v1271_v54 = vld [vmem:[#allocation2 + $0x60] sm:$0xff]  ;;  %v9735_v18 = vpack.c.bf16 %v1784_v16, %v1783_v60  ;;  %1046 = vst.msk [vmem:[#allocation3 + $0xb0] sm:$0xff] %vm375_vm0, %v1014_v6  ;;  %v9738_v16 = vpack.c.bf16 %v1786_v43, %v1785_v26  ;;  %v1789_v6 = vld [vmem:[%s15108_s1 + $0x150] sm:$0xff] }
  0xd3   : > { %v891_v53 = vpop.permute.xlu0 %890  ;;  %v634_v22 = vpop.permute.xlu1 %633  ;;  %9731 = vmatprep.subr.bf16.mxu0 %v15120_v1  ;;  %1303 = vst.msk [vmem:[#allocation3 + $0xb8] sm:$0xff] %vm375_vm0, %v1271_v54  ;;  %v1601_v36 = vld [vmem:[#allocation3 + $0x70] sm:$0xff] }
  0xd4   : > { %v1598_v42 = vld [vmem:[#allocation3 + $0x58] sm:$0xff]  ;;  %1992 = vmatmul.mubr.f32.gmra.mrb[2].mxu0 %v1592_v4  ;;  %982 = vst.msk [vmem:[#allocation3 + $0xa8] sm:$0xff] %vm721_vm3, %v891_v53  ;;  %726 = vst.msk [vmem:[#allocation3 + $0xa0] sm:$0xff] %vm721_vm3, %v634_v22  ;;  %v1597_v30 = vld [vmem:[#allocation3 + $0x50] sm:$0xff]  ;;  %9507 = vmatprep.mubr.msk.f32.mxu1 %vm375_vm0, %v1601_v36 }
  0xd5   : > { %1996 = vmatprep.mubr.f32.mxu0 %v1598_v42  ;;  %9733 = vmatpush1.bf16.msra.mxu0 %v9732_v12  ;;  %v1015_v53 = vld [vmem:[#allocation2 + $0x51] sm:$0xff]  ;;  %v1787_v22 = vld [vmem:[%s15108_s1 + $0x140] sm:$0xff]  ;;  %v1788_v42 = vld [vmem:[%s15108_s1 + $0x148] sm:$0xff] }
  0xd6   : > { %1397 = vrot.lane.b32.xlu0 %v11144_v63, %s10827_s25  ;;  %1140 = vrot.lane.b32.xlu1 %v11240_v34, %s10827_s25  ;;  %v1528_v63 = vld [vmem:[#allocation2 + $0x6a] sm:$0xff]  ;;  %1047 = vst.msk [vmem:[#allocation3 + $0xd8] sm:$0xff] %vm375_vm0, %v1015_v53  ;;  %v9741_v26 = vpack.c.bf16 %v1788_v42, %v1787_v22  ;;  %v1016_v43 = vld [vmem:[#allocation2 + $0x61] sm:$0xff]  ;;  %v1790_v36 = vld [vmem:[%s15108_s1 + $0x158] sm:$0xff] }
  0xd7   : > { %v893_v52 = vpop.permute.xlu0 %892  ;;  %v636_v4 = vpop.permute.xlu1 %635  ;;  %v1603_v12 = vld [vmem:[#allocation3 + $0x80] sm:$0xff]  ;;  %9734 = vmatprep.subr.bf16.mxu0 %v15120_v1  ;;  %v1606_v34 = vld [vmem:[#allocation3 + $0x98] sm:$0xff]  ;;  %1560 = vst.msk [vmem:[#allocation3 + $0xe8] sm:$0xff] %vm375_vm0, %v1528_v63  ;;  %1048 = vst.msk [vmem:[#allocation3 + $0x100] sm:$0xff] %vm375_vm0, %v1016_v43 }
  0xd8   : > { %1997 = vmatmul.mubr.f32.gmra.mrb[4].mxu0 %v1597_v30  ;;  %983 = vst.msk [vmem:[#allocation3 + $0xd0] sm:$0xff] %vm721_vm3, %v893_v52  ;;  %727 = vst.msk [vmem:[#allocation3 + $0xc8] sm:$0xff] %vm721_vm3, %v636_v4  ;;  %v1602_v60 = vld [vmem:[#allocation3 + $0x78] sm:$0xff]  ;;  %9508 = vmatmul.mubr.msk.f32.gmra.mrb[2].mxu1 %vm375_vm0, %v1606_v34  ;;  %v1611_v13 = vld [vmem:[#allocation3 + $0xc0] sm:$0xff] }
  0xd9   : > { %2001 = vmatprep.mubr.f32.mxu0 %v1603_v12  ;;  %9736 = vmatpush1.bf16.msra.mxu0 %v9735_v18  ;;  %v1529_v52 = vld [vmem:[#allocation2 + $0x7a] sm:$0xff]  ;;  %v1792_v22 = vld [vmem:[%s15108_s1 + $0x168] sm:$0xff]  ;;  %v1531_v43 = vld [vmem:[#allocation2 + $0x92] sm:$0xff] }
  0xda   : > { %1399 = vrot.lane.b32.xlu0 %v11171_v9, %s10827_s25  ;;  %1142 = vrot.lane.b32.xlu1 %v11242_v37, %s10827_s25  ;;  %v1273_v9 = vld [vmem:[#allocation2 + $0x78] sm:$0xff]  ;;  %1561 = vst.msk [vmem:[#allocation3 + $0x110] sm:$0xff] %vm375_vm0, %v1529_v52  ;;  %v1791_v53 = vld [vmem:[%s15108_s1 + $0x160] sm:$0xff]  ;;  %1563 = vst.msk [vmem:[#allocation3 + $0x160] sm:$0xff] %vm375_vm0, %v1531_v43 }
  0xdb   : > { %v895_v54 = vpop.permute.xlu0 %894  ;;  %v638_v30 = vpop.permute.xlu1 %637  ;;  %v1608_v18 = vld [vmem:[#allocation3 + $0xa8] sm:$0xff]  ;;  %9737 = vmatprep.subr.bf16.mxu0 %v15120_v1  ;;  %v1607_v37 = vld [vmem:[#allocation3 + $0xa0] sm:$0xff]  ;;  %1305 = vst.msk [vmem:[#allocation3 + $0x108] sm:$0xff] %vm375_vm0, %v1273_v9  ;;  %9510 = vmatprep.mubr.msk.f32.mxu1 %vm375_vm0, %v1611_v13 }
  0xdc   : > { %2002 = vmatmul.mubr.f32.gmra.mrb[6].mxu0 %v1602_v60  ;;  %984 = vst.msk [vmem:[#allocation3 + $0xf8] sm:$0xff] %vm721_vm3, %v895_v54  ;;  %728 = vst.msk [vmem:[#allocation3 + $0xf0] sm:$0xff] %vm721_vm3, %v638_v30  ;;  %v9744_v60 = vpack.c.bf16 %v1790_v36, %v1789_v6  ;;  %v1793_v9 = vld [vmem:[%s15108_s1 + $0x170] sm:$0xff]  ;;  %v1021_v43 = vld [vmem:[#allocation2 + $0x99] sm:$0xff] }
  0xdd   : > { %2006 = vmatprep.mubr.f32.mxu0 %v1608_v18  ;;  %9739 = vmatpush1.bf16.msra.mxu0 %v9738_v16  ;;  %v1017_v16 = vld [vmem:[#allocation2 + $0x69] sm:$0xff]  ;;  %v9747_v18 = vpack.c.bf16 %v1792_v22, %v1791_v53  ;;  %1053 = vst.msk [vmem:[#allocation3 + $0x1c8] sm:$0xff] %vm375_vm0, %v1021_v43 }
  0xde   : > { %1401 = vrot.lane.b32.xlu0 %v11196_v17, %s10827_s25  ;;  %1144 = vrot.lane.b32.xlu1 %v11255_v45, %s10827_s25  ;;  %v1616_v34 = vld [vmem:[#allocation3 + $0xe8] sm:$0xff]  ;;  %v1274_v17 = vld [vmem:[#allocation2 + $0x80] sm:$0xff]  ;;  %1049 = vst.msk [vmem:[#allocation3 + $0x128] sm:$0xff] %vm375_vm0, %v1017_v16  ;;  %v1797_v22 = vld [vmem:[%s15108_s1 + $0x190] sm:$0xff] }
  0xdf   : > { %v897_v4 = vpop.permute.xlu0 %896  ;;  %v640_v12 = vpop.permute.xlu1 %639  ;;  %v1613_v63 = vld [vmem:[#allocation3 + $0xd0] sm:$0xff]  ;;  %9740 = vmatprep.subr.bf16.mxu0 %v15120_v1  ;;  %9511 = vmatmul.mubr.msk.f32.gmra.mrb[4].mxu1 %vm375_vm0, %v1616_v34  ;;  %v1612_v41 = vld [vmem:[#allocation3 + $0xc8] sm:$0xff]  ;;  %1306 = vst.msk [vmem:[#allocation3 + $0x130] sm:$0xff] %vm375_vm0, %v1274_v17 }
  0xe0   : > { %2007 = vmatmul.mubr.f32.gmra.mrb[8].mxu0 %v1607_v37  ;;  %985 = vst.msk [vmem:[#allocation3 + $0x120] sm:$0xff] %vm721_vm3, %v897_v4  ;;  %729 = vst.msk [vmem:[#allocation3 + $0x118] sm:$0xff] %vm721_vm3, %v640_v12  ;;  %v1530_v45 = vld [vmem:[#allocation2 + $0x82] sm:$0xff]  ;;  %v1018_v37 = vld [vmem:[#allocation2 + $0x79] sm:$0xff] }
  0xe1   : > { %2011 = vmatprep.mubr.f32.mxu0 %v1613_v63  ;;  %9742 = vmatpush1.bf16.msra.mxu0 %v9741_v26  ;;  %1562 = vst.msk [vmem:[#allocation3 + $0x138] sm:$0xff] %vm375_vm0, %v1530_v45  ;;  %v1794_v26 = vld [vmem:[%s15108_s1 + $0x178] sm:$0xff]  ;;  %v1621_v6 = vld [vmem:[#allocation3 + $0x110] sm:$0xff]  ;;  %1050 = vst.msk [vmem:[#allocation3 + $0x150] sm:$0xff] %vm375_vm0, %v1018_v37 }
  0xe2   : > { %1403 = vrot.lane.b32.xlu0 %v11213_v24, %s10827_s25  ;;  %1146 = vrot.lane.b32.xlu1 %v11257_v47, %s10827_s25  ;;  %v1275_v24 = vld [vmem:[#allocation2 + $0x90] sm:$0xff]  ;;  %v1276_v4 = vld [vmem:[#allocation2 + $0x98] sm:$0xff]  ;;  %v9750_v63 = vpack.c.bf16 %v1794_v26, %v1793_v9  ;;  %v1019_v34 = vld [vmem:[#allocation2 + $0x81] sm:$0xff] }
  0xe3   : > { %v899_v42 = vpop.permute.xlu0 %898  ;;  %v642_v54 = vpop.permute.xlu1 %641  ;;  %v1618_v30 = vld [vmem:[#allocation3 + $0xf8] sm:$0xff]  ;;  %9743 = vmatprep.subr.bf16.mxu0 %v15120_v1  ;;  %v1617_v47 = vld [vmem:[#allocation3 + $0xf0] sm:$0xff]  ;;  %1307 = vst.msk [vmem:[#allocation3 + $0x158] sm:$0xff] %vm375_vm0, %v1275_v24  ;;  %9513 = vmatprep.mubr.msk.f32.mxu1 %vm375_vm0, %v1621_v6  ;;  %1308 = vst.msk [vmem:[#allocation3 + $0x180] sm:$0xff] %vm375_vm0, %v1276_v4 }
  0xe4   : > { %2012 = vmatmul.mubr.f32.gmra.mrb[10].mxu0 %v1612_v41  ;;  %986 = vst.msk [vmem:[#allocation3 + $0x148] sm:$0xff] %vm721_vm3, %v899_v42  ;;  %730 = vst.msk [vmem:[#allocation3 + $0x140] sm:$0xff] %vm721_vm3, %v642_v54  ;;  %v1795_v17 = vld [vmem:[%s15108_s1 + $0x180] sm:$0xff]  ;;  %v1796_v45 = vld [vmem:[%s15108_s1 + $0x188] sm:$0xff] }
  0xe5   : > { %2016 = vmatprep.mubr.f32.mxu0 %v1618_v30  ;;  %9745 = vmatpush1.bf16.msra.mxu0 %v9744_v60  ;;  %1051 = vst.msk [vmem:[#allocation3 + $0x178] sm:$0xff] %vm375_vm0, %v1019_v34  ;;  %v9753_v53 = vpack.c.bf16 %v1796_v45, %v1795_v17  ;;  %v1020_v42 = vld [vmem:[#allocation2 + $0x91] sm:$0xff]  ;;  %v1535_v45 = vld [vmem:[#allocation2 + $0xc2] sm:$0xff] }
  0xe6   : > { %1405 = vrot.lane.b32.xlu0 %v11238_v32, %s10827_s25  ;;  %1148 = vrot.lane.b32.xlu1 %v11269_v50, %s10827_s25  ;;  %v1532_v32 = vld [vmem:[#allocation2 + $0x9a] sm:$0xff]  ;;  %v1631_v30 = vld [vmem:[#allocation3 + $0x160] sm:$0xff]  ;;  %1052 = vst.msk [vmem:[#allocation3 + $0x1a0] sm:$0xff] %vm375_vm0, %v1020_v42  ;;  %1567 = vst.msk [vmem:[#allocation3 + $0x200] sm:$0xff] %vm375_vm0, %v1535_v45 }
  0xe7   : > { %v901_v36 = vpop.permute.xlu0 %900  ;;  %v644_v13 = vpop.permute.xlu1 %643  ;;  %v1623_v52 = vld [vmem:[#allocation3 + $0x120] sm:$0xff]  ;;  %9746 = vmatprep.subr.bf16.mxu0 %v15120_v1  ;;  %1564 = vst.msk [vmem:[#allocation3 + $0x188] sm:$0xff] %vm375_vm0, %v1532_v32  ;;  %v1622_v12 = vld [vmem:[#allocation3 + $0x118] sm:$0xff]  ;;  %v1798_v54 = vld [vmem:[%s15108_s1 + $0x198] sm:$0xff] }
  0xe8   : > { %2017 = vmatmul.mubr.f32.gmra.mrb[12].mxu0 %v1617_v47  ;;  %987 = vst.msk [vmem:[#allocation3 + $0x170] sm:$0xff] %vm721_vm3, %v901_v36  ;;  %731 = vst.msk [vmem:[#allocation3 + $0x168] sm:$0xff] %vm721_vm3, %v644_v13  ;;  %v1626_v50 = vld [vmem:[#allocation3 + $0x138] sm:$0xff]  ;;  %v9756_v6 = vpack.c.bf16 %v1798_v54, %v1797_v22  ;;  %v1799_v36 = vld [vmem:[%s15108_s1 + $0x1a0] sm:$0xff] }
  0xe9   : > { %2021 = vmatprep.mubr.f32.mxu0 %v1623_v52  ;;  %9748 = vmatpush1.bf16.msra.mxu0 %v9747_v18  ;;  %v1533_v24 = vld [vmem:[#allocation2 + $0xaa] sm:$0xff]  ;;  %v1802_v34 = vld [vmem:[%s15108_s1 + $0x1b8] sm:$0xff]  ;;  %v1803_v42 = vld [vmem:[%s15108_s1 + $0x1c0] sm:$0xff] }
  0xea   : > { %1407 = vrot.lane.b32.xlu0 %v11267_v48, %s10827_s25  ;;  %1150 = vrot.lane.b32.xlu1 %v11271_v51, %s10827_s25  ;;  %v1277_v48 = vld [vmem:[#allocation2 + $0xa8] sm:$0xff]  ;;  %1565 = vst.msk [vmem:[#allocation3 + $0x1b0] sm:$0xff] %vm375_vm0, %v1533_v24  ;;  %v1023_v22 = vld [vmem:[#allocation2 + $0xb1] sm:$0xff]  ;;  %v1026_v45 = vld [vmem:[#allocation2 + $0xd9] sm:$0xff] }
  0xeb   : > { %v903_v41 = vpop.permute.xlu0 %902  ;;  %v646_v60 = vpop.permute.xlu1 %645  ;;  %v1628_v16 = vld [vmem:[#allocation3 + $0x148] sm:$0xff]  ;;  %9749 = vmatprep.subr.bf16.mxu0 %v15120_v1  ;;  %9514 = vmatmul.mubr.msk.f32.gmra.mrb[6].mxu1 %vm375_vm0, %v1626_v50  ;;  %v1627_v51 = vld [vmem:[#allocation3 + $0x140] sm:$0xff]  ;;  %1309 = vst.msk [vmem:[#allocation3 + $0x1a8] sm:$0xff] %vm375_vm0, %v1277_v48  ;;  %v1800_v13 = vld [vmem:[%s15108_s1 + $0x1a8] sm:$0xff] }
  0xec   : > { %2022 = vmatmul.mubr.f32.gmra.mrb[14].mxu0 %v1622_v12  ;;  %988 = vst.msk [vmem:[#allocation3 + $0x198] sm:$0xff] %vm721_vm3, %v903_v41  ;;  %732 = vst.msk [vmem:[#allocation3 + $0x190] sm:$0xff] %vm721_vm3, %v646_v60  ;;  %9516 = vmatprep.mubr.msk.f32.mxu1 %vm375_vm0, %v1631_v30  ;;  %v9759_v4 = vpack.c.bf16 %v1800_v13, %v1799_v36  ;;  %v1801_v12 = vld [vmem:[%s15108_s1 + $0x1b0] sm:$0xff]  ;;  %v1280_v48 = vld [vmem:[#allocation2 + $0xc8] sm:$0xff] }
  0xed   : > { %2026 = vmatprep.mubr.f32.mxu0 %v1628_v16  ;;  %9751 = vmatpush1.bf16.msra.mxu0 %v9750_v63  ;;  %v1022_v63 = vld [vmem:[#allocation2 + $0xa9] sm:$0xff]  ;;  %1312 = vst.msk [vmem:[#allocation3 + $0x220] sm:$0xff] %vm375_vm0, %v1280_v48  ;;  %1055 = vst.msk [vmem:[#allocation3 + $0x218] sm:$0xff] %vm375_vm0, %v1023_v22 }
  0xee   : > { %1409 = vrot.lane.b32.xlu0 %v11292_v57, %s10827_s25  ;;  %1152 = vrot.lane.b32.xlu1 %v11288_v55, %s10827_s25  ;;  %v1636_v37 = vld [vmem:[#allocation3 + $0x188] sm:$0xff]  ;;  %v1278_v55 = vld [vmem:[#allocation2 + $0xb0] sm:$0xff]  ;;  %1054 = vst.msk [vmem:[#allocation3 + $0x1f0] sm:$0xff] %vm375_vm0, %v1022_v63  ;;  %v1804_v54 = vld [vmem:[%s15108_s1 + $0x1c8] sm:$0xff] }
  0xef   : > { %v905_v47 = vpop.permute.xlu0 %904  ;;  %v648_v18 = vpop.permute.xlu1 %647  ;;  %v1633_v9 = vld [vmem:[#allocation3 + $0x170] sm:$0xff]  ;;  %9752 = vmatprep.subr.bf16.mxu0 %v15120_v1  ;;  %9517 = vmatmul.mubr.msk.f32.gmra.mrb[8].mxu1 %vm375_vm0, %v1636_v37  ;;  %v1534_v57 = vld [vmem:[#allocation2 + $0xb2] sm:$0xff]  ;;  %1310 = vst.msk [vmem:[#allocation3 + $0x1d0] sm:$0xff] %vm375_vm0, %v1278_v55  ;;  %1058 = vst.msk [vmem:[#allocation3 + $0x290] sm:$0xff] %vm375_vm0, %v1026_v45 }
  0xf0   : > { %2027 = vmatmul.mubr.f32.gmra.mrb[16].mxu0 %v1627_v51  ;;  %989 = vst.msk [vmem:[#allocation3 + $0x1c0] sm:$0xff] %vm721_vm3, %v905_v47  ;;  %733 = vst.msk [vmem:[#allocation3 + $0x1b8] sm:$0xff] %vm721_vm3, %v648_v18  ;;  %v1632_v26 = vld [vmem:[#allocation3 + $0x168] sm:$0xff]  ;;  %v9765_v18 = vpack.c.bf16 %v1804_v54, %v1803_v42  ;;  %v1024_v37 = vld [vmem:[#allocation2 + $0xc1] sm:$0xff] }
  0xf1   : > { %2031 = vmatprep.mubr.f32.mxu0 %v1633_v9  ;;  %9754 = vmatpush1.bf16.msra.mxu0 %v9753_v53  ;;  %1566 = vst.msk [vmem:[#allocation3 + $0x1d8] sm:$0xff] %vm375_vm0, %v1534_v57  ;;  %v1641_v17 = vld [vmem:[#allocation3 + $0x1b0] sm:$0xff]  ;;  %v9762_v53 = vpack.c.bf16 %v1802_v34, %v1801_v12  ;;  %v1805_v9 = vld [vmem:[%s15108_s1 + $0x1d0] sm:$0xff]  ;;  %v1806_v55 = vld [vmem:[%s15108_s1 + $0x1d8] sm:$0xff] }
  0xf2   : > { %1411 = vrot.lane.b32.xlu0 %v11325_v2, %s10827_s25  ;;  %1154 = vrot.lane.b32.xlu1 %v11290_v56, %s10827_s25  ;;  %v1279_v56 = vld [vmem:[#allocation2 + $0xc0] sm:$0xff]  ;;  %v1651_v57 = vld [vmem:[#allocation3 + $0x200] sm:$0xff]  ;;  %1056 = vst.msk [vmem:[#allocation3 + $0x240] sm:$0xff] %vm375_vm0, %v1024_v37 }
  0xf3   : > { %v907_v52 = vpop.permute.xlu0 %906  ;;  %v650_v32 = vpop.permute.xlu1 %649  ;;  %v1638_v50 = vld [vmem:[#allocation3 + $0x198] sm:$0xff]  ;;  %9755 = vmatprep.subr.bf16.mxu0 %v15120_v1  ;;  %v1637_v2 = vld [vmem:[#allocation3 + $0x190] sm:$0xff]  ;;  %1311 = vst.msk [vmem:[#allocation3 + $0x1f8] sm:$0xff] %vm375_vm0, %v1279_v56  ;;  %9519 = vmatprep.mubr.msk.f32.mxu1 %vm375_vm0, %v1641_v17  ;;  %v1809_v17 = vld [vmem:[%s15108_s1 + $0x1f0] sm:$0xff] }
  0xf4   : > { %2032 = vmatmul.mubr.f32.gmra.mrb[18].mxu0 %v1632_v26  ;;  %990 = vst.msk [vmem:[#allocation3 + $0x1e8] sm:$0xff] %vm721_vm3, %v907_v52  ;;  %734 = vst.msk [vmem:[#allocation3 + $0x1e0] sm:$0xff] %vm721_vm3, %v650_v32  ;;  %v1537_v26 = vld [vmem:[#allocation2 + $0xda] sm:$0xff]  ;;  %v9768_v32 = vpack.c.bf16 %v1806_v55, %v1805_v9 }
  0xf5   : > { %2036 = vmatprep.mubr.f32.mxu0 %v1638_v50  ;;  %9757 = vmatpush1.bf16.msra.mxu0 %v9756_v6  ;;  %1569 = vst.msk [vmem:[#allocation3 + $0x250] sm:$0xff] %vm375_vm0, %v1537_v26  ;;  %v1025_v50 = vld [vmem:[#allocation2 + $0xc9] sm:$0xff]  ;;  %v1807_v56 = vld [vmem:[%s15108_s1 + $0x1e0] sm:$0xff] }
  0xf6   : > { %1413 = vrot.lane.b32.xlu0 %v11342_v8, %s10827_s25  ;;  %1156 = vrot.lane.b32.xlu1 %v11298_v59, %s10827_s25  ;;  %v1536_v8 = vld [vmem:[#allocation2 + $0xca] sm:$0xff]  ;;  %1057 = vst.msk [vmem:[#allocation3 + $0x268] sm:$0xff] %vm375_vm0, %v1025_v50  ;;  %v1027_v42 = vld [vmem:[#allocation2 + $0xe1] sm:$0xff] }
  0xf7   : > { %v909_v41 = vpop.permute.xlu0 %908  ;;  %v652_v60 = vpop.permute.xlu1 %651  ;;  %v1643_v16 = vld [vmem:[#allocation3 + $0x1c0] sm:$0xff]  ;;  %9758 = vmatprep.subr.bf16.mxu0 %v15120_v1  ;;  %1568 = vst.msk [vmem:[#allocation3 + $0x228] sm:$0xff] %vm375_vm0, %v1536_v8  ;;  %v1642_v51 = vld [vmem:[#allocation3 + $0x1b8] sm:$0xff]  ;;  %1059 = vst.msk [vmem:[#allocation3 + $0x2b8] sm:$0xff] %vm375_vm0, %v1027_v42 }
  0xf8   : > { %2037 = vmatmul.mubr.f32.gmra.mrb[20].mxu0 %v1637_v2  ;;  %991 = vst.msk [vmem:[#allocation3 + $0x210] sm:$0xff] %vm721_vm3, %v909_v41  ;;  %735 = vst.msk [vmem:[#allocation3 + $0x208] sm:$0xff] %vm721_vm3, %v652_v60  ;;  %v1646_v59 = vld [vmem:[#allocation3 + $0x1d8] sm:$0xff]  ;;  %v1810_v41 = vld [vmem:[%s15108_s1 + $0x1f8] sm:$0xff] }
  0xf9   : > { %2041 = vmatprep.mubr.f32.mxu0 %v1643_v16  ;;  %9760 = vmatpush1.bf16.msra.mxu0 %v9759_v4  ;;  %v1808_v2 = vld [vmem:[%s15108_s1 + $0x1e8] sm:$0xff]  ;;  %v1539_v16 = vld [vmem:[#allocation2 + $0xf2] sm:$0xff]  ;;  %v9774_v22 = vpack.c.bf16 %v1810_v41, %v1809_v17 }
  0xfa   : > { %1415 = vrot.lane.b32.xlu0 %v11359_v15, %s10827_s25  ;;  %1158 = vrot.lane.b32.xlu1 %v11300_v38, %s10827_s25  ;;  %v1281_v38 = vld [vmem:[#allocation2 + $0xd8] sm:$0xff]  ;;  %v9771_v34 = vpack.c.bf16 %v1808_v2, %v1807_v56  ;;  %1571 = vst.msk [vmem:[#allocation3 + $0x2a0] sm:$0xff] %vm375_vm0, %v1539_v16  ;;  %v1543_v50 = vld [vmem:[#allocation2 + $0x122] sm:$0xff] }
  0xfb   : > { %v911_v30 = vpop.permute.xlu0 %910  ;;  %v654_v24 = vpop.permute.xlu1 %653  ;;  %v1648_v47 = vld [vmem:[#allocation3 + $0x1e8] sm:$0xff]  ;;  %9761 = vmatprep.subr.bf16.mxu0 %v15120_v1  ;;  %9520 = vmatmul.mubr.msk.f32.gmra.mrb[10].mxu1 %vm375_vm0, %v1646_v59  ;;  %v1647_v15 = vld [vmem:[#allocation3 + $0x1e0] sm:$0xff]  ;;  %1313 = vst.msk [vmem:[#allocation3 + $0x248] sm:$0xff] %vm375_vm0, %v1281_v38  ;;  %v10770_v38 = vld [vmem:[#allocation2 + $0xe1] sm:$0xff] }
  0xfc   : > { %2042 = vmatmul.mubr.f32.gmra.mrb[22].mxu0 %v1642_v51  ;;  %992 = vst.msk [vmem:[#allocation3 + $0x238] sm:$0xff] %vm721_vm3, %v911_v30  ;;  %736 = vst.msk [vmem:[#allocation3 + $0x230] sm:$0xff] %vm721_vm3, %v654_v24  ;;  %9522 = vmatprep.mubr.msk.f32.mxu1 %vm375_vm0, %v1651_v57  ;;  %v1661_v60 = vld [vmem:[#allocation3 + $0x250] sm:$0xff]  ;;  %v1284_v51 = vld [vmem:[#allocation2 + $0xf8] sm:$0xff] }
  0xfd   : > { %2046 = vmatprep.mubr.f32.mxu0 %v1648_v47  ;;  %9763 = vmatpush1.bf16.msra.mxu0 %v9762_v53  ;;  %1316 = vst.msk [vmem:[#allocation3 + $0x2c0] sm:$0xff] %vm375_vm0, %v1284_v51  ;;  %v1285_v47 = vld [vmem:[#allocation2 + $0x108] sm:$0xff]  ;;  %1575 = vst.msk [vmem:[#allocation3 + $0x340] sm:$0xff] %vm375_vm0, %v1543_v50  ;;  %v10774_v16 = vld [vmem:[#allocation2 + $0x111] sm:$0xff] }
  0xfe   : > { %1417 = vrot.lane.b32.xlu0 %v11376_v20, %s10827_s25  ;;  %1160 = vrot.lane.b32.xlu1 %v11313_v62, %s10827_s25  ;;  %v1656_v13 = vld [vmem:[#allocation3 + $0x228] sm:$0xff]  ;;  %v1282_v62 = vld [vmem:[#allocation2 + $0xe0] sm:$0xff]  ;;  %1317 = vst.msk [vmem:[#allocation3 + $0x2e8] sm:$0xff] %vm375_vm0, %v1285_v47 }
  0xff   : > { %v913_v6 = vpop.permute.xlu0 %912  ;;  %v656_v43 = vpop.permute.xlu1 %655  ;;  %v1653_v36 = vld [vmem:[#allocation3 + $0x210] sm:$0xff]  ;;  %9764 = vmatprep.subr.bf16.mxu0 %v15120_v1  ;;  %9523 = vmatmul.mubr.msk.f32.gmra.mrb[12].mxu1 %vm375_vm0, %v1656_v13  ;;  %v1652_v52 = vld [vmem:[#allocation3 + $0x208] sm:$0xff]  ;;  %1314 = vst.msk [vmem:[#allocation3 + $0x270] sm:$0xff] %vm375_vm0, %v1282_v62 }
 0x100   : > { %2047 = vmatmul.mubr.f32.gmra.mrb[24].mxu0 %v1647_v15  ;;  %993 = vst.msk [vmem:[#allocation3 + $0x260] sm:$0xff] %vm721_vm3, %v913_v6  ;;  %737 = vst.msk [vmem:[#allocation3 + $0x258] sm:$0xff] %vm721_vm3, %v656_v43  ;;  %v1538_v20 = vld [vmem:[#allocation2 + $0xe2] sm:$0xff]  ;;  %9525 = vmatprep.mubr.msk.f32.mxu1 %vm375_vm0, %v1661_v60  ;;  %v1029_v6 = vld [vmem:[#allocation2 + $0xf9] sm:$0xff] }
 0x101   : > { %2051 = vmatprep.mubr.f32.mxu0 %v1653_v36  ;;  %9766 = vmatpush1.bf16.msra.mxu0 %v9765_v18  ;;  %1570 = vst.msk [vmem:[#allocation3 + $0x278] sm:$0xff] %vm375_vm0, %v1538_v20  ;;  %v1671_v15 = vld [vmem:[#allocation3 + $0x2a0] sm:$0xff]  ;;  %1061 = vst.msk [vmem:[#allocation3 + $0x308] sm:$0xff] %vm375_vm0, %v1029_v6  ;;  %v1032_v60 = vld [vmem:[#allocation2 + $0x121] sm:$0xff] }
 0x102   : > { %1419 = vrot.lane.b32.xlu0 %v11393_v25, %s10827_s25  ;;  %1162 = vrot.lane.b32.xlu1 %v11317_v0, %s10827_s25  ;;  %v1283_v0 = vld [vmem:[#allocation2 + $0xf0] sm:$0xff]  ;;  %1064 = vst.msk [vmem:[#allocation3 + $0x380] sm:$0xff] %vm375_vm0, %v1032_v60  ;;  %v1034_v47 = vld [vmem:[#allocation2 + $0x139] sm:$0xff]  ;;  %v1726_v60 = vld [vmem:[#allocation3 + $0x458] sm:$0xff] }
 0x103   : > { %v915_v4 = vpop.permute.xlu0 %914  ;;  %v658_v12 = vpop.permute.xlu1 %657  ;;  %v1658_v63 = vld [vmem:[#allocation3 + $0x238] sm:$0xff]  ;;  %9767 = vmatprep.subr.bf16.mxu0 %v15120_v1  ;;  %v1657_v25 = vld [vmem:[#allocation3 + $0x230] sm:$0xff]  ;;  %1315 = vst.msk [vmem:[#allocation3 + $0x298] sm:$0xff] %vm375_vm0, %v1283_v0  ;;  %v10771_v43 = vld [vmem:[#allocation2 + $0xf1] sm:$0xff] }
 0x104   : > { %2052 = vmatmul.mubr.f32.gmra.mrb[26].mxu0 %v1652_v52  ;;  %994 = vst.msk [vmem:[#allocation3 + $0x288] sm:$0xff] %vm721_vm3, %v915_v4  ;;  %738 = vst.msk [vmem:[#allocation3 + $0x280] sm:$0xff] %vm721_vm3, %v658_v12  ;;  %v1541_v18 = vld [vmem:[#allocation2 + $0x10a] sm:$0xff] }
 0x105   : > { %2056 = vmatprep.mubr.f32.mxu0 %v1658_v63  ;;  %9769 = vmatpush1.bf16.msra.mxu0 %v9768_v32  ;;  %1573 = vst.msk [vmem:[#allocation3 + $0x2f0] sm:$0xff] %vm375_vm0, %v1541_v18  ;;  %v1030_v52 = vld [vmem:[#allocation2 + $0x109] sm:$0xff]  ;;  %v10772_v32 = vld [vmem:[#allocation2 + $0xf9] sm:$0xff]  ;;  %v1031_v0 = vld [vmem:[#allocation2 + $0x111] sm:$0xff] }
 0x106   : > { %1421 = vrot.lane.b32.xlu0 %v11404_v44, %s10827_s25  ;;  %1164 = vrot.lane.b32.xlu1 %v11334_v7, %s10827_s25  ;;  %v1540_v44 = vld [vmem:[#allocation2 + $0xfa] sm:$0xff]  ;;  %1062 = vst.msk [vmem:[#allocation3 + $0x330] sm:$0xff] %vm375_vm0, %v1030_v52  ;;  %v1544_v12 = vld [vmem:[#allocation2 + $0x12a] sm:$0xff]  ;;  %1063 = vst.msk [vmem:[#allocation3 + $0x358] sm:$0xff] %vm375_vm0, %v1031_v0 }
 0x107   : > { %v917_v8 = vpop.permute.xlu0 %916  ;;  %v660_v59 = vpop.permute.xlu1 %659  ;;  %v1663_v48 = vld [vmem:[#allocation3 + $0x260] sm:$0xff]  ;;  %9770 = vmatprep.subr.bf16.mxu0 %v15120_v1  ;;  %1572 = vst.msk [vmem:[#allocation3 + $0x2c8] sm:$0xff] %vm375_vm0, %v1540_v44  ;;  %v1662_v53 = vld [vmem:[#allocation3 + $0x258] sm:$0xff]  ;;  %1576 = vst.msk [vmem:[#allocation3 + $0x368] sm:$0xff] %vm375_vm0, %v1544_v12 }
 0x108   : > { %2057 = vmatmul.mubr.f32.gmra.mrb[28].mxu0 %v1657_v25  ;;  %995 = vst.msk [vmem:[#allocation3 + $0x2b0] sm:$0xff] %vm721_vm3, %v917_v8  ;;  %739 = vst.msk [vmem:[#allocation3 + $0x2a8] sm:$0xff] %vm721_vm3, %v660_v59  ;;  %v1666_v7 = vld [vmem:[#allocation3 + $0x278] sm:$0xff]  ;;  %v1545_v8 = vld [vmem:[#allocation2 + $0x13a] sm:$0xff] }
 0x109   : > { %2061 = vmatprep.mubr.f32.mxu0 %v1663_v48  ;;  %9772 = vmatpush1.bf16.msra.mxu0 %v9771_v34  ;;  %v10773_v25 = vld [vmem:[#allocation2 + $0x109] sm:$0xff]  ;;  %1577 = vst.msk [vmem:[#allocation3 + $0x390] sm:$0xff] %vm375_vm0, %v1545_v8  ;;  %1066 = vst.msk [vmem:[#allocation3 + $0x3d0] sm:$0xff] %vm375_vm0, %v1034_v47 }
 0x10a   : > { %1423 = vrot.lane.b32.xlu0 %v11415_v46, %s10827_s25  ;;  %1166 = vrot.lane.b32.xlu1 %v11351_v14, %s10827_s25  ;;  %v1028_v14 = vld [vmem:[#allocation2 + $0xf1] sm:$0xff]  ;;  %v1554_v47 = vld [vmem:[#allocation2 + $0x1a2] sm:$0xff] }
 0x10b   : > { %v919_v54 = vpop.permute.xlu0 %918  ;;  %v662_v30 = vpop.permute.xlu1 %661  ;;  %v1668_v24 = vld [vmem:[#allocation3 + $0x288] sm:$0xff]  ;;  %9773 = vmatprep.subr.bf16.mxu0 %v15120_v1  ;;  %9526 = vmatmul.mubr.msk.f32.gmra.mrb[14].mxu1 %vm375_vm0, %v1666_v7  ;;  %v1667_v46 = vld [vmem:[#allocation3 + $0x280] sm:$0xff]  ;;  %1060 = vst.msk [vmem:[#allocation3 + $0x2e0] sm:$0xff] %vm375_vm0, %v1028_v14  ;;  %1586 = vst.msk [vmem:[#allocation3 + $0x4f8] sm:$0xff] %vm375_vm0, %v1554_v47 }
 0x10c   : > { %2062 = vmatmul.mubr.f32.gmra.mrb[30].mxu0 %v1662_v53  ;;  %996 = vst.msk [vmem:[#allocation3 + $0x2d8] sm:$0xff] %vm721_vm3, %v919_v54  ;;  %740 = vst.msk [vmem:[#allocation3 + $0x2d0] sm:$0xff] %vm721_vm3, %v662_v30  ;;  %9528 = vmatprep.mubr.msk.f32.mxu1 %vm375_vm0, %v1671_v15  ;;  %v1033_v53 = vld [vmem:[#allocation2 + $0x129] sm:$0xff]  ;;  %v1547_v14 = vld [vmem:[#allocation2 + $0x152] sm:$0xff] }
 0x10d   : > { %2066 = vmatprep.mubr.f32.mxu0 %v1668_v24  ;;  %9775 = vmatpush1.bf16.msra.mxu0 %v9774_v22  ;;  %v10775_v22 = vld [vmem:[#allocation2 + $0x121] sm:$0xff]  ;;  %1065 = vst.msk [vmem:[#allocation3 + $0x3a8] sm:$0xff] %vm375_vm0, %v1033_v53  ;;  %1579 = vst.msk [vmem:[#allocation3 + $0x3e0] sm:$0xff] %vm375_vm0, %v1547_v14 }
 0x10e   : > { %1425 = vrot.lane.b32.xlu0 %v10770_v38, %s10827_s25  ;;  %1168 = vrot.lane.b32.xlu1 %v11368_v19, %s10827_s25  ;;  %v1676_v57 = vld [vmem:[#allocation3 + $0x2c8] sm:$0xff]  ;;  %v1040_v53 = vld [vmem:[#allocation2 + $0x181] sm:$0xff] }
 0x10f   : > { %v921_v9 = vpop.permute.xlu0 %920  ;;  %v664_v37 = vpop.permute.xlu1 %663  ;;  %v1673_v55 = vld [vmem:[#allocation3 + $0x2b0] sm:$0xff]  ;;  %9529 = vmatmul.mubr.msk.f32.gmra.mrb[16].mxu1 %vm375_vm0, %v1676_v57  ;;  %v1542_v19 = vld [vmem:[#allocation2 + $0x112] sm:$0xff]  ;;  %1072 = vst.msk [vmem:[#allocation3 + $0x4c0] sm:$0xff] %vm375_vm0, %v1040_v53 }
 0x110   : > { %2067 = vmatmul.mubr.f32.gmra.mrb[32].mxu0 %v1667_v46  ;;  %997 = vst.msk [vmem:[#allocation3 + $0x300] sm:$0xff] %vm721_vm3, %v921_v9  ;;  %741 = vst.msk [vmem:[#allocation3 + $0x2f8] sm:$0xff] %vm721_vm3, %v664_v37  ;;  %v1672_v26 = vld [vmem:[#allocation3 + $0x2a8] sm:$0xff]  ;;  %v10776_v46 = vld [vmem:[#allocation2 + $0x129] sm:$0xff] }
 0x111   : > { %2071 = vmatprep.mubr.f32.mxu0 %v1673_v55  ;;  %1574 = vst.msk [vmem:[#allocation3 + $0x318] sm:$0xff] %vm375_vm0, %v1542_v19  ;;  %v1696_v7 = vld [vmem:[#allocation3 + $0x368] sm:$0xff]  ;;  %v1035_v55 = vld [vmem:[#allocation2 + $0x141] sm:$0xff] }
 0x112   : > { %1427 = vrot.lane.b32.xlu0 %v10771_v43, %s10827_s25  ;;  %1170 = vrot.lane.b32.xlu1 %v11385_v23, %s10827_s25  ;;  %v1681_v23 = vld [vmem:[#allocation3 + $0x2f0] sm:$0xff]  ;;  %1067 = vst.msk [vmem:[#allocation3 + $0x3f8] sm:$0xff] %vm375_vm0, %v1035_v55  ;;  %v1746_v55 = vld [vmem:[#allocation3 + $0x4f8] sm:$0xff] }
 0x113   : > { %v923_v36 = vpop.permute.xlu0 %922  ;;  %v666_v13 = vpop.permute.xlu1 %665  ;;  %v1678_v62 = vld [vmem:[#allocation3 + $0x2d8] sm:$0xff]  ;;  %v1677_v20 = vld [vmem:[#allocation3 + $0x2d0] sm:$0xff]  ;;  %9531 = vmatprep.mubr.msk.f32.mxu1 %vm375_vm0, %v1681_v23  ;;  %v1355_v23 = vld [vmem:[#allocation2 + $0x151] sm:$0xff]  ;;  %3748 = vst.msk [vmem:[#allocation3 + $0x4f8] sm:$0xff] %vm375_vm0, %v1554_v47 }
 0x114   : > { %2072 = vmatmul.mubr.f32.gmra.mrb[34].mxu0 %v1672_v26  ;;  %998 = vst.msk [vmem:[#allocation3 + $0x328] sm:$0xff] %vm721_vm3, %v923_v36  ;;  %742 = vst.msk [vmem:[#allocation3 + $0x320] sm:$0xff] %vm721_vm3, %v666_v13  ;;  %v1548_v9 = vld [vmem:[#allocation2 + $0x15a] sm:$0xff]  ;;  %v1036_v36 = vld [vmem:[#allocation2 + $0x151] sm:$0xff] }
 0x115   : > { %2076 = vmatprep.mubr.f32.mxu0 %v1678_v62  ;;  %1580 = vst.msk [vmem:[#allocation3 + $0x408] sm:$0xff] %vm375_vm0, %v1548_v9  ;;  %v10777_v57 = vld [vmem:[#allocation2 + $0x139] sm:$0xff]  ;;  %v10778_v13 = vld [vmem:[#allocation2 + $0x141] sm:$0xff]  ;;  %1068 = vst.msk [vmem:[#allocation3 + $0x420] sm:$0xff] %vm375_vm0, %v1036_v36 }
 0x116   : > { %1429 = vrot.lane.b32.xlu0 %v10772_v32, %s10827_s25  ;;  %1172 = vrot.lane.b32.xlu1 %v11396_v27, %s10827_s25  ;;  %v1549_v62 = vld [vmem:[#allocation2 + $0x16a] sm:$0xff] }
 0x117   : > { %v925_v56 = vpop.permute.xlu0 %924  ;;  %v668_v2 = vpop.permute.xlu1 %667  ;;  %v1683_v4 = vld [vmem:[#allocation3 + $0x300] sm:$0xff]  ;;  %v1682_v27 = vld [vmem:[#allocation3 + $0x2f8] sm:$0xff]  ;;  %1581 = vst.msk [vmem:[#allocation3 + $0x430] sm:$0xff] %vm375_vm0, %v1549_v62 }
 0x118   : > { %2077 = vmatmul.mubr.f32.gmra.mrb[36].mxu0 %v1677_v20  ;;  %999 = vst.msk [vmem:[#allocation3 + $0x350] sm:$0xff] %vm721_vm3, %v925_v56  ;;  %743 = vst.msk [vmem:[#allocation3 + $0x348] sm:$0xff] %vm721_vm3, %v668_v2  ;;  %v1686_v63 = vld [vmem:[#allocation3 + $0x318] sm:$0xff]  ;;  %v1037_v56 = vld [vmem:[#allocation2 + $0x159] sm:$0xff] }
 0x119   : > { %2081 = vmatprep.mubr.f32.mxu0 %v1683_v4  ;;  %9532 = vmatmul.mubr.msk.f32.gmra.mrb[18].mxu1 %vm375_vm0, %v1686_v63  ;;  %1069 = vst.msk [vmem:[#allocation3 + $0x448] sm:$0xff] %vm375_vm0, %v1037_v56  ;;  %v1356_v63 = vld [vmem:[#allocation2 + $0x159] sm:$0xff] }
 0x11a   : > { %1431 = vrot.lane.b32.xlu0 %v10773_v25, %s10827_s25  ;;  %1174 = vrot.lane.b32.xlu1 %v11407_v28, %s10827_s25  ;;  %v1691_v28 = vld [vmem:[#allocation3 + $0x340] sm:$0xff] }
 0x11b   : > { %v927_v34 = vpop.permute.xlu0 %926  ;;  %v670_v17 = vpop.permute.xlu1 %669  ;;  %v1688_v45 = vld [vmem:[#allocation3 + $0x328] sm:$0xff]  ;;  %v1687_v41 = vld [vmem:[#allocation3 + $0x320] sm:$0xff]  ;;  %9534 = vmatprep.mubr.msk.f32.mxu1 %vm375_vm0, %v1691_v28 }
 0x11c   : > { %2082 = vmatmul.mubr.f32.gmra.mrb[38].mxu0 %v1682_v27  ;;  %1000 = vst.msk [vmem:[#allocation3 + $0x378] sm:$0xff] %vm721_vm3, %v927_v34  ;;  %744 = vst.msk [vmem:[#allocation3 + $0x370] sm:$0xff] %vm721_vm3, %v670_v17  ;;  %v1716_v50 = vld [vmem:[#allocation3 + $0x408] sm:$0xff]  ;;  %v1295_v27 = vld [vmem:[#allocation2 + $0x180] sm:$0xff] }
 0x11d   : > { %2086 = vmatprep.mubr.f32.mxu0 %v1688_v45  ;;  %9535 = vmatmul.mubr.msk.f32.gmra.mrb[20].mxu1 %vm375_vm0, %v1696_v7  ;;  %1327 = vst.msk [vmem:[#allocation3 + $0x478] sm:$0xff] %vm375_vm0, %v1295_v27  ;;  %v1038_v25 = vld [vmem:[#allocation2 + $0x169] sm:$0xff]  ;;  %v1039_v28 = vld [vmem:[#allocation2 + $0x171] sm:$0xff] }
 0x11e   : > { %1433 = vrot.lane.b32.xlu0 %v10774_v16, %s10827_s25  ;;  %1176 = vrot.lane.b32.xlu1 %v11417_v29, %s10827_s25  ;;  %v1546_v29 = vld [vmem:[#allocation2 + $0x142] sm:$0xff]  ;;  %1070 = vst.msk [vmem:[#allocation3 + $0x470] sm:$0xff] %vm375_vm0, %v1038_v25  ;;  %1071 = vst.msk [vmem:[#allocation3 + $0x498] sm:$0xff] %vm375_vm0, %v1039_v28  ;;  %v1297_v7 = vld [vmem:[#allocation2 + $0x198] sm:$0xff] }
 0x11f   : > { %v929_v59 = vpop.permute.xlu0 %928  ;;  %v672_v48 = vpop.permute.xlu1 %671  ;;  %v1693_v44 = vld [vmem:[#allocation3 + $0x350] sm:$0xff]  ;;  %v1692_v51 = vld [vmem:[#allocation3 + $0x348] sm:$0xff]  ;;  %1578 = vst.msk [vmem:[#allocation3 + $0x3b8] sm:$0xff] %vm375_vm0, %v1546_v29  ;;  %v1296_v16 = vld [vmem:[#allocation2 + $0x188] sm:$0xff] }
 0x120   : > { %2087 = vmatmul.mubr.f32.gmra.mrb[40].mxu0 %v1687_v41  ;;  %1001 = vst.msk [vmem:[#allocation3 + $0x3a0] sm:$0xff] %vm721_vm3, %v929_v59  ;;  %745 = vst.msk [vmem:[#allocation3 + $0x398] sm:$0xff] %vm721_vm3, %v672_v48  ;;  %v1357_v41 = vld [vmem:[#allocation2 + $0x169] sm:$0xff] }
 0x121   : > { %2091 = vmatprep.mubr.f32.mxu0 %v1693_v44  ;;  %1328 = vst.msk [vmem:[#allocation3 + $0x4a0] sm:$0xff] %vm375_vm0, %v1296_v16  ;;  %v1358_v44 = vld [vmem:[#allocation2 + $0x171] sm:$0xff]  ;;  %1329 = vst.msk [vmem:[#allocation3 + $0x4c8] sm:$0xff] %vm375_vm0, %v1297_v7 }
 0x122   : > { %1435 = vrot.lane.b32.xlu0 %v10775_v22, %s10827_s25  ;;  %1178 = vrot.lane.b32.xlu1 %v11425_v31, %s10827_s25  ;;  %v1701_v31 = vld [vmem:[#allocation3 + $0x390] sm:$0xff] }
 0x123   : > { %v931_v42 = vpop.permute.xlu0 %930  ;;  %v674_v54 = vpop.permute.xlu1 %673  ;;  %v1698_v30 = vld [vmem:[#allocation3 + $0x378] sm:$0xff]  ;;  %v1697_v24 = vld [vmem:[#allocation3 + $0x370] sm:$0xff]  ;;  %9537 = vmatprep.mubr.msk.f32.mxu1 %vm375_vm0, %v1701_v31 }
 0x124   : > { %2092 = vmatmul.mubr.f32.gmra.mrb[42].mxu0 %v1692_v51  ;;  %1002 = vst.msk [vmem:[#allocation3 + $0x3c8] sm:$0xff] %vm721_vm3, %v931_v42  ;;  %746 = vst.msk [vmem:[#allocation3 + $0x3c0] sm:$0xff] %vm721_vm3, %v674_v54  ;;  %v1731_v51 = vld [vmem:[#allocation3 + $0x480] sm:$0xff] }
 0x125   : > { %2096 = vmatprep.mubr.f32.mxu0 %v1698_v30  ;;  %v1359_v30 = vld [vmem:[#allocation2 + $0x181] sm:$0xff] }
 0x126   : > { %1437 = vrot.lane.b32.xlu0 %v10776_v46, %s10827_s25  ;;  %1180 = vrot.lane.b32.xlu1 %v11432_v35, %s10827_s25  ;;  %v1706_v37 = vld [vmem:[#allocation3 + $0x3b8] sm:$0xff] }
 0x127   : > { %v933_v38 = vpop.permute.xlu0 %932  ;;  %v676_v15 = vpop.permute.xlu1 %675  ;;  %v1703_v18 = vld [vmem:[#allocation3 + $0x3a0] sm:$0xff]  ;;  %v1702_v35 = vld [vmem:[#allocation3 + $0x398] sm:$0xff]  ;;  %9538 = vmatmul.mubr.msk.f32.gmra.mrb[22].mxu1 %vm375_vm0, %v1706_v37  ;;  %v1361_v37 = vld [vmem:[#allocation2 + $0x199] sm:$0xff] }
 0x128   : > { %2097 = vmatmul.mubr.f32.gmra.mrb[44].mxu0 %v1697_v24  ;;  %1003 = vst.msk [vmem:[#allocation3 + $0x3f0] sm:$0xff] %vm721_vm3, %v933_v38  ;;  %747 = vst.msk [vmem:[#allocation3 + $0x3e8] sm:$0xff] %vm721_vm3, %v676_v15  ;;  %v1736_v24 = vld [vmem:[#allocation3 + $0x4a8] sm:$0xff] }
 0x129   : > { %2101 = vmatprep.mubr.f32.mxu0 %v1703_v18 }
 0x12a   : > { %1439 = vrot.lane.b32.xlu0 %v10777_v57, %s10827_s25  ;;  %1182 = vrot.lane.b32.xlu1 %v11441_v10, %s10827_s25  ;;  %v1711_v10 = vld [vmem:[#allocation3 + $0x3e0] sm:$0xff] }
 0x12b   : > { %v935_v19 = vpop.permute.xlu0 %934  ;;  %v678_v26 = vpop.permute.xlu1 %677  ;;  %v1708_v6 = vld [vmem:[#allocation3 + $0x3c8] sm:$0xff]  ;;  %v1707_v43 = vld [vmem:[#allocation3 + $0x3c0] sm:$0xff]  ;;  %9540 = vmatprep.mubr.msk.f32.mxu1 %vm375_vm0, %v1711_v10 }
 0x12c   : > { %2102 = vmatmul.mubr.f32.gmra.mrb[46].mxu0 %v1702_v35  ;;  %1004 = vst.msk [vmem:[#allocation3 + $0x418] sm:$0xff] %vm721_vm3, %v935_v19  ;;  %748 = vst.msk [vmem:[#allocation3 + $0x410] sm:$0xff] %vm721_vm3, %v678_v26  ;;  %9541 = vmatmul.mubr.msk.f32.gmra.mrb[24].mxu1 %vm375_vm0, %v1716_v50 }
 0x12d   : > { %2106 = vmatprep.mubr.f32.mxu0 %v1708_v6 }
 0x12e   : > { %1441 = vrot.lane.b32.xlu0 %v10778_v13, %s10827_s25  ;;  %1184 = vrot.lane.b32.xlu1 %v11449_v58, %s10827_s25 }
 0x12f   : > { %v937_v20 = vpop.permute.xlu0 %936  ;;  %v680_v52 = vpop.permute.xlu1 %679  ;;  %v1713_v32 = vld [vmem:[#allocation3 + $0x3f0] sm:$0xff]  ;;  %v1712_v58 = vld [vmem:[#allocation3 + $0x3e8] sm:$0xff] }
 0x130   : > { %2107 = vmatmul.mubr.f32.gmra.mrb[48].mxu0 %v1707_v43  ;;  %1005 = vst.msk [vmem:[#allocation3 + $0x440] sm:$0xff] %vm721_vm3, %v937_v20  ;;  %749 = vst.msk [vmem:[#allocation3 + $0x438] sm:$0xff] %vm721_vm3, %v680_v52 }
 0x131   : > { %2111 = vmatprep.mubr.f32.mxu0 %v1713_v32 }
 0x132   : > { %1443 = vrot.lane.b32.xlu0 %v1355_v23, %s10827_s25  ;;  %1186 = vrot.lane.b32.xlu1 %v11457_v5, %s10827_s25  ;;  %v1721_v5 = vld [vmem:[#allocation3 + $0x430] sm:$0xff] }
 0x133   : > { %v939_v2 = vpop.permute.xlu0 %938  ;;  %v682_v4 = vpop.permute.xlu1 %681  ;;  %v1718_v12 = vld [vmem:[#allocation3 + $0x418] sm:$0xff]  ;;  %v1717_v0 = vld [vmem:[#allocation3 + $0x410] sm:$0xff]  ;;  %9543 = vmatprep.mubr.msk.f32.mxu1 %vm375_vm0, %v1721_v5 }
 0x134   : > { %2112 = vmatmul.mubr.f32.gmra.mrb[50].mxu0 %v1712_v58  ;;  %1006 = vst.msk [vmem:[#allocation3 + $0x468] sm:$0xff] %vm721_vm3, %v939_v2  ;;  %750 = vst.msk [vmem:[#allocation3 + $0x460] sm:$0xff] %vm721_vm3, %v682_v4  ;;  %9544 = vmatmul.mubr.msk.f32.gmra.mrb[26].mxu1 %vm375_vm0, %v1726_v60 }
 0x135   : > { %2116 = vmatprep.mubr.f32.mxu0 %v1718_v12  ;;  %9546 = vmatprep.mubr.msk.f32.mxu1 %vm375_vm0, %v1731_v51 }
 0x136   : > { %1445 = vrot.lane.b32.xlu0 %v1356_v63, %s10827_s25  ;;  %1188 = vrot.lane.b32.xlu1 %v11465_v40, %s10827_s25 }
 0x137   : > { %v941_v34 = vpop.permute.xlu0 %940  ;;  %v684_v17 = vpop.permute.xlu1 %683  ;;  %v1723_v45 = vld [vmem:[#allocation3 + $0x440] sm:$0xff]  ;;  %v1722_v40 = vld [vmem:[#allocation3 + $0x438] sm:$0xff] }
 0x138   : > { %2117 = vmatmul.mubr.f32.gmra.mrb[52].mxu0 %v1717_v0  ;;  %1007 = vst.msk [vmem:[#allocation3 + $0x490] sm:$0xff] %vm721_vm3, %v941_v34  ;;  %751 = vst.msk [vmem:[#allocation3 + $0x488] sm:$0xff] %vm721_vm3, %v684_v17  ;;  %9547 = vmatmul.mubr.msk.f32.gmra.mrb[28].mxu1 %vm375_vm0, %v1736_v24 }
 0x139   : > { %2121 = vmatprep.mubr.f32.mxu0 %v1723_v45 }
 0x13a   : > { %1447 = vrot.lane.b32.xlu0 %v1357_v41, %s10827_s25  ;;  %1190 = vrot.lane.b32.xlu1 %v11473_v21, %s10827_s25  ;;  %v1553_v21 = vld [vmem:[#allocation2 + $0x19a] sm:$0xff] }
 0x13b   : > { %v943_v8 = vpop.permute.xlu0 %942  ;;  %v686_v59 = vpop.permute.xlu1 %685  ;;  %v1728_v48 = vld [vmem:[#allocation3 + $0x468] sm:$0xff]  ;;  %v1727_v29 = vld [vmem:[#allocation3 + $0x460] sm:$0xff]  ;;  %1585 = vst.msk [vmem:[#allocation3 + $0x4d0] sm:$0xff] %vm375_vm0, %v1553_v21 }
 0x13c   : > { %2122 = vmatmul.mubr.f32.gmra.mrb[54].mxu0 %v1722_v40  ;;  %1008 = vst.msk [vmem:[#allocation3 + $0x4b8] sm:$0xff] %vm721_vm3, %v943_v8  ;;  %752 = vst.msk [vmem:[#allocation3 + $0x4b0] sm:$0xff] %vm721_vm3, %v686_v59 }
 0x13d   : > { %2126 = vmatprep.mubr.f32.mxu0 %v1728_v48 }
 0x13e   : > { %1449 = vrot.lane.b32.xlu0 %v1358_v44, %s10827_s25  ;;  %1192 = vrot.lane.b32.xlu1 %v11481_v3, %s10827_s25  ;;  %v1298_v3 = vld [vmem:[#allocation2 + $0x1a0] sm:$0xff] }
 0x13f   : > { %v945_v22 = vpop.permute.xlu0 %944  ;;  %v688_v42 = vpop.permute.xlu1 %687  ;;  %v1733_v54 = vld [vmem:[#allocation3 + $0x490] sm:$0xff]  ;;  %v1732_v46 = vld [vmem:[#allocation3 + $0x488] sm:$0xff]  ;;  %1330 = vst.msk [vmem:[#allocation3 + $0x4f0] sm:$0xff] %vm375_vm0, %v1298_v3 }
 0x140   : > { %2127 = vmatmul.mubr.f32.gmra.mrb[56].mxu0 %v1727_v29  ;;  %1009 = vst.msk [vmem:[#allocation3 + $0x4e0] sm:$0xff] %vm721_vm3, %v945_v22  ;;  %753 = vst.msk [vmem:[#allocation3 + $0x4d8] sm:$0xff] %vm721_vm3, %v688_v42 }
 0x141   : > { %2131 = vmatprep.mubr.f32.mxu0 %v1733_v54 }
 0x142   : > { %1451 = vrot.lane.b32.xlu0 %v1359_v30, %s10827_s25  ;;  %1194 = vrot.lane.b32.xlu1 %v11489_v49, %s10827_s25  ;;  %v1741_v18 = vld [vmem:[#allocation3 + $0x4d0] sm:$0xff] }
 0x143   : > { %v1738_v31 = vld [vmem:[#allocation3 + $0x4b8] sm:$0xff]  ;;  %v1737_v15 = vld [vmem:[#allocation3 + $0x4b0] sm:$0xff]  ;;  %9549 = vmatprep.mubr.msk.f32.mxu1 %vm375_vm0, %v1741_v18  ;;  %3747 = vst.msk [vmem:[#allocation3 + $0x4d0] sm:$0xff] %vm375_vm0, %v1553_v21 }
 0x144   : > { %2132 = vmatmul.mubr.f32.gmra.mrb[58].mxu0 %v1732_v46  ;;  %v1396_v14 = vpop.permute.xlu0 %1395  ;;  %v1139_v38 = vpop.permute.xlu1 %1138  ;;  %9550 = vmatmul.mubr.msk.f32.gmra.mrb[30].mxu1 %vm375_vm0, %v1746_v55 }
 0x145   : > { %1491 = vst.msk [vmem:[#allocation3 + $0x18] sm:$0xff] %vm721_vm3, %v1396_v14  ;;  %1234 = vst.msk [vmem:[#allocation3 + $0x10] sm:$0xff] %vm721_vm3, %v1139_v38  ;;  %2136 = vmatprep.mubr.f32.mxu0 %v1738_v31 }
 0x146   : > { %1453 = vrot.lane.b32.xlu0 %v11531_v61, %s10827_s25  ;;  %1196 = vrot.lane.b32.xlu1 %v11503_v39, %s10827_s25  ;;  %v1362_v39 = vld [vmem:[#allocation2 + $0x1a1] sm:$0xff] }
 0x147   : > { %v1743_v9 = vld [vmem:[#allocation3 + $0x4e0] sm:$0xff]  ;;  %v1742_v61 = vld [vmem:[#allocation3 + $0x4d8] sm:$0xff] }
 0x148   : > { %2137 = vmatmul.mubr.f32.gmra.mrb[60].mxu0 %v1737_v15  ;;  %v1398_v49 = vpop.permute.xlu0 %1397  ;;  %v1141_v35 = vpop.permute.xlu1 %1140 }
 0x149   : > { %1492 = vst.msk [vmem:[#allocation3 + $0x40] sm:$0xff] %vm721_vm3, %v1398_v49  ;;  %1235 = vst.msk [vmem:[#allocation3 + $0x38] sm:$0xff] %vm721_vm3, %v1141_v35  ;;  %2141 = vmatprep.mubr.f32.mxu0 %v1743_v9 }
 0x14a   : > { %1455 = vrot.lane.b32.xlu0 %v1361_v37, %s10827_s25  ;;  %1198 = vrot.lane.b32.xlu1 %v11559_v11, %s10827_s25 }
 0x14c   : > { %2142 = vmatmul.mubr.f32.gmra.mrb[62].mxu0 %v1742_v61  ;;  %v1400_v57 = vpop.permute.xlu0 %1399  ;;  %v1143_v19 = vpop.permute.xlu1 %1142  ;;  %v1590_v26 = vld [vmem:[#allocation3 + $0x18] sm:$0xff]  ;;  %v1589_v6 = vld [vmem:[#allocation3 + $0x10] sm:$0xff] }
 0x14d   : > { %1493 = vst.msk [vmem:[#allocation3 + $0x68] sm:$0xff] %vm721_vm3, %v1400_v57  ;;  %1236 = vst.msk [vmem:[#allocation3 + $0x60] sm:$0xff] %vm721_vm3, %v1143_v19  ;;  %2211 = vmatprep.mubr.f32.mxu0 %v1590_v26 }
 0x14e   : > { %1457 = vrot.lane.b32.xlu0 %v1362_v39, %s10827_s25  ;;  %1200 = vrot.lane.b32.xlu1 %v11578_v33, %s10827_s25 }
 0x150   : > { %2212 = vmatmul.mubr.f32.vlgmr.msra.gmra.mrb[0].mxu0 %v1589_v6  ;;  %v1402_v43 = vpop.permute.xlu0 %1401  ;;  %v1145_v36 = vpop.permute.xlu1 %1144  ;;  %v1595_v11 = vld [vmem:[#allocation3 + $0x40] sm:$0xff]  ;;  %v1594_v13 = vld [vmem:[#allocation3 + $0x38] sm:$0xff] }
 0x151   : > { %1494 = vst.msk [vmem:[#allocation3 + $0x90] sm:$0xff] %vm721_vm3, %v1402_v43  ;;  %1237 = vst.msk [vmem:[#allocation3 + $0x88] sm:$0xff] %vm721_vm3, %v1145_v36  ;;  %2216 = vmatprep.mubr.f32.mxu0 %v1595_v11 }
 0x154   : > { %2217 = vmatmul.mubr.f32.gmra.mrb[2].mxu0 %v1594_v13  ;;  %v1404_v10 = vpop.permute.xlu0 %1403  ;;  %v1147_v62 = vpop.permute.xlu1 %1146  ;;  %v1600_v20 = vld [vmem:[#allocation3 + $0x68] sm:$0xff]  ;;  %v1599_v33 = vld [vmem:[#allocation3 + $0x60] sm:$0xff] }
 0x155   : > { %1495 = vst.msk [vmem:[#allocation3 + $0xb8] sm:$0xff] %vm721_vm3, %v1404_v10  ;;  %1238 = vst.msk [vmem:[#allocation3 + $0xb0] sm:$0xff] %vm721_vm3, %v1147_v62  ;;  %2221 = vmatprep.mubr.f32.mxu0 %v1600_v20 }
 0x158   : > { %2222 = vmatmul.mubr.f32.gmra.mrb[4].mxu0 %v1599_v33  ;;  %v1406_v52 = vpop.permute.xlu0 %1405  ;;  %v1149_v32 = vpop.permute.xlu1 %1148  ;;  %v1605_v23 = vld [vmem:[#allocation3 + $0x90] sm:$0xff]  ;;  %v1604_v50 = vld [vmem:[#allocation3 + $0x88] sm:$0xff] }
 0x159   : > { %1496 = vst.msk [vmem:[#allocation3 + $0xe0] sm:$0xff] %vm721_vm3, %v1406_v52  ;;  %1239 = vst.msk [vmem:[#allocation3 + $0xd8] sm:$0xff] %vm721_vm3, %v1149_v32  ;;  %2226 = vmatprep.mubr.f32.mxu0 %v1605_v23 }
 0x15c   : > { %2227 = vmatmul.mubr.f32.gmra.mrb[6].mxu0 %v1604_v50  ;;  %v1408_v58 = vpop.permute.xlu0 %1407  ;;  %v1151_v56 = vpop.permute.xlu1 %1150  ;;  %v1610_v2 = vld [vmem:[#allocation3 + $0xb8] sm:$0xff]  ;;  %v1609_v4 = vld [vmem:[#allocation3 + $0xb0] sm:$0xff] }
 0x15d   : > { %1497 = vst.msk [vmem:[#allocation3 + $0x108] sm:$0xff] %vm721_vm3, %v1408_v58  ;;  %1240 = vst.msk [vmem:[#allocation3 + $0x100] sm:$0xff] %vm721_vm3, %v1151_v56  ;;  %2231 = vmatprep.mubr.f32.mxu0 %v1610_v2 }
 0x160   : > { %2232 = vmatmul.mubr.f32.gmra.mrb[8].mxu0 %v1609_v4  ;;  %v1410_v12 = vpop.permute.xlu0 %1409  ;;  %v1153_v63 = vpop.permute.xlu1 %1152  ;;  %v1615_v27 = vld [vmem:[#allocation3 + $0xe0] sm:$0xff]  ;;  %v1614_v0 = vld [vmem:[#allocation3 + $0xd8] sm:$0xff] }
 0x161   : > { %1498 = vst.msk [vmem:[#allocation3 + $0x130] sm:$0xff] %vm721_vm3, %v1410_v12  ;;  %1241 = vst.msk [vmem:[#allocation3 + $0x128] sm:$0xff] %vm721_vm3, %v1153_v63  ;;  %2236 = vmatprep.mubr.f32.mxu0 %v1615_v27 }
 0x164   : > { %2237 = vmatmul.mubr.f32.gmra.mrb[10].mxu0 %v1614_v0  ;;  %v1412_v25 = vpop.permute.xlu0 %1411  ;;  %v1155_v5 = vpop.permute.xlu1 %1154  ;;  %v1620_v34 = vld [vmem:[#allocation3 + $0x108] sm:$0xff]  ;;  %v1619_v17 = vld [vmem:[#allocation3 + $0x100] sm:$0xff] }
 0x165   : > { %1499 = vst.msk [vmem:[#allocation3 + $0x158] sm:$0xff] %vm721_vm3, %v1412_v25  ;;  %1242 = vst.msk [vmem:[#allocation3 + $0x150] sm:$0xff] %vm721_vm3, %v1155_v5  ;;  %2241 = vmatprep.mubr.f32.mxu0 %v1620_v34 }
 0x168   : > { %2242 = vmatmul.mubr.f32.gmra.mrb[12].mxu0 %v1619_v17  ;;  %v1414_v45 = vpop.permute.xlu0 %1413  ;;  %v1157_v41 = vpop.permute.xlu1 %1156  ;;  %v1625_v60 = vld [vmem:[#allocation3 + $0x130] sm:$0xff]  ;;  %v1624_v16 = vld [vmem:[#allocation3 + $0x128] sm:$0xff] }
 0x169   : > { %1500 = vst.msk [vmem:[#allocation3 + $0x180] sm:$0xff] %vm721_vm3, %v1414_v45  ;;  %1243 = vst.msk [vmem:[#allocation3 + $0x178] sm:$0xff] %vm721_vm3, %v1157_v41  ;;  %2246 = vmatprep.mubr.f32.mxu0 %v1625_v60 }
 0x16c   : > { %2247 = vmatmul.mubr.f32.gmra.mrb[14].mxu0 %v1624_v16  ;;  %v1416_v40 = vpop.permute.xlu0 %1415  ;;  %v1159_v28 = vpop.permute.xlu1 %1158  ;;  %v1630_v8 = vld [vmem:[#allocation3 + $0x158] sm:$0xff]  ;;  %v1629_v59 = vld [vmem:[#allocation3 + $0x150] sm:$0xff] }
 0x16d   : > { %1501 = vst.msk [vmem:[#allocation3 + $0x1a8] sm:$0xff] %vm721_vm3, %v1416_v40  ;;  %1244 = vst.msk [vmem:[#allocation3 + $0x1a0] sm:$0xff] %vm721_vm3, %v1159_v28  ;;  %2251 = vmatprep.mubr.f32.mxu0 %v1630_v8 }
 0x170   : > { %2252 = vmatmul.mubr.f32.gmra.mrb[16].mxu0 %v1629_v59  ;;  %v1418_v48 = vpop.permute.xlu0 %1417  ;;  %v1161_v44 = vpop.permute.xlu1 %1160  ;;  %v1635_v7 = vld [vmem:[#allocation3 + $0x180] sm:$0xff]  ;;  %v1634_v29 = vld [vmem:[#allocation3 + $0x178] sm:$0xff] }
 0x171   : > { %1502 = vst.msk [vmem:[#allocation3 + $0x1d0] sm:$0xff] %vm721_vm3, %v1418_v48  ;;  %1245 = vst.msk [vmem:[#allocation3 + $0x1c8] sm:$0xff] %vm721_vm3, %v1161_v44  ;;  %2256 = vmatprep.mubr.f32.mxu0 %v1635_v7  ;;  %v2725_v59 = vld [vmem:[#allocation2 + $0x1] sm:$0xff] }
 0x172   : > { %2789 = vrot.lane.b32.xlu1 %v2725_v59, %s10827_s25  ;;  %v3910_v59 = vld [vmem:[%s15110_s3 + $0x8] sm:$0xff] }
 0x174   : > { %2257 = vmatmul.mubr.f32.gmra.mrb[18].mxu0 %v1634_v29  ;;  %v1420_v51 = vpop.permute.xlu0 %1419  ;;  %v1163_v53 = vpop.permute.xlu1 %1162  ;;  %v1640_v21 = vld [vmem:[#allocation3 + $0x1a8] sm:$0xff]  ;;  %v1639_v22 = vld [vmem:[#allocation3 + $0x1a0] sm:$0xff] }
 0x175   : > { %1503 = vst.msk [vmem:[#allocation3 + $0x1f8] sm:$0xff] %vm721_vm3, %v1420_v51  ;;  %1246 = vst.msk [vmem:[#allocation3 + $0x1f0] sm:$0xff] %vm721_vm3, %v1163_v53  ;;  %2261 = vmatprep.mubr.f32.mxu0 %v1640_v21  ;;  %v2726_v51 = vld [vmem:[#allocation2 + $0x9] sm:$0xff] }
 0x176   : > { %2791 = vrot.lane.b32.xlu1 %v2726_v51, %s10827_s25 }
 0x178   : > { %2262 = vmatmul.mubr.f32.gmra.mrb[20].mxu0 %v1639_v22  ;;  %v1422_v42 = vpop.permute.xlu0 %1421  ;;  %v1165_v54 = vpop.permute.xlu1 %1164  ;;  %v1645_v30 = vld [vmem:[#allocation3 + $0x1d0] sm:$0xff]  ;;  %v1644_v24 = vld [vmem:[#allocation3 + $0x1c8] sm:$0xff] }
 0x179   : > { %1504 = vst.msk [vmem:[#allocation3 + $0x220] sm:$0xff] %vm721_vm3, %v1422_v42  ;;  %1247 = vst.msk [vmem:[#allocation3 + $0x218] sm:$0xff] %vm721_vm3, %v1165_v54  ;;  %2266 = vmatprep.mubr.f32.mxu0 %v1645_v30 }
 0x17c   : > { %2267 = vmatmul.mubr.f32.gmra.mrb[22].mxu0 %v1644_v24  ;;  %v1424_v3 = vpop.permute.xlu0 %1423  ;;  %v1167_v47 = vpop.permute.xlu1 %1166  ;;  %v1650_v46 = vld [vmem:[#allocation3 + $0x1f8] sm:$0xff]  ;;  %v1649_v31 = vld [vmem:[#allocation3 + $0x1f0] sm:$0xff] }
 0x17d   : > { %1505 = vst.msk [vmem:[#allocation3 + $0x248] sm:$0xff] %vm721_vm3, %v1424_v3  ;;  %1248 = vst.msk [vmem:[#allocation3 + $0x240] sm:$0xff] %vm721_vm3, %v1167_v47  ;;  %2271 = vmatprep.mubr.f32.mxu0 %v1650_v46 }
 0x180   : > { %2272 = vmatmul.mubr.f32.gmra.mrb[24].mxu0 %v1649_v31  ;;  %v1426_v14 = vpop.permute.xlu0 %1425  ;;  %v1169_v38 = vpop.permute.xlu1 %1168  ;;  %v1655_v15 = vld [vmem:[#allocation3 + $0x220] sm:$0xff]  ;;  %v1654_v18 = vld [vmem:[#allocation3 + $0x218] sm:$0xff]  ;;  %v3973_v31 = vld [vmem:[%s15110_s3 + $0x200] sm:$0xff] }
 0x181   : > { %1506 = vst.msk [vmem:[#allocation3 + $0x270] sm:$0xff] %vm721_vm3, %v1426_v14  ;;  %1249 = vst.msk [vmem:[#allocation3 + $0x268] sm:$0xff] %vm721_vm3, %v1169_v38  ;;  %2276 = vmatprep.mubr.f32.mxu0 %v1655_v15  ;;  %v3974_v15 = vld [vmem:[%s15110_s3 + $0x208] sm:$0xff] }
 0x184   : > { %2277 = vmatmul.mubr.f32.gmra.mrb[26].mxu0 %v1654_v18  ;;  %v1428_v9 = vpop.permute.xlu0 %1427  ;;  %v1171_v37 = vpop.permute.xlu1 %1170  ;;  %v1660_v49 = vld [vmem:[#allocation3 + $0x248] sm:$0xff]  ;;  %v1659_v35 = vld [vmem:[#allocation3 + $0x240] sm:$0xff]  ;;  %v9888_v18 = vpack.c.bf16 %v3974_v15, %v3973_v31  ;;  %v3917_v15 = vld [vmem:[%s15110_s3 + $0x40] sm:$0xff] }
 0x185   : > { %1507 = vst.msk [vmem:[#allocation3 + $0x298] sm:$0xff] %vm721_vm3, %v1428_v9  ;;  %1250 = vst.msk [vmem:[#allocation3 + $0x290] sm:$0xff] %vm721_vm3, %v1171_v37  ;;  %2281 = vmatprep.mubr.f32.mxu0 %v1660_v49 }
 0x186   : > { %9889 = vmatprep.subr.bf16.mxu0 %v9888_v18 }
 0x187   : > { %9891 = vmatpush3.bf16.msra.mxu0 %v9888_v18  ;;  %v3918_v18 = vld [vmem:[%s15110_s3 + $0x48] sm:$0xff] }
 0x188   : > { %2282 = vmatmul.mubr.f32.gmra.mrb[28].mxu0 %v1659_v35  ;;  %v1430_v55 = vpop.permute.xlu0 %1429  ;;  %v1173_v61 = vpop.permute.xlu1 %1172  ;;  %v1665_v39 = vld [vmem:[#allocation3 + $0x270] sm:$0xff]  ;;  %v1664_v57 = vld [vmem:[#allocation3 + $0x268] sm:$0xff]  ;;  %v3975_v35 = vld [vmem:[%s15110_s3 + $0x210] sm:$0xff] }
 0x189   : > { %1508 = vst.msk [vmem:[#allocation3 + $0x2c0] sm:$0xff] %vm721_vm3, %v1430_v55  ;;  %1251 = vst.msk [vmem:[#allocation3 + $0x2b8] sm:$0xff] %vm721_vm3, %v1173_v61  ;;  %2286 = vmatprep.mubr.f32.mxu0 %v1665_v39  ;;  %v3976_v61 = vld [vmem:[%s15110_s3 + $0x218] sm:$0xff] }
 0x18a   : > { %v9892_v39 = vpack.c.bf16 %v3976_v61, %v3975_v35 }
 0x18c   : > { %2287 = vmatmul.mubr.f32.gmra.mrb[30].mxu0 %v1664_v57  ;;  %v1432_v19 = vpop.permute.xlu0 %1431  ;;  %v1175_v26 = vpop.permute.xlu1 %1174  ;;  %v1670_v6 = vld [vmem:[#allocation3 + $0x298] sm:$0xff]  ;;  %v1669_v43 = vld [vmem:[#allocation3 + $0x290] sm:$0xff]  ;;  %9893 = vmatprep.subr.bf16.mxu0 %v9892_v39 }
 0x18d   : > { %1509 = vst.msk [vmem:[#allocation3 + $0x2e8] sm:$0xff] %vm721_vm3, %v1432_v19  ;;  %1252 = vst.msk [vmem:[#allocation3 + $0x2e0] sm:$0xff] %vm721_vm3, %v1175_v26  ;;  %2291 = vmatprep.mubr.f32.mxu0 %v1670_v6  ;;  %v3977_v6 = vld [vmem:[%s15110_s3 + $0x220] sm:$0xff]  ;;  %9895 = vmatpush3.bf16.msra.mxu0 %v9892_v39 }
 0x18e   : > { %v3921_v39 = vld [vmem:[%s15110_s3 + $0x60] sm:$0xff] }
 0x190   : > { %2292 = vmatmul.mubr.f32.gmra.mrb[32].mxu0 %v1669_v43  ;;  %v1434_v36 = vpop.permute.xlu0 %1433  ;;  %v1177_v11 = vpop.permute.xlu1 %1176  ;;  %v1675_v13 = vld [vmem:[#allocation3 + $0x2c0] sm:$0xff]  ;;  %v1674_v10 = vld [vmem:[#allocation3 + $0x2b8] sm:$0xff] }
 0x191   : > { %1510 = vst.msk [vmem:[#allocation3 + $0x310] sm:$0xff] %vm721_vm3, %v1434_v36  ;;  %1253 = vst.msk [vmem:[#allocation3 + $0x308] sm:$0xff] %vm721_vm3, %v1177_v11  ;;  %2296 = vmatprep.mubr.f32.mxu0 %v1675_v13  ;;  %v3978_v36 = vld [vmem:[%s15110_s3 + $0x228] sm:$0xff] }
 0x192   : > { %v9896_v13 = vpack.c.bf16 %v3978_v36, %v3977_v6  ;;  %v3924_v6 = vld [vmem:[%s15110_s3 + $0x78] sm:$0xff] }
 0x194   : > { %2297 = vmatmul.mubr.f32.gmra.mrb[34].mxu0 %v1674_v10  ;;  %v1436_v62 = vpop.permute.xlu0 %1435  ;;  %v1179_v20 = vpop.permute.xlu1 %1178  ;;  %v1680_v33 = vld [vmem:[#allocation3 + $0x2e8] sm:$0xff]  ;;  %v1679_v52 = vld [vmem:[#allocation3 + $0x2e0] sm:$0xff]  ;;  %9897 = vmatprep.subr.bf16.mxu0 %v9896_v13 }
 0x195   : > { %1511 = vst.msk [vmem:[#allocation3 + $0x338] sm:$0xff] %vm721_vm3, %v1436_v62  ;;  %1254 = vst.msk [vmem:[#allocation3 + $0x330] sm:$0xff] %vm721_vm3, %v1179_v20  ;;  %2301 = vmatprep.mubr.f32.mxu0 %v1680_v33  ;;  %9899 = vmatpush3.bf16.msra.mxu0 %v9896_v13 }
 0x198   : > { %2302 = vmatmul.mubr.f32.gmra.mrb[36].mxu0 %v1679_v52  ;;  %v1438_v32 = vpop.permute.xlu0 %1437  ;;  %v1181_v23 = vpop.permute.xlu1 %1180  ;;  %v1685_v50 = vld [vmem:[#allocation3 + $0x310] sm:$0xff]  ;;  %v1684_v58 = vld [vmem:[#allocation3 + $0x308] sm:$0xff]  ;;  %v3979_v52 = vld [vmem:[%s15110_s3 + $0x230] sm:$0xff] }
 0x199   : > { %1512 = vst.msk [vmem:[#allocation3 + $0x360] sm:$0xff] %vm721_vm3, %v1438_v32  ;;  %1255 = vst.msk [vmem:[#allocation3 + $0x358] sm:$0xff] %vm721_vm3, %v1181_v23  ;;  %2306 = vmatprep.mubr.f32.mxu0 %v1685_v50  ;;  %v3980_v23 = vld [vmem:[%s15110_s3 + $0x238] sm:$0xff] }
 0x19a   : > { %v9900_v50 = vpack.c.bf16 %v3980_v23, %v3979_v52  ;;  %v3927_v52 = vld [vmem:[%s15110_s3 + $0x90] sm:$0xff] }
 0x19c   : > { %2307 = vmatmul.mubr.f32.gmra.mrb[38].mxu0 %v1684_v58  ;;  %v1440_v56 = vpop.permute.xlu0 %1439  ;;  %v1183_v2 = vpop.permute.xlu1 %1182  ;;  %v1690_v4 = vld [vmem:[#allocation3 + $0x338] sm:$0xff]  ;;  %v1689_v12 = vld [vmem:[#allocation3 + $0x330] sm:$0xff]  ;;  %9901 = vmatprep.subr.bf16.mxu0 %v9900_v50 }
 0x19d   : > { %1513 = vst.msk [vmem:[#allocation3 + $0x388] sm:$0xff] %vm721_vm3, %v1440_v56  ;;  %1256 = vst.msk [vmem:[#allocation3 + $0x380] sm:$0xff] %vm721_vm3, %v1183_v2  ;;  %2311 = vmatprep.mubr.f32.mxu0 %v1690_v4  ;;  %9903 = vmatpush3.bf16.msra.mxu0 %v9900_v50 }
 0x1a0   : > { %2312 = vmatmul.mubr.f32.gmra.mrb[40].mxu0 %v1689_v12  ;;  %v1442_v63 = vpop.permute.xlu0 %1441  ;;  %v1185_v27 = vpop.permute.xlu1 %1184  ;;  %v1695_v0 = vld [vmem:[#allocation3 + $0x360] sm:$0xff]  ;;  %v1694_v25 = vld [vmem:[#allocation3 + $0x358] sm:$0xff] }
 0x1a1   : > { %1514 = vst.msk [vmem:[#allocation3 + $0x3b0] sm:$0xff] %vm721_vm3, %v1442_v63  ;;  %1257 = vst.msk [vmem:[#allocation3 + $0x3a8] sm:$0xff] %vm721_vm3, %v1185_v27  ;;  %2316 = vmatprep.mubr.f32.mxu0 %v1695_v0 }
 0x1a2   : > { %v12006_v41 = vpop.f32.mrb[0].mxu1 }
 0x1a3   : > { %v12008_v60 = vpop.f32.mrb[1].mxu1 }
 0x1a4   : > { %2317 = vmatmul.mubr.f32.gmra.mrb[42].mxu0 %v1694_v25  ;;  %v1444_v5 = vpop.permute.xlu0 %1443  ;;  %v1187_v34 = vpop.permute.xlu1 %1186  ;;  %v1700_v17 = vld [vmem:[#allocation3 + $0x388] sm:$0xff]  ;;  %v1699_v45 = vld [vmem:[#allocation3 + $0x380] sm:$0xff] }
 0x1a5   : > { %1515 = vst.msk [vmem:[#allocation3 + $0x3d8] sm:$0xff] %vm721_vm3, %v1444_v5  ;;  %1258 = vst.msk [vmem:[#allocation3 + $0x3d0] sm:$0xff] %vm721_vm3, %v1187_v34  ;;  %2321 = vmatprep.mubr.f32.mxu0 %v1700_v17 }
 0x1a8   : > { %2322 = vmatmul.mubr.f32.gmra.mrb[44].mxu0 %v1699_v45  ;;  %v1446_v16 = vpop.permute.xlu0 %1445  ;;  %v1189_v40 = vpop.permute.xlu1 %1188  ;;  %v1705_v28 = vld [vmem:[#allocation3 + $0x3b0] sm:$0xff]  ;;  %v1704_v8 = vld [vmem:[#allocation3 + $0x3a8] sm:$0xff] }
 0x1a9   : > { %1516 = vst.msk [vmem:[#allocation3 + $0x400] sm:$0xff] %vm721_vm3, %v1446_v16  ;;  %1259 = vst.msk [vmem:[#allocation3 + $0x3f8] sm:$0xff] %vm721_vm3, %v1189_v40  ;;  %2326 = vmatprep.mubr.f32.mxu0 %v1705_v28 }
 0x1ab   : > { %v12015_v53 = vpop.f32.mrb[2].mxu1 }
 0x1ac   : > { %2327 = vmatmul.mubr.f32.gmra.mrb[46].mxu0 %v1704_v8  ;;  %v1448_v48 = vpop.permute.xlu0 %1447  ;;  %v1191_v44 = vpop.permute.xlu1 %1190  ;;  %v1710_v7 = vld [vmem:[#allocation3 + $0x3d8] sm:$0xff]  ;;  %v1709_v29 = vld [vmem:[#allocation3 + $0x3d0] sm:$0xff] }
 0x1ad   : > { %1517 = vst.msk [vmem:[#allocation3 + $0x428] sm:$0xff] %vm721_vm3, %v1448_v48  ;;  %1260 = vst.msk [vmem:[#allocation3 + $0x420] sm:$0xff] %vm721_vm3, %v1191_v44  ;;  %2331 = vmatprep.mubr.f32.mxu0 %v1710_v7  ;;  %v12018_v21 = vpop.f32.mrb[3].mxu1  ;;  %v3909_v8 = vld [vmem:[%s15110_s3] sm:$0xff]  ;;  %v3911_v44 = vld [vmem:[%s15110_s3 + $0x10] sm:$0xff] }
 0x1ae   : > { %v9793_v48 = vpack.c.bf16 %v3910_v59, %v3909_v8  ;;  %v3912_v7 = vld [vmem:[%s15110_s3 + $0x18] sm:$0xff]  ;;  %v3931_v8 = vld [vmem:[%s15110_s3 + $0xb0] sm:$0xff] }
 0x1af   : > { %v3932_v59 = vld [vmem:[%s15110_s3 + $0xb8] sm:$0xff] }
 0x1b0   : > { %2332 = vmatmul.mubr.f32.gmra.mrb[48].mxu0 %v1709_v29  ;;  %v1450_v22 = vpop.permute.xlu0 %1449  ;;  %v1193_v42 = vpop.permute.xlu1 %1192  ;;  %v1715_v54 = vld [vmem:[#allocation3 + $0x400] sm:$0xff]  ;;  %v1714_v30 = vld [vmem:[#allocation3 + $0x3f8] sm:$0xff]  ;;  %9794 = vmatpush1.bf16.msra.mxu1 %v9793_v48  ;;  %v9796_v29 = vpack.c.bf16 %v3912_v7, %v3911_v44  ;;  %v9826_v48 = vpack.c.bf16 %v3932_v59, %v3931_v8 }
 0x1b1   : > { %1518 = vst.msk [vmem:[#allocation3 + $0x450] sm:$0xff] %vm721_vm3, %v1450_v22  ;;  %1261 = vst.msk [vmem:[#allocation3 + $0x448] sm:$0xff] %vm721_vm3, %v1193_v42  ;;  %2336 = vmatprep.mubr.f32.mxu0 %v1715_v54  ;;  %9795 = vmatprep.subr.bf16.mxu1 %v15120_v1  ;;  %v3913_v42 = vld [vmem:[%s15110_s3 + $0x20] sm:$0xff]  ;;  %v3914_v54 = vld [vmem:[%s15110_s3 + $0x28] sm:$0xff] }
 0x1b2   : > { %v12022_v24 = vpop.f32.mrb[4].mxu1 }
 0x1b3   : > { %v12029_v38 = vpop.f32.mrb[5].mxu1 }
 0x1b4   : > { %2337 = vmatmul.mubr.f32.gmra.mrb[50].mxu0 %v1714_v30  ;;  %v1452_v3 = vpop.permute.xlu0 %1451  ;;  %v1195_v47 = vpop.permute.xlu1 %1194  ;;  %v1720_v46 = vld [vmem:[#allocation3 + $0x428] sm:$0xff]  ;;  %v1719_v14 = vld [vmem:[#allocation3 + $0x420] sm:$0xff]  ;;  %9797 = vmatpush1.bf16.msra.mxu1 %v9796_v29  ;;  %v9799_v30 = vpack.c.bf16 %v3914_v54, %v3913_v42  ;;  %v3933_v29 = vld [vmem:[%s15110_s3 + $0xc0] sm:$0xff] }
 0x1b5   : > { %1519 = vst.msk [vmem:[#allocation3 + $0x478] sm:$0xff] %vm721_vm3, %v1452_v3  ;;  %1262 = vst.msk [vmem:[#allocation3 + $0x470] sm:$0xff] %vm721_vm3, %v1195_v47  ;;  %2341 = vmatprep.mubr.f32.mxu0 %v1720_v46  ;;  %9798 = vmatprep.subr.bf16.mxu1 %v15120_v1  ;;  %v3915_v3 = vld [vmem:[%s15110_s3 + $0x30] sm:$0xff]  ;;  %v3916_v47 = vld [vmem:[%s15110_s3 + $0x38] sm:$0xff] }
 0x1b6   : > { %v9802_v46 = vpack.c.bf16 %v3916_v47, %v3915_v3  ;;  %v3934_v42 = vld [vmem:[%s15110_s3 + $0xc8] sm:$0xff]  ;;  %v3935_v47 = vld [vmem:[%s15110_s3 + $0xd0] sm:$0xff] }
 0x1b7   : > { %v9829_v54 = vpack.c.bf16 %v3934_v42, %v3933_v29 }
 0x1b8   : > { %2342 = vmatmul.mubr.f32.gmra.mrb[52].mxu0 %v1719_v14  ;;  %v1454_v9 = vpop.permute.xlu0 %1453  ;;  %v1197_v37 = vpop.permute.xlu1 %1196  ;;  %v1725_v49 = vld [vmem:[#allocation3 + $0x450] sm:$0xff]  ;;  %v1724_v55 = vld [vmem:[#allocation3 + $0x448] sm:$0xff]  ;;  %9800 = vmatpush1.bf16.msra.mxu1 %v9799_v30 }
 0x1b9   : > { %1520 = vst.msk [vmem:[#allocation3 + $0x4a0] sm:$0xff] %vm721_vm3, %v1454_v9  ;;  %1263 = vst.msk [vmem:[#allocation3 + $0x498] sm:$0xff] %vm721_vm3, %v1197_v37  ;;  %2346 = vmatprep.mubr.f32.mxu0 %v1725_v49  ;;  %9801 = vmatprep.subr.bf16.mxu1 %v15120_v1  ;;  %v9805_v9 = vpack.c.bf16 %v3918_v18, %v3917_v15  ;;  %v3919_v37 = vld [vmem:[%s15110_s3 + $0x50] sm:$0xff]  ;;  %v3920_v49 = vld [vmem:[%s15110_s3 + $0x58] sm:$0xff] }
 0x1ba   : > { %v9808_v35 = vpack.c.bf16 %v3920_v49, %v3919_v37  ;;  %v12203_v30 = vld [vmem:[%s15109_s2] ss:$0 sm:$0xff] }
 0x1bb   : > { %v2661_v15 = vld [vmem:[#allocation2] sm:$0xff] }
 0x1bc   : > { %2347 = vmatmul.mubr.f32.gmra.mrb[54].mxu0 %v1724_v55  ;;  %v1456_v57 = vpop.permute.xlu0 %1455  ;;  %v1199_v19 = vpop.permute.xlu1 %1198  ;;  %v1730_v26 = vld [vmem:[#allocation3 + $0x478] sm:$0xff]  ;;  %v1729_v43 = vld [vmem:[#allocation3 + $0x470] sm:$0xff]  ;;  %9803 = vmatpush1.bf16.msra.mxu1 %v9802_v46  ;;  %v3936_v46 = vld [vmem:[%s15110_s3 + $0xd8] sm:$0xff]  ;;  %2693 = vst.msk [vmem:[#allocation3] sm:$0xff] %vm375_vm0, %v2661_v15 }
 0x1bd   : > { %1521 = vst.msk [vmem:[#allocation3 + $0x4c8] sm:$0xff] %vm721_vm3, %v1456_v57  ;;  %1264 = vst.msk [vmem:[#allocation3 + $0x4c0] sm:$0xff] %vm721_vm3, %v1199_v19  ;;  %2351 = vmatprep.mubr.f32.mxu0 %v1730_v26  ;;  %9804 = vmatprep.subr.bf16.mxu1 %v15120_v1  ;;  %v3922_v57 = vld [vmem:[%s15110_s3 + $0x68] sm:$0xff]  ;;  %v3923_v26 = vld [vmem:[%s15110_s3 + $0x70] sm:$0xff]  ;;  %v9832_v18 = vpack.c.bf16 %v3936_v46, %v3935_v47 }
 0x1be   : > { %v12050_v11 = vpop.f32.mrb[6].mxu1  ;;  %v9811_v19 = vpack.c.bf16 %v3922_v57, %v3921_v39  ;;  %v3938_v39 = vld [vmem:[%s15110_s3 + $0xe8] sm:$0xff] }
 0x1bf   : > { %v12052_v10 = vpop.f32.mrb[7].mxu1 }
 0x1c0   : > { %2352 = vmatmul.mubr.f32.gmra.mrb[56].mxu0 %v1729_v43  ;;  %v1458_v62 = vpop.permute.xlu0 %1457  ;;  %v1201_v20 = vpop.permute.xlu1 %1200  ;;  %v1735_v33 = vld [vmem:[#allocation3 + $0x4a0] sm:$0xff]  ;;  %v1734_v32 = vld [vmem:[#allocation3 + $0x498] sm:$0xff]  ;;  %9806 = vmatpush1.bf16.msra.mxu1 %v9805_v9  ;;  %v9814_v43 = vpack.c.bf16 %v3924_v6, %v3923_v26 }
 0x1c1   : > { %1522 = vst.msk [vmem:[#allocation3 + $0x4f0] sm:$0xff] %vm721_vm3, %v1458_v62  ;;  %1265 = vst.msk [vmem:[#allocation3 + $0x4e8] sm:$0xff] %vm721_vm3, %v1201_v20  ;;  %2356 = vmatprep.mubr.f32.mxu0 %v1735_v33  ;;  %9807 = vmatprep.subr.bf16.mxu1 %v15120_v1  ;;  %v3925_v62 = vld [vmem:[%s15110_s3 + $0x80] sm:$0xff]  ;;  %v3926_v20 = vld [vmem:[%s15110_s3 + $0x88] sm:$0xff] }
 0x1c2   : > { %v12062_v58 = vpop.f32.mrb[8].mxu1  ;;  %v9817_v33 = vpack.c.bf16 %v3926_v20, %v3925_v62  ;;  %v2918_v62 = vld [vmem:[#allocation2 + $0xa] sm:$0xff] }
 0x1c3   : > { %v12064_v2 = vpop.f32.mrb[9].mxu1  ;;  %2950 = vst.msk [vmem:[#allocation3 + $0x30] sm:$0xff] %vm375_vm0, %v2918_v62 }
 0x1c4   : > { %2357 = vmatmul.mubr.f32.gmra.mrb[58].mxu0 %v1734_v32  ;;  %v1740_v56 = vld [vmem:[#allocation3 + $0x4c8] sm:$0xff]  ;;  %v1739_v4 = vld [vmem:[#allocation3 + $0x4c0] sm:$0xff]  ;;  %9809 = vmatpush1.bf16.msra.mxu1 %v9808_v35  ;;  %v3937_v35 = vld [vmem:[%s15110_s3 + $0xe0] sm:$0xff] }
 0x1c5   : > { %2361 = vmatprep.mubr.f32.mxu0 %v1740_v56  ;;  %9810 = vmatprep.subr.bf16.mxu1 %v15120_v1  ;;  %v3928_v32 = vld [vmem:[%s15110_s3 + $0x98] sm:$0xff]  ;;  %v9835_v26 = vpack.c.bf16 %v3938_v39, %v3937_v35 }
 0x1c6   : > { %v9820_v23 = vpack.c.bf16 %v3928_v32, %v3927_v52  ;;  %v3940_v32 = vld [vmem:[%s15110_s3 + $0xf8] sm:$0xff] }
 0x1c8   : > { %2362 = vmatmul.mubr.f32.gmra.mrb[60].mxu0 %v1739_v4  ;;  %v1745_v12 = vld [vmem:[#allocation3 + $0x4f0] sm:$0xff]  ;;  %v1744_v63 = vld [vmem:[#allocation3 + $0x4e8] sm:$0xff]  ;;  %9812 = vmatpush1.bf16.msra.mxu1 %v9811_v19  ;;  %v2662_v19 = vld [vmem:[#allocation2 + $0x8] sm:$0xff] }
 0x1c9   : > { %2366 = vmatprep.mubr.f32.mxu0 %v1745_v12  ;;  %9813 = vmatprep.subr.bf16.mxu1 %v15120_v1  ;;  %v3929_v4 = vld [vmem:[%s15110_s3 + $0xa0] sm:$0xff]  ;;  %v3930_v12 = vld [vmem:[%s15110_s3 + $0xa8] sm:$0xff]  ;;  %2694 = vst.msk [vmem:[#allocation3 + $0x28] sm:$0xff] %vm375_vm0, %v2662_v19 }
 0x1cc   : > { %2367 = vmatmul.mubr.f32.gmra.mrb[62].mxu0 %v1744_v63  ;;  %9815 = vmatpush1.bf16.msra.mxu1 %v9814_v43  ;;  %v9823_v63 = vpack.c.bf16 %v3930_v12, %v3929_v4 }
 0x1cd   : > { %9816 = vmatprep.subr.bf16.mxu1 %v15120_v1 }
 0x1ce   : > { %v12066_v27 = vpop.f32.mrb[10].mxu1 }
 0x1cf   : > { %v12068_v0 = vpop.f32.mrb[11].mxu1 }
 0x1d0   : > { %9818 = vmatpush1.bf16.msra.mxu1 %v9817_v33 }
 0x1d1   : > { %9819 = vmatprep.subr.bf16.mxu1 %v15120_v1 }
 0x1d2   : > { %v12070_v25 = vpop.f32.mrb[12].mxu1 }
 0x1d3   : > { %v12072_v5 = vpop.f32.mrb[13].mxu1 }
 0x1d4   : > { %9821 = vmatpush1.bf16.msra.mxu1 %v9820_v23 }
 0x1d5   : > { %9822 = vmatprep.subr.bf16.mxu1 %v15120_v1 }
 0x1d8   : > { %9824 = vmatpush1.bf16.msra.mxu1 %v9823_v63 }
 0x1d9   : > { %9825 = vmatprep.subr.bf16.mxu1 %v15120_v1 }
 0x1dc   : > { %9827 = vmatpush1.bf16.msra.mxu1 %v9826_v48 }
 0x1dd   : > { %9828 = vmatprep.subr.bf16.mxu1 %v15120_v1 }
 0x1de   : > { %v12074_v34 = vpop.f32.mrb[14].mxu1 }
 0x1df   : > { %v12076_v17 = vpop.f32.mrb[15].mxu1 }
 0x1e0   : > { %9830 = vmatpush1.bf16.msra.mxu1 %v9829_v54 }
 0x1e1   : > { %9831 = vmatprep.subr.bf16.mxu1 %v15120_v1 }
 0x1e2   : > { %v12078_v45 = vpop.f32.mrb[16].mxu1 }
 0x1e3   : > { %v12080_v16 = vpop.f32.mrb[17].mxu1 }
 0x1e4   : > { %v2790_v3 = vpop.permute.xlu1 %2789  ;;  %9833 = vmatpush1.bf16.msra.mxu1 %v9832_v18 }
 0x1e5   : > { %2885 = vst.msk [vmem:[#allocation3] sm:$0xff] %vm721_vm3, %v2790_v3  ;;  %9834 = vmatprep.subr.bf16.mxu1 %v15120_v1 }
 0x1e8   : > { %v2792_v43 = vpop.permute.xlu1 %2791  ;;  %9836 = vmatpush1.bf16.msra.mxu1 %v9835_v26 }
 0x1e9   : > { %2886 = vst.msk [vmem:[#allocation3 + $0x28] sm:$0xff] %vm721_vm3, %v2792_v43  ;;  %9837 = vmatprep.subr.bf16.mxu1 %v15120_v1 }
 0x1ec   : > { %v12082_v40 = vpop.f32.mrb[18].mxu1 }
 0x1ed   : > { %v12084_v28 = vpop.f32.mrb[19].mxu1 }
 0x1f0   : > { %v12099_v51 = vpop.f32.mrb[20].mxu1 }
 0x1f1   : > { %v12101_v22 = vpop.f32.mrb[21].mxu1 }
 0x1fa   : > { %v12117_v31 = vpop.f32.mrb[22].mxu1 }
 0x1fb   : > { %v12119_v14 = vpop.f32.mrb[23].mxu1 }
 0x1ff   : > { %v12135_v55 = vpop.f32.mrb[24].mxu1 }
 0x200   : > { %v12137_v61 = vpop.f32.mrb[25].mxu1 }
 0x207   : > { %v12153_v36 = vpop.f32.mrb[26].mxu1 }
 0x208   : > { %v12155_v13 = vpop.f32.mrb[27].mxu1 }
 0x20b   : > { %v12171_v50 = vpop.f32.mrb[28].mxu1 }
 0x20c   : > { %v12173_v56 = vpop.f32.mrb[29].mxu1 }
 0x217   : > { %v12189_v44 = vpop.f32.mrb[30].mxu1 }
 0x218   : > { %v12191_v7 = vpop.f32.mrb[31].mxu1 }
 0x223   : > { %v2213_v9 = vpop.f32.mrb[0].mxu0 }
 0x224   : > { %v10448_v37 = vadd.f32 %v12203_v30, %v2213_v9  ;;  %v2215_v49 = vpop.f32.mrb[1].mxu0 }
 0x226   : > { %v2439_v57 = vadd.f32 %v10448_v37, %v12008_v60  ;;  %v3939_v60 = vld [vmem:[%s15110_s3 + $0xf0] sm:$0xff] }
 0x227   : > { %v2218_v6 = vpop.f32.mrb[2].mxu0  ;;  %v9838_v4 = vpack.c.bf16 %v3940_v32, %v3939_v60 }
 0x228   : > { %v2597_v20 = vmax.f32 %v2439_v57, 0.0  ;;  %v10449_v33 = vadd.f32 %v12203_v30, %v2218_v6  ;;  %v2220_v52 = vpop.f32.mrb[3].mxu0 }
 0x229   : > { %9839 = vmatpush1.bf16.msra.mxu1 %v9838_v4 }
 0x22a   : > { %2629 = vst.msk [vmem:[#allocation2 + $0x19] sm:$0xff] %vm375_vm0, %v2597_v20  ;;  %v2444_v23 = vadd.f32 %v10449_v33, %v12006_v41  ;;  %9840 = vmatprep.subr.bf16.mxu1 %v15120_v1 }
 0x22b   : > { %v2223_v12 = vpop.f32.mrb[4].mxu0 }
 0x22c   : > { %v2598_v63 = vmax.f32 %v2444_v23, 0.0  ;;  %v10450_v8 = vadd.f32 %v12203_v30, %v2223_v12  ;;  %v2225_v59 = vpop.f32.mrb[5].mxu0 }
 0x22e   : > { %2630 = vst.msk [vmem:[#allocation2 + $0x21] sm:$0xff] %vm375_vm0, %v2598_v63  ;;  %v2449_v48 = vadd.f32 %v10450_v8, %v12018_v21 }
 0x22f   : > { %v2228_v29 = vpop.f32.mrb[6].mxu0 }
 0x230   : > { %v2599_v42 = vmax.f32 %v2449_v48, 0.0  ;;  %v10451_v54 = vadd.f32 %v12203_v30, %v2228_v29  ;;  %v2230_v3 = vpop.f32.mrb[7].mxu0 }
 0x231   : > { %v2981_v47 = vld [vmem:[#allocation2 + $0x18] sm:$0xff] }
 0x232   : > { %v2727_v41 = vld [vmem:[#allocation2 + $0x19] sm:$0xff]  ;;  %2631 = vst.msk [vmem:[#allocation2 + $0x31] sm:$0xff] %vm375_vm0, %v2599_v42  ;;  %v2454_v15 = vadd.f32 %v10451_v54, %v12015_v53  ;;  %3045 = vrot.lane.b32.xlu0 %v2981_v47, %s10827_s25  ;;  %2695 = vst.msk [vmem:[#allocation3 + $0x50] sm:$0xff] %vm375_vm0, %v2981_v47 }
 0x233   : > { %v3173_v46 = vld [vmem:[#allocation2 + $0x19] sm:$0xff]  ;;  %2793 = vrot.lane.b32.xlu1 %v2727_v41, %s10827_s25  ;;  %v2233_v21 = vpop.f32.mrb[8].mxu0 }
 0x234   : > { %3205 = vst.msk [vmem:[#allocation3 + $0x10] sm:$0xff] %vm375_vm0, %v3173_v46  ;;  %v2600_v18 = vmax.f32 %v2454_v15, 0.0  ;;  %v10452_v9 = vadd.f32 %v12203_v30, %v2233_v21  ;;  %v2235_v37 = vpop.f32.mrb[9].mxu0 }
 0x235   : > { %v2982_v49 = vld [vmem:[#allocation2 + $0x20] sm:$0xff] }
 0x236   : > { %v2728_v35 = vld [vmem:[#allocation2 + $0x21] sm:$0xff]  ;;  %2632 = vst.msk [vmem:[#allocation2 + $0x39] sm:$0xff] %vm375_vm0, %v2600_v18  ;;  %v2459_v53 = vadd.f32 %v10452_v9, %v12029_v38  ;;  %3047 = vrot.lane.b32.xlu0 %v2982_v49, %s10827_s25 }
 0x237   : > { %v2664_v39 = vld [vmem:[#allocation2 + $0x20] sm:$0xff]  ;;  %2795 = vrot.lane.b32.xlu1 %v2728_v35, %s10827_s25  ;;  %v2238_v26 = vpop.f32.mrb[10].mxu0 }
 0x238   : > { %2696 = vst.msk [vmem:[#allocation3 + $0x78] sm:$0xff] %vm375_vm0, %v2664_v39  ;;  %v12253_v57 = vld [vmem:[#allocation2 + $0x1a] sm:$0xff]  ;;  %v12255_v19 = vld [vmem:[#allocation2 + $0x22] sm:$0xff]  ;;  %v2601_v43 = vmax.f32 %v2459_v53, 0.0  ;;  %v10453_v38 = vadd.f32 %v12203_v30, %v2238_v26  ;;  %v2240_v62 = vpop.f32.mrb[11].mxu0 }
 0x239   : > { %2951 = vst.msk [vmem:[#allocation3 + $0x58] sm:$0xff] %vm375_vm0, %v12253_v57  ;;  %2952 = vst.msk [vmem:[#allocation3 + $0x80] sm:$0xff] %vm375_vm0, %v12255_v19  ;;  %v3174_v6 = vld [vmem:[#allocation2 + $0x21] sm:$0xff]  ;;  %v2983_v20 = vld [vmem:[#allocation2 + $0x30] sm:$0xff] }
 0x23a   : > { %3206 = vst.msk [vmem:[#allocation3 + $0x38] sm:$0xff] %vm375_vm0, %v3174_v6  ;;  %v2729_v33 = vld [vmem:[#allocation2 + $0x31] sm:$0xff]  ;;  %2633 = vst.msk [vmem:[#allocation2 + $0x49] sm:$0xff] %vm375_vm0, %v2601_v43  ;;  %v2464_v60 = vadd.f32 %v10453_v38, %v12022_v24  ;;  %3049 = vrot.lane.b32.xlu0 %v2983_v20, %s10827_s25 }
 0x23b   : > { %v2665_v52 = vld [vmem:[#allocation2 + $0x30] sm:$0xff]  ;;  %2797 = vrot.lane.b32.xlu1 %v2729_v33, %s10827_s25  ;;  %v2243_v4 = vpop.f32.mrb[12].mxu0 }
 0x23c   : > { %2697 = vst.msk [vmem:[#allocation3 + $0xa0] sm:$0xff] %vm375_vm0, %v2665_v52  ;;  %v3429_v32 = vld [vmem:[#allocation2 + $0x30] sm:$0xff]  ;;  %v2602_v12 = vmax.f32 %v2464_v60, 0.0  ;;  %v10454_v63 = vadd.f32 %v12203_v30, %v2243_v4  ;;  %v2245_v8 = vpop.f32.mrb[13].mxu0 }
 0x23d   : > { %v3175_v23 = vld [vmem:[#allocation2 + $0x31] sm:$0xff]  ;;  %3461 = vst.msk [vmem:[#allocation3 + $0x18] sm:$0xff] %vm375_vm0, %v3429_v32  ;;  %v2730_v48 = vld [vmem:[#allocation2 + $0x39] sm:$0xff] }
 0x23e   : > { %3207 = vst.msk [vmem:[#allocation3 + $0x60] sm:$0xff] %vm375_vm0, %v3175_v23  ;;  %v2984_v59 = vld [vmem:[#allocation2 + $0x38] sm:$0xff]  ;;  %2634 = vst.msk [vmem:[#allocation2 + $0x51] sm:$0xff] %vm375_vm0, %v2602_v12  ;;  %v2469_v29 = vadd.f32 %v10454_v63, %v12052_v10 }
 0x23f   : > { %v3685_v24 = vld [vmem:[#allocation2 + $0x32] sm:$0xff]  ;;  %3051 = vrot.lane.b32.xlu0 %v2984_v59, %s10827_s25  ;;  %2799 = vrot.lane.b32.xlu1 %v2730_v48, %s10827_s25  ;;  %v3686_v42 = vld [vmem:[#allocation2 + $0x3a] sm:$0xff]  ;;  %v2248_v47 = vpop.f32.mrb[14].mxu0 }
 0x240   : > { %3717 = vst.msk [vmem:[#allocation3 + $0x20] sm:$0xff] %vm375_vm0, %v3685_v24  ;;  %v2666_v54 = vld [vmem:[#allocation2 + $0x38] sm:$0xff]  ;;  %3718 = vst.msk [vmem:[#allocation3 + $0x48] sm:$0xff] %vm375_vm0, %v3686_v42  ;;  %v2603_v10 = vmax.f32 %v2469_v29, 0.0  ;;  %v10455_v46 = vadd.f32 %v12203_v30, %v2248_v47  ;;  %v2250_v15 = vpop.f32.mrb[15].mxu0 }
 0x241   : > { %v12276_v3 = vld [vmem:[#allocation2 + $0x32] sm:$0xff]  ;;  %2698 = vst.msk [vmem:[#allocation3 + $0xc8] sm:$0xff] %vm375_vm0, %v2666_v54  ;;  %v12282_v41 = vld [vmem:[#allocation2 + $0x3a] sm:$0xff]  ;;  %v2985_v9 = vld [vmem:[#allocation2 + $0x48] sm:$0xff] }
 0x242   : > { %2953 = vst.msk [vmem:[#allocation3 + $0xa8] sm:$0xff] %vm375_vm0, %v12276_v3  ;;  %2954 = vst.msk [vmem:[#allocation3 + $0xd0] sm:$0xff] %vm375_vm0, %v12282_v41  ;;  %v3430_v21 = vld [vmem:[#allocation2 + $0x38] sm:$0xff]  ;;  %v2731_v37 = vld [vmem:[#allocation2 + $0x49] sm:$0xff]  ;;  %v2474_v35 = vadd.f32 %v10455_v46, %v12050_v11 }
 0x243   : > { %v3176_v18 = vld [vmem:[#allocation2 + $0x39] sm:$0xff]  ;;  %v2667_v49 = vld [vmem:[#allocation2 + $0x48] sm:$0xff]  ;;  %3462 = vst.msk [vmem:[#allocation3 + $0x40] sm:$0xff] %vm375_vm0, %v3430_v21  ;;  %2635 = vst.msk [vmem:[#allocation2 + $0x61] sm:$0xff] %vm375_vm0, %v2603_v10  ;;  %3053 = vrot.lane.b32.xlu0 %v2985_v9, %s10827_s25  ;;  %2801 = vrot.lane.b32.xlu1 %v2731_v37, %s10827_s25  ;;  %v2253_v26 = vpop.f32.mrb[16].mxu0 }
 0x244   : > { %3208 = vst.msk [vmem:[#allocation3 + $0x88] sm:$0xff] %vm375_vm0, %v3176_v18  ;;  %2699 = vst.msk [vmem:[#allocation3 + $0xf0] sm:$0xff] %vm375_vm0, %v2667_v49  ;;  %v3431_v39 = vld [vmem:[#allocation2 + $0x48] sm:$0xff]  ;;  %v2604_v6 = vmax.f32 %v2474_v35, 0.0  ;;  %v10456_v43 = vadd.f32 %v12203_v30, %v2253_v26  ;;  %v2255_v38 = vpop.f32.mrb[17].mxu0 }
 0x245   : > { %v3177_v53 = vld [vmem:[#allocation2 + $0x49] sm:$0xff]  ;;  %3463 = vst.msk [vmem:[#allocation3 + $0x68] sm:$0xff] %vm375_vm0, %v3431_v39  ;;  %v2732_v11 = vld [vmem:[#allocation2 + $0x51] sm:$0xff] }
 0x246   : > { %3209 = vst.msk [vmem:[#allocation3 + $0xb0] sm:$0xff] %vm375_vm0, %v3177_v53  ;;  %v2986_v20 = vld [vmem:[#allocation2 + $0x50] sm:$0xff]  ;;  %2636 = vst.msk [vmem:[#allocation2 + $0x69] sm:$0xff] %vm375_vm0, %v2604_v6  ;;  %v2479_v33 = vadd.f32 %v10456_v43, %v12064_v2 }
 0x247   : > { %v3753_v62 = vld [vmem:[#allocation3 + $0x20] sm:$0xff]  ;;  %3055 = vrot.lane.b32.xlu0 %v2986_v20, %s10827_s25  ;;  %v3758_v52 = vld [vmem:[#allocation3 + $0x48] sm:$0xff]  ;;  %2803 = vrot.lane.b32.xlu1 %v2732_v11, %s10827_s25  ;;  %v2258_v23 = vpop.f32.mrb[18].mxu0 }
 0x248   : > { %9568 = vmatprep.mubr.msk.f32.mxu0 %vm375_vm0, %v3753_v62  ;;  %v3687_v60 = vld [vmem:[#allocation2 + $0x4a] sm:$0xff]  ;;  %v3688_v32 = vld [vmem:[#allocation2 + $0x52] sm:$0xff]  ;;  %v2605_v2 = vmax.f32 %v2479_v33, 0.0  ;;  %v10457_v63 = vadd.f32 %v12203_v30, %v2258_v23  ;;  %v2260_v8 = vpop.f32.mrb[19].mxu0 }
 0x249   : > { %9569 = vmatmul.mubr.msk.f32.vlgmr.msra.gmra.mrb[64].mxu0 %vm375_vm0, %v3758_v52  ;;  %3719 = vst.msk [vmem:[#allocation3 + $0x70] sm:$0xff] %vm375_vm0, %v3687_v60  ;;  %3720 = vst.msk [vmem:[#allocation3 + $0x98] sm:$0xff] %vm375_vm0, %v3688_v32  ;;  %v2668_v4 = vld [vmem:[#allocation2 + $0x50] sm:$0xff] }
 0x24a   : > { %v12305_v12 = vld [vmem:[#allocation2 + $0x4a] sm:$0xff]  ;;  %2700 = vst.msk [vmem:[#allocation3 + $0x118] sm:$0xff] %vm375_vm0, %v2668_v4  ;;  %v12311_v59 = vld [vmem:[#allocation2 + $0x52] sm:$0xff]  ;;  %v2987_v48 = vld [vmem:[#allocation2 + $0x60] sm:$0xff]  ;;  %v2484_v42 = vadd.f32 %v10457_v63, %v12062_v58 }
 0x24b   : > { %2955 = vst.msk [vmem:[#allocation3 + $0xf8] sm:$0xff] %vm375_vm0, %v12305_v12  ;;  %v2733_v24 = vld [vmem:[#allocation2 + $0x61] sm:$0xff]  ;;  %2956 = vst.msk [vmem:[#allocation3 + $0x120] sm:$0xff] %vm375_vm0, %v12311_v59  ;;  %3057 = vrot.lane.b32.xlu0 %v2987_v48, %s10827_s25  ;;  %v3432_v54 = vld [vmem:[#allocation2 + $0x50] sm:$0xff]  ;;  %v2263_v10 = vpop.f32.mrb[20].mxu0 }
 0x24c   : > { %v2669_v29 = vld [vmem:[#allocation2 + $0x60] sm:$0xff]  ;;  %2637 = vst.msk [vmem:[#allocation2 + $0x79] sm:$0xff] %vm375_vm0, %v2605_v2  ;;  %v3178_v47 = vld [vmem:[#allocation2 + $0x51] sm:$0xff]  ;;  %2805 = vrot.lane.b32.xlu1 %v2733_v24, %s10827_s25  ;;  %3464 = vst.msk [vmem:[#allocation3 + $0x90] sm:$0xff] %vm375_vm0, %v3432_v54  ;;  %v2606_v21 = vmax.f32 %v2484_v42, 0.0  ;;  %v10458_v18 = vadd.f32 %v12203_v30, %v2263_v10  ;;  %v2265_v9 = vpop.f32.mrb[21].mxu0 }
 0x24d   : > { %2701 = vst.msk [vmem:[#allocation3 + $0x140] sm:$0xff] %vm375_vm0, %v2669_v29  ;;  %3210 = vst.msk [vmem:[#allocation3 + $0xd8] sm:$0xff] %vm375_vm0, %v3178_v47  ;;  %v3433_v46 = vld [vmem:[#allocation2 + $0x60] sm:$0xff]  ;;  %v2988_v58 = vld [vmem:[#allocation2 + $0x68] sm:$0xff] }
 0x24e   : > { %v3179_v15 = vld [vmem:[#allocation2 + $0x61] sm:$0xff]  ;;  %3465 = vst.msk [vmem:[#allocation3 + $0xb8] sm:$0xff] %vm375_vm0, %v3433_v46  ;;  %v2734_v37 = vld [vmem:[#allocation2 + $0x69] sm:$0xff]  ;;  %2638 = vst.msk [vmem:[#allocation2 + $0x81] sm:$0xff] %vm375_vm0, %v2606_v21  ;;  %v2489_v35 = vadd.f32 %v10458_v18, %v12068_v0 }
 0x24f   : > { %3211 = vst.msk [vmem:[#allocation3 + $0x100] sm:$0xff] %vm375_vm0, %v3179_v15  ;;  %v3689_v49 = vld [vmem:[#allocation2 + $0x62] sm:$0xff]  ;;  %3059 = vrot.lane.b32.xlu0 %v2988_v58, %s10827_s25  ;;  %v3690_v26 = vld [vmem:[#allocation2 + $0x6a] sm:$0xff]  ;;  %v2268_v6 = vpop.f32.mrb[22].mxu0 }
 0x250   : > { %v3763_v39 = vld [vmem:[#allocation3 + $0x70] sm:$0xff]  ;;  %v3768_v53 = vld [vmem:[#allocation3 + $0x98] sm:$0xff]  ;;  %3721 = vst.msk [vmem:[#allocation3 + $0xc0] sm:$0xff] %vm375_vm0, %v3689_v49  ;;  %2807 = vrot.lane.b32.xlu1 %v2734_v37, %s10827_s25  ;;  %3722 = vst.msk [vmem:[#allocation3 + $0xe8] sm:$0xff] %vm375_vm0, %v3690_v26  ;;  %v2607_v62 = vmax.f32 %v2489_v35, 0.0  ;;  %v10459_v0 = vadd.f32 %v12203_v30, %v2268_v6  ;;  %v2270_v20 = vpop.f32.mrb[23].mxu0 }
 0x251   : > { %9571 = vmatprep.mubr.msk.f32.mxu0 %vm375_vm0, %v3763_v39  ;;  %v2670_v43 = vld [vmem:[#allocation2 + $0x68] sm:$0xff] }
 0x252   : > { %v12332_v38 = vld [vmem:[#allocation2 + $0x62] sm:$0xff]  ;;  %9572 = vmatmul.mubr.msk.f32.gmra.mrb[66].mxu0 %vm375_vm0, %v3768_v53  ;;  %2702 = vst.msk [vmem:[#allocation3 + $0x168] sm:$0xff] %vm375_vm0, %v2670_v43  ;;  %v12339_v11 = vld [vmem:[#allocation2 + $0x6a] sm:$0xff]  ;;  %2639 = vst.msk [vmem:[#allocation2 + $0x91] sm:$0xff] %vm375_vm0, %v2607_v62  ;;  %v2494_v32 = vadd.f32 %v10459_v0, %v12066_v27 }
 0x253   : > { %2957 = vst.msk [vmem:[#allocation3 + $0x148] sm:$0xff] %vm375_vm0, %v12332_v38  ;;  %v2989_v33 = vld [vmem:[#allocation2 + $0x78] sm:$0xff]  ;;  %2958 = vst.msk [vmem:[#allocation3 + $0x170] sm:$0xff] %vm375_vm0, %v12339_v11  ;;  %v3434_v4 = vld [vmem:[#allocation2 + $0x68] sm:$0xff]  ;;  %v2273_v63 = vpop.f32.mrb[24].mxu0 }
 0x254   : > { %v2735_v52 = vld [vmem:[#allocation2 + $0x79] sm:$0xff]  ;;  %3061 = vrot.lane.b32.xlu0 %v2989_v33, %s10827_s25  ;;  %v3180_v2 = vld [vmem:[#allocation2 + $0x69] sm:$0xff]  ;;  %3466 = vst.msk [vmem:[#allocation3 + $0xe0] sm:$0xff] %vm375_vm0, %v3434_v4  ;;  %v2608_v27 = vmax.f32 %v2494_v32, 0.0  ;;  %v10460_v48 = vadd.f32 %v12203_v30, %v2273_v63  ;;  %v2275_v24 = vpop.f32.mrb[25].mxu0 }
 0x255   : > { %v2671_v60 = vld [vmem:[#allocation2 + $0x78] sm:$0xff]  ;;  %2809 = vrot.lane.b32.xlu1 %v2735_v52, %s10827_s25  ;;  %3212 = vst.msk [vmem:[#allocation3 + $0x128] sm:$0xff] %vm375_vm0, %v3180_v2  ;;  %v2990_v42 = vld [vmem:[#allocation2 + $0x80] sm:$0xff] }
 0x256   : > { %2703 = vst.msk [vmem:[#allocation3 + $0x190] sm:$0xff] %vm375_vm0, %v2671_v60  ;;  %v12347_v23 = vld [vmem:[#allocation2 + $0x79] sm:$0xff]  ;;  %v2736_v54 = vld [vmem:[#allocation2 + $0x81] sm:$0xff]  ;;  %2640 = vst.msk [vmem:[#allocation2 + $0x99] sm:$0xff] %vm375_vm0, %v2608_v27  ;;  %v2499_v47 = vadd.f32 %v10460_v48, %v12072_v5 }
 0x257   : > { %v3435_v8 = vld [vmem:[#allocation2 + $0x78] sm:$0xff]  ;;  %3213 = vst.msk [vmem:[#allocation3 + $0x150] sm:$0xff] %vm375_vm0, %v12347_v23  ;;  %v3773_v29 = vld [vmem:[#allocation3 + $0xc0] sm:$0xff]  ;;  %v3692_v15 = vld [vmem:[#allocation2 + $0x82] sm:$0xff]  ;;  %v2278_v21 = vpop.f32.mrb[26].mxu0 }
 0x258   : > { %3467 = vst.msk [vmem:[#allocation3 + $0x108] sm:$0xff] %vm375_vm0, %v3435_v8  ;;  %9574 = vmatprep.mubr.msk.f32.mxu0 %vm375_vm0, %v3773_v29  ;;  %3063 = vrot.lane.b32.xlu0 %v2990_v42, %s10827_s25  ;;  %v3778_v10 = vld [vmem:[#allocation3 + $0xe8] sm:$0xff]  ;;  %3724 = vst.msk [vmem:[#allocation3 + $0x138] sm:$0xff] %vm375_vm0, %v3692_v15  ;;  %v2672_v18 = vld [vmem:[#allocation2 + $0x80] sm:$0xff]  ;;  %v2609_v58 = vmax.f32 %v2499_v47, 0.0  ;;  %v10461_v37 = vadd.f32 %v12203_v30, %v2278_v21  ;;  %v2280_v49 = vpop.f32.mrb[27].mxu0 }
 0x259   : > { %v3691_v46 = vld [vmem:[#allocation2 + $0x7a] sm:$0xff]  ;;  %2811 = vrot.lane.b32.xlu1 %v2736_v54, %s10827_s25  ;;  %9575 = vmatmul.mubr.msk.f32.gmra.mrb[68].mxu0 %vm375_vm0, %v3778_v10  ;;  %2704 = vst.msk [vmem:[#allocation3 + $0x1b8] sm:$0xff] %vm375_vm0, %v2672_v18  ;;  %v12372_v35 = vld [vmem:[#allocation2 + $0x82] sm:$0xff]  ;;  %v2991_v39 = vld [vmem:[#allocation2 + $0x90] sm:$0xff] }
 0x25a   : > { %3723 = vst.msk [vmem:[#allocation3 + $0x110] sm:$0xff] %vm375_vm0, %v3691_v46  ;;  %v12364_v9 = vld [vmem:[#allocation2 + $0x7a] sm:$0xff]  ;;  %v2737_v53 = vld [vmem:[#allocation2 + $0x91] sm:$0xff]  ;;  %2960 = vst.msk [vmem:[#allocation3 + $0x1c0] sm:$0xff] %vm375_vm0, %v12372_v35  ;;  %v2504_v6 = vadd.f32 %v10461_v37, %v12070_v25 }
 0x25b   : > { %v12366_v5 = vld [vmem:[#allocation2 + $0x81] sm:$0xff]  ;;  %2959 = vst.msk [vmem:[#allocation3 + $0x198] sm:$0xff] %vm375_vm0, %v12364_v9  ;;  %v2673_v26 = vld [vmem:[#allocation2 + $0x90] sm:$0xff]  ;;  %2641 = vst.msk [vmem:[#allocation2 + $0xa9] sm:$0xff] %vm375_vm0, %v2609_v58  ;;  %v2283_v20 = vpop.f32.mrb[28].mxu0 }
 0x25c   : > { %3214 = vst.msk [vmem:[#allocation3 + $0x178] sm:$0xff] %vm375_vm0, %v12366_v5  ;;  %3065 = vrot.lane.b32.xlu0 %v2991_v39, %s10827_s25  ;;  %2705 = vst.msk [vmem:[#allocation3 + $0x1e0] sm:$0xff] %vm375_vm0, %v2673_v26  ;;  %v12382_v43 = vld [vmem:[#allocation2 + $0x91] sm:$0xff]  ;;  %v3436_v62 = vld [vmem:[#allocation2 + $0x80] sm:$0xff]  ;;  %v2610_v33 = vmax.f32 %v2504_v6, 0.0  ;;  %v10462_v25 = vadd.f32 %v12203_v30, %v2283_v20  ;;  %v2285_v52 = vpop.f32.mrb[29].mxu0 }
 0x25d   : > { %v3437_v0 = vld [vmem:[#allocation2 + $0x90] sm:$0xff]  ;;  %2813 = vrot.lane.b32.xlu1 %v2737_v53, %s10827_s25  ;;  %3468 = vst.msk [vmem:[#allocation3 + $0x130] sm:$0xff] %vm375_vm0, %v3436_v62  ;;  %3215 = vst.msk [vmem:[#allocation3 + $0x1a0] sm:$0xff] %vm375_vm0, %v12382_v43  ;;  %v2992_v60 = vld [vmem:[#allocation2 + $0x98] sm:$0xff] }
 0x25e   : > { %3469 = vst.msk [vmem:[#allocation3 + $0x158] sm:$0xff] %vm375_vm0, %v3437_v0  ;;  %v2738_v32 = vld [vmem:[#allocation2 + $0x99] sm:$0xff]  ;;  %2642 = vst.msk [vmem:[#allocation2 + $0xb1] sm:$0xff] %vm375_vm0, %v2610_v33  ;;  %v2509_v2 = vadd.f32 %v10462_v25, %v12076_v17 }
 0x25f   : > { %v3693_v4 = vld [vmem:[#allocation2 + $0x92] sm:$0xff]  ;;  %v3788_v8 = vld [vmem:[#allocation3 + $0x138] sm:$0xff]  ;;  %v3694_v27 = vld [vmem:[#allocation2 + $0x9a] sm:$0xff]  ;;  %v2288_v48 = vpop.f32.mrb[30].mxu0 }
 0x260   : > { %3067 = vrot.lane.b32.xlu0 %v2992_v60, %s10827_s25  ;;  %3725 = vst.msk [vmem:[#allocation3 + $0x160] sm:$0xff] %vm375_vm0, %v3693_v4  ;;  %3726 = vst.msk [vmem:[#allocation3 + $0x188] sm:$0xff] %vm375_vm0, %v3694_v27  ;;  %v2674_v24 = vld [vmem:[#allocation2 + $0x98] sm:$0xff]  ;;  %v2611_v17 = vmax.f32 %v2509_v2, 0.0  ;;  %v10463_v54 = vadd.f32 %v12203_v30, %v2288_v48  ;;  %v2290_v47 = vpop.f32.mrb[31].mxu0 }
 0x261   : > { %v3783_v63 = vld [vmem:[#allocation3 + $0x110] sm:$0xff]  ;;  %2815 = vrot.lane.b32.xlu1 %v2738_v32, %s10827_s25  ;;  %v12397_v29 = vld [vmem:[#allocation2 + $0x92] sm:$0xff]  ;;  %2706 = vst.msk [vmem:[#allocation3 + $0x208] sm:$0xff] %vm375_vm0, %v2674_v24 }
 0x262   : > { %9577 = vmatprep.mubr.msk.f32.mxu0 %vm375_vm0, %v3783_v63  ;;  %v12399_v42 = vld [vmem:[#allocation2 + $0x99] sm:$0xff]  ;;  %2961 = vst.msk [vmem:[#allocation3 + $0x1e8] sm:$0xff] %vm375_vm0, %v12397_v29  ;;  %v2993_v46 = vld [vmem:[#allocation2 + $0xa8] sm:$0xff]  ;;  %2643 = vst.msk [vmem:[#allocation2 + $0xc1] sm:$0xff] %vm375_vm0, %v2611_v17  ;;  %v2514_v18 = vadd.f32 %v10463_v54, %v12074_v34 }
 0x263   : > { %9578 = vmatmul.mubr.msk.f32.gmra.mrb[70].mxu0 %vm375_vm0, %v3788_v8  ;;  %v12406_v10 = vld [vmem:[#allocation2 + $0x9a] sm:$0xff]  ;;  %3216 = vst.msk [vmem:[#allocation3 + $0x1c8] sm:$0xff] %vm375_vm0, %v12399_v42  ;;  %v2739_v15 = vld [vmem:[#allocation2 + $0xa9] sm:$0xff]  ;;  %v2293_v39 = vpop.f32.mrb[32].mxu0 }
 0x264   : > { %v2675_v21 = vld [vmem:[#allocation2 + $0xa8] sm:$0xff]  ;;  %2962 = vst.msk [vmem:[#allocation3 + $0x210] sm:$0xff] %vm375_vm0, %v12406_v10  ;;  %3069 = vrot.lane.b32.xlu0 %v2993_v46, %s10827_s25  ;;  %v3438_v37 = vld [vmem:[#allocation2 + $0x98] sm:$0xff]  ;;  %v2612_v53 = vmax.f32 %v2514_v18, 0.0  ;;  %v10464_v34 = vadd.f32 %v12203_v30, %v2293_v39  ;;  %v2295_v26 = vpop.f32.mrb[33].mxu0 }
 0x265   : > { %2707 = vst.msk [vmem:[#allocation3 + $0x230] sm:$0xff] %vm375_vm0, %v2675_v21  ;;  %v12416_v58 = vld [vmem:[#allocation2 + $0xa9] sm:$0xff]  ;;  %2817 = vrot.lane.b32.xlu1 %v2739_v15, %s10827_s25  ;;  %3470 = vst.msk [vmem:[#allocation3 + $0x180] sm:$0xff] %vm375_vm0, %v3438_v37  ;;  %v2740_v0 = vld [vmem:[#allocation2 + $0xb1] sm:$0xff] }
 0x266   : > { %v3439_v49 = vld [vmem:[#allocation2 + $0xa8] sm:$0xff]  ;;  %3217 = vst.msk [vmem:[#allocation3 + $0x1f0] sm:$0xff] %vm375_vm0, %v12416_v58  ;;  %v2994_v62 = vld [vmem:[#allocation2 + $0xb0] sm:$0xff]  ;;  %2644 = vst.msk [vmem:[#allocation2 + $0xc9] sm:$0xff] %vm375_vm0, %v2612_v53  ;;  %v2519_v20 = vadd.f32 %v10464_v34, %v12080_v16 }
 0x267   : > { %3471 = vst.msk [vmem:[#allocation3 + $0x1a8] sm:$0xff] %vm375_vm0, %v3439_v49  ;;  %v3793_v6 = vld [vmem:[#allocation3 + $0x160] sm:$0xff]  ;;  %v3798_v33 = vld [vmem:[#allocation3 + $0x188] sm:$0xff]  ;;  %v2298_v60 = vpop.f32.mrb[34].mxu0 }
 0x268   : > { %9580 = vmatprep.mubr.msk.f32.mxu0 %vm375_vm0, %v3793_v6  ;;  %3071 = vrot.lane.b32.xlu0 %v2994_v62, %s10827_s25  ;;  %v3695_v25 = vld [vmem:[#allocation2 + $0xaa] sm:$0xff]  ;;  %v3696_v52 = vld [vmem:[#allocation2 + $0xb2] sm:$0xff]  ;;  %v2613_v2 = vmax.f32 %v2519_v20, 0.0  ;;  %v10465_v63 = vadd.f32 %v12203_v30, %v2298_v60  ;;  %v2300_v8 = vpop.f32.mrb[35].mxu0 }
 0x269   : > { %2819 = vrot.lane.b32.xlu1 %v2740_v0, %s10827_s25  ;;  %9581 = vmatmul.mubr.msk.f32.gmra.mrb[72].mxu0 %vm375_vm0, %v3798_v33  ;;  %3727 = vst.msk [vmem:[#allocation3 + $0x1b0] sm:$0xff] %vm375_vm0, %v3695_v25  ;;  %3728 = vst.msk [vmem:[#allocation3 + $0x1d8] sm:$0xff] %vm375_vm0, %v3696_v52  ;;  %v2676_v32 = vld [vmem:[#allocation2 + $0xb0] sm:$0xff]  ;;  %v2995_v48 = vld [vmem:[#allocation2 + $0xc0] sm:$0xff] }
 0x26a   : > { %v12432_v4 = vld [vmem:[#allocation2 + $0xaa] sm:$0xff]  ;;  %2708 = vst.msk [vmem:[#allocation3 + $0x258] sm:$0xff] %vm375_vm0, %v2676_v32  ;;  %v12440_v27 = vld [vmem:[#allocation2 + $0xb2] sm:$0xff]  ;;  %3472 = vst.msk [vmem:[#allocation3 + $0x1d0] sm:$0xff] %vm375_vm0, %v2676_v32  ;;  %v2524_v54 = vadd.f32 %v10465_v63, %v12078_v45 }
 0x26b   : > { %v12434_v16 = vld [vmem:[#allocation2 + $0xb1] sm:$0xff]  ;;  %2963 = vst.msk [vmem:[#allocation3 + $0x238] sm:$0xff] %vm375_vm0, %v12432_v4  ;;  %v2741_v24 = vld [vmem:[#allocation2 + $0xc1] sm:$0xff]  ;;  %2964 = vst.msk [vmem:[#allocation3 + $0x260] sm:$0xff] %vm375_vm0, %v12440_v27  ;;  %v2303_v46 = vpop.f32.mrb[36].mxu0 }
 0x26c   : > { %3218 = vst.msk [vmem:[#allocation3 + $0x218] sm:$0xff] %vm375_vm0, %v12434_v16  ;;  %v2677_v17 = vld [vmem:[#allocation2 + $0xc0] sm:$0xff]  ;;  %2645 = vst.msk [vmem:[#allocation2 + $0xd9] sm:$0xff] %vm375_vm0, %v2613_v2  ;;  %3073 = vrot.lane.b32.xlu0 %v2995_v48, %s10827_s25  ;;  %v2614_v15 = vmax.f32 %v2524_v54, 0.0  ;;  %v10466_v21 = vadd.f32 %v12203_v30, %v2303_v46  ;;  %v2305_v18 = vpop.f32.mrb[37].mxu0 }
 0x26d   : > { %2709 = vst.msk [vmem:[#allocation3 + $0x280] sm:$0xff] %vm375_vm0, %v2677_v17  ;;  %v12451_v47 = vld [vmem:[#allocation2 + $0xc1] sm:$0xff]  ;;  %3473 = vst.msk [vmem:[#allocation3 + $0x1f8] sm:$0xff] %vm375_vm0, %v2677_v17  ;;  %2821 = vrot.lane.b32.xlu1 %v2741_v24, %s10827_s25  ;;  %v2742_v45 = vld [vmem:[#allocation2 + $0xc9] sm:$0xff] }
 0x26e   : > { %3219 = vst.msk [vmem:[#allocation3 + $0x240] sm:$0xff] %vm375_vm0, %v12451_v47  ;;  %v2996_v37 = vld [vmem:[#allocation2 + $0xc8] sm:$0xff]  ;;  %2646 = vst.msk [vmem:[#allocation2 + $0xe1] sm:$0xff] %vm375_vm0, %v2614_v15  ;;  %v2529_v39 = vadd.f32 %v10466_v21, %v12084_v28 }
 0x26f   : > { %v3697_v49 = vld [vmem:[#allocation2 + $0xc2] sm:$0xff]  ;;  %v3698_v26 = vld [vmem:[#allocation2 + $0xca] sm:$0xff]  ;;  %v2308_v6 = vpop.f32.mrb[38].mxu0 }
 0x270   : > { %v3803_v53 = vld [vmem:[#allocation3 + $0x1b0] sm:$0xff]  ;;  %3075 = vrot.lane.b32.xlu0 %v2996_v37, %s10827_s25  ;;  %v3808_v34 = vld [vmem:[#allocation3 + $0x1d8] sm:$0xff]  ;;  %3729 = vst.msk [vmem:[#allocation3 + $0x200] sm:$0xff] %vm375_vm0, %v3697_v49  ;;  %3730 = vst.msk [vmem:[#allocation3 + $0x228] sm:$0xff] %vm375_vm0, %v3698_v26  ;;  %v2615_v28 = vmax.f32 %v2529_v39, 0.0  ;;  %v10467_v33 = vadd.f32 %v12203_v30, %v2308_v6  ;;  %v2310_v25 = vpop.f32.mrb[39].mxu0 }
 0x271   : > { %9583 = vmatprep.mubr.msk.f32.mxu0 %vm375_vm0, %v3803_v53  ;;  %2823 = vrot.lane.b32.xlu1 %v2742_v45, %s10827_s25  ;;  %v2678_v62 = vld [vmem:[#allocation2 + $0xc8] sm:$0xff] }
 0x272   : > { %v12465_v0 = vld [vmem:[#allocation2 + $0xc2] sm:$0xff]  ;;  %9584 = vmatmul.mubr.msk.f32.gmra.mrb[74].mxu0 %vm375_vm0, %v3808_v34  ;;  %2710 = vst.msk [vmem:[#allocation3 + $0x2a8] sm:$0xff] %vm375_vm0, %v2678_v62  ;;  %v12474_v52 = vld [vmem:[#allocation2 + $0xca] sm:$0xff]  ;;  %3474 = vst.msk [vmem:[#allocation3 + $0x220] sm:$0xff] %vm375_vm0, %v2678_v62  ;;  %v2534_v63 = vadd.f32 %v10467_v33, %v12082_v40 }
 0x273   : > { %v12467_v20 = vld [vmem:[#allocation2 + $0xc9] sm:$0xff]  ;;  %2965 = vst.msk [vmem:[#allocation3 + $0x288] sm:$0xff] %vm375_vm0, %v12465_v0  ;;  %v2997_v60 = vld [vmem:[#allocation2 + $0xd8] sm:$0xff]  ;;  %2966 = vst.msk [vmem:[#allocation3 + $0x2b0] sm:$0xff] %vm375_vm0, %v12474_v52  ;;  %v2313_v48 = vpop.f32.mrb[40].mxu0 }
 0x274   : > { %3220 = vst.msk [vmem:[#allocation3 + $0x268] sm:$0xff] %vm375_vm0, %v12467_v20  ;;  %v2743_v32 = vld [vmem:[#allocation2 + $0xd9] sm:$0xff]  ;;  %2647 = vst.msk [vmem:[#allocation2 + $0xf1] sm:$0xff] %vm375_vm0, %v2615_v28  ;;  %3077 = vrot.lane.b32.xlu0 %v2997_v60, %s10827_s25  ;;  %v2616_v24 = vmax.f32 %v2534_v63, 0.0  ;;  %v10468_v17 = vadd.f32 %v12203_v30, %v2313_v48  ;;  %v2315_v54 = vpop.f32.mrb[41].mxu0 }
 0x275   : > { %v2679_v2 = vld [vmem:[#allocation2 + $0xd8] sm:$0xff]  ;;  %2825 = vrot.lane.b32.xlu1 %v2743_v32, %s10827_s25  ;;  %v2998_v40 = vld [vmem:[#allocation2 + $0xe0] sm:$0xff] }
 0x276   : > { %2711 = vst.msk [vmem:[#allocation3 + $0x2d0] sm:$0xff] %vm375_vm0, %v2679_v2  ;;  %v12485_v8 = vld [vmem:[#allocation2 + $0xd9] sm:$0xff]  ;;  %3475 = vst.msk [vmem:[#allocation3 + $0x248] sm:$0xff] %vm375_vm0, %v2679_v2  ;;  %v2744_v15 = vld [vmem:[#allocation2 + $0xe1] sm:$0xff]  ;;  %v2539_v21 = vadd.f32 %v10468_v17, %v12101_v22 }
 0x277   : > { %3221 = vst.msk [vmem:[#allocation3 + $0x290] sm:$0xff] %vm375_vm0, %v12485_v8  ;;  %v3813_v46 = vld [vmem:[#allocation3 + $0x200] sm:$0xff]  ;;  %2648 = vst.msk [vmem:[#allocation2 + $0xf9] sm:$0xff] %vm375_vm0, %v2616_v24  ;;  %v3818_v18 = vld [vmem:[#allocation3 + $0x228] sm:$0xff]  ;;  %v2318_v49 = vpop.f32.mrb[42].mxu0 }
 0x278   : > { %9586 = vmatprep.mubr.msk.f32.mxu0 %vm375_vm0, %v3813_v46  ;;  %3079 = vrot.lane.b32.xlu0 %v2998_v40, %s10827_s25  ;;  %v3699_v37 = vld [vmem:[#allocation2 + $0xda] sm:$0xff]  ;;  %v3700_v45 = vld [vmem:[#allocation2 + $0xe2] sm:$0xff]  ;;  %v2617_v34 = vmax.f32 %v2539_v21, 0.0  ;;  %v10469_v26 = vadd.f32 %v12203_v30, %v2318_v49  ;;  %v2320_v6 = vpop.f32.mrb[43].mxu0 }
 0x279   : > { %2827 = vrot.lane.b32.xlu1 %v2744_v15, %s10827_s25  ;;  %9587 = vmatmul.mubr.msk.f32.gmra.mrb[76].mxu0 %vm375_vm0, %v3818_v18  ;;  %3731 = vst.msk [vmem:[#allocation3 + $0x250] sm:$0xff] %vm375_vm0, %v3699_v37  ;;  %3732 = vst.msk [vmem:[#allocation3 + $0x278] sm:$0xff] %vm375_vm0, %v3700_v45  ;;  %v2680_v39 = vld [vmem:[#allocation2 + $0xe0] sm:$0xff] }
 0x27a   : > { %v12500_v53 = vld [vmem:[#allocation2 + $0xda] sm:$0xff]  ;;  %2712 = vst.msk [vmem:[#allocation3 + $0x2f8] sm:$0xff] %vm375_vm0, %v2680_v39  ;;  %v12508_v62 = vld [vmem:[#allocation2 + $0xe2] sm:$0xff]  ;;  %3476 = vst.msk [vmem:[#allocation3 + $0x270] sm:$0xff] %vm375_vm0, %v2680_v39  ;;  %v2544_v60 = vadd.f32 %v10469_v26, %v12099_v51 }
 0x27b   : > { %v12502_v22 = vld [vmem:[#allocation2 + $0xe1] sm:$0xff]  ;;  %2967 = vst.msk [vmem:[#allocation3 + $0x2d8] sm:$0xff] %vm375_vm0, %v12500_v53  ;;  %v2999_v28 = vld [vmem:[#allocation2 + $0xf0] sm:$0xff]  ;;  %2968 = vst.msk [vmem:[#allocation3 + $0x300] sm:$0xff] %vm375_vm0, %v12508_v62  ;;  %v2323_v2 = vpop.f32.mrb[44].mxu0 }
 0x27c   : > { %3222 = vst.msk [vmem:[#allocation3 + $0x2b8] sm:$0xff] %vm375_vm0, %v12502_v22  ;;  %v2745_v33 = vld [vmem:[#allocation2 + $0xf1] sm:$0xff]  ;;  %2649 = vst.msk [vmem:[#allocation2 + $0x109] sm:$0xff] %vm375_vm0, %v2617_v34  ;;  %3081 = vrot.lane.b32.xlu0 %v2999_v28, %s10827_s25  ;;  %v2618_v63 = vmax.f32 %v2544_v60, 0.0  ;;  %v10470_v48 = vadd.f32 %v12203_v30, %v2323_v2  ;;  %v2325_v24 = vpop.f32.mrb[45].mxu0 }
 0x27d   : > { %v2681_v25 = vld [vmem:[#allocation2 + $0xf0] sm:$0xff]  ;;  %2829 = vrot.lane.b32.xlu1 %v2745_v33, %s10827_s25 }
 0x27e   : > { %2713 = vst.msk [vmem:[#allocation3 + $0x320] sm:$0xff] %vm375_vm0, %v2681_v25  ;;  %v12519_v32 = vld [vmem:[#allocation2 + $0xf1] sm:$0xff]  ;;  %3477 = vst.msk [vmem:[#allocation3 + $0x298] sm:$0xff] %vm375_vm0, %v2681_v25  ;;  %v2746_v51 = vld [vmem:[#allocation2 + $0xf9] sm:$0xff]  ;;  %v2549_v46 = vadd.f32 %v10470_v48, %v12119_v14 }
 0x27f   : > { %3223 = vst.msk [vmem:[#allocation3 + $0x2e0] sm:$0xff] %vm375_vm0, %v12519_v32  ;;  %v3000_v17 = vld [vmem:[#allocation2 + $0xf8] sm:$0xff]  ;;  %2650 = vst.msk [vmem:[#allocation2 + $0x111] sm:$0xff] %vm375_vm0, %v2618_v63  ;;  %v2328_v18 = vpop.f32.mrb[46].mxu0 }
 0x280   : > { %v3701_v54 = vld [vmem:[#allocation2 + $0xf2] sm:$0xff]  ;;  %v3823_v40 = vld [vmem:[#allocation3 + $0x250] sm:$0xff]  ;;  %3083 = vrot.lane.b32.xlu0 %v3000_v17, %s10827_s25  ;;  %v3828_v15 = vld [vmem:[#allocation3 + $0x278] sm:$0xff]  ;;  %v2619_v14 = vmax.f32 %v2549_v46, 0.0  ;;  %v10471_v39 = vadd.f32 %v12203_v30, %v2328_v18  ;;  %v2330_v34 = vpop.f32.mrb[47].mxu0 }
 0x281   : > { %3733 = vst.msk [vmem:[#allocation3 + $0x2a0] sm:$0xff] %vm375_vm0, %v3701_v54  ;;  %v3702_v21 = vld [vmem:[#allocation2 + $0xfa] sm:$0xff]  ;;  %9589 = vmatprep.mubr.msk.f32.mxu0 %vm375_vm0, %v3823_v40  ;;  %2831 = vrot.lane.b32.xlu1 %v2746_v51, %s10827_s25  ;;  %v12533_v45 = vld [vmem:[#allocation2 + $0xf2] sm:$0xff] }
 0x282   : > { %3734 = vst.msk [vmem:[#allocation3 + $0x2c8] sm:$0xff] %vm375_vm0, %v3702_v21  ;;  %v2682_v37 = vld [vmem:[#allocation2 + $0xf8] sm:$0xff]  ;;  %9590 = vmatmul.mubr.msk.f32.gmra.mrb[78].mxu0 %vm375_vm0, %v3828_v15  ;;  %2969 = vst.msk [vmem:[#allocation3 + $0x328] sm:$0xff] %vm375_vm0, %v12533_v45  ;;  %v2554_v25 = vadd.f32 %v10471_v39, %v12117_v31 }
 0x283   : > { %v12535_v49 = vld [vmem:[#allocation2 + $0xf9] sm:$0xff]  ;;  %2714 = vst.msk [vmem:[#allocation3 + $0x348] sm:$0xff] %vm375_vm0, %v2682_v37  ;;  %3478 = vst.msk [vmem:[#allocation3 + $0x2c0] sm:$0xff] %vm375_vm0, %v2682_v37  ;;  %v3001_v6 = vld [vmem:[#allocation2 + $0x108] sm:$0xff]  ;;  %v2333_v2 = vpop.f32.mrb[48].mxu0 }
 0x284   : > { %v12542_v26 = vld [vmem:[#allocation2 + $0xfa] sm:$0xff]  ;;  %3224 = vst.msk [vmem:[#allocation3 + $0x308] sm:$0xff] %vm375_vm0, %v12535_v49  ;;  %v2747_v28 = vld [vmem:[#allocation2 + $0x109] sm:$0xff]  ;;  %2651 = vst.msk [vmem:[#allocation2 + $0x121] sm:$0xff] %vm375_vm0, %v2619_v14  ;;  %3085 = vrot.lane.b32.xlu0 %v3001_v6, %s10827_s25  ;;  %v2620_v63 = vmax.f32 %v2554_v25, 0.0  ;;  %v10472_v48 = vadd.f32 %v12203_v30, %v2333_v2  ;;  %v2335_v24 = vpop.f32.mrb[49].mxu0 }
 0x285   : > { %v2683_v33 = vld [vmem:[#allocation2 + $0x108] sm:$0xff]  ;;  %2970 = vst.msk [vmem:[#allocation3 + $0x350] sm:$0xff] %vm375_vm0, %v12542_v26  ;;  %2833 = vrot.lane.b32.xlu1 %v2747_v28, %s10827_s25  ;;  %v12596_v24 = vld [vmem:[%s15109_s2] ss:$0 sm:$0xff] }
 0x286   : > { %2715 = vst.msk [vmem:[#allocation3 + $0x370] sm:$0xff] %vm375_vm0, %v2683_v33  ;;  %v12553_v60 = vld [vmem:[#allocation2 + $0x109] sm:$0xff]  ;;  %3479 = vst.msk [vmem:[#allocation3 + $0x2e8] sm:$0xff] %vm375_vm0, %v2683_v33  ;;  %v2748_v51 = vld [vmem:[#allocation2 + $0x111] sm:$0xff]  ;;  %v2559_v54 = vadd.f32 %v10472_v48, %v12137_v61 }
 0x287   : > { %3225 = vst.msk [vmem:[#allocation3 + $0x330] sm:$0xff] %vm375_vm0, %v12553_v60  ;;  %v3002_v31 = vld [vmem:[#allocation2 + $0x110] sm:$0xff]  ;;  %2652 = vst.msk [vmem:[#allocation2 + $0x129] sm:$0xff] %vm375_vm0, %v2620_v63  ;;  %v2338_v21 = vpop.f32.mrb[50].mxu0 }
 0x288   : > { %v3833_v17 = vld [vmem:[#allocation3 + $0x2a0] sm:$0xff]  ;;  %3087 = vrot.lane.b32.xlu0 %v3002_v31, %s10827_s25  ;;  %v2621_v14 = vmax.f32 %v2559_v54, 0.0  ;;  %v10473_v39 = vadd.f32 %v12203_v30, %v2338_v21  ;;  %v2340_v34 = vpop.f32.mrb[51].mxu0 }
 0x289   : > { %9592 = vmatprep.mubr.msk.f32.mxu0 %vm375_vm0, %v3833_v17  ;;  %v3838_v46 = vld [vmem:[#allocation3 + $0x2c8] sm:$0xff]  ;;  %v3703_v40 = vld [vmem:[#allocation2 + $0x10a] sm:$0xff]  ;;  %2835 = vrot.lane.b32.xlu1 %v2748_v51, %s10827_s25 }
 0x28a   : > { %v3704_v15 = vld [vmem:[#allocation2 + $0x112] sm:$0xff]  ;;  %9593 = vmatmul.mubr.msk.f32.gmra.mrb[80].mxu0 %vm375_vm0, %v3838_v46  ;;  %3735 = vst.msk [vmem:[#allocation3 + $0x2f0] sm:$0xff] %vm375_vm0, %v3703_v40  ;;  %v12568_v37 = vld [vmem:[#allocation2 + $0x10a] sm:$0xff]  ;;  %2653 = vst.msk [vmem:[#allocation2 + $0x139] sm:$0xff] %vm375_vm0, %v2621_v14  ;;  %v2564_v30 = vadd.f32 %v10473_v39, %v12135_v55 }
 0x28b   : > { %3736 = vst.msk [vmem:[#allocation3 + $0x318] sm:$0xff] %vm375_vm0, %v3704_v15  ;;  %v2684_v18 = vld [vmem:[#allocation2 + $0x110] sm:$0xff]  ;;  %2971 = vst.msk [vmem:[#allocation3 + $0x378] sm:$0xff] %vm375_vm0, %v12568_v37  ;;  %v3003_v28 = vld [vmem:[#allocation2 + $0x120] sm:$0xff]  ;;  %v2343_v63 = vpop.f32.mrb[52].mxu0 }
 0x28c   : > { %v12570_v61 = vld [vmem:[#allocation2 + $0x111] sm:$0xff]  ;;  %2716 = vst.msk [vmem:[#allocation3 + $0x398] sm:$0xff] %vm375_vm0, %v2684_v18  ;;  %3480 = vst.msk [vmem:[#allocation3 + $0x310] sm:$0xff] %vm375_vm0, %v2684_v18  ;;  %v2749_v33 = vld [vmem:[#allocation2 + $0x121] sm:$0xff]  ;;  %3089 = vrot.lane.b32.xlu0 %v3003_v28, %s10827_s25  ;;  %v2622_v48 = vmax.f32 %v2564_v30, 0.0  ;;  %v10474_v55 = vadd.f32 %v12596_v24, %v2343_v63  ;;  %v2345_v17 = vpop.f32.mrb[53].mxu0 }
 0x28d   : > { %v12576_v6 = vld [vmem:[#allocation2 + $0x112] sm:$0xff]  ;;  %3226 = vst.msk [vmem:[#allocation3 + $0x358] sm:$0xff] %vm375_vm0, %v12570_v61  ;;  %v2685_v25 = vld [vmem:[#allocation2 + $0x120] sm:$0xff]  ;;  %2837 = vrot.lane.b32.xlu1 %v2749_v33, %s10827_s25 }
 0x28e   : > { %2972 = vst.msk [vmem:[#allocation3 + $0x3a0] sm:$0xff] %vm375_vm0, %v12576_v6  ;;  %2717 = vst.msk [vmem:[#allocation3 + $0x3c0] sm:$0xff] %vm375_vm0, %v2685_v25  ;;  %v12587_v2 = vld [vmem:[#allocation2 + $0x121] sm:$0xff]  ;;  %v2750_v51 = vld [vmem:[#allocation2 + $0x129] sm:$0xff]  ;;  %v2569_v46 = vadd.f32 %v10474_v55, %v12155_v13 }
 0x28f   : > { %3481 = vst.msk [vmem:[#allocation3 + $0x338] sm:$0xff] %vm375_vm0, %v2685_v25  ;;  %3227 = vst.msk [vmem:[#allocation3 + $0x380] sm:$0xff] %vm375_vm0, %v12587_v2  ;;  %v3004_v31 = vld [vmem:[#allocation2 + $0x128] sm:$0xff]  ;;  %v2348_v18 = vpop.f32.mrb[54].mxu0 }
 0x290   : > { %v3705_v54 = vld [vmem:[#allocation2 + $0x122] sm:$0xff]  ;;  %2654 = vst.msk [vmem:[#allocation2 + $0x141] sm:$0xff] %vm375_vm0, %v2622_v48  ;;  %3091 = vrot.lane.b32.xlu0 %v3004_v31, %s10827_s25  ;;  %v3706_v21 = vld [vmem:[#allocation2 + $0x12a] sm:$0xff]  ;;  %v2623_v13 = vmax.f32 %v2569_v46, 0.0  ;;  %v10475_v28 = vadd.f32 %v12596_v24, %v2348_v18  ;;  %v2350_v33 = vpop.f32.mrb[55].mxu0 }
 0x291   : > { %v3843_v40 = vld [vmem:[#allocation3 + $0x2f0] sm:$0xff]  ;;  %3737 = vst.msk [vmem:[#allocation3 + $0x340] sm:$0xff] %vm375_vm0, %v3705_v54  ;;  %2839 = vrot.lane.b32.xlu1 %v2750_v51, %s10827_s25  ;;  %3738 = vst.msk [vmem:[#allocation3 + $0x368] sm:$0xff] %vm375_vm0, %v3706_v21  ;;  %v2686_v14 = vld [vmem:[#allocation2 + $0x128] sm:$0xff] }
 0x292   : > { %v3848_v15 = vld [vmem:[#allocation3 + $0x318] sm:$0xff]  ;;  %9595 = vmatprep.mubr.msk.f32.mxu0 %vm375_vm0, %v3843_v40  ;;  %2718 = vst.msk [vmem:[#allocation3 + $0x3e8] sm:$0xff] %vm375_vm0, %v2686_v14  ;;  %3482 = vst.msk [vmem:[#allocation3 + $0x360] sm:$0xff] %vm375_vm0, %v2686_v14  ;;  %v3005_v30 = vld [vmem:[#allocation2 + $0x138] sm:$0xff]  ;;  %v2574_v55 = vadd.f32 %v10475_v28, %v12153_v36 }
 0x293   : > { %v12606_v39 = vld [vmem:[#allocation2 + $0x122] sm:$0xff]  ;;  %9596 = vmatmul.mubr.msk.f32.gmra.mrb[82].mxu0 %vm375_vm0, %v3848_v15  ;;  %v12615_v25 = vld [vmem:[#allocation2 + $0x12a] sm:$0xff]  ;;  %v2751_v63 = vld [vmem:[#allocation2 + $0x139] sm:$0xff]  ;;  %2655 = vst.msk [vmem:[#allocation2 + $0x151] sm:$0xff] %vm375_vm0, %v2623_v13  ;;  %v2353_v31 = vpop.f32.mrb[56].mxu0 }
 0x294   : > { %v12608_v34 = vld [vmem:[#allocation2 + $0x129] sm:$0xff]  ;;  %2973 = vst.msk [vmem:[#allocation3 + $0x3c8] sm:$0xff] %vm375_vm0, %v12606_v39  ;;  %v2687_v48 = vld [vmem:[#allocation2 + $0x138] sm:$0xff]  ;;  %2974 = vst.msk [vmem:[#allocation3 + $0x3f0] sm:$0xff] %vm375_vm0, %v12615_v25  ;;  %3093 = vrot.lane.b32.xlu0 %v3005_v30, %s10827_s25  ;;  %v2624_v51 = vmax.f32 %v2574_v55, 0.0  ;;  %v10476_v54 = vadd.f32 %v12596_v24, %v2353_v31  ;;  %v2355_v46 = vpop.f32.mrb[57].mxu0 }
 0x295   : > { %3228 = vst.msk [vmem:[#allocation3 + $0x3a8] sm:$0xff] %vm375_vm0, %v12608_v34  ;;  %2719 = vst.msk [vmem:[#allocation3 + $0x410] sm:$0xff] %vm375_vm0, %v2687_v48  ;;  %v12626_v17 = vld [vmem:[#allocation2 + $0x139] sm:$0xff]  ;;  %2841 = vrot.lane.b32.xlu1 %v2751_v63, %s10827_s25 }
 0x296   : > { %3483 = vst.msk [vmem:[#allocation3 + $0x388] sm:$0xff] %vm375_vm0, %v2687_v48  ;;  %3229 = vst.msk [vmem:[#allocation3 + $0x3d0] sm:$0xff] %vm375_vm0, %v12626_v17  ;;  %v2579_v21 = vadd.f32 %v10476_v54, %v12173_v56 }
 0x297   : > { %v3006_v36 = vld [vmem:[#allocation2 + $0x140] sm:$0xff]  ;;  %2656 = vst.msk [vmem:[#allocation2 + $0x159] sm:$0xff] %vm375_vm0, %v2624_v51  ;;  %v2358_v28 = vpop.f32.mrb[58].mxu0 }
 0x298   : > { %v3853_v40 = vld [vmem:[#allocation3 + $0x340] sm:$0xff]  ;;  %v2752_v15 = vld [vmem:[#allocation2 + $0x141] sm:$0xff]  ;;  %3095 = vrot.lane.b32.xlu0 %v3006_v36, %s10827_s25  ;;  %v3858_v18 = vld [vmem:[#allocation3 + $0x368] sm:$0xff]  ;;  %v2625_v63 = vmax.f32 %v2579_v21, 0.0  ;;  %v10477_v48 = vadd.f32 %v12596_v24, %v2358_v28  ;;  %v2360_v55 = vpop.f32.mrb[59].mxu0 }
 0x299   : > { %9598 = vmatprep.mubr.msk.f32.mxu0 %vm375_vm0, %v3853_v40  ;;  %v3707_v14 = vld [vmem:[#allocation2 + $0x13a] sm:$0xff]  ;;  %v3708_v13 = vld [vmem:[#allocation2 + $0x142] sm:$0xff]  ;;  %2843 = vrot.lane.b32.xlu1 %v2752_v15, %s10827_s25 }
 0x29a   : > { %9599 = vmatmul.mubr.msk.f32.gmra.mrb[84].mxu0 %vm375_vm0, %v3858_v18  ;;  %3739 = vst.msk [vmem:[#allocation3 + $0x390] sm:$0xff] %vm375_vm0, %v3707_v14  ;;  %3740 = vst.msk [vmem:[#allocation3 + $0x3b8] sm:$0xff] %vm375_vm0, %v3708_v13  ;;  %v2688_v33 = vld [vmem:[#allocation2 + $0x140] sm:$0xff]  ;;  %v3007_v51 = vld [vmem:[#allocation2 + $0x150] sm:$0xff]  ;;  %v2584_v40 = vadd.f32 %v10477_v48, %v12171_v50 }
 0x29b   : > { %v12641_v30 = vld [vmem:[#allocation2 + $0x13a] sm:$0xff]  ;;  %2720 = vst.msk [vmem:[#allocation3 + $0x438] sm:$0xff] %vm375_vm0, %v2688_v33  ;;  %v12649_v31 = vld [vmem:[#allocation2 + $0x142] sm:$0xff]  ;;  %3484 = vst.msk [vmem:[#allocation3 + $0x3b0] sm:$0xff] %vm375_vm0, %v2688_v33  ;;  %v2363_v15 = vpop.f32.mrb[60].mxu0 }
 0x29c   : > { %v12643_v56 = vld [vmem:[#allocation2 + $0x141] sm:$0xff]  ;;  %2975 = vst.msk [vmem:[#allocation3 + $0x418] sm:$0xff] %vm375_vm0, %v12641_v30  ;;  %v2753_v54 = vld [vmem:[#allocation2 + $0x151] sm:$0xff]  ;;  %2976 = vst.msk [vmem:[#allocation3 + $0x440] sm:$0xff] %vm375_vm0, %v12649_v31  ;;  %3097 = vrot.lane.b32.xlu0 %v3007_v51, %s10827_s25  ;;  %v2626_v21 = vmax.f32 %v2584_v40, 0.0  ;;  %v10478_v18 = vadd.f32 %v12596_v24, %v2363_v15  ;;  %v2365_v14 = vpop.f32.mrb[61].mxu0 }
 0x29d   : > { %3230 = vst.msk [vmem:[#allocation3 + $0x3f8] sm:$0xff] %vm375_vm0, %v12643_v56  ;;  %v2689_v46 = vld [vmem:[#allocation2 + $0x150] sm:$0xff]  ;;  %2657 = vst.msk [vmem:[#allocation2 + $0x169] sm:$0xff] %vm375_vm0, %v2625_v63  ;;  %2845 = vrot.lane.b32.xlu1 %v2753_v54, %s10827_s25 }
 0x29e   : > { %2721 = vst.msk [vmem:[#allocation3 + $0x460] sm:$0xff] %vm375_vm0, %v2689_v46  ;;  %v12660_v36 = vld [vmem:[#allocation2 + $0x151] sm:$0xff]  ;;  %3485 = vst.msk [vmem:[#allocation3 + $0x3d8] sm:$0xff] %vm375_vm0, %v2689_v46  ;;  %v2754_v50 = vld [vmem:[#allocation2 + $0x159] sm:$0xff]  ;;  %v2589_v33 = vadd.f32 %v10478_v18, %v12191_v7 }
 0x29f   : > { %3231 = vst.msk [vmem:[#allocation3 + $0x420] sm:$0xff] %vm375_vm0, %v12660_v36  ;;  %v3008_v13 = vld [vmem:[#allocation2 + $0x158] sm:$0xff]  ;;  %2658 = vst.msk [vmem:[#allocation2 + $0x171] sm:$0xff] %vm375_vm0, %v2626_v21  ;;  %v2368_v51 = vpop.f32.mrb[62].mxu0 }
 0x2a0   : > { %v3709_v28 = vld [vmem:[#allocation2 + $0x152] sm:$0xff]  ;;  %3099 = vrot.lane.b32.xlu0 %v3008_v13, %s10827_s25  ;;  %v3710_v55 = vld [vmem:[#allocation2 + $0x15a] sm:$0xff]  ;;  %v2627_v7 = vmax.f32 %v2589_v33, 0.0  ;;  %v10479_v15 = vadd.f32 %v12596_v24, %v2368_v51  ;;  %v2370_v21 = vpop.f32.mrb[63].mxu0 }
 0x2a1   : > { %v3863_v63 = vld [vmem:[#allocation3 + $0x390] sm:$0xff]  ;;  %v3868_v48 = vld [vmem:[#allocation3 + $0x3b8] sm:$0xff]  ;;  %3741 = vst.msk [vmem:[#allocation3 + $0x3e0] sm:$0xff] %vm375_vm0, %v3709_v28  ;;  %2847 = vrot.lane.b32.xlu1 %v2754_v50, %s10827_s25  ;;  %3742 = vst.msk [vmem:[#allocation3 + $0x408] sm:$0xff] %vm375_vm0, %v3710_v55 }
 0x2a2   : > { %9601 = vmatprep.mubr.msk.f32.mxu0 %vm375_vm0, %v3863_v63  ;;  %v2690_v54 = vld [vmem:[#allocation2 + $0x158] sm:$0xff]  ;;  %2659 = vst.msk [vmem:[#allocation2 + $0x181] sm:$0xff] %vm375_vm0, %v2627_v7  ;;  %v2594_v24 = vadd.f32 %v10479_v15, %v12189_v44 }
 0x2a3   : > { %v12674_v46 = vld [vmem:[#allocation2 + $0x152] sm:$0xff]  ;;  %9602 = vmatmul.mubr.msk.f32.gmra.mrb[86].mxu0 %vm375_vm0, %v3868_v48  ;;  %2722 = vst.msk [vmem:[#allocation3 + $0x488] sm:$0xff] %vm375_vm0, %v2690_v54  ;;  %v12683_v18 = vld [vmem:[#allocation2 + $0x15a] sm:$0xff]  ;;  %3486 = vst.msk [vmem:[#allocation3 + $0x400] sm:$0xff] %vm375_vm0, %v2690_v54 }
 0x2a4   : > { %v12676_v40 = vld [vmem:[#allocation2 + $0x159] sm:$0xff]  ;;  %2977 = vst.msk [vmem:[#allocation3 + $0x468] sm:$0xff] %vm375_vm0, %v12674_v46  ;;  %v3009_v14 = vld [vmem:[#allocation2 + $0x168] sm:$0xff]  ;;  %2978 = vst.msk [vmem:[#allocation3 + $0x490] sm:$0xff] %vm375_vm0, %v12683_v18  ;;  %v2628_v33 = vmax.f32 %v2594_v24, 0.0  ;;  %v3046_v63 = vpop.permute.xlu0 %3045 }
 0x2a5   : > { %3232 = vst.msk [vmem:[#allocation3 + $0x448] sm:$0xff] %vm375_vm0, %v12676_v40  ;;  %v2755_v13 = vld [vmem:[#allocation2 + $0x169] sm:$0xff]  ;;  %3101 = vrot.lane.b32.xlu0 %v3009_v14, %s10827_s25  ;;  %v2794_v48 = vpop.permute.xlu1 %2793 }
 0x2a6   : > { %v2691_v50 = vld [vmem:[#allocation2 + $0x168] sm:$0xff]  ;;  %2849 = vrot.lane.b32.xlu1 %v2755_v13, %s10827_s25  ;;  %3141 = vst.msk [vmem:[#allocation3 + $0x8] sm:$0xff] %vm721_vm3, %v3046_v63  ;;  %2887 = vst.msk [vmem:[#allocation3 + $0x50] sm:$0xff] %vm721_vm3, %v2794_v48  ;;  %v3010_v55 = vld [vmem:[#allocation2 + $0x170] sm:$0xff] }
 0x2a7   : > { %2723 = vst.msk [vmem:[#allocation3 + $0x4b0] sm:$0xff] %vm375_vm0, %v2691_v50  ;;  %v12694_v28 = vld [vmem:[#allocation2 + $0x169] sm:$0xff]  ;;  %3487 = vst.msk [vmem:[#allocation3 + $0x428] sm:$0xff] %vm375_vm0, %v2691_v50  ;;  %v2756_v51 = vld [vmem:[#allocation2 + $0x171] sm:$0xff] }
 0x2a8   : > { %3233 = vst.msk [vmem:[#allocation3 + $0x470] sm:$0xff] %vm375_vm0, %v12694_v28  ;;  %v3873_v44 = vld [vmem:[#allocation3 + $0x3e0] sm:$0xff]  ;;  %2660 = vst.msk [vmem:[#allocation2 + $0x189] sm:$0xff] %vm375_vm0, %v2628_v33  ;;  %v3878_v54 = vld [vmem:[#allocation3 + $0x408] sm:$0xff]  ;;  %v3048_v50 = vpop.permute.xlu0 %3047 }
 0x2a9   : > { %9604 = vmatprep.mubr.msk.f32.mxu0 %vm375_vm0, %v3873_v44  ;;  %3103 = vrot.lane.b32.xlu0 %v3010_v55, %s10827_s25  ;;  %v3711_v7 = vld [vmem:[#allocation2 + $0x16a] sm:$0xff]  ;;  %v3712_v15 = vld [vmem:[#allocation2 + $0x172] sm:$0xff]  ;;  %v2796_v24 = vpop.permute.xlu1 %2795  ;;  %v3941_v33 = vld [vmem:[%s15110_s3 + $0x100] sm:$0xff]  ;;  %3142 = vst.msk [vmem:[#allocation3 + $0x30] sm:$0xff] %vm721_vm3, %v3048_v50 }
 0x2aa   : > { %2851 = vrot.lane.b32.xlu1 %v2756_v51, %s10827_s25  ;;  %9605 = vmatmul.mubr.msk.f32.gmra.mrb[88].mxu0 %vm375_vm0, %v3878_v54  ;;  %3743 = vst.msk [vmem:[#allocation3 + $0x430] sm:$0xff] %vm375_vm0, %v3711_v7  ;;  %3744 = vst.msk [vmem:[#allocation3 + $0x458] sm:$0xff] %vm375_vm0, %v3712_v15  ;;  %v2692_v21 = vld [vmem:[#allocation2 + $0x170] sm:$0xff]  ;;  %v3942_v63 = vld [vmem:[%s15110_s3 + $0x108] sm:$0xff] }
 0x2ab   : > { %v12709_v14 = vld [vmem:[#allocation2 + $0x16a] sm:$0xff]  ;;  %2724 = vst.msk [vmem:[#allocation3 + $0x4d8] sm:$0xff] %vm375_vm0, %v2692_v21  ;;  %v12722_v48 = vld [vmem:[#allocation2 + $0x172] sm:$0xff]  ;;  %3488 = vst.msk [vmem:[#allocation3 + $0x450] sm:$0xff] %vm375_vm0, %v2692_v21  ;;  %v9841_v7 = vpack.c.bf16 %v3942_v63, %v3941_v33 }
 0x2ac   : > { %v12711_v13 = vld [vmem:[#allocation2 + $0x171] sm:$0xff]  ;;  %2979 = vst.msk [vmem:[#allocation3 + $0x4b8] sm:$0xff] %vm375_vm0, %v12709_v14  ;;  %15139 = vst [vmem:[#allocation7_spill] sm:$0xff] %v12722_v48  ;;  %v3011_v44 = vld [vmem:[#allocation2 + $0x180] sm:$0xff]  ;;  %v3050_v15 = vpop.permute.xlu0 %3049 }
 0x2ad   : > { %3234 = vst.msk [vmem:[#allocation3 + $0x498] sm:$0xff] %vm375_vm0, %v12711_v13  ;;  %2980 = vst.msk [vmem:[#allocation3 + $0x4e0] sm:$0xff] %vm375_vm0, %v12722_v48  ;;  %v12731_v55 = vld [vmem:[#allocation2 + $0x181] sm:$0xff]  ;;  %3105 = vrot.lane.b32.xlu0 %v3011_v44, %s10827_s25  ;;  %v3749_v54 = vld [vmem:[#allocation3] sm:$0xff]  ;;  %v2798_v21 = vpop.permute.xlu1 %2797 }
 0x2ae   : > { %2888 = vst.msk [vmem:[#allocation3 + $0x78] sm:$0xff] %vm721_vm3, %v2796_v24  ;;  %15140 = vst [vmem:[#allocation8_spill] sm:$0xff] %v12731_v55  ;;  %v3457_v51 = vld [vmem:[#allocation2 + $0x180] sm:$0xff]  ;;  %3301 = vrot.lane.b32.xlu1 %v12253_v57, %s10827_s25  ;;  %v3750_v50 = vld [vmem:[#allocation3 + $0x8] sm:$0xff] }
 0x2af   : > { %3489 = vst.msk [vmem:[#allocation3 + $0x478] sm:$0xff] %vm375_vm0, %v3457_v51  ;;  %3235 = vst.msk [vmem:[#allocation3 + $0x4c0] sm:$0xff] %vm375_vm0, %v12731_v55  ;;  %v3943_v24 = vld [vmem:[%s15110_s3 + $0x110] sm:$0xff]  ;;  %v3944_v44 = vld [vmem:[%s15110_s3 + $0x118] sm:$0xff]  ;;  %4148 = vmatprep.mubr.f32.mxu1 %v3750_v50 }
 0x2b0   : > { %3143 = vst.msk [vmem:[#allocation3 + $0x58] sm:$0xff] %vm721_vm3, %v3050_v15  ;;  %2889 = vst.msk [vmem:[#allocation3 + $0xa0] sm:$0xff] %vm721_vm3, %v2798_v21  ;;  %v3012_v51 = vld [vmem:[#allocation2 + $0x188] sm:$0xff]  ;;  %4149 = vmatmul.mubr.f32.vlgmr.msra.gmra.mrb[32].mxu1 %v3749_v54  ;;  %v3754_v55 = vld [vmem:[#allocation3 + $0x28] sm:$0xff]  ;;  %v9844_v15 = vpack.c.bf16 %v3944_v44, %v3943_v24 }
 0x2b1   : > { %v3713_v57 = vld [vmem:[#allocation2 + $0x182] sm:$0xff]  ;;  %v3714_v1 = vld [vmem:[#allocation2 + $0x18a] sm:$0xff]  ;;  %3107 = vrot.lane.b32.xlu0 %v3012_v51, %s10827_s25  ;;  %9842 = vmatpush1.bf16.msra.mxu1 %v9841_v7  ;;  %v3052_v21 = vpop.permute.xlu0 %3051  ;;  %v2800_v50 = vpop.permute.xlu1 %2799  ;;  %v15141_v7 = vmov 0.0|0.0  }
 0x2b2   : > { %v3883_v33 = vld [vmem:[#allocation3 + $0x430] sm:$0xff]  ;;  %v3888_v63 = vld [vmem:[#allocation3 + $0x458] sm:$0xff]  ;;  %3745 = vst.msk [vmem:[#allocation3 + $0x480] sm:$0xff] %vm375_vm0, %v3713_v57  ;;  %3746 = vst.msk [vmem:[#allocation3 + $0x4a8] sm:$0xff] %vm375_vm0, %v3714_v1  ;;  %3303 = vrot.lane.b32.xlu1 %v12255_v19, %s10827_s25  ;;  %9843 = vmatprep.subr.bf16.mxu1 %v15141_v7 }
 0x2b3   : > { %9607 = vmatprep.mubr.msk.f32.mxu0 %vm375_vm0, %v3883_v33  ;;  %v12751_v48 = vld [vmem:[#allocation2 + $0x189] sm:$0xff]  ;;  %v3755_v54 = vld [vmem:[#allocation3 + $0x30] sm:$0xff]  ;;  %3144 = vst.msk [vmem:[#allocation3 + $0x80] sm:$0xff] %vm721_vm3, %v3052_v21  ;;  %2890 = vst.msk [vmem:[#allocation3 + $0xc8] sm:$0xff] %vm721_vm3, %v2800_v50 }
 0x2b4   : > { %9608 = vmatmul.mubr.msk.f32.gmra.mrb[90].mxu0 %vm375_vm0, %v3888_v63  ;;  %v3458_v51 = vld [vmem:[#allocation2 + $0x188] sm:$0xff]  ;;  %3236 = vst.msk [vmem:[#allocation3 + $0x4e8] sm:$0xff] %vm375_vm0, %v12751_v48  ;;  %4153 = vmatprep.mubr.f32.mxu1 %v3755_v54  ;;  %v3493_v1 = vld [vmem:[#allocation2 + $0x31] sm:$0xff]  ;;  %v3945_v19 = vld [vmem:[%s15110_s3 + $0x120] sm:$0xff] }
 0x2b5   : > { %v3946_v24 = vld [vmem:[%s15110_s3 + $0x128] sm:$0xff]  ;;  %3490 = vst.msk [vmem:[#allocation3 + $0x4a0] sm:$0xff] %vm375_vm0, %v3458_v51  ;;  %3557 = vrot.lane.b32.xlu0 %v3493_v1, %s10827_s25  ;;  %4154 = vmatmul.mubr.f32.gmra.mrb[34].mxu1 %v3754_v55  ;;  %v3054_v44 = vpop.permute.xlu0 %3053  ;;  %v2802_v57 = vpop.permute.xlu1 %2801  ;;  %v3494_v63 = vld [vmem:[#allocation2 + $0x39] sm:$0xff]  ;;  %v3947_v50 = vld [vmem:[%s15110_s3 + $0x130] sm:$0xff] }
 0x2b6   : > { %9845 = vmatpush1.bf16.msra.mxu1 %v9844_v15  ;;  %3305 = vrot.lane.b32.xlu1 %v12276_v3, %s10827_s25  ;;  %v9847_v21 = vpack.c.bf16 %v3946_v24, %v3945_v19  ;;  %3145 = vst.msk [vmem:[#allocation3 + $0xa8] sm:$0xff] %vm721_vm3, %v3054_v44  ;;  %2891 = vst.msk [vmem:[#allocation3 + $0xf0] sm:$0xff] %vm721_vm3, %v2802_v57  ;;  %v3948_v3 = vld [vmem:[%s15110_s3 + $0x138] sm:$0xff]  ;;  %v3759_v54 = vld [vmem:[#allocation3 + $0x50] sm:$0xff] }
 0x2b7   : > { %v3760_v33 = vld [vmem:[#allocation3 + $0x58] sm:$0xff]  ;;  %9846 = vmatprep.subr.bf16.mxu1 %v15141_v7  ;;  %v9850_v19 = vpack.c.bf16 %v3948_v3, %v3947_v50  ;;  %v3949_v57 = vld [vmem:[%s15110_s3 + $0x140] sm:$0xff]  ;;  %v3951_v3 = vld [vmem:[%s15110_s3 + $0x150] sm:$0xff] }
 0x2b8   : > { %4158 = vmatprep.mubr.f32.mxu1 %v3760_v33  ;;  %v3495_v44 = vld [vmem:[#allocation2 + $0x49] sm:$0xff] }
 0x2b9   : > { %v3893_v55 = vld [vmem:[#allocation3 + $0x480] sm:$0xff]  ;;  %v3898_v15 = vld [vmem:[#allocation3 + $0x4a8] sm:$0xff]  ;;  %3559 = vrot.lane.b32.xlu0 %v3494_v63, %s10827_s25  ;;  %4159 = vmatmul.mubr.f32.gmra.mrb[36].mxu1 %v3759_v54  ;;  %v3056_v51 = vpop.permute.xlu0 %3055  ;;  %v2804_v24 = vpop.permute.xlu1 %2803  ;;  %v3950_v33 = vld [vmem:[%s15110_s3 + $0x148] sm:$0xff] }
 0x2ba   : > { %9610 = vmatprep.mubr.msk.f32.mxu0 %vm375_vm0, %v3893_v55  ;;  %3307 = vrot.lane.b32.xlu1 %v12282_v41, %s10827_s25  ;;  %v3765_v1 = vld [vmem:[#allocation3 + $0x80] sm:$0xff]  ;;  %3146 = vst.msk [vmem:[#allocation3 + $0xd0] sm:$0xff] %vm721_vm3, %v3056_v51  ;;  %2892 = vst.msk [vmem:[#allocation3 + $0x118] sm:$0xff] %vm721_vm3, %v2804_v24  ;;  %v3764_v41 = vld [vmem:[#allocation3 + $0x78] sm:$0xff]  ;;  %v9853_v50 = vpack.c.bf16 %v3950_v33, %v3949_v57 }
 0x2bb   : > { %9611 = vmatmul.mubr.msk.f32.gmra.mrb[92].mxu0 %vm375_vm0, %v3898_v15  ;;  %9848 = vmatpush1.bf16.msra.mxu1 %v9847_v21  ;;  %v3496_v15 = vld [vmem:[#allocation2 + $0x51] sm:$0xff]  ;;  %v3953_v57 = vld [vmem:[%s15110_s3 + $0x160] sm:$0xff]  ;;  %v3954_v33 = vld [vmem:[%s15110_s3 + $0x168] sm:$0xff] }
 0x2bc   : > { %4163 = vmatprep.mubr.f32.mxu1 %v3765_v1  ;;  %9849 = vmatprep.subr.bf16.mxu1 %v15141_v7  ;;  %v3952_v54 = vld [vmem:[%s15110_s3 + $0x158] sm:$0xff] }
 0x2bd   : > { %3561 = vrot.lane.b32.xlu0 %v3495_v44, %s10827_s25  ;;  %4164 = vmatmul.mubr.f32.gmra.mrb[38].mxu1 %v3764_v41  ;;  %v3058_v63 = vpop.permute.xlu0 %3057  ;;  %v3770_v21 = vld [vmem:[#allocation3 + $0xa8] sm:$0xff]  ;;  %v3497_v44 = vld [vmem:[#allocation2 + $0x61] sm:$0xff] }
 0x2be   : > { %3309 = vrot.lane.b32.xlu1 %v12305_v12, %s10827_s25  ;;  %3147 = vst.msk [vmem:[#allocation3 + $0xf8] sm:$0xff] %vm721_vm3, %v3058_v63  ;;  %v2806_v55 = vpop.permute.xlu1 %2805  ;;  %4168 = vmatprep.mubr.f32.mxu1 %v3770_v21  ;;  %v3769_v12 = vld [vmem:[#allocation3 + $0xa0] sm:$0xff]  ;;  %v9859_v21 = vpack.c.bf16 %v3954_v33, %v3953_v57 }
 0x2bf   : > { %9851 = vmatpush1.bf16.msra.mxu1 %v9850_v19  ;;  %2893 = vst.msk [vmem:[#allocation3 + $0x140] sm:$0xff] %vm721_vm3, %v2806_v55  ;;  %v9856_v19 = vpack.c.bf16 %v3952_v54, %v3951_v3  ;;  %v3498_v55 = vld [vmem:[#allocation2 + $0x69] sm:$0xff]  ;;  %v3956_v3 = vld [vmem:[%s15110_s3 + $0x178] sm:$0xff] }
 0x2c0   : > { %9852 = vmatprep.subr.bf16.mxu1 %v15141_v7 }
 0x2c1   : > { %3563 = vrot.lane.b32.xlu0 %v3496_v15, %s10827_s25  ;;  %4169 = vmatmul.mubr.f32.gmra.mrb[40].mxu1 %v3769_v12  ;;  %v3060_v51 = vpop.permute.xlu0 %3059  ;;  %v3775_v1 = vld [vmem:[#allocation3 + $0xd0] sm:$0xff]  ;;  %v3955_v15 = vld [vmem:[%s15110_s3 + $0x170] sm:$0xff] }
 0x2c2   : > { %3311 = vrot.lane.b32.xlu1 %v12311_v59, %s10827_s25  ;;  %3148 = vst.msk [vmem:[#allocation3 + $0x120] sm:$0xff] %vm721_vm3, %v3060_v51  ;;  %v2808_v24 = vpop.permute.xlu1 %2807  ;;  %4173 = vmatprep.mubr.f32.mxu1 %v3775_v1  ;;  %v3774_v59 = vld [vmem:[#allocation3 + $0xc8] sm:$0xff]  ;;  %v9862_v51 = vpack.c.bf16 %v3956_v3, %v3955_v15  ;;  %v3961_v15 = vld [vmem:[%s15110_s3 + $0x1a0] sm:$0xff] }
 0x2c3   : > { %9854 = vmatpush1.bf16.msra.mxu1 %v9853_v50  ;;  %2894 = vst.msk [vmem:[#allocation3 + $0x168] sm:$0xff] %vm721_vm3, %v2808_v24  ;;  %v3958_v24 = vld [vmem:[%s15110_s3 + $0x188] sm:$0xff] }
 0x2c4   : > { %9855 = vmatprep.subr.bf16.mxu1 %v15141_v7 }
 0x2c5   : > { %3565 = vrot.lane.b32.xlu0 %v3497_v44, %s10827_s25  ;;  %4174 = vmatmul.mubr.f32.gmra.mrb[42].mxu1 %v3774_v59  ;;  %v3780_v63 = vld [vmem:[#allocation3 + $0xf8] sm:$0xff] }
 0x2c6   : > { %3313 = vrot.lane.b32.xlu1 %v12332_v38, %s10827_s25  ;;  %v3062_v41 = vpop.permute.xlu0 %3061  ;;  %4178 = vmatprep.mubr.f32.mxu1 %v3780_v63  ;;  %v3779_v38 = vld [vmem:[#allocation3 + $0xf0] sm:$0xff] }
 0x2c7   : > { %9857 = vmatpush1.bf16.msra.mxu1 %v9856_v19  ;;  %3149 = vst.msk [vmem:[#allocation3 + $0x148] sm:$0xff] %vm721_vm3, %v3062_v41  ;;  %v2810_v50 = vpop.permute.xlu1 %2809  ;;  %v3957_v19 = vld [vmem:[%s15110_s3 + $0x180] sm:$0xff]  ;;  %v3959_v41 = vld [vmem:[%s15110_s3 + $0x190] sm:$0xff] }
 0x2c8   : > { %9858 = vmatprep.subr.bf16.mxu1 %v15141_v7  ;;  %2895 = vst.msk [vmem:[#allocation3 + $0x190] sm:$0xff] %vm721_vm3, %v2810_v50  ;;  %v9865_v33 = vpack.c.bf16 %v3958_v24, %v3957_v19 }
 0x2c9   : > { %3567 = vrot.lane.b32.xlu0 %v3498_v55, %s10827_s25  ;;  %4179 = vmatmul.mubr.f32.gmra.mrb[44].mxu1 %v3779_v38  ;;  %v3785_v12 = vld [vmem:[#allocation3 + $0x120] sm:$0xff] }
 0x2ca   : > { %3315 = vrot.lane.b32.xlu1 %v12339_v11, %s10827_s25  ;;  %v3064_v54 = vpop.permute.xlu0 %3063  ;;  %4183 = vmatprep.mubr.f32.mxu1 %v3785_v12  ;;  %v3784_v11 = vld [vmem:[#allocation3 + $0x118] sm:$0xff] }
 0x2cb   : > { %9860 = vmatpush1.bf16.msra.mxu1 %v9859_v21  ;;  %3150 = vst.msk [vmem:[#allocation3 + $0x170] sm:$0xff] %vm721_vm3, %v3064_v54  ;;  %v2812_v1 = vpop.permute.xlu1 %2811 }
 0x2cc   : > { %9861 = vmatprep.subr.bf16.mxu1 %v15141_v7  ;;  %2896 = vst.msk [vmem:[#allocation3 + $0x1b8] sm:$0xff] %vm721_vm3, %v2812_v1 }
 0x2cd   : > { %3569 = vrot.lane.b32.xlu0 %v12347_v23, %s10827_s25  ;;  %4184 = vmatmul.mubr.f32.gmra.mrb[46].mxu1 %v3784_v11  ;;  %v3960_v23 = vld [vmem:[%s15110_s3 + $0x198] sm:$0xff] }
 0x2ce   : > { %3317 = vrot.lane.b32.xlu1 %v12364_v9, %s10827_s25  ;;  %v3066_v44 = vpop.permute.xlu0 %3065  ;;  %v3790_v57 = vld [vmem:[#allocation3 + $0x148] sm:$0xff]  ;;  %v3789_v9 = vld [vmem:[#allocation3 + $0x140] sm:$0xff]  ;;  %v9868_v50 = vpack.c.bf16 %v3960_v23, %v3959_v41 }
 0x2cf   : > { %9863 = vmatpush1.bf16.msra.mxu1 %v9862_v51  ;;  %3151 = vst.msk [vmem:[#allocation3 + $0x198] sm:$0xff] %vm721_vm3, %v3066_v44  ;;  %v2814_v59 = vpop.permute.xlu1 %2813  ;;  %4188 = vmatprep.mubr.f32.mxu1 %v3790_v57  ;;  %v3963_v51 = vld [vmem:[%s15110_s3 + $0x1b0] sm:$0xff]  ;;  %v3965_v44 = vld [vmem:[%s15110_s3 + $0x1c0] sm:$0xff] }
 0x2d0   : > { %9864 = vmatprep.subr.bf16.mxu1 %v15141_v7  ;;  %2897 = vst.msk [vmem:[#allocation3 + $0x1e0] sm:$0xff] %vm721_vm3, %v2814_v59  ;;  %v3967_v23 = vld [vmem:[%s15110_s3 + $0x1d0] sm:$0xff] }
 0x2d1   : > { %3571 = vrot.lane.b32.xlu0 %v12366_v5, %s10827_s25  ;;  %4189 = vmatmul.mubr.f32.gmra.mrb[48].mxu1 %v3789_v9  ;;  %v3962_v5 = vld [vmem:[%s15110_s3 + $0x1a8] sm:$0xff] }
 0x2d2   : > { %3319 = vrot.lane.b32.xlu1 %v12372_v35, %s10827_s25  ;;  %v3068_v63 = vpop.permute.xlu0 %3067  ;;  %v3795_v21 = vld [vmem:[#allocation3 + $0x170] sm:$0xff]  ;;  %v3794_v35 = vld [vmem:[#allocation3 + $0x168] sm:$0xff]  ;;  %v9871_v54 = vpack.c.bf16 %v3962_v5, %v3961_v15 }
 0x2d3   : > { %9866 = vmatpush1.bf16.msra.mxu1 %v9865_v33  ;;  %3152 = vst.msk [vmem:[#allocation3 + $0x1c0] sm:$0xff] %vm721_vm3, %v3068_v63  ;;  %v2816_v55 = vpop.permute.xlu1 %2815  ;;  %4193 = vmatprep.mubr.f32.mxu1 %v3795_v21 }
 0x2d4   : > { %9867 = vmatprep.subr.bf16.mxu1 %v15141_v7  ;;  %2898 = vst.msk [vmem:[#allocation3 + $0x208] sm:$0xff] %vm721_vm3, %v2816_v55  ;;  %v3969_v55 = vld [vmem:[%s15110_s3 + $0x1e0] sm:$0xff] }
 0x2d5   : > { %3573 = vrot.lane.b32.xlu0 %v12382_v43, %s10827_s25  ;;  %4194 = vmatmul.mubr.f32.gmra.mrb[50].mxu1 %v3794_v35  ;;  %v3964_v43 = vld [vmem:[%s15110_s3 + $0x1b8] sm:$0xff] }
 0x2d6   : > { %3321 = vrot.lane.b32.xlu1 %v12397_v29, %s10827_s25  ;;  %v3070_v3 = vpop.permute.xlu0 %3069  ;;  %v3800_v38 = vld [vmem:[#allocation3 + $0x198] sm:$0xff]  ;;  %v3799_v29 = vld [vmem:[#allocation3 + $0x190] sm:$0xff]  ;;  %v9874_v24 = vpack.c.bf16 %v3964_v43, %v3963_v51 }
 0x2d7   : > { %9869 = vmatpush1.bf16.msra.mxu1 %v9868_v50  ;;  %3153 = vst.msk [vmem:[#allocation3 + $0x1e8] sm:$0xff] %vm721_vm3, %v3070_v3  ;;  %v2818_v12 = vpop.permute.xlu1 %2817  ;;  %4198 = vmatprep.mubr.f32.mxu1 %v3800_v38  ;;  %v3971_v38 = vld [vmem:[%s15110_s3 + $0x1f0] sm:$0xff] }
 0x2d8   : > { %9870 = vmatprep.subr.bf16.mxu1 %v15141_v7  ;;  %2899 = vst.msk [vmem:[#allocation3 + $0x230] sm:$0xff] %vm721_vm3, %v2818_v12 }
 0x2d9   : > { %3575 = vrot.lane.b32.xlu0 %v12399_v42, %s10827_s25  ;;  %4199 = vmatmul.mubr.f32.gmra.mrb[52].mxu1 %v3799_v29  ;;  %v3966_v42 = vld [vmem:[%s15110_s3 + $0x1c8] sm:$0xff] }
 0x2da   : > { %3323 = vrot.lane.b32.xlu1 %v12406_v10, %s10827_s25  ;;  %v3072_v1 = vpop.permute.xlu0 %3071  ;;  %v3805_v19 = vld [vmem:[#allocation3 + $0x1c0] sm:$0xff]  ;;  %v3804_v10 = vld [vmem:[#allocation3 + $0x1b8] sm:$0xff]  ;;  %v9877_v59 = vpack.c.bf16 %v3966_v42, %v3965_v44 }
 0x2db   : > { %9872 = vmatpush1.bf16.msra.mxu1 %v9871_v54  ;;  %3154 = vst.msk [vmem:[#allocation3 + $0x210] sm:$0xff] %vm721_vm3, %v3072_v1  ;;  %v2820_v11 = vpop.permute.xlu1 %2819  ;;  %4203 = vmatprep.mubr.f32.mxu1 %v3805_v19 }
 0x2dc   : > { %9873 = vmatprep.subr.bf16.mxu1 %v15141_v7  ;;  %2900 = vst.msk [vmem:[#allocation3 + $0x258] sm:$0xff] %vm721_vm3, %v2820_v11 }
 0x2dd   : > { %3577 = vrot.lane.b32.xlu0 %v12416_v58, %s10827_s25  ;;  %4204 = vmatmul.mubr.f32.gmra.mrb[54].mxu1 %v3804_v10  ;;  %v3968_v58 = vld [vmem:[%s15110_s3 + $0x1d8] sm:$0xff] }
 0x2de   : > { %3325 = vrot.lane.b32.xlu1 %v12432_v4, %s10827_s25  ;;  %v3074_v57 = vpop.permute.xlu0 %3073  ;;  %v3810_v33 = vld [vmem:[#allocation3 + $0x1e8] sm:$0xff]  ;;  %v3809_v4 = vld [vmem:[#allocation3 + $0x1e0] sm:$0xff]  ;;  %v9880_v21 = vpack.c.bf16 %v3968_v58, %v3967_v23 }
 0x2df   : > { %9875 = vmatpush1.bf16.msra.mxu1 %v9874_v24  ;;  %3155 = vst.msk [vmem:[#allocation3 + $0x238] sm:$0xff] %vm721_vm3, %v3074_v57  ;;  %v2822_v41 = vpop.permute.xlu1 %2821  ;;  %4208 = vmatprep.mubr.f32.mxu1 %v3810_v33 }
 0x2e0   : > { %9876 = vmatprep.subr.bf16.mxu1 %v15141_v7  ;;  %2901 = vst.msk [vmem:[#allocation3 + $0x280] sm:$0xff] %vm721_vm3, %v2822_v41 }
 0x2e1   : > { %3579 = vrot.lane.b32.xlu0 %v12434_v16, %s10827_s25  ;;  %4209 = vmatmul.mubr.f32.gmra.mrb[56].mxu1 %v3809_v4  ;;  %v3970_v16 = vld [vmem:[%s15110_s3 + $0x1e8] sm:$0xff] }
 0x2e2   : > { %3327 = vrot.lane.b32.xlu1 %v12440_v27, %s10827_s25  ;;  %v3076_v9 = vpop.permute.xlu0 %3075  ;;  %v3815_v63 = vld [vmem:[#allocation3 + $0x210] sm:$0xff]  ;;  %v3814_v27 = vld [vmem:[#allocation3 + $0x208] sm:$0xff]  ;;  %v9883_v35 = vpack.c.bf16 %v3970_v16, %v3969_v55 }
 0x2e3   : > { %9878 = vmatpush1.bf16.msra.mxu1 %v9877_v59  ;;  %3156 = vst.msk [vmem:[#allocation3 + $0x260] sm:$0xff] %vm721_vm3, %v3076_v9  ;;  %v2824_v50 = vpop.permute.xlu1 %2823  ;;  %4213 = vmatprep.mubr.f32.mxu1 %v3815_v63 }
 0x2e4   : > { %9879 = vmatprep.subr.bf16.mxu1 %v15141_v7  ;;  %2902 = vst.msk [vmem:[#allocation3 + $0x2a8] sm:$0xff] %vm721_vm3, %v2824_v50 }
 0x2e5   : > { %3581 = vrot.lane.b32.xlu0 %v12451_v47, %s10827_s25  ;;  %4214 = vmatmul.mubr.f32.gmra.mrb[58].mxu1 %v3814_v27  ;;  %v3972_v47 = vld [vmem:[%s15110_s3 + $0x1f8] sm:$0xff] }
 0x2e6   : > { %3329 = vrot.lane.b32.xlu1 %v12465_v0, %s10827_s25  ;;  %v3078_v15 = vpop.permute.xlu0 %3077  ;;  %v3820_v5 = vld [vmem:[#allocation3 + $0x238] sm:$0xff]  ;;  %v3819_v0 = vld [vmem:[#allocation3 + $0x230] sm:$0xff]  ;;  %v9886_v51 = vpack.c.bf16 %v3972_v47, %v3971_v38  ;;  %v3459_v38 = vld [vmem:[#allocation2 + $0x198] sm:$0xff] }
 0x2e7   : > { %9881 = vmatpush1.bf16.msra.mxu1 %v9880_v21  ;;  %3157 = vst.msk [vmem:[#allocation3 + $0x288] sm:$0xff] %vm721_vm3, %v3078_v15  ;;  %v2826_v3 = vpop.permute.xlu1 %2825  ;;  %4218 = vmatprep.mubr.f32.mxu1 %v3820_v5 }
 0x2e8   : > { %9882 = vmatprep.subr.bf16.mxu1 %v15141_v7  ;;  %2903 = vst.msk [vmem:[#allocation3 + $0x2d0] sm:$0xff] %vm721_vm3, %v2826_v3 }
 0x2e9   : > { %3583 = vrot.lane.b32.xlu0 %v12467_v20, %s10827_s25  ;;  %4219 = vmatmul.mubr.f32.gmra.mrb[60].mxu1 %v3819_v0  ;;  %v3824_v20 = vld [vmem:[#allocation3 + $0x258] sm:$0xff]  ;;  %3491 = vst.msk [vmem:[#allocation3 + $0x4c8] sm:$0xff] %vm375_vm0, %v3459_v38 }
 0x2ea   : > { %3331 = vrot.lane.b32.xlu1 %v12474_v52, %s10827_s25  ;;  %v3080_v54 = vpop.permute.xlu0 %3079  ;;  %v3825_v12 = vld [vmem:[#allocation3 + $0x260] sm:$0xff] }
 0x2eb   : > { %9884 = vmatpush1.bf16.msra.mxu1 %v9883_v35  ;;  %3158 = vst.msk [vmem:[#allocation3 + $0x2b0] sm:$0xff] %vm721_vm3, %v3080_v54  ;;  %v2828_v43 = vpop.permute.xlu1 %2827  ;;  %4223 = vmatprep.mubr.f32.mxu1 %v3825_v12  ;;  %v3834_v11 = vld [vmem:[#allocation3 + $0x2a8] sm:$0xff]  ;;  %v3460_v54 = vld [vmem:[#allocation2 + $0x1a0] sm:$0xff]  ;;  %v15142_v12 = vld [vmem:[#allocation7_spill] sm:$0xff] }
 0x2ec   : > { %9885 = vmatprep.subr.bf16.mxu1 %v15141_v7  ;;  %2904 = vst.msk [vmem:[#allocation3 + $0x2f8] sm:$0xff] %vm721_vm3, %v2828_v43 }
 0x2ed   : > { %3585 = vrot.lane.b32.xlu0 %v12485_v8, %s10827_s25  ;;  %4224 = vmatmul.mubr.f32.gmra.mrb[62].mxu1 %v3824_v20  ;;  %v3829_v8 = vld [vmem:[#allocation3 + $0x280] sm:$0xff]  ;;  %3492 = vst.msk [vmem:[#allocation3 + $0x4f0] sm:$0xff] %vm375_vm0, %v3460_v54  ;;  %v15143_v20 = vld [vmem:[#allocation8_spill] sm:$0xff] }
 0x2ee   : > { %3333 = vrot.lane.b32.xlu1 %v12500_v53, %s10827_s25  ;;  %v3082_v52 = vpop.permute.xlu0 %3081  ;;  %v3830_v29 = vld [vmem:[#allocation3 + $0x288] sm:$0xff] }
 0x2ef   : > { %9887 = vmatpush1.bf16.msra.mxu1 %v9886_v51  ;;  %3159 = vst.msk [vmem:[#allocation3 + $0x2d8] sm:$0xff] %vm721_vm3, %v3082_v52  ;;  %v2830_v1 = vpop.permute.xlu1 %2829  ;;  %4228 = vmatprep.mubr.f32.mxu1 %v3830_v29  ;;  %v3839_v42 = vld [vmem:[#allocation3 + $0x2d0] sm:$0xff] }
 0x2f0   : > { %9904 = vmatprep.subr.bf16.mxu1 %v15141_v7  ;;  %2905 = vst.msk [vmem:[#allocation3 + $0x320] sm:$0xff] %vm721_vm3, %v2830_v1  ;;  %v3267_v29 = vld [vmem:[#allocation2 + $0x182] sm:$0xff] }
 0x2f1   : > { %3587 = vrot.lane.b32.xlu0 %v12502_v22, %s10827_s25  ;;  %4229 = vmatmul.mubr.f32.gmra.mrb[64].mxu1 %v3829_v8 }
 0x2f2   : > { %3335 = vrot.lane.b32.xlu1 %v12508_v62, %s10827_s25  ;;  %v3084_v53 = vpop.permute.xlu0 %3083  ;;  %v3835_v19 = vld [vmem:[#allocation3 + $0x2b0] sm:$0xff] }
 0x2f3   : > { %3160 = vst.msk [vmem:[#allocation3 + $0x300] sm:$0xff] %vm721_vm3, %v3084_v53  ;;  %v2832_v24 = vpop.permute.xlu1 %2831  ;;  %4233 = vmatprep.mubr.f32.mxu1 %v3835_v19  ;;  %v3844_v57 = vld [vmem:[#allocation3 + $0x2f8] sm:$0xff]  ;;  %v3903_v19 = vld [vmem:[#allocation3 + $0x4d0] sm:$0xff] }
 0x2f4   : > { %2906 = vst.msk [vmem:[#allocation3 + $0x348] sm:$0xff] %vm721_vm3, %v2832_v24  ;;  %v5877_v24 = vld [vmem:[#allocation2 + $0x19a] sm:$0xff]  ;;  %9613 = vmatprep.mubr.msk.f32.mxu0 %vm375_vm0, %v3903_v19 }
 0x2f5   : > { %3589 = vrot.lane.b32.xlu0 %v12519_v32, %s10827_s25  ;;  %4234 = vmatmul.mubr.f32.gmra.mrb[66].mxu1 %v3834_v11  ;;  %5909 = vst.msk [vmem:[#allocation3 + $0x4d0] sm:$0xff] %vm375_vm0, %v5877_v24 }
 0x2f6   : > { %3337 = vrot.lane.b32.xlu1 %v12533_v45, %s10827_s25  ;;  %v3086_v22 = vpop.permute.xlu0 %3085  ;;  %v3840_v44 = vld [vmem:[#allocation3 + $0x2d8] sm:$0xff] }
 0x2f7   : > { %3161 = vst.msk [vmem:[#allocation3 + $0x328] sm:$0xff] %vm721_vm3, %v3086_v22  ;;  %v2834_v62 = vpop.permute.xlu1 %2833  ;;  %4238 = vmatprep.mubr.f32.mxu1 %v3840_v44  ;;  %v3849_v59 = vld [vmem:[#allocation3 + $0x320] sm:$0xff]  ;;  %v3523_v44 = vld [vmem:[#allocation2 + $0x199] sm:$0xff] }
 0x2f8   : > { %2907 = vst.msk [vmem:[#allocation3 + $0x370] sm:$0xff] %vm721_vm3, %v2834_v62  ;;  %v3268_v62 = vld [vmem:[#allocation2 + $0x18a] sm:$0xff] }
 0x2f9   : > { %3591 = vrot.lane.b32.xlu0 %v12535_v49, %s10827_s25  ;;  %4239 = vmatmul.mubr.f32.gmra.mrb[68].mxu1 %v3839_v42  ;;  %v3908_v42 = vld [vmem:[#allocation3 + $0x4f8] sm:$0xff] }
 0x2fa   : > { %3339 = vrot.lane.b32.xlu1 %v12542_v26, %s10827_s25  ;;  %v3088_v32 = vpop.permute.xlu0 %3087  ;;  %v3845_v10 = vld [vmem:[#allocation3 + $0x300] sm:$0xff]  ;;  %9614 = vmatmul.mubr.msk.f32.gmra.mrb[94].mxu0 %vm375_vm0, %v3908_v42 }
 0x2fb   : > { %3162 = vst.msk [vmem:[#allocation3 + $0x350] sm:$0xff] %vm721_vm3, %v3088_v32  ;;  %v2836_v45 = vpop.permute.xlu1 %2835  ;;  %4243 = vmatprep.mubr.f32.mxu1 %v3845_v10  ;;  %v3854_v23 = vld [vmem:[#allocation3 + $0x348] sm:$0xff]  ;;  %v5878_v32 = vld [vmem:[#allocation2 + $0x1a2] sm:$0xff] }
 0x2fc   : > { %2908 = vst.msk [vmem:[#allocation3 + $0x398] sm:$0xff] %vm721_vm3, %v2836_v45 }
 0x2fd   : > { %3593 = vrot.lane.b32.xlu0 %v12553_v60, %s10827_s25  ;;  %4244 = vmatmul.mubr.f32.gmra.mrb[70].mxu1 %v3844_v57  ;;  %5910 = vst.msk [vmem:[#allocation3 + $0x4f8] sm:$0xff] %vm375_vm0, %v5878_v32 }
 0x2fe   : > { %3341 = vrot.lane.b32.xlu1 %v12568_v37, %s10827_s25  ;;  %v3090_v49 = vpop.permute.xlu0 %3089  ;;  %v3850_v33 = vld [vmem:[#allocation3 + $0x328] sm:$0xff] }
 0x2ff   : > { %3163 = vst.msk [vmem:[#allocation3 + $0x378] sm:$0xff] %vm721_vm3, %v3090_v49  ;;  %v2838_v26 = vpop.permute.xlu1 %2837  ;;  %4248 = vmatprep.mubr.f32.mxu1 %v3850_v33  ;;  %v3859_v4 = vld [vmem:[#allocation3 + $0x370] sm:$0xff] }
 0x300   : > { %2909 = vst.msk [vmem:[#allocation3 + $0x3c0] sm:$0xff] %vm721_vm3, %v2838_v26  ;;  %v3524_v26 = vld [vmem:[#allocation2 + $0x1a1] sm:$0xff] }
 0x301   : > { %3595 = vrot.lane.b32.xlu0 %v12570_v61, %s10827_s25  ;;  %4249 = vmatmul.mubr.f32.gmra.mrb[72].mxu1 %v3849_v59 }
 0x302   : > { %3343 = vrot.lane.b32.xlu1 %v12576_v6, %s10827_s25  ;;  %v3092_v60 = vpop.permute.xlu0 %3091  ;;  %v3855_v41 = vld [vmem:[#allocation3 + $0x350] sm:$0xff] }
 0x303   : > { %3164 = vst.msk [vmem:[#allocation3 + $0x3a0] sm:$0xff] %vm721_vm3, %v3092_v60  ;;  %v2840_v37 = vpop.permute.xlu1 %2839  ;;  %4253 = vmatprep.mubr.f32.mxu1 %v3855_v41  ;;  %v3864_v63 = vld [vmem:[#allocation3 + $0x398] sm:$0xff] }
 0x304   : > { %2910 = vst.msk [vmem:[#allocation3 + $0x3e8] sm:$0xff] %vm721_vm3, %v2840_v37 }
 0x305   : > { %3597 = vrot.lane.b32.xlu0 %v12587_v2, %s10827_s25  ;;  %4254 = vmatmul.mubr.f32.gmra.mrb[74].mxu1 %v3854_v23 }
 0x306   : > { %3345 = vrot.lane.b32.xlu1 %v12606_v39, %s10827_s25  ;;  %v3094_v61 = vpop.permute.xlu0 %3093  ;;  %v3860_v58 = vld [vmem:[#allocation3 + $0x378] sm:$0xff] }
 0x307   : > { %3165 = vst.msk [vmem:[#allocation3 + $0x3c8] sm:$0xff] %vm721_vm3, %v3094_v61  ;;  %v2842_v6 = vpop.permute.xlu1 %2841  ;;  %4258 = vmatprep.mubr.f32.mxu1 %v3860_v58  ;;  %v3869_v50 = vld [vmem:[#allocation3 + $0x3c0] sm:$0xff] }
 0x308   : > { %2911 = vst.msk [vmem:[#allocation3 + $0x410] sm:$0xff] %vm721_vm3, %v2842_v6 }
 0x309   : > { %3599 = vrot.lane.b32.xlu0 %v12608_v34, %s10827_s25  ;;  %4259 = vmatmul.mubr.f32.gmra.mrb[76].mxu1 %v3859_v4 }
 0x30a   : > { %3347 = vrot.lane.b32.xlu1 %v12615_v25, %s10827_s25  ;;  %v3096_v2 = vpop.permute.xlu0 %3095  ;;  %v3865_v9 = vld [vmem:[#allocation3 + $0x3a0] sm:$0xff] }
 0x30b   : > { %3166 = vst.msk [vmem:[#allocation3 + $0x3f0] sm:$0xff] %vm721_vm3, %v3096_v2  ;;  %v2844_v39 = vpop.permute.xlu1 %2843  ;;  %4263 = vmatprep.mubr.f32.mxu1 %v3865_v9  ;;  %v3874_v16 = vld [vmem:[#allocation3 + $0x3e8] sm:$0xff] }
 0x30c   : > { %2912 = vst.msk [vmem:[#allocation3 + $0x438] sm:$0xff] %vm721_vm3, %v2844_v39 }
 0x30d   : > { %3601 = vrot.lane.b32.xlu0 %v12626_v17, %s10827_s25  ;;  %4264 = vmatmul.mubr.f32.gmra.mrb[78].mxu1 %v3864_v63 }
 0x30e   : > { %3349 = vrot.lane.b32.xlu1 %v12641_v30, %s10827_s25  ;;  %v3098_v34 = vpop.permute.xlu0 %3097  ;;  %v3870_v21 = vld [vmem:[#allocation3 + $0x3c8] sm:$0xff] }
 0x30f   : > { %3167 = vst.msk [vmem:[#allocation3 + $0x418] sm:$0xff] %vm721_vm3, %v3098_v34  ;;  %v2846_v25 = vpop.permute.xlu1 %2845  ;;  %4268 = vmatprep.mubr.f32.mxu1 %v3870_v21  ;;  %v3879_v15 = vld [vmem:[#allocation3 + $0x410] sm:$0xff] }
 0x310   : > { %2913 = vst.msk [vmem:[#allocation3 + $0x460] sm:$0xff] %vm721_vm3, %v2846_v25 }
 0x311   : > { %3603 = vrot.lane.b32.xlu0 %v12643_v56, %s10827_s25  ;;  %4269 = vmatmul.mubr.f32.gmra.mrb[80].mxu1 %v3869_v50 }
 0x312   : > { %3351 = vrot.lane.b32.xlu1 %v12649_v31, %s10827_s25  ;;  %v3100_v17 = vpop.permute.xlu0 %3099  ;;  %v3875_v55 = vld [vmem:[#allocation3 + $0x3f0] sm:$0xff] }
 0x313   : > { %3168 = vst.msk [vmem:[#allocation3 + $0x440] sm:$0xff] %vm721_vm3, %v3100_v17  ;;  %v2848_v30 = vpop.permute.xlu1 %2847  ;;  %4273 = vmatprep.mubr.f32.mxu1 %v3875_v55  ;;  %v3884_v3 = vld [vmem:[#allocation3 + $0x438] sm:$0xff] }
 0x314   : > { %2914 = vst.msk [vmem:[#allocation3 + $0x488] sm:$0xff] %vm721_vm3, %v2848_v30 }
 0x315   : > { %3605 = vrot.lane.b32.xlu0 %v12660_v36, %s10827_s25  ;;  %4274 = vmatmul.mubr.f32.gmra.mrb[82].mxu1 %v3874_v16 }
 0x316   : > { %3353 = vrot.lane.b32.xlu1 %v12674_v46, %s10827_s25  ;;  %v3880_v27 = vld [vmem:[#allocation3 + $0x418] sm:$0xff] }
 0x317   : > { %v3102_v56 = vpop.permute.xlu0 %3101  ;;  %4278 = vmatprep.mubr.f32.mxu1 %v3880_v27 }
 0x318   : > { %3169 = vst.msk [vmem:[#allocation3 + $0x468] sm:$0xff] %vm721_vm3, %v3102_v56  ;;  %v2850_v31 = vpop.permute.xlu1 %2849 }
 0x319   : > { %2915 = vst.msk [vmem:[#allocation3 + $0x4b0] sm:$0xff] %vm721_vm3, %v2850_v31  ;;  %3607 = vrot.lane.b32.xlu0 %v12676_v40, %s10827_s25  ;;  %4279 = vmatmul.mubr.f32.gmra.mrb[84].mxu1 %v3879_v15 }
 0x31a   : > { %3355 = vrot.lane.b32.xlu1 %v12683_v18, %s10827_s25  ;;  %v3885_v5 = vld [vmem:[#allocation3 + $0x440] sm:$0xff] }
 0x31b   : > { %v3104_v36 = vpop.permute.xlu0 %3103  ;;  %4283 = vmatprep.mubr.f32.mxu1 %v3885_v5  ;;  %v3894_v52 = vld [vmem:[#allocation3 + $0x488] sm:$0xff] }
 0x31c   : > { %3170 = vst.msk [vmem:[#allocation3 + $0x490] sm:$0xff] %vm721_vm3, %v3104_v36  ;;  %v2852_v46 = vpop.permute.xlu1 %2851  ;;  %v13013_v35 = vpop.f32.mrb[64].mxu0 }
 0x31d   : > { %2916 = vst.msk [vmem:[#allocation3 + $0x4d8] sm:$0xff] %vm721_vm3, %v2852_v46  ;;  %3609 = vrot.lane.b32.xlu0 %v12694_v28, %s10827_s25  ;;  %4284 = vmatmul.mubr.f32.gmra.mrb[86].mxu1 %v3884_v3  ;;  %v13017_v40 = vpop.f32.mrb[65].mxu0  ;;  %v3889_v28 = vld [vmem:[#allocation3 + $0x460] sm:$0xff] }
 0x31e   : > { %3357 = vrot.lane.b32.xlu1 %v12709_v14, %s10827_s25 }
 0x31f   : > { %v3106_v18 = vpop.permute.xlu0 %3105  ;;  %v3890_v47 = vld [vmem:[#allocation3 + $0x468] sm:$0xff] }
 0x320   : > { %3171 = vst.msk [vmem:[#allocation3 + $0x4b8] sm:$0xff] %vm721_vm3, %v3106_v18  ;;  %v3302_v0 = vpop.permute.xlu1 %3301  ;;  %4288 = vmatprep.mubr.f32.mxu1 %v3890_v47  ;;  %v3899_v22 = vld [vmem:[#allocation3 + $0x4b0] sm:$0xff] }
 0x321   : > { %3397 = vst.msk [vmem:[#allocation3 + $0x10] sm:$0xff] %vm721_vm3, %v3302_v0  ;;  %3611 = vrot.lane.b32.xlu0 %v12711_v13, %s10827_s25  ;;  %4289 = vmatmul.mubr.f32.gmra.mrb[88].mxu1 %v3889_v28 }
 0x322   : > { %3359 = vrot.lane.b32.xlu1 %v15142_v12, %s10827_s25 }
 0x323   : > { %v3108_v14 = vpop.permute.xlu0 %3107  ;;  %v3895_v51 = vld [vmem:[#allocation3 + $0x490] sm:$0xff] }
 0x324   : > { %3172 = vst.msk [vmem:[#allocation3 + $0x4e0] sm:$0xff] %vm721_vm3, %v3108_v14  ;;  %4293 = vmatprep.mubr.f32.mxu1 %v3895_v51  ;;  %v3304_v43 = vpop.permute.xlu1 %3303  ;;  %v3904_v49 = vld [vmem:[#allocation3 + $0x4d8] sm:$0xff] }
 0x325   : > { %3613 = vrot.lane.b32.xlu0 %v15143_v20, %s10827_s25  ;;  %3398 = vst.msk [vmem:[#allocation3 + $0x38] sm:$0xff] %vm721_vm3, %v3304_v43  ;;  %v13033_v13 = vpop.f32.mrb[66].mxu0  ;;  %4294 = vmatmul.mubr.f32.gmra.mrb[90].mxu1 %v3894_v52 }
 0x326   : > { %3361 = vrot.lane.b32.xlu1 %v3267_v29, %s10827_s25  ;;  %v13036_v1 = vpop.f32.mrb[67].mxu0 }
 0x327   : > { %v3558_v8 = vpop.permute.xlu0 %3557  ;;  %v3900_v53 = vld [vmem:[#allocation3 + $0x4b8] sm:$0xff] }
 0x328   : > { %3653 = vst.msk [vmem:[#allocation3 + $0x18] sm:$0xff] %vm721_vm3, %v3558_v8  ;;  %4298 = vmatprep.mubr.f32.mxu1 %v3900_v53  ;;  %v3306_v11 = vpop.permute.xlu1 %3305  ;;  %v3751_v37 = vld [vmem:[#allocation3 + $0x10] sm:$0xff] }
 0x329   : > { %3615 = vrot.lane.b32.xlu0 %v12751_v48, %s10827_s25  ;;  %3399 = vst.msk [vmem:[#allocation3 + $0x60] sm:$0xff] %vm721_vm3, %v3306_v11  ;;  %4299 = vmatmul.mubr.f32.gmra.mrb[92].mxu1 %v3899_v22 }
 0x32a   : > { %3363 = vrot.lane.b32.xlu1 %v3268_v62, %s10827_s25 }
 0x32b   : > { %v3560_v10 = vpop.permute.xlu0 %3559  ;;  %v3905_v45 = vld [vmem:[#allocation3 + $0x4e0] sm:$0xff] }
 0x32c   : > { %3654 = vst.msk [vmem:[#allocation3 + $0x40] sm:$0xff] %vm721_vm3, %v3560_v10  ;;  %4303 = vmatprep.mubr.f32.mxu1 %v3905_v45  ;;  %v3308_v48 = vpop.permute.xlu1 %3307  ;;  %v13048_v57 = vpop.f32.mrb[68].mxu0  ;;  %v3756_v6 = vld [vmem:[#allocation3 + $0x38] sm:$0xff] }
 0x32d   : > { %3617 = vrot.lane.b32.xlu0 %v3523_v44, %s10827_s25  ;;  %3400 = vst.msk [vmem:[#allocation3 + $0x88] sm:$0xff] %vm721_vm3, %v3308_v48  ;;  %4304 = vmatmul.mubr.f32.gmra.mrb[94].mxu1 %v3904_v49  ;;  %v13052_v33 = vpop.f32.mrb[69].mxu0 }
 0x32f   : > { %v3562_v59 = vpop.permute.xlu0 %3561  ;;  %v3752_v60 = vld [vmem:[#allocation3 + $0x18] sm:$0xff] }
 0x330   : > { %3655 = vst.msk [vmem:[#allocation3 + $0x68] sm:$0xff] %vm721_vm3, %v3562_v59  ;;  %4373 = vmatprep.mubr.f32.mxu1 %v3752_v60  ;;  %v3310_v41 = vpop.permute.xlu1 %3309  ;;  %v3761_v34 = vld [vmem:[#allocation3 + $0x60] sm:$0xff] }
 0x331   : > { %3619 = vrot.lane.b32.xlu0 %v3524_v26, %s10827_s25  ;;  %3401 = vst.msk [vmem:[#allocation3 + $0xb0] sm:$0xff] %vm721_vm3, %v3310_v41  ;;  %4374 = vmatmul.mubr.f32.vlgmr.msra.gmra.mrb[32].mxu1 %v3751_v37 }
 0x333   : > { %v3564_v23 = vpop.permute.xlu0 %3563  ;;  %v3757_v61 = vld [vmem:[#allocation3 + $0x40] sm:$0xff] }
 0x334   : > { %3656 = vst.msk [vmem:[#allocation3 + $0x90] sm:$0xff] %vm721_vm3, %v3564_v23  ;;  %4378 = vmatprep.mubr.f32.mxu1 %v3757_v61  ;;  %v3312_v58 = vpop.permute.xlu1 %3311  ;;  %v3766_v17 = vld [vmem:[#allocation3 + $0x88] sm:$0xff] }
 0x335   : > { %3402 = vst.msk [vmem:[#allocation3 + $0xd8] sm:$0xff] %vm721_vm3, %v3312_v58  ;;  %4379 = vmatmul.mubr.f32.gmra.mrb[34].mxu1 %v3756_v6 }
 0x336   : > { %v13059_v4 = vpop.f32.mrb[70].mxu0 }
 0x337   : > { %v13061_v2 = vpop.f32.mrb[71].mxu0  ;;  %v3566_v9 = vpop.permute.xlu0 %3565  ;;  %v3762_v39 = vld [vmem:[#allocation3 + $0x68] sm:$0xff] }
 0x338   : > { %3657 = vst.msk [vmem:[#allocation3 + $0xb8] sm:$0xff] %vm721_vm3, %v3566_v9  ;;  %4383 = vmatprep.mubr.f32.mxu1 %v3762_v39  ;;  %v3314_v63 = vpop.permute.xlu1 %3313  ;;  %v3771_v31 = vld [vmem:[#allocation3 + $0xb0] sm:$0xff] }
 0x339   : > { %3403 = vst.msk [vmem:[#allocation3 + $0x100] sm:$0xff] %vm721_vm3, %v3314_v63  ;;  %4384 = vmatmul.mubr.f32.gmra.mrb[36].mxu1 %v3761_v34 }
 0x33b   : > { %v3568_v21 = vpop.permute.xlu0 %3567  ;;  %v3767_v25 = vld [vmem:[#allocation3 + $0x90] sm:$0xff] }
 0x33c   : > { %3658 = vst.msk [vmem:[#allocation3 + $0xe0] sm:$0xff] %vm721_vm3, %v3568_v21  ;;  %4388 = vmatprep.mubr.f32.mxu1 %v3767_v25  ;;  %v3316_v50 = vpop.permute.xlu1 %3315  ;;  %v13066_v55 = vpop.f32.mrb[72].mxu0  ;;  %v3776_v46 = vld [vmem:[#allocation3 + $0xd8] sm:$0xff] }
 0x33d   : > { %3404 = vst.msk [vmem:[#allocation3 + $0x128] sm:$0xff] %vm721_vm3, %v3316_v50  ;;  %4389 = vmatmul.mubr.f32.gmra.mrb[38].mxu1 %v3766_v17  ;;  %v13069_v30 = vpop.f32.mrb[73].mxu0 }
 0x33f   : > { %v3570_v16 = vpop.permute.xlu0 %3569  ;;  %v3772_v56 = vld [vmem:[#allocation3 + $0xb8] sm:$0xff] }
 0x340   : > { %3659 = vst.msk [vmem:[#allocation3 + $0x108] sm:$0xff] %vm721_vm3, %v3570_v16  ;;  %4393 = vmatprep.mubr.f32.mxu1 %v3772_v56  ;;  %v3318_v27 = vpop.permute.xlu1 %3317  ;;  %v3781_v28 = vld [vmem:[#allocation3 + $0x100] sm:$0xff] }
 0x341   : > { %3405 = vst.msk [vmem:[#allocation3 + $0x150] sm:$0xff] %vm721_vm3, %v3318_v27  ;;  %4394 = vmatmul.mubr.f32.gmra.mrb[40].mxu1 %v3771_v31 }
 0x343   : > { %v3572_v15 = vpop.permute.xlu0 %3571  ;;  %v3777_v36 = vld [vmem:[#allocation3 + $0xe0] sm:$0xff] }
 0x344   : > { %3660 = vst.msk [vmem:[#allocation3 + $0x130] sm:$0xff] %vm721_vm3, %v3572_v15  ;;  %4398 = vmatprep.mubr.f32.mxu1 %v3777_v36  ;;  %v3320_v5 = vpop.permute.xlu1 %3319  ;;  %v3786_v51 = vld [vmem:[#allocation3 + $0x128] sm:$0xff] }
 0x345   : > { %3406 = vst.msk [vmem:[#allocation3 + $0x178] sm:$0xff] %vm721_vm3, %v3320_v5  ;;  %4399 = vmatmul.mubr.f32.gmra.mrb[42].mxu1 %v3776_v46  ;;  %v13075_v3 = vpop.f32.mrb[74].mxu0 }
 0x346   : > { %v13077_v38 = vpop.f32.mrb[75].mxu0 }
 0x347   : > { %v3574_v18 = vpop.permute.xlu0 %3573  ;;  %v3782_v47 = vld [vmem:[#allocation3 + $0x108] sm:$0xff] }
 0x348   : > { %3661 = vst.msk [vmem:[#allocation3 + $0x158] sm:$0xff] %vm721_vm3, %v3574_v18  ;;  %4403 = vmatprep.mubr.f32.mxu1 %v3782_v47  ;;  %v3322_v0 = vpop.permute.xlu1 %3321  ;;  %v3791_v53 = vld [vmem:[#allocation3 + $0x150] sm:$0xff] }
 0x349   : > { %3407 = vst.msk [vmem:[#allocation3 + $0x1a0] sm:$0xff] %vm721_vm3, %v3322_v0  ;;  %4404 = vmatmul.mubr.f32.gmra.mrb[44].mxu1 %v3781_v28 }
 0x34b   : > { %v3576_v54 = vpop.permute.xlu0 %3575  ;;  %v3787_v12 = vld [vmem:[#allocation3 + $0x130] sm:$0xff] }
 0x34c   : > { %3662 = vst.msk [vmem:[#allocation3 + $0x180] sm:$0xff] %vm721_vm3, %v3576_v54  ;;  %4408 = vmatprep.mubr.f32.mxu1 %v3787_v12  ;;  %v3324_v14 = vpop.permute.xlu1 %3323  ;;  %v13082_v43 = vpop.f32.mrb[76].mxu0  ;;  %v3796_v22 = vld [vmem:[#allocation3 + $0x178] sm:$0xff] }
 0x34d   : > { %3408 = vst.msk [vmem:[#allocation3 + $0x1c8] sm:$0xff] %vm721_vm3, %v3324_v14  ;;  %4409 = vmatmul.mubr.f32.gmra.mrb[46].mxu1 %v3786_v51  ;;  %v13085_v20 = vpop.f32.mrb[77].mxu0 }
 0x34f   : > { %v3578_v52 = vpop.permute.xlu0 %3577  ;;  %v3792_v29 = vld [vmem:[#allocation3 + $0x158] sm:$0xff] }
 0x350   : > { %3663 = vst.msk [vmem:[#allocation3 + $0x1a8] sm:$0xff] %vm721_vm3, %v3578_v52  ;;  %4413 = vmatprep.mubr.f32.mxu1 %v3792_v29  ;;  %v3326_v8 = vpop.permute.xlu1 %3325  ;;  %v3801_v45 = vld [vmem:[#allocation3 + $0x1a0] sm:$0xff] }
 0x351   : > { %3409 = vst.msk [vmem:[#allocation3 + $0x1f0] sm:$0xff] %vm721_vm3, %v3326_v8  ;;  %4414 = vmatmul.mubr.f32.gmra.mrb[48].mxu1 %v3791_v53 }
 0x353   : > { %v3580_v19 = vpop.permute.xlu0 %3579  ;;  %v3797_v24 = vld [vmem:[#allocation3 + $0x180] sm:$0xff] }
 0x354   : > { %3664 = vst.msk [vmem:[#allocation3 + $0x1d0] sm:$0xff] %vm721_vm3, %v3580_v19  ;;  %4418 = vmatprep.mubr.f32.mxu1 %v3797_v24  ;;  %v3328_v11 = vpop.permute.xlu1 %3327  ;;  %v3806_v59 = vld [vmem:[#allocation3 + $0x1c8] sm:$0xff] }
 0x355   : > { %3410 = vst.msk [vmem:[#allocation3 + $0x218] sm:$0xff] %vm721_vm3, %v3328_v11  ;;  %4419 = vmatmul.mubr.f32.gmra.mrb[50].mxu1 %v3796_v22  ;;  %v13091_v44 = vpop.f32.mrb[78].mxu0 }
 0x356   : > { %v13093_v62 = vpop.f32.mrb[79].mxu0 }
 0x357   : > { %v3582_v42 = vpop.permute.xlu0 %3581  ;;  %v3802_v32 = vld [vmem:[#allocation3 + $0x1a8] sm:$0xff] }
 0x358   : > { %3665 = vst.msk [vmem:[#allocation3 + $0x1f8] sm:$0xff] %vm721_vm3, %v3582_v42  ;;  %4423 = vmatprep.mubr.f32.mxu1 %v3802_v32  ;;  %v3330_v10 = vpop.permute.xlu1 %3329  ;;  %v3811_v58 = vld [vmem:[#allocation3 + $0x1f0] sm:$0xff] }
 0x359   : > { %3411 = vst.msk [vmem:[#allocation3 + $0x240] sm:$0xff] %vm721_vm3, %v3330_v10  ;;  %4424 = vmatmul.mubr.f32.gmra.mrb[52].mxu1 %v3801_v45 }
 0x35b   : > { %v3584_v48 = vpop.permute.xlu0 %3583  ;;  %v3807_v49 = vld [vmem:[#allocation3 + $0x1d0] sm:$0xff] }
 0x35c   : > { %3666 = vst.msk [vmem:[#allocation3 + $0x220] sm:$0xff] %vm721_vm3, %v3584_v48  ;;  %4428 = vmatprep.mubr.f32.mxu1 %v3807_v49  ;;  %v3332_v26 = vpop.permute.xlu1 %3331  ;;  %v3816_v63 = vld [vmem:[#allocation3 + $0x218] sm:$0xff] }
 0x35d   : > { %v13098_v60 = vpop.f32.mrb[80].mxu0  ;;  %3412 = vst.msk [vmem:[#allocation3 + $0x268] sm:$0xff] %vm721_vm3, %v3332_v26  ;;  %4429 = vmatmul.mubr.f32.gmra.mrb[54].mxu1 %v3806_v59 }
 0x35e   : > { %v13101_v41 = vpop.f32.mrb[81].mxu0 }
 0x35f   : > { %v3586_v37 = vpop.permute.xlu0 %3585  ;;  %v3812_v23 = vld [vmem:[#allocation3 + $0x1f8] sm:$0xff] }
 0x360   : > { %3667 = vst.msk [vmem:[#allocation3 + $0x248] sm:$0xff] %vm721_vm3, %v3586_v37  ;;  %4433 = vmatprep.mubr.f32.mxu1 %v3812_v23  ;;  %v3334_v61 = vpop.permute.xlu1 %3333  ;;  %v3821_v16 = vld [vmem:[#allocation3 + $0x240] sm:$0xff] }
 0x361   : > { %3413 = vst.msk [vmem:[#allocation3 + $0x290] sm:$0xff] %vm721_vm3, %v3334_v61  ;;  %4434 = vmatmul.mubr.f32.gmra.mrb[56].mxu1 %v3811_v58 }
 0x363   : > { %v3588_v6 = vpop.permute.xlu0 %3587  ;;  %v3817_v9 = vld [vmem:[#allocation3 + $0x220] sm:$0xff] }
 0x364   : > { %3668 = vst.msk [vmem:[#allocation3 + $0x270] sm:$0xff] %vm721_vm3, %v3588_v6  ;;  %4438 = vmatprep.mubr.f32.mxu1 %v3817_v9  ;;  %v3336_v39 = vpop.permute.xlu1 %3335  ;;  %v3826_v15 = vld [vmem:[#allocation3 + $0x268] sm:$0xff] }
 0x365   : > { %3414 = vst.msk [vmem:[#allocation3 + $0x2b8] sm:$0xff] %vm721_vm3, %v3336_v39  ;;  %4439 = vmatmul.mubr.f32.gmra.mrb[58].mxu1 %v3816_v63 }
 0x366   : > { %v13107_v34 = vpop.f32.mrb[82].mxu0 }
 0x367   : > { %v13109_v21 = vpop.f32.mrb[83].mxu0  ;;  %v3590_v25 = vpop.permute.xlu0 %3589  ;;  %v3822_v50 = vld [vmem:[#allocation3 + $0x248] sm:$0xff] }
 0x368   : > { %3669 = vst.msk [vmem:[#allocation3 + $0x298] sm:$0xff] %vm721_vm3, %v3590_v25  ;;  %4443 = vmatprep.mubr.f32.mxu1 %v3822_v50  ;;  %v3338_v17 = vpop.permute.xlu1 %3337  ;;  %v3831_v0 = vld [vmem:[#allocation3 + $0x290] sm:$0xff] }
 0x369   : > { %3415 = vst.msk [vmem:[#allocation3 + $0x2e0] sm:$0xff] %vm721_vm3, %v3338_v17  ;;  %4444 = vmatmul.mubr.f32.gmra.mrb[60].mxu1 %v3821_v16 }
 0x36b   : > { %v3592_v56 = vpop.permute.xlu0 %3591  ;;  %v3827_v27 = vld [vmem:[#allocation3 + $0x270] sm:$0xff] }
 0x36c   : > { %3670 = vst.msk [vmem:[#allocation3 + $0x2c0] sm:$0xff] %vm721_vm3, %v3592_v56  ;;  %4448 = vmatprep.mubr.f32.mxu1 %v3827_v27  ;;  %v3340_v31 = vpop.permute.xlu1 %3339  ;;  %v3836_v14 = vld [vmem:[#allocation3 + $0x2b8] sm:$0xff] }
 0x36d   : > { %v13114_v36 = vpop.f32.mrb[84].mxu0  ;;  %3416 = vst.msk [vmem:[#allocation3 + $0x308] sm:$0xff] %vm721_vm3, %v3340_v31  ;;  %4449 = vmatmul.mubr.f32.gmra.mrb[62].mxu1 %v3826_v15 }
 0x36e   : > { %v13117_v5 = vpop.f32.mrb[85].mxu0 }
 0x36f   : > { %v3594_v46 = vpop.permute.xlu0 %3593  ;;  %v3832_v18 = vld [vmem:[#allocation3 + $0x298] sm:$0xff] }
 0x370   : > { %3671 = vst.msk [vmem:[#allocation3 + $0x2e8] sm:$0xff] %vm721_vm3, %v3594_v46  ;;  %4453 = vmatprep.mubr.f32.mxu1 %v3832_v18  ;;  %v3342_v47 = vpop.permute.xlu1 %3341  ;;  %v3841_v19 = vld [vmem:[#allocation3 + $0x2e0] sm:$0xff]  ;;  %v4887_v18 = vld [vmem:[#allocation2 + $0x1] sm:$0xff] }
 0x371   : > { %3417 = vst.msk [vmem:[#allocation3 + $0x330] sm:$0xff] %vm721_vm3, %v3342_v47  ;;  %4454 = vmatmul.mubr.f32.gmra.mrb[64].mxu1 %v3831_v0  ;;  %4951 = vrot.lane.b32.xlu1 %v4887_v18, %s10827_s25 }
 0x373   : > { %v3596_v28 = vpop.permute.xlu0 %3595  ;;  %v3837_v54 = vld [vmem:[#allocation3 + $0x2c0] sm:$0xff] }
 0x374   : > { %3672 = vst.msk [vmem:[#allocation3 + $0x310] sm:$0xff] %vm721_vm3, %v3596_v28  ;;  %4458 = vmatprep.mubr.f32.mxu1 %v3837_v54  ;;  %v3344_v12 = vpop.permute.xlu1 %3343  ;;  %v3846_v42 = vld [vmem:[#allocation3 + $0x308] sm:$0xff] }
 0x375   : > { %3418 = vst.msk [vmem:[#allocation3 + $0x358] sm:$0xff] %vm721_vm3, %v3344_v12  ;;  %4459 = vmatmul.mubr.f32.gmra.mrb[66].mxu1 %v3836_v14  ;;  %v4888_v12 = vld [vmem:[#allocation2 + $0x9] sm:$0xff]  ;;  %v6071_v14 = vld [vmem:[%s15112_s5] sm:$0xff] }
 0x376   : > { %v13123_v51 = vpop.f32.mrb[86].mxu0  ;;  %4953 = vrot.lane.b32.xlu1 %v4888_v12, %s10827_s25 }
 0x377   : > { %v13125_v52 = vpop.f32.mrb[87].mxu0  ;;  %v3598_v29 = vpop.permute.xlu0 %3597  ;;  %v3842_v8 = vld [vmem:[#allocation3 + $0x2e8] sm:$0xff] }
 0x378   : > { %3673 = vst.msk [vmem:[#allocation3 + $0x338] sm:$0xff] %vm721_vm3, %v3598_v29  ;;  %4463 = vmatprep.mubr.f32.mxu1 %v3842_v8  ;;  %v3346_v53 = vpop.permute.xlu1 %3345  ;;  %v3851_v26 = vld [vmem:[#allocation3 + $0x330] sm:$0xff]  ;;  %v6072_v29 = vld [vmem:[%s15112_s5 + $0x8] sm:$0xff] }
 0x379   : > { %3419 = vst.msk [vmem:[#allocation3 + $0x380] sm:$0xff] %vm721_vm3, %v3346_v53  ;;  %4464 = vmatmul.mubr.f32.gmra.mrb[68].mxu1 %v3841_v19  ;;  %v9905_v19 = vpack.c.bf16 %v6072_v29, %v6071_v14  ;;  %v6141_v29 = vld [vmem:[%s15112_s5 + $0x230] sm:$0xff] }
 0x37b   : > { %v3600_v24 = vpop.permute.xlu0 %3599  ;;  %v3847_v11 = vld [vmem:[#allocation3 + $0x310] sm:$0xff]  ;;  %9906 = vmatpush1.bf16.msra.mxu1 %v9905_v19 }
 0x37c   : > { %3674 = vst.msk [vmem:[#allocation3 + $0x360] sm:$0xff] %vm721_vm3, %v3600_v24  ;;  %4468 = vmatprep.mubr.f32.mxu1 %v3847_v11  ;;  %v3348_v22 = vpop.permute.xlu1 %3347  ;;  %v3856_v61 = vld [vmem:[#allocation3 + $0x358] sm:$0xff]  ;;  %9907 = vmatprep.subr.bf16.mxu1 %v15141_v7 }
 0x37d   : > { %v13130_v32 = vpop.f32.mrb[88].mxu0  ;;  %3420 = vst.msk [vmem:[#allocation3 + $0x3a8] sm:$0xff] %vm721_vm3, %v3348_v22  ;;  %4469 = vmatmul.mubr.f32.gmra.mrb[70].mxu1 %v3846_v42 }
 0x37e   : > { %v13133_v10 = vpop.f32.mrb[89].mxu0 }
 0x37f   : > { %v3602_v45 = vpop.permute.xlu0 %3601  ;;  %v3852_v48 = vld [vmem:[#allocation3 + $0x338] sm:$0xff] }
 0x380   : > { %3675 = vst.msk [vmem:[#allocation3 + $0x388] sm:$0xff] %vm721_vm3, %v3602_v45  ;;  %4473 = vmatprep.mubr.f32.mxu1 %v3852_v48  ;;  %v3350_v49 = vpop.permute.xlu1 %3349  ;;  %v3861_v25 = vld [vmem:[#allocation3 + $0x380] sm:$0xff]  ;;  %v6135_v45 = vld [vmem:[%s15112_s5 + $0x200] sm:$0xff]  ;;  %v6136_v48 = vld [vmem:[%s15112_s5 + $0x208] sm:$0xff] }
 0x381   : > { %3421 = vst.msk [vmem:[#allocation3 + $0x3d0] sm:$0xff] %vm721_vm3, %v3350_v49  ;;  %4474 = vmatmul.mubr.f32.gmra.mrb[72].mxu1 %v3851_v26 }
 0x383   : > { %v3604_v59 = vpop.permute.xlu0 %3603  ;;  %v3857_v37 = vld [vmem:[#allocation3 + $0x360] sm:$0xff] }
 0x384   : > { %3676 = vst.msk [vmem:[#allocation3 + $0x3b0] sm:$0xff] %vm721_vm3, %v3604_v59  ;;  %4478 = vmatprep.mubr.f32.mxu1 %v3857_v37  ;;  %v3352_v23 = vpop.permute.xlu1 %3351  ;;  %v3866_v56 = vld [vmem:[#allocation3 + $0x3a8] sm:$0xff]  ;;  %v10000_v59 = vpack.c.bf16 %v6136_v48, %v6135_v45  ;;  %v6073_v37 = vld [vmem:[%s15112_s5 + $0x10] sm:$0xff] }
 0x385   : > { %3422 = vst.msk [vmem:[#allocation3 + $0x3f8] sm:$0xff] %vm721_vm3, %v3352_v23  ;;  %4479 = vmatmul.mubr.f32.gmra.mrb[74].mxu1 %v3856_v61  ;;  %v6074_v23 = vld [vmem:[%s15112_s5 + $0x18] sm:$0xff] }
 0x386   : > { %10001 = vmatprep.subr.bf16.mxu0 %v10000_v59 }
 0x387   : > { %v13139_v58 = vpop.f32.mrb[90].mxu0  ;;  %v3606_v9 = vpop.permute.xlu0 %3605  ;;  %v3862_v39 = vld [vmem:[#allocation3 + $0x388] sm:$0xff]  ;;  %10003 = vmatpush3.bf16.msra.mxu0 %v10000_v59 }
 0x388   : > { %v13141_v6 = vpop.f32.mrb[91].mxu0  ;;  %3677 = vst.msk [vmem:[#allocation3 + $0x3d8] sm:$0xff] %vm721_vm3, %v3606_v9  ;;  %4483 = vmatprep.mubr.f32.mxu1 %v3862_v39  ;;  %v3354_v63 = vpop.permute.xlu1 %3353  ;;  %v3871_v0 = vld [vmem:[#allocation3 + $0x3d0] sm:$0xff]  ;;  %v9908_v39 = vpack.c.bf16 %v6074_v23, %v6073_v37  ;;  %v6081_v37 = vld [vmem:[%s15112_s5 + $0x50] sm:$0xff]  ;;  %v6082_v23 = vld [vmem:[%s15112_s5 + $0x58] sm:$0xff] }
 0x389   : > { %3423 = vst.msk [vmem:[#allocation3 + $0x420] sm:$0xff] %vm721_vm3, %v3354_v63  ;;  %4484 = vmatmul.mubr.f32.gmra.mrb[76].mxu1 %v3861_v25  ;;  %v6137_v63 = vld [vmem:[%s15112_s5 + $0x210] sm:$0xff]  ;;  %v6138_v25 = vld [vmem:[%s15112_s5 + $0x218] sm:$0xff] }
 0x38a   : > { %9909 = vmatpush1.bf16.msra.mxu1 %v9908_v39  ;;  %v6084_v39 = vld [vmem:[%s15112_s5 + $0x68] sm:$0xff] }
 0x38b   : > { %v3608_v50 = vpop.permute.xlu0 %3607  ;;  %v3867_v17 = vld [vmem:[#allocation3 + $0x3b0] sm:$0xff]  ;;  %9910 = vmatprep.subr.bf16.mxu1 %v15141_v7 }
 0x38c   : > { %3678 = vst.msk [vmem:[#allocation3 + $0x400] sm:$0xff] %vm721_vm3, %v3608_v50  ;;  %4488 = vmatprep.mubr.f32.mxu1 %v3867_v17  ;;  %v3356_v16 = vpop.permute.xlu1 %3355  ;;  %v3876_v53 = vld [vmem:[#allocation3 + $0x3f8] sm:$0xff] }
 0x38d   : > { %3424 = vst.msk [vmem:[#allocation3 + $0x448] sm:$0xff] %vm721_vm3, %v3356_v16  ;;  %4489 = vmatmul.mubr.f32.gmra.mrb[78].mxu1 %v3866_v56  ;;  %v10004_v16 = vpack.c.bf16 %v6138_v25, %v6137_v63  ;;  %v6085_v25 = vld [vmem:[%s15112_s5 + $0x70] sm:$0xff] }
 0x38e   : > { %v13146_v27 = vpop.f32.mrb[92].mxu0 }
 0x38f   : > { %v13149_v31 = vpop.f32.mrb[93].mxu0  ;;  %v3610_v15 = vpop.permute.xlu0 %3609  ;;  %v3872_v46 = vld [vmem:[#allocation3 + $0x3d8] sm:$0xff]  ;;  %10005 = vmatprep.subr.bf16.mxu0 %v10004_v16 }
 0x390   : > { %3679 = vst.msk [vmem:[#allocation3 + $0x428] sm:$0xff] %vm721_vm3, %v3610_v15  ;;  %4493 = vmatprep.mubr.f32.mxu1 %v3872_v46  ;;  %v3358_v47 = vpop.permute.xlu1 %3357  ;;  %v3881_v42 = vld [vmem:[#allocation3 + $0x420] sm:$0xff]  ;;  %10007 = vmatpush3.bf16.msra.mxu0 %v10004_v16  ;;  %v6139_v15 = vld [vmem:[%s15112_s5 + $0x220] sm:$0xff]  ;;  %v6140_v46 = vld [vmem:[%s15112_s5 + $0x228] sm:$0xff] }
 0x391   : > { %3425 = vst.msk [vmem:[#allocation3 + $0x470] sm:$0xff] %vm721_vm3, %v3358_v47  ;;  %4494 = vmatmul.mubr.f32.gmra.mrb[80].mxu1 %v3871_v0  ;;  %v10008_v0 = vpack.c.bf16 %v6140_v46, %v6139_v15  ;;  %v6087_v16 = vld [vmem:[%s15112_s5 + $0x80] sm:$0xff]  ;;  %v6089_v46 = vld [vmem:[%s15112_s5 + $0x90] sm:$0xff] }
 0x393   : > { %v3612_v28 = vpop.permute.xlu0 %3611  ;;  %v3877_v54 = vld [vmem:[#allocation3 + $0x400] sm:$0xff]  ;;  %10009 = vmatprep.subr.bf16.mxu0 %v10008_v0 }
 0x394   : > { %3680 = vst.msk [vmem:[#allocation3 + $0x450] sm:$0xff] %vm721_vm3, %v3612_v28  ;;  %4498 = vmatprep.mubr.f32.mxu1 %v3877_v54  ;;  %v3360_v8 = vpop.permute.xlu1 %3359  ;;  %v3886_v9 = vld [vmem:[#allocation3 + $0x448] sm:$0xff]  ;;  %v6075_v28 = vld [vmem:[%s15112_s5 + $0x20] sm:$0xff]  ;;  %v6076_v54 = vld [vmem:[%s15112_s5 + $0x28] sm:$0xff]  ;;  %10011 = vmatpush3.bf16.msra.mxu0 %v10008_v0 }
 0x395   : > { %3426 = vst.msk [vmem:[#allocation3 + $0x498] sm:$0xff] %vm721_vm3, %v3360_v8  ;;  %4499 = vmatmul.mubr.f32.gmra.mrb[82].mxu1 %v3876_v53  ;;  %v9911_v14 = vpack.c.bf16 %v6076_v54, %v6075_v28  ;;  %v6142_v8 = vld [vmem:[%s15112_s5 + $0x238] sm:$0xff]  ;;  %v6091_v0 = vld [vmem:[%s15112_s5 + $0xa0] sm:$0xff]  ;;  %v6092_v28 = vld [vmem:[%s15112_s5 + $0xa8] sm:$0xff] }
 0x396   : > { %v10012_v19 = vpack.c.bf16 %v6142_v8, %v6141_v29  ;;  %v9935_v54 = vpack.c.bf16 %v6092_v28, %v6091_v0  ;;  %v6095_v8 = vld [vmem:[%s15112_s5 + $0xc0] sm:$0xff] }
 0x397   : > { %v3614_v24 = vpop.permute.xlu0 %3613  ;;  %v3882_v11 = vld [vmem:[#allocation3 + $0x428] sm:$0xff]  ;;  %9912 = vmatpush1.bf16.msra.mxu1 %v9911_v14 }
 0x398   : > { %3681 = vst.msk [vmem:[#allocation3 + $0x478] sm:$0xff] %vm721_vm3, %v3614_v24  ;;  %4503 = vmatprep.mubr.f32.mxu1 %v3882_v11  ;;  %v3362_v22 = vpop.permute.xlu1 %3361  ;;  %v3891_v56 = vld [vmem:[#allocation3 + $0x470] sm:$0xff]  ;;  %9913 = vmatprep.subr.bf16.mxu1 %v15141_v7  ;;  %v6094_v14 = vld [vmem:[%s15112_s5 + $0xb8] sm:$0xff] }
 0x399   : > { %3427 = vst.msk [vmem:[#allocation3 + $0x4c0] sm:$0xff] %vm721_vm3, %v3362_v22  ;;  %4504 = vmatmul.mubr.f32.gmra.mrb[84].mxu1 %v3881_v42  ;;  %10013 = vmatprep.subr.bf16.mxu0 %v10012_v19  ;;  %v6077_v22 = vld [vmem:[%s15112_s5 + $0x30] sm:$0xff]  ;;  %v6078_v42 = vld [vmem:[%s15112_s5 + $0x38] sm:$0xff] }
 0x39a   : > { %10015 = vmatpush3.bf16.msra.mxu0 %v10012_v19  ;;  %v9914_v48 = vpack.c.bf16 %v6078_v42, %v6077_v22 }
 0x39b   : > { %v3616_v49 = vpop.permute.xlu0 %3615  ;;  %v3887_v26 = vld [vmem:[#allocation3 + $0x450] sm:$0xff] }
 0x39c   : > { %3682 = vst.msk [vmem:[#allocation3 + $0x4a0] sm:$0xff] %vm721_vm3, %v3616_v49  ;;  %4508 = vmatprep.mubr.f32.mxu1 %v3887_v26  ;;  %v3364_v61 = vpop.permute.xlu1 %3363  ;;  %v3896_v12 = vld [vmem:[#allocation3 + $0x498] sm:$0xff]  ;;  %9915 = vmatpush1.bf16.msra.mxu1 %v9914_v48  ;;  %v6079_v49 = vld [vmem:[%s15112_s5 + $0x40] sm:$0xff] }
 0x39d   : > { %3428 = vst.msk [vmem:[#allocation3 + $0x4e8] sm:$0xff] %vm721_vm3, %v3364_v61  ;;  %4509 = vmatmul.mubr.f32.gmra.mrb[86].mxu1 %v3886_v9  ;;  %9916 = vmatprep.subr.bf16.mxu1 %v15141_v7  ;;  %v6080_v26 = vld [vmem:[%s15112_s5 + $0x48] sm:$0xff]  ;;  %v9920_v61 = vpack.c.bf16 %v6082_v23, %v6081_v37  ;;  %v6083_v9 = vld [vmem:[%s15112_s5 + $0x60] sm:$0xff] }
 0x39e   : > { %v9917_v59 = vpack.c.bf16 %v6080_v26, %v6079_v49  ;;  %v9923_v63 = vpack.c.bf16 %v6084_v39, %v6083_v9  ;;  %v13292_v48 = vld [vmem:[%s15111_s4] ss:$0 sm:$0xff]  ;;  %v6100_v37 = vld [vmem:[%s15112_s5 + $0xe8] sm:$0xff] }
 0x39f   : > { %v3618_v50 = vpop.permute.xlu0 %3617  ;;  %v3892_v17 = vld [vmem:[#allocation3 + $0x478] sm:$0xff]  ;;  %v4823_v26 = vld [vmem:[#allocation2] sm:$0xff] }
 0x3a0   : > { %3683 = vst.msk [vmem:[#allocation3 + $0x4c8] sm:$0xff] %vm721_vm3, %v3618_v50  ;;  %4513 = vmatprep.mubr.f32.mxu1 %v3892_v17  ;;  %v3901_v24 = vld [vmem:[#allocation3 + $0x4c0] sm:$0xff]  ;;  %9918 = vmatpush1.bf16.msra.mxu1 %v9917_v59  ;;  %v6086_v50 = vld [vmem:[%s15112_s5 + $0x78] sm:$0xff]  ;;  %v6099_v59 = vld [vmem:[%s15112_s5 + $0xe0] sm:$0xff] }
 0x3a1   : > { %4514 = vmatmul.mubr.f32.gmra.mrb[88].mxu1 %v3891_v56  ;;  %9919 = vmatprep.subr.bf16.mxu1 %v15141_v7  ;;  %v9926_v17 = vpack.c.bf16 %v6086_v50, %v6085_v25  ;;  %v6088_v56 = vld [vmem:[%s15112_s5 + $0x88] sm:$0xff]  ;;  %4855 = vst.msk [vmem:[#allocation3] sm:$0xff] %vm375_vm0, %v4823_v26 }
 0x3a2   : > { %v9929_v15 = vpack.c.bf16 %v6088_v56, %v6087_v16  ;;  %v4824_v25 = vld [vmem:[#allocation2 + $0x8] sm:$0xff] }
 0x3a3   : > { %v3620_v18 = vpop.permute.xlu0 %3619  ;;  %v3897_v47 = vld [vmem:[#allocation3 + $0x4a0] sm:$0xff]  ;;  %v5079_v50 = vld [vmem:[#allocation2 + $0x2] sm:$0xff]  ;;  %4856 = vst.msk [vmem:[#allocation3 + $0x28] sm:$0xff] %vm375_vm0, %v4824_v25 }
 0x3a4   : > { %3684 = vst.msk [vmem:[#allocation3 + $0x4f0] sm:$0xff] %vm721_vm3, %v3620_v18  ;;  %4518 = vmatprep.mubr.f32.mxu1 %v3897_v47  ;;  %v3906_v45 = vld [vmem:[#allocation3 + $0x4e8] sm:$0xff]  ;;  %9921 = vmatpush1.bf16.msra.mxu1 %v9920_v61  ;;  %v9947_v61 = vpack.c.bf16 %v6100_v37, %v6099_v59 }
 0x3a5   : > { %4519 = vmatmul.mubr.f32.gmra.mrb[90].mxu1 %v3896_v12  ;;  %9922 = vmatprep.subr.bf16.mxu1 %v15141_v7  ;;  %v6090_v18 = vld [vmem:[%s15112_s5 + $0x98] sm:$0xff]  ;;  %v6093_v12 = vld [vmem:[%s15112_s5 + $0xb0] sm:$0xff]  ;;  %5111 = vst.msk [vmem:[#allocation3 + $0x8] sm:$0xff] %vm375_vm0, %v5079_v50 }
 0x3a6   : > { %v9932_v47 = vpack.c.bf16 %v6090_v18, %v6089_v46  ;;  %v9938_v29 = vpack.c.bf16 %v6094_v14, %v6093_v12  ;;  %v5080_v46 = vld [vmem:[#allocation2 + $0xa] sm:$0xff] }
 0x3a7   : > { %v3902_v53 = vld [vmem:[#allocation3 + $0x4c8] sm:$0xff]  ;;  %5112 = vst.msk [vmem:[#allocation3 + $0x30] sm:$0xff] %vm375_vm0, %v5080_v46 }
 0x3a8   : > { %4523 = vmatprep.mubr.f32.mxu1 %v3902_v53  ;;  %9924 = vmatpush1.bf16.msra.mxu1 %v9923_v63  ;;  %v6096_v53 = vld [vmem:[%s15112_s5 + $0xc8] sm:$0xff] }
 0x3a9   : > { %4524 = vmatmul.mubr.f32.gmra.mrb[92].mxu1 %v3901_v24  ;;  %9925 = vmatprep.subr.bf16.mxu1 %v15141_v7  ;;  %v9941_v19 = vpack.c.bf16 %v6096_v53, %v6095_v8  ;;  %v6097_v24 = vld [vmem:[%s15112_s5 + $0xd0] sm:$0xff] }
 0x3ab   : > { %v3907_v11 = vld [vmem:[#allocation3 + $0x4f0] sm:$0xff] }
 0x3ac   : > { %4528 = vmatprep.mubr.f32.mxu1 %v3907_v11  ;;  %9927 = vmatpush1.bf16.msra.mxu1 %v9926_v17  ;;  %v6098_v11 = vld [vmem:[%s15112_s5 + $0xd8] sm:$0xff]  ;;  %v6101_v17 = vld [vmem:[%s15112_s5 + $0xf0] sm:$0xff] }
 0x3ad   : > { %4529 = vmatmul.mubr.f32.gmra.mrb[94].mxu1 %v3906_v45  ;;  %9928 = vmatprep.subr.bf16.mxu1 %v15141_v7  ;;  %v9944_v22 = vpack.c.bf16 %v6098_v11, %v6097_v24 }
 0x3b0   : > { %9930 = vmatpush1.bf16.msra.mxu1 %v9929_v15  ;;  %v6102_v15 = vld [vmem:[%s15112_s5 + $0xf8] sm:$0xff] }
 0x3b1   : > { %9931 = vmatprep.subr.bf16.mxu1 %v15141_v7  ;;  %v9950_v0 = vpack.c.bf16 %v6102_v15, %v6101_v17 }
 0x3b4   : > { %9933 = vmatpush1.bf16.msra.mxu1 %v9932_v47 }
 0x3b5   : > { %9934 = vmatprep.subr.bf16.mxu1 %v15141_v7 }
 0x3b8   : > { %9936 = vmatpush1.bf16.msra.mxu1 %v9935_v54 }
 0x3b9   : > { %9937 = vmatprep.subr.bf16.mxu1 %v15141_v7 }
 0x3bc   : > { %9939 = vmatpush1.bf16.msra.mxu1 %v9938_v29 }
 0x3bd   : > { %9940 = vmatprep.subr.bf16.mxu1 %v15141_v7 }
 0x3c0   : > { %9942 = vmatpush1.bf16.msra.mxu1 %v9941_v19 }
 0x3c1   : > { %9943 = vmatprep.subr.bf16.mxu1 %v15141_v7 }
 0x3c4   : > { %9945 = vmatpush1.bf16.msra.mxu1 %v9944_v22 }
 0x3c5   : > { %9946 = vmatprep.subr.bf16.mxu1 %v15141_v7 }
 0x3c8   : > { %9948 = vmatpush1.bf16.msra.mxu1 %v9947_v61 }
 0x3c9   : > { %9949 = vmatprep.subr.bf16.mxu1 %v15141_v7 }
 0x3cc   : > { %9951 = vmatpush1.bf16.msra.mxu1 %v9950_v0 }
 0x3cd   : > { %v13284_v42 = vpop.f32.mrb[94].mxu0  ;;  %9952 = vmatprep.subr.bf16.mxu1 %v15141_v7 }
 0x3ce   : > { %v13287_v45 = vpop.f32.mrb[95].mxu0 }
 0x3e3   : > { %v4952_v49 = vpop.permute.xlu1 %4951 }
 0x3e4   : > { %5047 = vst.msk [vmem:[#allocation3] sm:$0xff] %vm721_vm3, %v4952_v49 }
 0x3e8   : > { %v4954_v56 = vpop.permute.xlu1 %4953 }
 0x3e9   : > { %5048 = vst.msk [vmem:[#allocation3 + $0x28] sm:$0xff] %vm721_vm3, %v4954_v56 }
 0x404   : > { %v4375_v23 = vpop.f32.mrb[32].mxu1 }
 0x405   : > { %v10480_v9 = vadd.f32 %v13292_v48, %v4375_v23  ;;  %v4377_v39 = vpop.f32.mrb[33].mxu1 }
 0x407   : > { %v4601_v63 = vadd.f32 %v10480_v9, %v13017_v40 }
 0x408   : > { %v4380_v16 = vpop.f32.mrb[34].mxu1 }
 0x409   : > { %v4759_v40 = vmax.f32 %v4601_v63, 0.0  ;;  %v10481_v18 = vadd.f32 %v13292_v48, %v4380_v16  ;;  %v4382_v47 = vpop.f32.mrb[35].mxu1 }
 0x40b   : > { %4791 = vst.msk [vmem:[#allocation2 + $0x19] sm:$0xff] %vm375_vm0, %v4759_v40  ;;  %v4606_v28 = vadd.f32 %v10481_v18, %v13013_v35 }
 0x40c   : > { %v4385_v54 = vpop.f32.mrb[36].mxu1 }
 0x40d   : > { %v4760_v12 = vmax.f32 %v4606_v28, 0.0  ;;  %v10482_v14 = vadd.f32 %v13292_v48, %v4385_v54  ;;  %v4387_v29 = vpop.f32.mrb[37].mxu1 }
 0x40f   : > { %4792 = vst.msk [vmem:[#allocation2 + $0x21] sm:$0xff] %vm375_vm0, %v4760_v12  ;;  %v4611_v8 = vadd.f32 %v10482_v14, %v13036_v1 }
 0x410   : > { %v4390_v53 = vpop.f32.mrb[38].mxu1 }
 0x411   : > { %v4761_v19 = vmax.f32 %v4611_v8, 0.0  ;;  %v10483_v24 = vadd.f32 %v13292_v48, %v4390_v53  ;;  %v4392_v11 = vpop.f32.mrb[39].mxu1 }
 0x412   : > { %v5143_v22 = vld [vmem:[#allocation2 + $0x18] sm:$0xff] }
 0x413   : > { %v4889_v49 = vld [vmem:[#allocation2 + $0x19] sm:$0xff]  ;;  %4793 = vst.msk [vmem:[#allocation2 + $0x31] sm:$0xff] %vm375_vm0, %v4761_v19  ;;  %v4616_v26 = vadd.f32 %v10483_v24, %v13033_v13  ;;  %5207 = vrot.lane.b32.xlu0 %v5143_v22, %s10827_s25  ;;  %4857 = vst.msk [vmem:[#allocation3 + $0x50] sm:$0xff] %vm375_vm0, %v5143_v22 }
 0x414   : > { %v5335_v35 = vld [vmem:[#allocation2 + $0x19] sm:$0xff]  ;;  %4955 = vrot.lane.b32.xlu1 %v4889_v49, %s10827_s25  ;;  %v4395_v1 = vpop.f32.mrb[40].mxu1 }
 0x415   : > { %5367 = vst.msk [vmem:[#allocation3 + $0x10] sm:$0xff] %vm375_vm0, %v5335_v35  ;;  %v4762_v59 = vmax.f32 %v4616_v26, 0.0  ;;  %v10484_v37 = vadd.f32 %v13292_v48, %v4395_v1  ;;  %v4397_v23 = vpop.f32.mrb[41].mxu1 }
 0x416   : > { %v5144_v61 = vld [vmem:[#allocation2 + $0x20] sm:$0xff] }
 0x417   : > { %v4890_v9 = vld [vmem:[#allocation2 + $0x21] sm:$0xff]  ;;  %4794 = vst.msk [vmem:[#allocation2 + $0x39] sm:$0xff] %vm375_vm0, %v4762_v59  ;;  %v4621_v13 = vadd.f32 %v10484_v37, %v13052_v33  ;;  %5209 = vrot.lane.b32.xlu0 %v5144_v61, %s10827_s25  ;;  %4858 = vst.msk [vmem:[#allocation3 + $0x78] sm:$0xff] %vm375_vm0, %v5144_v61 }
 0x418   : > { %v13330_v39 = vld [vmem:[#allocation2 + $0x1a] sm:$0xff]  ;;  %4957 = vrot.lane.b32.xlu1 %v4890_v9, %s10827_s25  ;;  %v13339_v63 = vld [vmem:[#allocation2 + $0x22] sm:$0xff]  ;;  %v4400_v25 = vpop.f32.mrb[42].mxu1 }
 0x419   : > { %5113 = vst.msk [vmem:[#allocation3 + $0x58] sm:$0xff] %vm375_vm0, %v13330_v39  ;;  %5114 = vst.msk [vmem:[#allocation3 + $0x80] sm:$0xff] %vm375_vm0, %v13339_v63  ;;  %v5336_v50 = vld [vmem:[#allocation2 + $0x21] sm:$0xff]  ;;  %v4763_v17 = vmax.f32 %v4621_v13, 0.0  ;;  %v10485_v16 = vadd.f32 %v13292_v48, %v4400_v25  ;;  %v4402_v33 = vpop.f32.mrb[43].mxu1 }
 0x41a   : > { %5368 = vst.msk [vmem:[#allocation3 + $0x38] sm:$0xff] %vm375_vm0, %v5336_v50  ;;  %v5145_v56 = vld [vmem:[#allocation2 + $0x30] sm:$0xff] }
 0x41b   : > { %v4891_v15 = vld [vmem:[#allocation2 + $0x31] sm:$0xff]  ;;  %4795 = vst.msk [vmem:[#allocation2 + $0x49] sm:$0xff] %vm375_vm0, %v4763_v17  ;;  %v4626_v46 = vadd.f32 %v10485_v16, %v13048_v57  ;;  %5211 = vrot.lane.b32.xlu0 %v5145_v56, %s10827_s25  ;;  %4859 = vst.msk [vmem:[#allocation3 + $0xa0] sm:$0xff] %vm375_vm0, %v5145_v56 }
 0x41c   : > { %4959 = vrot.lane.b32.xlu1 %v4891_v15, %s10827_s25  ;;  %v5591_v40 = vld [vmem:[#allocation2 + $0x30] sm:$0xff]  ;;  %v4405_v47 = vpop.f32.mrb[44].mxu1 }
 0x41d   : > { %v5337_v18 = vld [vmem:[#allocation2 + $0x31] sm:$0xff]  ;;  %5623 = vst.msk [vmem:[#allocation3 + $0x18] sm:$0xff] %vm375_vm0, %v5591_v40  ;;  %v4764_v0 = vmax.f32 %v4626_v46, 0.0  ;;  %v10486_v28 = vadd.f32 %v13292_v48, %v4405_v47  ;;  %v4407_v54 = vpop.f32.mrb[45].mxu1 }
 0x41e   : > { %5369 = vst.msk [vmem:[#allocation3 + $0x60] sm:$0xff] %vm375_vm0, %v5337_v18  ;;  %v5146_v12 = vld [vmem:[#allocation2 + $0x38] sm:$0xff] }
 0x41f   : > { %v4892_v14 = vld [vmem:[#allocation2 + $0x39] sm:$0xff]  ;;  %4796 = vst.msk [vmem:[#allocation2 + $0x51] sm:$0xff] %vm375_vm0, %v4764_v0  ;;  %v4631_v29 = vadd.f32 %v10486_v28, %v13061_v2  ;;  %5213 = vrot.lane.b32.xlu0 %v5146_v12, %s10827_s25  ;;  %4860 = vst.msk [vmem:[#allocation3 + $0xc8] sm:$0xff] %vm375_vm0, %v5146_v12 }
 0x420   : > { %v13353_v57 = vld [vmem:[#allocation2 + $0x32] sm:$0xff]  ;;  %4961 = vrot.lane.b32.xlu1 %v4892_v14, %s10827_s25  ;;  %v13361_v8 = vld [vmem:[#allocation2 + $0x3a] sm:$0xff]  ;;  %v4410_v53 = vpop.f32.mrb[46].mxu1 }
 0x421   : > { %5879 = vst.msk [vmem:[#allocation3 + $0x20] sm:$0xff] %vm375_vm0, %v13353_v57  ;;  %5115 = vst.msk [vmem:[#allocation3 + $0xa8] sm:$0xff] %vm375_vm0, %v13353_v57  ;;  %v5592_v2 = vld [vmem:[#allocation2 + $0x38] sm:$0xff]  ;;  %v4765_v24 = vmax.f32 %v4631_v29, 0.0  ;;  %v10487_v11 = vadd.f32 %v13292_v48, %v4410_v53  ;;  %v4412_v22 = vpop.f32.mrb[47].mxu1 }
 0x422   : > { %5880 = vst.msk [vmem:[#allocation3 + $0x48] sm:$0xff] %vm375_vm0, %v13361_v8  ;;  %5116 = vst.msk [vmem:[#allocation3 + $0xd0] sm:$0xff] %vm375_vm0, %v13361_v8  ;;  %v5338_v19 = vld [vmem:[#allocation2 + $0x39] sm:$0xff]  ;;  %v5147_v49 = vld [vmem:[#allocation2 + $0x48] sm:$0xff] }
 0x423   : > { %5624 = vst.msk [vmem:[#allocation3 + $0x40] sm:$0xff] %vm375_vm0, %v5592_v2  ;;  %5370 = vst.msk [vmem:[#allocation3 + $0x88] sm:$0xff] %vm375_vm0, %v5338_v19  ;;  %v4893_v35 = vld [vmem:[#allocation2 + $0x49] sm:$0xff]  ;;  %v4636_v26 = vadd.f32 %v10487_v11, %v13059_v4  ;;  %5215 = vrot.lane.b32.xlu0 %v5147_v49, %s10827_s25 }
 0x424   : > { %4797 = vst.msk [vmem:[#allocation2 + $0x61] sm:$0xff] %vm375_vm0, %v4765_v24  ;;  %4963 = vrot.lane.b32.xlu1 %v4893_v35, %s10827_s25  ;;  %4861 = vst.msk [vmem:[#allocation3 + $0xf0] sm:$0xff] %vm375_vm0, %v5147_v49  ;;  %v5593_v1 = vld [vmem:[#allocation2 + $0x48] sm:$0xff]  ;;  %v4415_v37 = vpop.f32.mrb[48].mxu1 }
 0x425   : > { %v5339_v59 = vld [vmem:[#allocation2 + $0x49] sm:$0xff]  ;;  %5625 = vst.msk [vmem:[#allocation3 + $0x68] sm:$0xff] %vm375_vm0, %v5593_v1  ;;  %v4766_v23 = vmax.f32 %v4636_v26, 0.0  ;;  %v10488_v61 = vadd.f32 %v13292_v48, %v4415_v37  ;;  %v4417_v9 = vpop.f32.mrb[49].mxu1 }
 0x426   : > { %5371 = vst.msk [vmem:[#allocation3 + $0xb0] sm:$0xff] %vm375_vm0, %v5339_v59  ;;  %v5148_v25 = vld [vmem:[#allocation2 + $0x50] sm:$0xff] }
 0x427   : > { %v4894_v4 = vld [vmem:[#allocation2 + $0x51] sm:$0xff]  ;;  %4798 = vst.msk [vmem:[#allocation2 + $0x69] sm:$0xff] %vm375_vm0, %v4766_v23  ;;  %v4641_v50 = vadd.f32 %v10488_v61, %v13069_v30  ;;  %5217 = vrot.lane.b32.xlu0 %v5148_v25, %s10827_s25  ;;  %4862 = vst.msk [vmem:[#allocation3 + $0x118] sm:$0xff] %vm375_vm0, %v5148_v25 }
 0x428   : > { %v5915_v13 = vld [vmem:[#allocation3 + $0x20] sm:$0xff]  ;;  %4965 = vrot.lane.b32.xlu1 %v4894_v4, %s10827_s25  ;;  %v4420_v56 = vpop.f32.mrb[50].mxu1 }
 0x429   : > { %9632 = vmatprep.mubr.msk.f32.mxu0 %vm375_vm0, %v5915_v13  ;;  %v5920_v17 = vld [vmem:[#allocation3 + $0x48] sm:$0xff]  ;;  %v13385_v16 = vld [vmem:[#allocation2 + $0x4a] sm:$0xff]  ;;  %v4767_v30 = vmax.f32 %v4641_v50, 0.0  ;;  %v10489_v15 = vadd.f32 %v13292_v48, %v4420_v56  ;;  %v4422_v46 = vpop.f32.mrb[51].mxu1 }
 0x42a   : > { %v13387_v33 = vld [vmem:[#allocation2 + $0x52] sm:$0xff]  ;;  %9633 = vmatmul.mubr.msk.f32.vlgmr.msra.gmra.mrb[96].mxu0 %vm375_vm0, %v5920_v17  ;;  %5881 = vst.msk [vmem:[#allocation3 + $0x70] sm:$0xff] %vm375_vm0, %v13385_v16  ;;  %5117 = vst.msk [vmem:[#allocation3 + $0xf8] sm:$0xff] %vm375_vm0, %v13385_v16 }
 0x42b   : > { %5882 = vst.msk [vmem:[#allocation3 + $0x98] sm:$0xff] %vm375_vm0, %v13387_v33  ;;  %5118 = vst.msk [vmem:[#allocation3 + $0x120] sm:$0xff] %vm375_vm0, %v13387_v33  ;;  %v5594_v40 = vld [vmem:[#allocation2 + $0x50] sm:$0xff]  ;;  %v5149_v47 = vld [vmem:[#allocation2 + $0x60] sm:$0xff]  ;;  %v4646_v28 = vadd.f32 %v10489_v15, %v13066_v55 }
 0x42c   : > { %v5340_v18 = vld [vmem:[#allocation2 + $0x51] sm:$0xff]  ;;  %v4895_v0 = vld [vmem:[#allocation2 + $0x61] sm:$0xff]  ;;  %5626 = vst.msk [vmem:[#allocation3 + $0x90] sm:$0xff] %vm375_vm0, %v5594_v40  ;;  %4799 = vst.msk [vmem:[#allocation2 + $0x79] sm:$0xff] %vm375_vm0, %v4767_v30  ;;  %5219 = vrot.lane.b32.xlu0 %v5149_v47, %s10827_s25  ;;  %v4425_v14 = vpop.f32.mrb[52].mxu1 }
 0x42d   : > { %5372 = vst.msk [vmem:[#allocation3 + $0xd8] sm:$0xff] %vm375_vm0, %v5340_v18  ;;  %4863 = vst.msk [vmem:[#allocation3 + $0x140] sm:$0xff] %vm375_vm0, %v5149_v47  ;;  %v5595_v54 = vld [vmem:[#allocation2 + $0x60] sm:$0xff]  ;;  %4967 = vrot.lane.b32.xlu1 %v4895_v0, %s10827_s25  ;;  %v4768_v29 = vmax.f32 %v4646_v28, 0.0  ;;  %v10490_v53 = vadd.f32 %v13292_v48, %v4425_v14  ;;  %v4427_v2 = vpop.f32.mrb[53].mxu1 }
 0x42e   : > { %v5341_v12 = vld [vmem:[#allocation2 + $0x61] sm:$0xff]  ;;  %5627 = vst.msk [vmem:[#allocation3 + $0xb8] sm:$0xff] %vm375_vm0, %v5595_v54  ;;  %v4896_v24 = vld [vmem:[#allocation2 + $0x69] sm:$0xff] }
 0x42f   : > { %5373 = vst.msk [vmem:[#allocation3 + $0x100] sm:$0xff] %vm375_vm0, %v5341_v12  ;;  %v5150_v19 = vld [vmem:[#allocation2 + $0x68] sm:$0xff]  ;;  %4800 = vst.msk [vmem:[#allocation2 + $0x81] sm:$0xff] %vm375_vm0, %v4768_v29  ;;  %v4651_v11 = vadd.f32 %v10490_v53, %v13077_v38 }
 0x430   : > { %v13411_v55 = vld [vmem:[#allocation2 + $0x62] sm:$0xff]  ;;  %5221 = vrot.lane.b32.xlu0 %v5150_v19, %s10827_s25  ;;  %v13418_v35 = vld [vmem:[#allocation2 + $0x6a] sm:$0xff]  ;;  %4864 = vst.msk [vmem:[#allocation3 + $0x168] sm:$0xff] %vm375_vm0, %v5150_v19  ;;  %v4430_v26 = vpop.f32.mrb[54].mxu1 }
 0x431   : > { %v5925_v22 = vld [vmem:[#allocation3 + $0x70] sm:$0xff]  ;;  %5883 = vst.msk [vmem:[#allocation3 + $0xc0] sm:$0xff] %vm375_vm0, %v13411_v55  ;;  %5119 = vst.msk [vmem:[#allocation3 + $0x148] sm:$0xff] %vm375_vm0, %v13411_v55  ;;  %4969 = vrot.lane.b32.xlu1 %v4896_v24, %s10827_s25  ;;  %v4769_v38 = vmax.f32 %v4651_v11, 0.0  ;;  %v10491_v1 = vadd.f32 %v13292_v48, %v4430_v26  ;;  %v4432_v59 = vpop.f32.mrb[55].mxu1  ;;  %v5596_v37 = vld [vmem:[#allocation2 + $0x68] sm:$0xff] }
 0x432   : > { %v5930_v49 = vld [vmem:[#allocation3 + $0x98] sm:$0xff]  ;;  %9635 = vmatprep.mubr.msk.f32.mxu0 %vm375_vm0, %v5925_v22  ;;  %5884 = vst.msk [vmem:[#allocation3 + $0xe8] sm:$0xff] %vm375_vm0, %v13418_v35  ;;  %5120 = vst.msk [vmem:[#allocation3 + $0x170] sm:$0xff] %vm375_vm0, %v13418_v35 }
 0x433   : > { %9636 = vmatmul.mubr.msk.f32.gmra.mrb[98].mxu0 %vm375_vm0, %v5930_v49  ;;  %v5342_v23 = vld [vmem:[#allocation2 + $0x69] sm:$0xff]  ;;  %v5151_v61 = vld [vmem:[#allocation2 + $0x78] sm:$0xff]  ;;  %5628 = vst.msk [vmem:[#allocation3 + $0xe0] sm:$0xff] %vm375_vm0, %v5596_v37  ;;  %4801 = vst.msk [vmem:[#allocation2 + $0x91] sm:$0xff] %vm375_vm0, %v4769_v38  ;;  %v4656_v25 = vadd.f32 %v10491_v1, %v13075_v3 }
 0x434   : > { %v4897_v9 = vld [vmem:[#allocation2 + $0x79] sm:$0xff]  ;;  %5374 = vst.msk [vmem:[#allocation3 + $0x128] sm:$0xff] %vm375_vm0, %v5342_v23  ;;  %5223 = vrot.lane.b32.xlu0 %v5151_v61, %s10827_s25  ;;  %4865 = vst.msk [vmem:[#allocation3 + $0x190] sm:$0xff] %vm375_vm0, %v5151_v61  ;;  %v4435_v50 = vpop.f32.mrb[56].mxu1 }
 0x435   : > { %v13431_v13 = vld [vmem:[#allocation2 + $0x79] sm:$0xff]  ;;  %4971 = vrot.lane.b32.xlu1 %v4897_v9, %s10827_s25  ;;  %v4770_v17 = vmax.f32 %v4656_v25, 0.0  ;;  %v10492_v56 = vadd.f32 %v13292_v48, %v4435_v50  ;;  %v4437_v30 = vpop.f32.mrb[57].mxu1 }
 0x436   : > { %v5597_v4 = vld [vmem:[#allocation2 + $0x78] sm:$0xff]  ;;  %5375 = vst.msk [vmem:[#allocation3 + $0x150] sm:$0xff] %vm375_vm0, %v13431_v13  ;;  %v5152_v46 = vld [vmem:[#allocation2 + $0x80] sm:$0xff] }
 0x437   : > { %5629 = vst.msk [vmem:[#allocation3 + $0x108] sm:$0xff] %vm375_vm0, %v5597_v4  ;;  %v4898_v3 = vld [vmem:[#allocation2 + $0x81] sm:$0xff]  ;;  %4802 = vst.msk [vmem:[#allocation2 + $0x99] sm:$0xff] %vm375_vm0, %v4770_v17  ;;  %v4661_v40 = vadd.f32 %v10492_v56, %v13085_v20 }
 0x438   : > { %v5935_v15 = vld [vmem:[#allocation3 + $0xc0] sm:$0xff]  ;;  %5225 = vrot.lane.b32.xlu0 %v5152_v46, %s10827_s25  ;;  %v13448_v47 = vld [vmem:[#allocation2 + $0x7a] sm:$0xff]  ;;  %v13450_v0 = vld [vmem:[#allocation2 + $0x82] sm:$0xff]  ;;  %v4440_v28 = vpop.f32.mrb[58].mxu1 }
 0x439   : > { %9638 = vmatprep.mubr.msk.f32.mxu0 %vm375_vm0, %v5935_v15  ;;  %v5940_v18 = vld [vmem:[#allocation3 + $0xe8] sm:$0xff]  ;;  %4973 = vrot.lane.b32.xlu1 %v4898_v3, %s10827_s25  ;;  %5885 = vst.msk [vmem:[#allocation3 + $0x110] sm:$0xff] %vm375_vm0, %v13448_v47  ;;  %5886 = vst.msk [vmem:[#allocation3 + $0x138] sm:$0xff] %vm375_vm0, %v13450_v0  ;;  %v4834_v20 = vld [vmem:[#allocation2 + $0x80] sm:$0xff]  ;;  %v4771_v12 = vmax.f32 %v4661_v40, 0.0  ;;  %v10493_v14 = vadd.f32 %v13292_v48, %v4440_v28  ;;  %v4442_v29 = vpop.f32.mrb[59].mxu1 }
 0x43a   : > { %9639 = vmatmul.mubr.msk.f32.gmra.mrb[100].mxu0 %vm375_vm0, %v5940_v18  ;;  %5121 = vst.msk [vmem:[#allocation3 + $0x198] sm:$0xff] %vm375_vm0, %v13448_v47  ;;  %v13460_v54 = vld [vmem:[#allocation2 + $0x81] sm:$0xff]  ;;  %5122 = vst.msk [vmem:[#allocation3 + $0x1c0] sm:$0xff] %vm375_vm0, %v13450_v0  ;;  %v5153_v2 = vld [vmem:[#allocation2 + $0x90] sm:$0xff] }
 0x43b   : > { %4866 = vst.msk [vmem:[#allocation3 + $0x1b8] sm:$0xff] %vm375_vm0, %v4834_v20  ;;  %v5598_v53 = vld [vmem:[#allocation2 + $0x80] sm:$0xff]  ;;  %5376 = vst.msk [vmem:[#allocation3 + $0x178] sm:$0xff] %vm375_vm0, %v13460_v54  ;;  %v4899_v19 = vld [vmem:[#allocation2 + $0x91] sm:$0xff]  ;;  %v4666_v11 = vadd.f32 %v10493_v14, %v13082_v43 }
 0x43c   : > { %v4835_v24 = vld [vmem:[#allocation2 + $0x90] sm:$0xff]  ;;  %5630 = vst.msk [vmem:[#allocation3 + $0x130] sm:$0xff] %vm375_vm0, %v5598_v53  ;;  %4803 = vst.msk [vmem:[#allocation2 + $0xa9] sm:$0xff] %vm375_vm0, %v4771_v12  ;;  %5227 = vrot.lane.b32.xlu0 %v5153_v2, %s10827_s25  ;;  %v4445_v26 = vpop.f32.mrb[60].mxu1 }
 0x43d   : > { %4867 = vst.msk [vmem:[#allocation3 + $0x1e0] sm:$0xff] %vm375_vm0, %v4835_v24  ;;  %v13473_v22 = vld [vmem:[#allocation2 + $0x91] sm:$0xff]  ;;  %4975 = vrot.lane.b32.xlu1 %v4899_v19, %s10827_s25  ;;  %v4772_v38 = vmax.f32 %v4666_v11, 0.0  ;;  %v10494_v1 = vadd.f32 %v13292_v48, %v4445_v26  ;;  %v4447_v59 = vpop.f32.mrb[61].mxu1 }
 0x43e   : > { %v5599_v49 = vld [vmem:[#allocation2 + $0x90] sm:$0xff]  ;;  %5377 = vst.msk [vmem:[#allocation3 + $0x1a0] sm:$0xff] %vm375_vm0, %v13473_v22  ;;  %v5154_v43 = vld [vmem:[#allocation2 + $0x98] sm:$0xff] }
 0x43f   : > { %5631 = vst.msk [vmem:[#allocation3 + $0x158] sm:$0xff] %vm375_vm0, %v5599_v49  ;;  %v4900_v37 = vld [vmem:[#allocation2 + $0x99] sm:$0xff]  ;;  %4804 = vst.msk [vmem:[#allocation2 + $0xb1] sm:$0xff] %vm375_vm0, %v4772_v38  ;;  %v4671_v61 = vadd.f32 %v10494_v1, %v13093_v62 }
 0x440   : > { %v13480_v23 = vld [vmem:[#allocation2 + $0x92] sm:$0xff]  ;;  %v5945_v9 = vld [vmem:[#allocation3 + $0x110] sm:$0xff]  ;;  %5229 = vrot.lane.b32.xlu0 %v5154_v43, %s10827_s25  ;;  %v5950_v25 = vld [vmem:[#allocation3 + $0x138] sm:$0xff]  ;;  %v4450_v50 = vpop.f32.mrb[62].mxu1 }
 0x441   : > { %5887 = vst.msk [vmem:[#allocation3 + $0x160] sm:$0xff] %vm375_vm0, %v13480_v23  ;;  %v13487_v4 = vld [vmem:[#allocation2 + $0x9a] sm:$0xff]  ;;  %5123 = vst.msk [vmem:[#allocation3 + $0x1e8] sm:$0xff] %vm375_vm0, %v13480_v23  ;;  %9641 = vmatprep.mubr.msk.f32.mxu0 %vm375_vm0, %v5945_v9  ;;  %4977 = vrot.lane.b32.xlu1 %v4900_v37, %s10827_s25  ;;  %v4773_v56 = vmax.f32 %v4671_v61, 0.0  ;;  %v10495_v30 = vadd.f32 %v13292_v48, %v4450_v50  ;;  %v4452_v15 = vpop.f32.mrb[63].mxu1 }
 0x442   : > { %5888 = vst.msk [vmem:[#allocation3 + $0x188] sm:$0xff] %vm375_vm0, %v13487_v4  ;;  %v4836_v62 = vld [vmem:[#allocation2 + $0x98] sm:$0xff]  ;;  %5124 = vst.msk [vmem:[#allocation3 + $0x210] sm:$0xff] %vm375_vm0, %v13487_v4  ;;  %9642 = vmatmul.mubr.msk.f32.gmra.mrb[102].mxu0 %vm375_vm0, %v5950_v25 }
 0x443   : > { %v13495_v17 = vld [vmem:[#allocation2 + $0x99] sm:$0xff]  ;;  %4868 = vst.msk [vmem:[#allocation3 + $0x208] sm:$0xff] %vm375_vm0, %v4836_v62  ;;  %v5155_v3 = vld [vmem:[#allocation2 + $0xa8] sm:$0xff]  ;;  %4805 = vst.msk [vmem:[#allocation2 + $0xc1] sm:$0xff] %vm375_vm0, %v4773_v56  ;;  %v4676_v28 = vadd.f32 %v10495_v30, %v13091_v44 }
 0x444   : > { %v5600_v46 = vld [vmem:[#allocation2 + $0x98] sm:$0xff]  ;;  %5378 = vst.msk [vmem:[#allocation3 + $0x1c8] sm:$0xff] %vm375_vm0, %v13495_v17  ;;  %v4901_v40 = vld [vmem:[#allocation2 + $0xa9] sm:$0xff]  ;;  %5231 = vrot.lane.b32.xlu0 %v5155_v3, %s10827_s25  ;;  %v4455_v14 = vpop.f32.mrb[64].mxu1 }
 0x445   : > { %v4837_v18 = vld [vmem:[#allocation2 + $0xa8] sm:$0xff]  ;;  %5632 = vst.msk [vmem:[#allocation3 + $0x180] sm:$0xff] %vm375_vm0, %v5600_v46  ;;  %4979 = vrot.lane.b32.xlu1 %v4901_v40, %s10827_s25  ;;  %v4774_v29 = vmax.f32 %v4676_v28, 0.0  ;;  %v10496_v53 = vadd.f32 %v13292_v48, %v4455_v14  ;;  %v4457_v2 = vpop.f32.mrb[65].mxu1 }
 0x446   : > { %4869 = vst.msk [vmem:[#allocation3 + $0x230] sm:$0xff] %vm375_vm0, %v4837_v18  ;;  %v13509_v20 = vld [vmem:[#allocation2 + $0xa9] sm:$0xff]  ;;  %v4902_v24 = vld [vmem:[#allocation2 + $0xb1] sm:$0xff] }
 0x447   : > { %v5601_v12 = vld [vmem:[#allocation2 + $0xa8] sm:$0xff]  ;;  %5379 = vst.msk [vmem:[#allocation3 + $0x1f0] sm:$0xff] %vm375_vm0, %v13509_v20  ;;  %v5156_v19 = vld [vmem:[#allocation2 + $0xb0] sm:$0xff]  ;;  %4806 = vst.msk [vmem:[#allocation2 + $0xc9] sm:$0xff] %vm375_vm0, %v4774_v29  ;;  %v4681_v11 = vadd.f32 %v10496_v53, %v13101_v41 }
 0x448   : > { %5633 = vst.msk [vmem:[#allocation3 + $0x1a8] sm:$0xff] %vm375_vm0, %v5601_v12  ;;  %v5955_v44 = vld [vmem:[#allocation3 + $0x160] sm:$0xff]  ;;  %5233 = vrot.lane.b32.xlu0 %v5156_v19, %s10827_s25  ;;  %v4460_v1 = vpop.f32.mrb[66].mxu1 }
 0x449   : > { %9644 = vmatprep.mubr.msk.f32.mxu0 %vm375_vm0, %v5955_v44  ;;  %v5960_v49 = vld [vmem:[#allocation3 + $0x188] sm:$0xff]  ;;  %v13520_v26 = vld [vmem:[#allocation2 + $0xaa] sm:$0xff]  ;;  %4981 = vrot.lane.b32.xlu1 %v4902_v24, %s10827_s25  ;;  %v4775_v37 = vmax.f32 %v4681_v11, 0.0  ;;  %v10497_v61 = vadd.f32 %v13292_v48, %v4460_v1  ;;  %v4462_v9 = vpop.f32.mrb[67].mxu1 }
 0x44a   : > { %v13522_v38 = vld [vmem:[#allocation2 + $0xb2] sm:$0xff]  ;;  %9645 = vmatmul.mubr.msk.f32.gmra.mrb[104].mxu0 %vm375_vm0, %v5960_v49  ;;  %5889 = vst.msk [vmem:[#allocation3 + $0x1b0] sm:$0xff] %vm375_vm0, %v13520_v26  ;;  %5125 = vst.msk [vmem:[#allocation3 + $0x238] sm:$0xff] %vm375_vm0, %v13520_v26  ;;  %v5157_v25 = vld [vmem:[#allocation2 + $0xc0] sm:$0xff] }
 0x44b   : > { %5890 = vst.msk [vmem:[#allocation3 + $0x1d8] sm:$0xff] %vm375_vm0, %v13522_v38  ;;  %v4838_v41 = vld [vmem:[#allocation2 + $0xb0] sm:$0xff]  ;;  %v4903_v50 = vld [vmem:[#allocation2 + $0xc1] sm:$0xff]  ;;  %4807 = vst.msk [vmem:[#allocation2 + $0xd9] sm:$0xff] %vm375_vm0, %v4775_v37  ;;  %v4686_v56 = vadd.f32 %v10497_v61, %v13098_v60 }
 0x44c   : > { %v13532_v59 = vld [vmem:[#allocation2 + $0xb1] sm:$0xff]  ;;  %4870 = vst.msk [vmem:[#allocation3 + $0x258] sm:$0xff] %vm375_vm0, %v4838_v41  ;;  %5634 = vst.msk [vmem:[#allocation3 + $0x1d0] sm:$0xff] %vm375_vm0, %v4838_v41  ;;  %v4839_v62 = vld [vmem:[#allocation2 + $0xc0] sm:$0xff]  ;;  %5235 = vrot.lane.b32.xlu0 %v5157_v25, %s10827_s25  ;;  %v4465_v15 = vpop.f32.mrb[68].mxu1 }
 0x44d   : > { %v5094_v43 = vld [vmem:[#allocation2 + $0xb2] sm:$0xff]  ;;  %5380 = vst.msk [vmem:[#allocation3 + $0x218] sm:$0xff] %vm375_vm0, %v13532_v59  ;;  %4871 = vst.msk [vmem:[#allocation3 + $0x280] sm:$0xff] %vm375_vm0, %v4839_v62  ;;  %v13544_v30 = vld [vmem:[#allocation2 + $0xc1] sm:$0xff]  ;;  %4983 = vrot.lane.b32.xlu1 %v4903_v50, %s10827_s25  ;;  %v4776_v46 = vmax.f32 %v4686_v56, 0.0  ;;  %v10498_v3 = vadd.f32 %v13292_v48, %v4465_v15  ;;  %v4467_v40 = vpop.f32.mrb[69].mxu1 }
 0x44e   : > { %5126 = vst.msk [vmem:[#allocation3 + $0x260] sm:$0xff] %vm375_vm0, %v5094_v43  ;;  %5635 = vst.msk [vmem:[#allocation3 + $0x1f8] sm:$0xff] %vm375_vm0, %v4839_v62  ;;  %v5158_v18 = vld [vmem:[#allocation2 + $0xc8] sm:$0xff] }
 0x44f   : > { %5381 = vst.msk [vmem:[#allocation3 + $0x240] sm:$0xff] %vm375_vm0, %v13544_v30  ;;  %v4904_v60 = vld [vmem:[#allocation2 + $0xc9] sm:$0xff]  ;;  %4808 = vst.msk [vmem:[#allocation2 + $0xe1] sm:$0xff] %vm375_vm0, %v4776_v46  ;;  %v4691_v12 = vadd.f32 %v10498_v3, %v13109_v21 }
 0x450   : > { %v13551_v28 = vld [vmem:[#allocation2 + $0xc2] sm:$0xff]  ;;  %5237 = vrot.lane.b32.xlu0 %v5158_v18, %s10827_s25  ;;  %v5860_v53 = vld [vmem:[#allocation2 + $0xca] sm:$0xff]  ;;  %v4470_v2 = vpop.f32.mrb[70].mxu1 }
 0x451   : > { %v5965_v14 = vld [vmem:[#allocation3 + $0x1b0] sm:$0xff]  ;;  %5891 = vst.msk [vmem:[#allocation3 + $0x200] sm:$0xff] %vm375_vm0, %v13551_v28  ;;  %5127 = vst.msk [vmem:[#allocation3 + $0x288] sm:$0xff] %vm375_vm0, %v13551_v28  ;;  %4985 = vrot.lane.b32.xlu1 %v4904_v60, %s10827_s25  ;;  %v4840_v44 = vld [vmem:[#allocation2 + $0xc8] sm:$0xff]  ;;  %v4777_v24 = vmax.f32 %v4691_v12, 0.0  ;;  %v10499_v11 = vadd.f32 %v13292_v48, %v4470_v2  ;;  %v4472_v49 = vpop.f32.mrb[71].mxu1 }
 0x452   : > { %v5970_v29 = vld [vmem:[#allocation3 + $0x1d8] sm:$0xff]  ;;  %9647 = vmatprep.mubr.msk.f32.mxu0 %vm375_vm0, %v5965_v14  ;;  %5892 = vst.msk [vmem:[#allocation3 + $0x228] sm:$0xff] %vm375_vm0, %v5860_v53  ;;  %4872 = vst.msk [vmem:[#allocation3 + $0x2a8] sm:$0xff] %vm375_vm0, %v4840_v44  ;;  %v5159_v1 = vld [vmem:[#allocation2 + $0xd8] sm:$0xff] }
 0x453   : > { %v13563_v21 = vld [vmem:[#allocation2 + $0xc9] sm:$0xff]  ;;  %9648 = vmatmul.mubr.msk.f32.gmra.mrb[106].mxu0 %vm375_vm0, %v5970_v29  ;;  %5636 = vst.msk [vmem:[#allocation3 + $0x220] sm:$0xff] %vm375_vm0, %v4840_v44  ;;  %v4905_v41 = vld [vmem:[#allocation2 + $0xd9] sm:$0xff]  ;;  %4809 = vst.msk [vmem:[#allocation2 + $0xf1] sm:$0xff] %vm375_vm0, %v4777_v24  ;;  %v4696_v37 = vadd.f32 %v10499_v11, %v13107_v34 }
 0x454   : > { %v13565_v19 = vld [vmem:[#allocation2 + $0xca] sm:$0xff]  ;;  %5382 = vst.msk [vmem:[#allocation3 + $0x268] sm:$0xff] %vm375_vm0, %v13563_v21  ;;  %v4841_v43 = vld [vmem:[#allocation2 + $0xd8] sm:$0xff]  ;;  %5239 = vrot.lane.b32.xlu0 %v5159_v1, %s10827_s25  ;;  %v4475_v9 = vpop.f32.mrb[72].mxu1 }
 0x455   : > { %5128 = vst.msk [vmem:[#allocation3 + $0x2b0] sm:$0xff] %vm375_vm0, %v13565_v19  ;;  %4873 = vst.msk [vmem:[#allocation3 + $0x2d0] sm:$0xff] %vm375_vm0, %v4841_v43  ;;  %v13579_v61 = vld [vmem:[#allocation2 + $0xd9] sm:$0xff]  ;;  %4987 = vrot.lane.b32.xlu1 %v4905_v41, %s10827_s25  ;;  %v4778_v25 = vmax.f32 %v4696_v37, 0.0  ;;  %v10500_v50 = vadd.f32 %v13292_v48, %v4475_v9  ;;  %v4477_v62 = vpop.f32.mrb[73].mxu1 }
 0x456   : > { %5637 = vst.msk [vmem:[#allocation3 + $0x248] sm:$0xff] %vm375_vm0, %v4841_v43  ;;  %5383 = vst.msk [vmem:[#allocation3 + $0x290] sm:$0xff] %vm375_vm0, %v13579_v61  ;;  %v5160_v34 = vld [vmem:[#allocation2 + $0xe0] sm:$0xff] }
 0x457   : > { %v4906_v15 = vld [vmem:[#allocation2 + $0xe1] sm:$0xff]  ;;  %4810 = vst.msk [vmem:[#allocation2 + $0xf9] sm:$0xff] %vm375_vm0, %v4778_v25  ;;  %v4701_v46 = vadd.f32 %v10500_v50, %v13117_v5 }
 0x458   : > { %v5975_v56 = vld [vmem:[#allocation3 + $0x200] sm:$0xff]  ;;  %5241 = vrot.lane.b32.xlu0 %v5160_v34, %s10827_s25  ;;  %v13590_v40 = vld [vmem:[#allocation2 + $0xda] sm:$0xff]  ;;  %v5862_v18 = vld [vmem:[#allocation2 + $0xe2] sm:$0xff]  ;;  %v4480_v60 = vpop.f32.mrb[74].mxu1 }
 0x459   : > { %9650 = vmatprep.mubr.msk.f32.mxu0 %vm375_vm0, %v5975_v56  ;;  %v5980_v3 = vld [vmem:[#allocation3 + $0x228] sm:$0xff]  ;;  %4989 = vrot.lane.b32.xlu1 %v4906_v15, %s10827_s25  ;;  %5893 = vst.msk [vmem:[#allocation3 + $0x250] sm:$0xff] %vm375_vm0, %v13590_v40  ;;  %5894 = vst.msk [vmem:[#allocation3 + $0x278] sm:$0xff] %vm375_vm0, %v5862_v18  ;;  %v4842_v12 = vld [vmem:[#allocation2 + $0xe0] sm:$0xff]  ;;  %v4779_v29 = vmax.f32 %v4701_v46, 0.0  ;;  %v10501_v53 = vadd.f32 %v13292_v48, %v4480_v60  ;;  %v4482_v2 = vpop.f32.mrb[75].mxu1 }
 0x45a   : > { %9651 = vmatmul.mubr.msk.f32.gmra.mrb[108].mxu0 %vm375_vm0, %v5980_v3  ;;  %v5097_v5 = vld [vmem:[#allocation2 + $0xda] sm:$0xff]  ;;  %4874 = vst.msk [vmem:[#allocation3 + $0x2f8] sm:$0xff] %vm375_vm0, %v4842_v12  ;;  %v13602_v44 = vld [vmem:[#allocation2 + $0xe2] sm:$0xff]  ;;  %5638 = vst.msk [vmem:[#allocation3 + $0x270] sm:$0xff] %vm375_vm0, %v4842_v12 }
 0x45b   : > { %v13597_v14 = vld [vmem:[#allocation2 + $0xe1] sm:$0xff]  ;;  %5129 = vst.msk [vmem:[#allocation3 + $0x2d8] sm:$0xff] %vm375_vm0, %v5097_v5  ;;  %v5161_v24 = vld [vmem:[#allocation2 + $0xf0] sm:$0xff]  ;;  %5130 = vst.msk [vmem:[#allocation3 + $0x300] sm:$0xff] %vm375_vm0, %v13602_v44  ;;  %v4706_v1 = vadd.f32 %v10501_v53, %v13114_v36 }
 0x45c   : > { %5384 = vst.msk [vmem:[#allocation3 + $0x2b8] sm:$0xff] %vm375_vm0, %v13597_v14  ;;  %v4907_v11 = vld [vmem:[#allocation2 + $0xf1] sm:$0xff]  ;;  %4811 = vst.msk [vmem:[#allocation2 + $0x109] sm:$0xff] %vm375_vm0, %v4779_v29  ;;  %5243 = vrot.lane.b32.xlu0 %v5161_v24, %s10827_s25  ;;  %v4485_v43 = vpop.f32.mrb[76].mxu1 }
 0x45d   : > { %v4843_v49 = vld [vmem:[#allocation2 + $0xf0] sm:$0xff]  ;;  %4991 = vrot.lane.b32.xlu1 %v4907_v11, %s10827_s25  ;;  %v4780_v37 = vmax.f32 %v4706_v1, 0.0  ;;  %v10502_v9 = vadd.f32 %v13292_v48, %v4485_v43  ;;  %v4487_v25 = vpop.f32.mrb[77].mxu1 }
 0x45e   : > { %4875 = vst.msk [vmem:[#allocation3 + $0x320] sm:$0xff] %vm375_vm0, %v4843_v49  ;;  %v13613_v41 = vld [vmem:[#allocation2 + $0xf1] sm:$0xff]  ;;  %5639 = vst.msk [vmem:[#allocation3 + $0x298] sm:$0xff] %vm375_vm0, %v4843_v49  ;;  %v4908_v36 = vld [vmem:[#allocation2 + $0xf9] sm:$0xff] }
 0x45f   : > { %5385 = vst.msk [vmem:[#allocation3 + $0x2e0] sm:$0xff] %vm375_vm0, %v13613_v41  ;;  %v5162_v50 = vld [vmem:[#allocation2 + $0xf8] sm:$0xff]  ;;  %4812 = vst.msk [vmem:[#allocation2 + $0x111] sm:$0xff] %vm375_vm0, %v4780_v37  ;;  %v4711_v56 = vadd.f32 %v10502_v9, %v13125_v52 }
 0x460   : > { %v5863_v62 = vld [vmem:[#allocation2 + $0xf2] sm:$0xff]  ;;  %v5985_v34 = vld [vmem:[#allocation3 + $0x250] sm:$0xff]  ;;  %5245 = vrot.lane.b32.xlu0 %v5162_v50, %s10827_s25  ;;  %v5990_v15 = vld [vmem:[#allocation3 + $0x278] sm:$0xff]  ;;  %v4490_v3 = vpop.f32.mrb[78].mxu1 }
 0x461   : > { %5895 = vst.msk [vmem:[#allocation3 + $0x2a0] sm:$0xff] %vm375_vm0, %v5863_v62  ;;  %v5864_v46 = vld [vmem:[#allocation2 + $0xfa] sm:$0xff]  ;;  %9653 = vmatprep.mubr.msk.f32.mxu0 %vm375_vm0, %v5985_v34  ;;  %4993 = vrot.lane.b32.xlu1 %v4908_v36, %s10827_s25  ;;  %v13627_v60 = vld [vmem:[#allocation2 + $0xf2] sm:$0xff]  ;;  %v4781_v52 = vmax.f32 %v4711_v56, 0.0  ;;  %v10503_v5 = vadd.f32 %v13292_v48, %v4490_v3  ;;  %v4492_v29 = vpop.f32.mrb[79].mxu1 }
 0x462   : > { %5896 = vst.msk [vmem:[#allocation3 + $0x2c8] sm:$0xff] %vm375_vm0, %v5864_v46  ;;  %v4844_v18 = vld [vmem:[#allocation2 + $0xf8] sm:$0xff]  ;;  %9654 = vmatmul.mubr.msk.f32.gmra.mrb[110].mxu0 %vm375_vm0, %v5990_v15  ;;  %5131 = vst.msk [vmem:[#allocation3 + $0x328] sm:$0xff] %vm375_vm0, %v13627_v60 }
 0x463   : > { %v13629_v12 = vld [vmem:[#allocation2 + $0xf9] sm:$0xff]  ;;  %4876 = vst.msk [vmem:[#allocation3 + $0x348] sm:$0xff] %vm375_vm0, %v4844_v18  ;;  %5640 = vst.msk [vmem:[#allocation3 + $0x2c0] sm:$0xff] %vm375_vm0, %v4844_v18  ;;  %v5163_v2 = vld [vmem:[#allocation2 + $0x108] sm:$0xff]  ;;  %v4716_v49 = vadd.f32 %v10503_v5, %v13123_v51 }
 0x464   : > { %v13636_v53 = vld [vmem:[#allocation2 + $0xfa] sm:$0xff]  ;;  %5386 = vst.msk [vmem:[#allocation3 + $0x308] sm:$0xff] %vm375_vm0, %v13629_v12  ;;  %v4909_v24 = vld [vmem:[#allocation2 + $0x109] sm:$0xff]  ;;  %4813 = vst.msk [vmem:[#allocation2 + $0x121] sm:$0xff] %vm375_vm0, %v4781_v52  ;;  %5247 = vrot.lane.b32.xlu0 %v5163_v2, %s10827_s25  ;;  %v4495_v43 = vpop.f32.mrb[80].mxu1 }
 0x465   : > { %v4845_v11 = vld [vmem:[#allocation2 + $0x108] sm:$0xff]  ;;  %5132 = vst.msk [vmem:[#allocation3 + $0x350] sm:$0xff] %vm375_vm0, %v13636_v53  ;;  %4995 = vrot.lane.b32.xlu1 %v4909_v24, %s10827_s25  ;;  %v4782_v37 = vmax.f32 %v4716_v49, 0.0  ;;  %v10504_v9 = vadd.f32 %v13292_v48, %v4495_v43  ;;  %v4497_v25 = vpop.f32.mrb[81].mxu1 }
 0x466   : > { %4877 = vst.msk [vmem:[#allocation3 + $0x370] sm:$0xff] %vm375_vm0, %v4845_v11  ;;  %v13647_v1 = vld [vmem:[#allocation2 + $0x109] sm:$0xff]  ;;  %5641 = vst.msk [vmem:[#allocation3 + $0x2e8] sm:$0xff] %vm375_vm0, %v4845_v11  ;;  %v4910_v36 = vld [vmem:[#allocation2 + $0x111] sm:$0xff] }
 0x467   : > { %5387 = vst.msk [vmem:[#allocation3 + $0x330] sm:$0xff] %vm375_vm0, %v13647_v1  ;;  %v5164_v51 = vld [vmem:[#allocation2 + $0x110] sm:$0xff]  ;;  %4814 = vst.msk [vmem:[#allocation2 + $0x129] sm:$0xff] %vm375_vm0, %v4782_v37  ;;  %v4721_v62 = vadd.f32 %v10504_v9, %v13133_v10 }
 0x468   : > { %v5995_v50 = vld [vmem:[#allocation3 + $0x2a0] sm:$0xff]  ;;  %5249 = vrot.lane.b32.xlu0 %v5164_v51, %s10827_s25  ;;  %v4500_v46 = vpop.f32.mrb[82].mxu1 }
 0x469   : > { %9656 = vmatprep.mubr.msk.f32.mxu0 %vm375_vm0, %v5995_v50  ;;  %v6000_v56 = vld [vmem:[#allocation3 + $0x2c8] sm:$0xff]  ;;  %v5865_v34 = vld [vmem:[#allocation2 + $0x10a] sm:$0xff]  ;;  %4997 = vrot.lane.b32.xlu1 %v4910_v36, %s10827_s25  ;;  %v4783_v52 = vmax.f32 %v4721_v62, 0.0  ;;  %v10505_v5 = vadd.f32 %v13292_v48, %v4500_v46  ;;  %v4502_v29 = vpop.f32.mrb[83].mxu1 }
 0x46a   : > { %v5866_v15 = vld [vmem:[#allocation2 + $0x112] sm:$0xff]  ;;  %9657 = vmatmul.mubr.msk.f32.gmra.mrb[112].mxu0 %vm375_vm0, %v6000_v56  ;;  %5897 = vst.msk [vmem:[#allocation3 + $0x2f0] sm:$0xff] %vm375_vm0, %v5865_v34  ;;  %v13662_v18 = vld [vmem:[#allocation2 + $0x10a] sm:$0xff]  ;;  %v13702_v29 = vld [vmem:[%s15111_s4] ss:$0 sm:$0xff] }
 0x46b   : > { %5898 = vst.msk [vmem:[#allocation3 + $0x318] sm:$0xff] %vm375_vm0, %v5866_v15  ;;  %v4846_v3 = vld [vmem:[#allocation2 + $0x110] sm:$0xff]  ;;  %5133 = vst.msk [vmem:[#allocation3 + $0x378] sm:$0xff] %vm375_vm0, %v13662_v18  ;;  %v5165_v24 = vld [vmem:[#allocation2 + $0x120] sm:$0xff]  ;;  %v4726_v43 = vadd.f32 %v10505_v5, %v13130_v32 }
 0x46c   : > { %v13664_v10 = vld [vmem:[#allocation2 + $0x111] sm:$0xff]  ;;  %4878 = vst.msk [vmem:[#allocation3 + $0x398] sm:$0xff] %vm375_vm0, %v4846_v3  ;;  %5642 = vst.msk [vmem:[#allocation3 + $0x310] sm:$0xff] %vm375_vm0, %v4846_v3  ;;  %v4911_v11 = vld [vmem:[#allocation2 + $0x121] sm:$0xff]  ;;  %5251 = vrot.lane.b32.xlu0 %v5165_v24, %s10827_s25  ;;  %v4505_v9 = vpop.f32.mrb[84].mxu1 }
 0x46d   : > { %v13670_v2 = vld [vmem:[#allocation2 + $0x112] sm:$0xff]  ;;  %5388 = vst.msk [vmem:[#allocation3 + $0x358] sm:$0xff] %vm375_vm0, %v13664_v10  ;;  %v4847_v49 = vld [vmem:[#allocation2 + $0x120] sm:$0xff]  ;;  %4815 = vst.msk [vmem:[#allocation2 + $0x139] sm:$0xff] %vm375_vm0, %v4783_v52  ;;  %4999 = vrot.lane.b32.xlu1 %v4911_v11, %s10827_s25  ;;  %v4784_v25 = vmax.f32 %v4726_v43, 0.0  ;;  %v10506_v50 = vadd.f32 %v13292_v48, %v4505_v9  ;;  %v4507_v51 = vpop.f32.mrb[85].mxu1 }
 0x46e   : > { %5134 = vst.msk [vmem:[#allocation3 + $0x3a0] sm:$0xff] %vm375_vm0, %v13670_v2  ;;  %4879 = vst.msk [vmem:[#allocation3 + $0x3c0] sm:$0xff] %vm375_vm0, %v4847_v49  ;;  %v13681_v37 = vld [vmem:[#allocation2 + $0x121] sm:$0xff]  ;;  %v4912_v32 = vld [vmem:[#allocation2 + $0x129] sm:$0xff] }
 0x46f   : > { %5643 = vst.msk [vmem:[#allocation3 + $0x338] sm:$0xff] %vm375_vm0, %v4847_v49  ;;  %5389 = vst.msk [vmem:[#allocation3 + $0x380] sm:$0xff] %vm375_vm0, %v13681_v37  ;;  %v5166_v36 = vld [vmem:[#allocation2 + $0x128] sm:$0xff]  ;;  %v4731_v56 = vadd.f32 %v10506_v50, %v13141_v6 }
 0x470   : > { %v5867_v62 = vld [vmem:[#allocation2 + $0x122] sm:$0xff]  ;;  %4816 = vst.msk [vmem:[#allocation2 + $0x141] sm:$0xff] %vm375_vm0, %v4784_v25  ;;  %5253 = vrot.lane.b32.xlu0 %v5166_v36, %s10827_s25  ;;  %v5868_v46 = vld [vmem:[#allocation2 + $0x12a] sm:$0xff]  ;;  %v4510_v48 = vpop.f32.mrb[86].mxu1 }
 0x471   : > { %v6005_v34 = vld [vmem:[#allocation3 + $0x2f0] sm:$0xff]  ;;  %5899 = vst.msk [vmem:[#allocation3 + $0x340] sm:$0xff] %vm375_vm0, %v5867_v62  ;;  %5001 = vrot.lane.b32.xlu1 %v4912_v32, %s10827_s25  ;;  %5900 = vst.msk [vmem:[#allocation3 + $0x368] sm:$0xff] %vm375_vm0, %v5868_v46  ;;  %v4848_v3 = vld [vmem:[#allocation2 + $0x128] sm:$0xff]  ;;  %v4785_v6 = vmax.f32 %v4731_v56, 0.0  ;;  %v10507_v24 = vadd.f32 %v13702_v29, %v4510_v48  ;;  %v4512_v11 = vpop.f32.mrb[87].mxu1 }
 0x472   : > { %v6010_v15 = vld [vmem:[#allocation3 + $0x318] sm:$0xff]  ;;  %9659 = vmatprep.mubr.msk.f32.mxu0 %vm375_vm0, %v6005_v34  ;;  %4880 = vst.msk [vmem:[#allocation3 + $0x3e8] sm:$0xff] %vm375_vm0, %v4848_v3  ;;  %5644 = vst.msk [vmem:[#allocation3 + $0x360] sm:$0xff] %vm375_vm0, %v4848_v3 }
 0x473   : > { %v13695_v52 = vld [vmem:[#allocation2 + $0x122] sm:$0xff]  ;;  %9660 = vmatmul.mubr.msk.f32.gmra.mrb[114].mxu0 %vm375_vm0, %v6010_v15  ;;  %v13709_v49 = vld [vmem:[#allocation2 + $0x12a] sm:$0xff]  ;;  %4817 = vst.msk [vmem:[#allocation2 + $0x151] sm:$0xff] %vm375_vm0, %v4785_v6  ;;  %v4736_v50 = vadd.f32 %v10507_v24, %v13139_v58 }
 0x474   : > { %v13697_v5 = vld [vmem:[#allocation2 + $0x129] sm:$0xff]  ;;  %5135 = vst.msk [vmem:[#allocation3 + $0x3c8] sm:$0xff] %vm375_vm0, %v13695_v52  ;;  %v5167_v43 = vld [vmem:[#allocation2 + $0x138] sm:$0xff]  ;;  %5136 = vst.msk [vmem:[#allocation3 + $0x3f0] sm:$0xff] %vm375_vm0, %v13709_v49  ;;  %v4515_v36 = vpop.f32.mrb[88].mxu1 }
 0x475   : > { %5390 = vst.msk [vmem:[#allocation3 + $0x3a8] sm:$0xff] %vm375_vm0, %v13697_v5  ;;  %v4913_v9 = vld [vmem:[#allocation2 + $0x139] sm:$0xff]  ;;  %5255 = vrot.lane.b32.xlu0 %v5167_v43, %s10827_s25  ;;  %v4786_v32 = vmax.f32 %v4736_v50, 0.0  ;;  %v10508_v62 = vadd.f32 %v13702_v29, %v4515_v36  ;;  %v4517_v56 = vpop.f32.mrb[89].mxu1 }
 0x476   : > { %v4849_v25 = vld [vmem:[#allocation2 + $0x138] sm:$0xff]  ;;  %5003 = vrot.lane.b32.xlu1 %v4913_v9, %s10827_s25 }
 0x477   : > { %4881 = vst.msk [vmem:[#allocation3 + $0x410] sm:$0xff] %vm375_vm0, %v4849_v25  ;;  %v13720_v51 = vld [vmem:[#allocation2 + $0x139] sm:$0xff]  ;;  %5645 = vst.msk [vmem:[#allocation3 + $0x388] sm:$0xff] %vm375_vm0, %v4849_v25  ;;  %v4914_v15 = vld [vmem:[#allocation2 + $0x141] sm:$0xff]  ;;  %v4741_v46 = vadd.f32 %v10508_v62, %v13149_v31 }
 0x478   : > { %5391 = vst.msk [vmem:[#allocation3 + $0x3d0] sm:$0xff] %vm375_vm0, %v13720_v51  ;;  %v6015_v34 = vld [vmem:[#allocation3 + $0x340] sm:$0xff]  ;;  %v5168_v58 = vld [vmem:[#allocation2 + $0x140] sm:$0xff]  ;;  %4818 = vst.msk [vmem:[#allocation2 + $0x159] sm:$0xff] %vm375_vm0, %v4786_v32  ;;  %v4520_v24 = vpop.f32.mrb[90].mxu1 }
 0x479   : > { %9662 = vmatprep.mubr.msk.f32.mxu0 %vm375_vm0, %v6015_v34  ;;  %5257 = vrot.lane.b32.xlu0 %v5168_v58, %s10827_s25  ;;  %v6020_v48 = vld [vmem:[#allocation3 + $0x368] sm:$0xff]  ;;  %v5870_v6 = vld [vmem:[#allocation2 + $0x142] sm:$0xff]  ;;  %v4787_v9 = vmax.f32 %v4741_v46, 0.0  ;;  %v10509_v25 = vadd.f32 %v13702_v29, %v4520_v24  ;;  %v4522_v50 = vpop.f32.mrb[91].mxu1 }
 0x47a   : > { %v5869_v3 = vld [vmem:[#allocation2 + $0x13a] sm:$0xff]  ;;  %5005 = vrot.lane.b32.xlu1 %v4914_v15, %s10827_s25  ;;  %9663 = vmatmul.mubr.msk.f32.gmra.mrb[116].mxu0 %vm375_vm0, %v6020_v48  ;;  %5902 = vst.msk [vmem:[#allocation3 + $0x3b8] sm:$0xff] %vm375_vm0, %v5870_v6  ;;  %v13743_v36 = vld [vmem:[#allocation2 + $0x142] sm:$0xff]  ;;  %v5169_v32 = vld [vmem:[#allocation2 + $0x150] sm:$0xff] }
 0x47b   : > { %5901 = vst.msk [vmem:[#allocation3 + $0x390] sm:$0xff] %vm375_vm0, %v5869_v3  ;;  %v4850_v11 = vld [vmem:[#allocation2 + $0x140] sm:$0xff]  ;;  %v4915_v62 = vld [vmem:[#allocation2 + $0x151] sm:$0xff]  ;;  %5138 = vst.msk [vmem:[#allocation3 + $0x440] sm:$0xff] %vm375_vm0, %v13743_v36  ;;  %v4746_v34 = vadd.f32 %v10509_v25, %v13146_v27 }
 0x47c   : > { %v13735_v43 = vld [vmem:[#allocation2 + $0x13a] sm:$0xff]  ;;  %4882 = vst.msk [vmem:[#allocation3 + $0x438] sm:$0xff] %vm375_vm0, %v4850_v11  ;;  %5646 = vst.msk [vmem:[#allocation3 + $0x3b0] sm:$0xff] %vm375_vm0, %v4850_v11  ;;  %v4851_v56 = vld [vmem:[#allocation2 + $0x150] sm:$0xff]  ;;  %v4525_v15 = vpop.f32.mrb[92].mxu1 }
 0x47d   : > { %v13737_v31 = vld [vmem:[#allocation2 + $0x141] sm:$0xff]  ;;  %5137 = vst.msk [vmem:[#allocation3 + $0x418] sm:$0xff] %vm375_vm0, %v13735_v43  ;;  %4819 = vst.msk [vmem:[#allocation2 + $0x169] sm:$0xff] %vm375_vm0, %v4787_v9  ;;  %5259 = vrot.lane.b32.xlu0 %v5169_v32, %s10827_s25  ;;  %v13754_v58 = vld [vmem:[#allocation2 + $0x151] sm:$0xff]  ;;  %v4788_v46 = vmax.f32 %v4746_v34, 0.0  ;;  %v10510_v48 = vadd.f32 %v13702_v29, %v4525_v15  ;;  %v4527_v3 = vpop.f32.mrb[93].mxu1 }
 0x47e   : > { %5392 = vst.msk [vmem:[#allocation3 + $0x3f8] sm:$0xff] %vm375_vm0, %v13737_v31  ;;  %4883 = vst.msk [vmem:[#allocation3 + $0x460] sm:$0xff] %vm375_vm0, %v4851_v56  ;;  %5007 = vrot.lane.b32.xlu1 %v4915_v62, %s10827_s25 }
 0x47f   : > { %5647 = vst.msk [vmem:[#allocation3 + $0x3d8] sm:$0xff] %vm375_vm0, %v4851_v56  ;;  %5393 = vst.msk [vmem:[#allocation3 + $0x420] sm:$0xff] %vm375_vm0, %v13754_v58  ;;  %v5170_v6 = vld [vmem:[#allocation2 + $0x158] sm:$0xff]  ;;  %v4751_v11 = vadd.f32 %v10510_v48, %v13287_v45 }
 0x480   : > { %v4916_v27 = vld [vmem:[#allocation2 + $0x159] sm:$0xff]  ;;  %4820 = vst.msk [vmem:[#allocation2 + $0x171] sm:$0xff] %vm375_vm0, %v4788_v46  ;;  %v4530_v32 = vpop.f32.mrb[94].mxu1 }
 0x481   : > { %v5871_v24 = vld [vmem:[#allocation2 + $0x152] sm:$0xff]  ;;  %5261 = vrot.lane.b32.xlu0 %v5170_v6, %s10827_s25  ;;  %v6030_v25 = vld [vmem:[#allocation3 + $0x3b8] sm:$0xff]  ;;  %v5872_v50 = vld [vmem:[#allocation2 + $0x15a] sm:$0xff]  ;;  %v4789_v45 = vmax.f32 %v4751_v11, 0.0  ;;  %v10511_v15 = vadd.f32 %v13702_v29, %v4530_v32  ;;  %v4532_v46 = vpop.f32.mrb[95].mxu1 }
 0x482   : > { %v6025_v9 = vld [vmem:[#allocation3 + $0x390] sm:$0xff]  ;;  %5903 = vst.msk [vmem:[#allocation3 + $0x3e0] sm:$0xff] %vm375_vm0, %v5871_v24  ;;  %5009 = vrot.lane.b32.xlu1 %v4916_v27, %s10827_s25  ;;  %5904 = vst.msk [vmem:[#allocation3 + $0x408] sm:$0xff] %vm375_vm0, %v5872_v50  ;;  %v4852_v62 = vld [vmem:[#allocation2 + $0x158] sm:$0xff] }
 0x483   : > { %9665 = vmatprep.mubr.msk.f32.mxu0 %vm375_vm0, %v6025_v9  ;;  %v13768_v56 = vld [vmem:[#allocation2 + $0x152] sm:$0xff]  ;;  %4884 = vst.msk [vmem:[#allocation3 + $0x488] sm:$0xff] %vm375_vm0, %v4852_v62  ;;  %v13777_v48 = vld [vmem:[#allocation2 + $0x15a] sm:$0xff]  ;;  %5648 = vst.msk [vmem:[#allocation3 + $0x400] sm:$0xff] %vm375_vm0, %v4852_v62  ;;  %v4756_v29 = vadd.f32 %v10511_v15, %v13284_v42 }
 0x484   : > { %v13770_v34 = vld [vmem:[#allocation2 + $0x159] sm:$0xff]  ;;  %9666 = vmatmul.mubr.msk.f32.gmra.mrb[118].mxu0 %vm375_vm0, %v6030_v25  ;;  %5139 = vst.msk [vmem:[#allocation3 + $0x468] sm:$0xff] %vm375_vm0, %v13768_v56  ;;  %v5171_v3 = vld [vmem:[#allocation2 + $0x168] sm:$0xff]  ;;  %5140 = vst.msk [vmem:[#allocation3 + $0x490] sm:$0xff] %vm375_vm0, %v13777_v48 }
 0x485   : > { %5394 = vst.msk [vmem:[#allocation3 + $0x448] sm:$0xff] %vm375_vm0, %v13770_v34  ;;  %v4917_v6 = vld [vmem:[#allocation2 + $0x169] sm:$0xff]  ;;  %4821 = vst.msk [vmem:[#allocation2 + $0x181] sm:$0xff] %vm375_vm0, %v4789_v45  ;;  %5263 = vrot.lane.b32.xlu0 %v5171_v3, %s10827_s25  ;;  %v4790_v11 = vmax.f32 %v4756_v29, 0.0  ;;  %v5208_v9 = vpop.permute.xlu0 %5207 }
 0x486   : > { %v4853_v27 = vld [vmem:[#allocation2 + $0x168] sm:$0xff]  ;;  %5011 = vrot.lane.b32.xlu1 %v4917_v6, %s10827_s25  ;;  %v4956_v25 = vpop.permute.xlu1 %4955  ;;  %5303 = vst.msk [vmem:[#allocation3 + $0x8] sm:$0xff] %vm721_vm3, %v5208_v9 }
 0x487   : > { %4885 = vst.msk [vmem:[#allocation3 + $0x4b0] sm:$0xff] %vm375_vm0, %v4853_v27  ;;  %v13788_v24 = vld [vmem:[#allocation2 + $0x169] sm:$0xff]  ;;  %5649 = vst.msk [vmem:[#allocation3 + $0x428] sm:$0xff] %vm375_vm0, %v4853_v27  ;;  %v4918_v32 = vld [vmem:[#allocation2 + $0x171] sm:$0xff] }
 0x488   : > { %5395 = vst.msk [vmem:[#allocation3 + $0x470] sm:$0xff] %vm375_vm0, %v13788_v24  ;;  %v5172_v50 = vld [vmem:[#allocation2 + $0x170] sm:$0xff]  ;;  %4822 = vst.msk [vmem:[#allocation2 + $0x189] sm:$0xff] %vm375_vm0, %v4790_v11  ;;  %v6103_v11 = vld [vmem:[%s15112_s5 + $0x100] sm:$0xff] }
 0x489   : > { %5049 = vst.msk [vmem:[#allocation3 + $0x50] sm:$0xff] %vm721_vm3, %v4956_v25  ;;  %v6035_v42 = vld [vmem:[#allocation3 + $0x3e0] sm:$0xff]  ;;  %5265 = vrot.lane.b32.xlu0 %v5172_v50, %s10827_s25  ;;  %v6040_v62 = vld [vmem:[#allocation3 + $0x408] sm:$0xff]  ;;  %v5210_v27 = vpop.permute.xlu0 %5209  ;;  %v6104_v9 = vld [vmem:[%s15112_s5 + $0x108] sm:$0xff] }
 0x48a   : > { %9668 = vmatprep.mubr.msk.f32.mxu0 %vm375_vm0, %v6035_v42  ;;  %v5873_v45 = vld [vmem:[#allocation2 + $0x16a] sm:$0xff]  ;;  %v5874_v15 = vld [vmem:[#allocation2 + $0x172] sm:$0xff]  ;;  %5013 = vrot.lane.b32.xlu1 %v4918_v32, %s10827_s25  ;;  %v4958_v29 = vpop.permute.xlu1 %4957  ;;  %5304 = vst.msk [vmem:[#allocation3 + $0x30] sm:$0xff] %vm721_vm3, %v5210_v27 }
 0x48b   : > { %9669 = vmatmul.mubr.msk.f32.gmra.mrb[120].mxu0 %vm375_vm0, %v6040_v62  ;;  %5905 = vst.msk [vmem:[#allocation3 + $0x430] sm:$0xff] %vm375_vm0, %v5873_v45  ;;  %5906 = vst.msk [vmem:[#allocation3 + $0x458] sm:$0xff] %vm375_vm0, %v5874_v15  ;;  %v4854_v46 = vld [vmem:[#allocation2 + $0x170] sm:$0xff]  ;;  %v9953_v45 = vpack.c.bf16 %v6104_v9, %v6103_v11 }
 0x48c   : > { %v13803_v3 = vld [vmem:[#allocation2 + $0x16a] sm:$0xff]  ;;  %4886 = vst.msk [vmem:[#allocation3 + $0x4d8] sm:$0xff] %vm375_vm0, %v4854_v46  ;;  %v13816_v25 = vld [vmem:[#allocation2 + $0x172] sm:$0xff]  ;;  %5650 = vst.msk [vmem:[#allocation3 + $0x450] sm:$0xff] %vm375_vm0, %v4854_v46 }
 0x48d   : > { %v13805_v6 = vld [vmem:[#allocation2 + $0x171] sm:$0xff]  ;;  %5141 = vst.msk [vmem:[#allocation3 + $0x4b8] sm:$0xff] %vm375_vm0, %v13803_v3  ;;  %15145 = vst [vmem:[#allocation8_spill] sm:$0xff] %v13816_v25  ;;  %v5173_v42 = vld [vmem:[#allocation2 + $0x180] sm:$0xff]  ;;  %v5212_v15 = vpop.permute.xlu0 %5211 }
 0x48e   : > { %15144 = vst [vmem:[#allocation7_spill] sm:$0xff] %v13805_v6  ;;  %5396 = vst.msk [vmem:[#allocation3 + $0x498] sm:$0xff] %vm375_vm0, %v13805_v6  ;;  %v13825_v50 = vld [vmem:[#allocation2 + $0x181] sm:$0xff]  ;;  %5267 = vrot.lane.b32.xlu0 %v5173_v42, %s10827_s25  ;;  %5463 = vrot.lane.b32.xlu1 %v13330_v39, %s10827_s25  ;;  %v5911_v62 = vld [vmem:[#allocation3] sm:$0xff]  ;;  %v4960_v46 = vpop.permute.xlu1 %4959 }
 0x48f   : > { %5050 = vst.msk [vmem:[#allocation3 + $0x78] sm:$0xff] %vm721_vm3, %v4958_v29  ;;  %15146 = vst [vmem:[#allocation9_spill] sm:$0xff] %v13825_v50  ;;  %v5619_v32 = vld [vmem:[#allocation2 + $0x180] sm:$0xff]  ;;  %v5912_v27 = vld [vmem:[#allocation3 + $0x8] sm:$0xff] }
 0x490   : > { %5142 = vst.msk [vmem:[#allocation3 + $0x4e0] sm:$0xff] %vm375_vm0, %v13816_v25  ;;  %5651 = vst.msk [vmem:[#allocation3 + $0x478] sm:$0xff] %vm375_vm0, %v5619_v32  ;;  %v6105_v29 = vld [vmem:[%s15112_s5 + $0x110] sm:$0xff]  ;;  %v6106_v42 = vld [vmem:[%s15112_s5 + $0x118] sm:$0xff]  ;;  %6310 = vmatprep.mubr.f32.mxu1 %v5912_v27 }
 0x491   : > { %5397 = vst.msk [vmem:[#allocation3 + $0x4c0] sm:$0xff] %vm375_vm0, %v13825_v50  ;;  %v5174_v32 = vld [vmem:[#allocation2 + $0x188] sm:$0xff]  ;;  %6311 = vmatmul.mubr.f32.vlgmr.msra.gmra.mrb[96].mxu1 %v5911_v62  ;;  %v5916_v25 = vld [vmem:[#allocation3 + $0x28] sm:$0xff]  ;;  %v5917_v62 = vld [vmem:[#allocation3 + $0x30] sm:$0xff] }
 0x492   : > { %5305 = vst.msk [vmem:[#allocation3 + $0x58] sm:$0xff] %vm721_vm3, %v5212_v15  ;;  %5051 = vst.msk [vmem:[#allocation3 + $0xa0] sm:$0xff] %vm721_vm3, %v4960_v46  ;;  %v5875_v39 = vld [vmem:[#allocation2 + $0x182] sm:$0xff]  ;;  %v5876_v50 = vld [vmem:[#allocation2 + $0x18a] sm:$0xff]  ;;  %5269 = vrot.lane.b32.xlu0 %v5174_v32, %s10827_s25  ;;  %9954 = vmatpush1.bf16.msra.mxu1 %v9953_v45  ;;  %v9956_v15 = vpack.c.bf16 %v6106_v42, %v6105_v29  ;;  %v5214_v46 = vpop.permute.xlu0 %5213  ;;  %v4962_v27 = vpop.permute.xlu1 %4961 }
 0x493   : > { %v6045_v11 = vld [vmem:[#allocation3 + $0x430] sm:$0xff]  ;;  %v6050_v9 = vld [vmem:[#allocation3 + $0x458] sm:$0xff]  ;;  %5907 = vst.msk [vmem:[#allocation3 + $0x480] sm:$0xff] %vm375_vm0, %v5875_v39  ;;  %5908 = vst.msk [vmem:[#allocation3 + $0x4a8] sm:$0xff] %vm375_vm0, %v5876_v50  ;;  %5465 = vrot.lane.b32.xlu1 %v13339_v63, %s10827_s25  ;;  %6315 = vmatprep.mubr.f32.mxu1 %v5917_v62 }
 0x494   : > { %9671 = vmatprep.mubr.msk.f32.mxu0 %vm375_vm0, %v6045_v11  ;;  %v13845_v6 = vld [vmem:[#allocation2 + $0x189] sm:$0xff]  ;;  %5306 = vst.msk [vmem:[#allocation3 + $0x80] sm:$0xff] %vm721_vm3, %v5214_v46  ;;  %5052 = vst.msk [vmem:[#allocation3 + $0xc8] sm:$0xff] %vm721_vm3, %v4962_v27  ;;  %v5655_v50 = vld [vmem:[#allocation2 + $0x31] sm:$0xff]  ;;  %9955 = vmatprep.subr.bf16.mxu1 %v15141_v7 }
 0x495   : > { %9672 = vmatmul.mubr.msk.f32.gmra.mrb[122].mxu0 %vm375_vm0, %v6050_v9  ;;  %v5620_v32 = vld [vmem:[#allocation2 + $0x188] sm:$0xff]  ;;  %5398 = vst.msk [vmem:[#allocation3 + $0x4e8] sm:$0xff] %vm375_vm0, %v13845_v6  ;;  %v6107_v63 = vld [vmem:[%s15112_s5 + $0x120] sm:$0xff]  ;;  %6316 = vmatmul.mubr.f32.gmra.mrb[98].mxu1 %v5916_v25  ;;  %v6109_v46 = vld [vmem:[%s15112_s5 + $0x130] sm:$0xff] }
 0x496   : > { %v6108_v45 = vld [vmem:[%s15112_s5 + $0x128] sm:$0xff]  ;;  %5652 = vst.msk [vmem:[#allocation3 + $0x4a0] sm:$0xff] %vm375_vm0, %v5620_v32  ;;  %5719 = vrot.lane.b32.xlu0 %v5655_v50, %s10827_s25  ;;  %9957 = vmatpush1.bf16.msra.mxu1 %v9956_v15  ;;  %v5216_v29 = vpop.permute.xlu0 %5215  ;;  %v4964_v42 = vpop.permute.xlu1 %4963  ;;  %v5656_v11 = vld [vmem:[#allocation2 + $0x39] sm:$0xff] }
 0x497   : > { %5467 = vrot.lane.b32.xlu1 %v13353_v57, %s10827_s25  ;;  %9958 = vmatprep.subr.bf16.mxu1 %v15141_v7  ;;  %v9959_v9 = vpack.c.bf16 %v6108_v45, %v6107_v63  ;;  %5307 = vst.msk [vmem:[#allocation3 + $0xa8] sm:$0xff] %vm721_vm3, %v5216_v29  ;;  %5053 = vst.msk [vmem:[#allocation3 + $0xf0] sm:$0xff] %vm721_vm3, %v4964_v42  ;;  %v6110_v57 = vld [vmem:[%s15112_s5 + $0x138] sm:$0xff]  ;;  %v5921_v27 = vld [vmem:[#allocation3 + $0x50] sm:$0xff] }
 0x498   : > { %v9962_v50 = vpack.c.bf16 %v6110_v57, %v6109_v46  ;;  %v5657_v45 = vld [vmem:[#allocation2 + $0x49] sm:$0xff]  ;;  %v6111_v29 = vld [vmem:[%s15112_s5 + $0x140] sm:$0xff]  ;;  %v6114_v57 = vld [vmem:[%s15112_s5 + $0x158] sm:$0xff] }
 0x499   : > { %v5922_v39 = vld [vmem:[#allocation3 + $0x58] sm:$0xff] }
 0x49a   : > { %6320 = vmatprep.mubr.f32.mxu1 %v5922_v39  ;;  %v6055_v25 = vld [vmem:[#allocation3 + $0x480] sm:$0xff]  ;;  %v6060_v15 = vld [vmem:[#allocation3 + $0x4a8] sm:$0xff]  ;;  %5721 = vrot.lane.b32.xlu0 %v5656_v11, %s10827_s25  ;;  %v5218_v62 = vpop.permute.xlu0 %5217  ;;  %v4966_v63 = vpop.permute.xlu1 %4965  ;;  %v6112_v42 = vld [vmem:[%s15112_s5 + $0x148] sm:$0xff] }
 0x49b   : > { %9674 = vmatprep.mubr.msk.f32.mxu0 %vm375_vm0, %v6055_v25  ;;  %6321 = vmatmul.mubr.f32.gmra.mrb[100].mxu1 %v5921_v27  ;;  %v5927_v32 = vld [vmem:[#allocation3 + $0x80] sm:$0xff]  ;;  %5308 = vst.msk [vmem:[#allocation3 + $0xd0] sm:$0xff] %vm721_vm3, %v5218_v62  ;;  %5054 = vst.msk [vmem:[#allocation3 + $0x118] sm:$0xff] %vm721_vm3, %v4966_v63  ;;  %v5659_v63 = vld [vmem:[#allocation2 + $0x61] sm:$0xff] }
 0x49c   : > { %9675 = vmatmul.mubr.msk.f32.gmra.mrb[124].mxu0 %vm375_vm0, %v6060_v15  ;;  %5469 = vrot.lane.b32.xlu1 %v13361_v8, %s10827_s25  ;;  %v5926_v8 = vld [vmem:[#allocation3 + $0x78] sm:$0xff]  ;;  %v5658_v25 = vld [vmem:[#allocation2 + $0x51] sm:$0xff] }
 0x49d   : > { %9960 = vmatpush1.bf16.msra.mxu1 %v9959_v9  ;;  %6325 = vmatprep.mubr.f32.mxu1 %v5927_v32  ;;  %v9965_v9 = vpack.c.bf16 %v6112_v42, %v6111_v29  ;;  %v6113_v15 = vld [vmem:[%s15112_s5 + $0x150] sm:$0xff]  ;;  %v6116_v29 = vld [vmem:[%s15112_s5 + $0x168] sm:$0xff] }
 0x49e   : > { %9961 = vmatprep.subr.bf16.mxu1 %v15141_v7  ;;  %5723 = vrot.lane.b32.xlu0 %v5657_v45, %s10827_s25  ;;  %v5220_v39 = vpop.permute.xlu0 %5219  ;;  %v5932_v11 = vld [vmem:[#allocation3 + $0xa8] sm:$0xff]  ;;  %v9968_v32 = vpack.c.bf16 %v6114_v57, %v6113_v15  ;;  %v6115_v45 = vld [vmem:[%s15112_s5 + $0x160] sm:$0xff] }
 0x49f   : > { %6326 = vmatmul.mubr.f32.gmra.mrb[102].mxu1 %v5926_v8  ;;  %5309 = vst.msk [vmem:[#allocation3 + $0xf8] sm:$0xff] %vm721_vm3, %v5220_v39  ;;  %v4968_v46 = vpop.permute.xlu1 %4967  ;;  %v9971_v39 = vpack.c.bf16 %v6116_v29, %v6115_v45 }
 0x4a0   : > { %5471 = vrot.lane.b32.xlu1 %v13385_v16, %s10827_s25  ;;  %6330 = vmatprep.mubr.f32.mxu1 %v5932_v11  ;;  %5055 = vst.msk [vmem:[#allocation3 + $0x140] sm:$0xff] %vm721_vm3, %v4968_v46  ;;  %v5931_v16 = vld [vmem:[#allocation3 + $0xa0] sm:$0xff] }
 0x4a1   : > { %9963 = vmatpush1.bf16.msra.mxu1 %v9962_v50  ;;  %v6117_v46 = vld [vmem:[%s15112_s5 + $0x170] sm:$0xff] }
 0x4a2   : > { %9964 = vmatprep.subr.bf16.mxu1 %v15141_v7  ;;  %5725 = vrot.lane.b32.xlu0 %v5658_v25, %s10827_s25  ;;  %v5222_v27 = vpop.permute.xlu0 %5221  ;;  %v5937_v62 = vld [vmem:[#allocation3 + $0xd0] sm:$0xff]  ;;  %v6118_v25 = vld [vmem:[%s15112_s5 + $0x178] sm:$0xff] }
 0x4a3   : > { %6331 = vmatmul.mubr.f32.gmra.mrb[104].mxu1 %v5931_v16  ;;  %5310 = vst.msk [vmem:[#allocation3 + $0x120] sm:$0xff] %vm721_vm3, %v5222_v27  ;;  %v4970_v50 = vpop.permute.xlu1 %4969  ;;  %v9974_v16 = vpack.c.bf16 %v6118_v25, %v6117_v46 }
 0x4a4   : > { %5473 = vrot.lane.b32.xlu1 %v13387_v33, %s10827_s25  ;;  %6335 = vmatprep.mubr.f32.mxu1 %v5937_v62  ;;  %5056 = vst.msk [vmem:[#allocation3 + $0x168] sm:$0xff] %vm721_vm3, %v4970_v50  ;;  %v5936_v33 = vld [vmem:[#allocation3 + $0xc8] sm:$0xff]  ;;  %v6119_v62 = vld [vmem:[%s15112_s5 + $0x180] sm:$0xff] }
 0x4a5   : > { %9966 = vmatpush1.bf16.msra.mxu1 %v9965_v9  ;;  %v5660_v9 = vld [vmem:[#allocation2 + $0x69] sm:$0xff] }
 0x4a6   : > { %9967 = vmatprep.subr.bf16.mxu1 %v15141_v7  ;;  %5727 = vrot.lane.b32.xlu0 %v5659_v63, %s10827_s25  ;;  %v5224_v42 = vpop.permute.xlu0 %5223  ;;  %v5942_v8 = vld [vmem:[#allocation3 + $0xf8] sm:$0xff] }
 0x4a7   : > { %6336 = vmatmul.mubr.f32.gmra.mrb[106].mxu1 %v5936_v33  ;;  %5311 = vst.msk [vmem:[#allocation3 + $0x148] sm:$0xff] %vm721_vm3, %v5224_v42  ;;  %v4972_v11 = vpop.permute.xlu1 %4971  ;;  %v6121_v33 = vld [vmem:[%s15112_s5 + $0x190] sm:$0xff] }
 0x4a8   : > { %5475 = vrot.lane.b32.xlu1 %v13411_v55, %s10827_s25  ;;  %6340 = vmatprep.mubr.f32.mxu1 %v5942_v8  ;;  %5057 = vst.msk [vmem:[#allocation3 + $0x190] sm:$0xff] %vm721_vm3, %v4972_v11  ;;  %v5941_v55 = vld [vmem:[#allocation3 + $0xf0] sm:$0xff] }
 0x4a9   : > { %9969 = vmatpush1.bf16.msra.mxu1 %v9968_v32  ;;  %v6120_v32 = vld [vmem:[%s15112_s5 + $0x188] sm:$0xff] }
 0x4aa   : > { %9970 = vmatprep.subr.bf16.mxu1 %v15141_v7  ;;  %5729 = vrot.lane.b32.xlu0 %v5660_v9, %s10827_s25  ;;  %v5226_v15 = vpop.permute.xlu0 %5225  ;;  %v5947_v57 = vld [vmem:[#allocation3 + $0x120] sm:$0xff]  ;;  %v9977_v45 = vpack.c.bf16 %v6120_v32, %v6119_v62  ;;  %v6123_v9 = vld [vmem:[%s15112_s5 + $0x1a0] sm:$0xff] }
 0x4ab   : > { %6341 = vmatmul.mubr.f32.gmra.mrb[108].mxu1 %v5941_v55  ;;  %5312 = vst.msk [vmem:[#allocation3 + $0x170] sm:$0xff] %vm721_vm3, %v5226_v15  ;;  %v4974_v27 = vpop.permute.xlu1 %4973 }
 0x4ac   : > { %5477 = vrot.lane.b32.xlu1 %v13418_v35, %s10827_s25  ;;  %6345 = vmatprep.mubr.f32.mxu1 %v5947_v57  ;;  %5058 = vst.msk [vmem:[#allocation3 + $0x1b8] sm:$0xff] %vm721_vm3, %v4974_v27  ;;  %v5946_v35 = vld [vmem:[#allocation3 + $0x118] sm:$0xff]  ;;  %v6125_v57 = vld [vmem:[%s15112_s5 + $0x1b0] sm:$0xff] }
 0x4ad   : > { %9972 = vmatpush1.bf16.msra.mxu1 %v9971_v39 }
 0x4ae   : > { %9973 = vmatprep.subr.bf16.mxu1 %v15141_v7  ;;  %5731 = vrot.lane.b32.xlu0 %v13431_v13, %s10827_s25  ;;  %v5228_v50 = vpop.permute.xlu0 %5227  ;;  %v5952_v63 = vld [vmem:[#allocation3 + $0x148] sm:$0xff] }
 0x4af   : > { %6346 = vmatmul.mubr.f32.gmra.mrb[110].mxu1 %v5946_v35  ;;  %5313 = vst.msk [vmem:[#allocation3 + $0x198] sm:$0xff] %vm721_vm3, %v5228_v50  ;;  %v4976_v29 = vpop.permute.xlu1 %4975  ;;  %v6122_v13 = vld [vmem:[%s15112_s5 + $0x198] sm:$0xff]  ;;  %v6127_v35 = vld [vmem:[%s15112_s5 + $0x1c0] sm:$0xff] }
 0x4b0   : > { %5479 = vrot.lane.b32.xlu1 %v13448_v47, %s10827_s25  ;;  %6350 = vmatprep.mubr.f32.mxu1 %v5952_v63  ;;  %5059 = vst.msk [vmem:[#allocation3 + $0x1e0] sm:$0xff] %vm721_vm3, %v4976_v29  ;;  %v5951_v47 = vld [vmem:[#allocation3 + $0x140] sm:$0xff]  ;;  %v9980_v39 = vpack.c.bf16 %v6122_v13, %v6121_v33 }
 0x4b1   : > { %9975 = vmatpush1.bf16.msra.mxu1 %v9974_v16  ;;  %v6129_v33 = vld [vmem:[%s15112_s5 + $0x1d0] sm:$0xff] }
 0x4b2   : > { %9976 = vmatprep.subr.bf16.mxu1 %v15141_v7  ;;  %5733 = vrot.lane.b32.xlu0 %v13460_v54, %s10827_s25  ;;  %v5230_v42 = vpop.permute.xlu0 %5229  ;;  %v5957_v8 = vld [vmem:[#allocation3 + $0x170] sm:$0xff]  ;;  %v6124_v54 = vld [vmem:[%s15112_s5 + $0x1a8] sm:$0xff] }
 0x4b3   : > { %6351 = vmatmul.mubr.f32.gmra.mrb[112].mxu1 %v5951_v47  ;;  %5314 = vst.msk [vmem:[#allocation3 + $0x1c0] sm:$0xff] %vm721_vm3, %v5230_v42  ;;  %v4978_v11 = vpop.permute.xlu1 %4977  ;;  %v9983_v55 = vpack.c.bf16 %v6124_v54, %v6123_v9 }
 0x4b4   : > { %5481 = vrot.lane.b32.xlu1 %v13450_v0, %s10827_s25  ;;  %6355 = vmatprep.mubr.f32.mxu1 %v5957_v8  ;;  %5060 = vst.msk [vmem:[#allocation3 + $0x208] sm:$0xff] %vm721_vm3, %v4978_v11  ;;  %v5956_v0 = vld [vmem:[#allocation3 + $0x168] sm:$0xff] }
 0x4b5   : > { %9978 = vmatpush1.bf16.msra.mxu1 %v9977_v45 }
 0x4b6   : > { %9979 = vmatprep.subr.bf16.mxu1 %v15141_v7  ;;  %5735 = vrot.lane.b32.xlu0 %v13473_v22, %s10827_s25  ;;  %v5232_v46 = vpop.permute.xlu0 %5231  ;;  %v5962_v25 = vld [vmem:[#allocation3 + $0x198] sm:$0xff]  ;;  %v6126_v22 = vld [vmem:[%s15112_s5 + $0x1b8] sm:$0xff] }
 0x4b7   : > { %6356 = vmatmul.mubr.f32.gmra.mrb[114].mxu1 %v5956_v0  ;;  %5315 = vst.msk [vmem:[#allocation3 + $0x1e8] sm:$0xff] %vm721_vm3, %v5232_v46  ;;  %v4980_v15 = vpop.permute.xlu1 %4979  ;;  %v9986_v62 = vpack.c.bf16 %v6126_v22, %v6125_v57  ;;  %v6133_v46 = vld [vmem:[%s15112_s5 + $0x1f0] sm:$0xff] }
 0x4b8   : > { %5483 = vrot.lane.b32.xlu1 %v13480_v23, %s10827_s25  ;;  %6360 = vmatprep.mubr.f32.mxu1 %v5962_v25  ;;  %5061 = vst.msk [vmem:[#allocation3 + $0x230] sm:$0xff] %vm721_vm3, %v4980_v15  ;;  %v5961_v23 = vld [vmem:[#allocation3 + $0x190] sm:$0xff] }
 0x4b9   : > { %9981 = vmatpush1.bf16.msra.mxu1 %v9980_v39  ;;  %v6131_v39 = vld [vmem:[%s15112_s5 + $0x1e0] sm:$0xff] }
 0x4ba   : > { %9982 = vmatprep.subr.bf16.mxu1 %v15141_v7  ;;  %5737 = vrot.lane.b32.xlu0 %v13495_v17, %s10827_s25  ;;  %v5234_v16 = vpop.permute.xlu0 %5233  ;;  %v5967_v27 = vld [vmem:[#allocation3 + $0x1c0] sm:$0xff]  ;;  %v6128_v17 = vld [vmem:[%s15112_s5 + $0x1c8] sm:$0xff] }
 0x4bb   : > { %6361 = vmatmul.mubr.f32.gmra.mrb[116].mxu1 %v5961_v23  ;;  %5316 = vst.msk [vmem:[#allocation3 + $0x210] sm:$0xff] %vm721_vm3, %v5234_v16  ;;  %v4982_v32 = vpop.permute.xlu1 %4981  ;;  %v9989_v45 = vpack.c.bf16 %v6128_v17, %v6127_v35 }
 0x4bc   : > { %5485 = vrot.lane.b32.xlu1 %v13487_v4, %s10827_s25  ;;  %6365 = vmatprep.mubr.f32.mxu1 %v5967_v27  ;;  %5062 = vst.msk [vmem:[#allocation3 + $0x258] sm:$0xff] %vm721_vm3, %v4982_v32  ;;  %v5966_v4 = vld [vmem:[#allocation3 + $0x1b8] sm:$0xff] }
 0x4bd   : > { %9984 = vmatpush1.bf16.msra.mxu1 %v9983_v55 }
 0x4be   : > { %9985 = vmatprep.subr.bf16.mxu1 %v15141_v7  ;;  %5739 = vrot.lane.b32.xlu0 %v13509_v20, %s10827_s25  ;;  %v5236_v50 = vpop.permute.xlu0 %5235  ;;  %v5972_v63 = vld [vmem:[#allocation3 + $0x1e8] sm:$0xff] }
 0x4bf   : > { %6366 = vmatmul.mubr.f32.gmra.mrb[118].mxu1 %v5966_v4  ;;  %5317 = vst.msk [vmem:[#allocation3 + $0x238] sm:$0xff] %vm721_vm3, %v5236_v50  ;;  %v4984_v29 = vpop.permute.xlu1 %4983  ;;  %v6130_v20 = vld [vmem:[%s15112_s5 + $0x1d8] sm:$0xff] }
 0x4c0   : > { %5487 = vrot.lane.b32.xlu1 %v13520_v26, %s10827_s25  ;;  %6370 = vmatprep.mubr.f32.mxu1 %v5972_v63  ;;  %5063 = vst.msk [vmem:[#allocation3 + $0x280] sm:$0xff] %vm721_vm3, %v4984_v29  ;;  %v5971_v26 = vld [vmem:[#allocation3 + $0x1e0] sm:$0xff]  ;;  %v9992_v42 = vpack.c.bf16 %v6130_v20, %v6129_v33 }
 0x4c1   : > { %9987 = vmatpush1.bf16.msra.mxu1 %v9986_v62 }
 0x4c2   : > { %9988 = vmatprep.subr.bf16.mxu1 %v15141_v7  ;;  %5741 = vrot.lane.b32.xlu0 %v13532_v59, %s10827_s25  ;;  %v5238_v13 = vpop.permute.xlu0 %5237  ;;  %v5977_v47 = vld [vmem:[#allocation3 + $0x210] sm:$0xff]  ;;  %v6132_v59 = vld [vmem:[%s15112_s5 + $0x1e8] sm:$0xff] }
 0x4c3   : > { %6371 = vmatmul.mubr.f32.gmra.mrb[120].mxu1 %v5971_v26  ;;  %5318 = vst.msk [vmem:[#allocation3 + $0x260] sm:$0xff] %vm721_vm3, %v5238_v13  ;;  %v4986_v8 = vpop.permute.xlu1 %4985  ;;  %v9995_v54 = vpack.c.bf16 %v6132_v59, %v6131_v39 }
 0x4c4   : > { %5489 = vrot.lane.b32.xlu1 %v13522_v38, %s10827_s25  ;;  %6375 = vmatprep.mubr.f32.mxu1 %v5977_v47  ;;  %5064 = vst.msk [vmem:[#allocation3 + $0x2a8] sm:$0xff] %vm721_vm3, %v4986_v8  ;;  %v5976_v38 = vld [vmem:[#allocation3 + $0x208] sm:$0xff] }
 0x4c5   : > { %9990 = vmatpush1.bf16.msra.mxu1 %v9989_v45 }
 0x4c6   : > { %9991 = vmatprep.subr.bf16.mxu1 %v15141_v7  ;;  %5743 = vrot.lane.b32.xlu0 %v13544_v30, %s10827_s25  ;;  %v5240_v11 = vpop.permute.xlu0 %5239  ;;  %v5982_v9 = vld [vmem:[#allocation3 + $0x238] sm:$0xff]  ;;  %v6134_v30 = vld [vmem:[%s15112_s5 + $0x1f8] sm:$0xff] }
 0x4c7   : > { %6376 = vmatmul.mubr.f32.gmra.mrb[122].mxu1 %v5976_v38  ;;  %5319 = vst.msk [vmem:[#allocation3 + $0x288] sm:$0xff] %vm721_vm3, %v5240_v11  ;;  %v4988_v0 = vpop.permute.xlu1 %4987  ;;  %v9998_v15 = vpack.c.bf16 %v6134_v30, %v6133_v46 }
 0x4c8   : > { %5491 = vrot.lane.b32.xlu1 %v13551_v28, %s10827_s25  ;;  %6380 = vmatprep.mubr.f32.mxu1 %v5982_v9  ;;  %5065 = vst.msk [vmem:[#allocation3 + $0x2d0] sm:$0xff] %vm721_vm3, %v4988_v0  ;;  %v5981_v28 = vld [vmem:[#allocation3 + $0x230] sm:$0xff] }
 0x4c9   : > { %9993 = vmatpush1.bf16.msra.mxu1 %v9992_v42 }
 0x4ca   : > { %9994 = vmatprep.subr.bf16.mxu1 %v15141_v7  ;;  %5745 = vrot.lane.b32.xlu0 %v13563_v21, %s10827_s25  ;;  %v5242_v25 = vpop.permute.xlu0 %5241  ;;  %v5987_v55 = vld [vmem:[#allocation3 + $0x260] sm:$0xff]  ;;  %v5986_v21 = vld [vmem:[#allocation3 + $0x258] sm:$0xff] }
 0x4cb   : > { %6381 = vmatmul.mubr.f32.gmra.mrb[124].mxu1 %v5981_v28  ;;  %5320 = vst.msk [vmem:[#allocation3 + $0x2b0] sm:$0xff] %vm721_vm3, %v5242_v25  ;;  %v4990_v57 = vpop.permute.xlu1 %4989  ;;  %v5996_v27 = vld [vmem:[#allocation3 + $0x2a8] sm:$0xff]  ;;  %v5622_v28 = vld [vmem:[#allocation2 + $0x1a0] sm:$0xff] }
 0x4cc   : > { %5493 = vrot.lane.b32.xlu1 %v13565_v19, %s10827_s25  ;;  %6385 = vmatprep.mubr.f32.mxu1 %v5987_v55  ;;  %5066 = vst.msk [vmem:[#allocation3 + $0x2f8] sm:$0xff] %vm721_vm3, %v4990_v57  ;;  %v15148_v25 = vld [vmem:[#allocation8_spill] sm:$0xff]  ;;  %v15149_v57 = vld [vmem:[#allocation9_spill] sm:$0xff] }
 0x4cd   : > { %9996 = vmatpush1.bf16.msra.mxu1 %v9995_v54  ;;  %v5621_v54 = vld [vmem:[#allocation2 + $0x198] sm:$0xff]  ;;  %5654 = vst.msk [vmem:[#allocation3 + $0x4f0] sm:$0xff] %vm375_vm0, %v5622_v28 }
 0x4ce   : > { %9997 = vmatprep.subr.bf16.mxu1 %v15141_v7  ;;  %5747 = vrot.lane.b32.xlu0 %v13579_v61, %s10827_s25  ;;  %v5244_v19 = vpop.permute.xlu0 %5243  ;;  %v5992_v22 = vld [vmem:[#allocation3 + $0x288] sm:$0xff]  ;;  %v5991_v7 = vld [vmem:[#allocation3 + $0x280] sm:$0xff]  ;;  %5653 = vst.msk [vmem:[#allocation3 + $0x4c8] sm:$0xff] %vm375_vm0, %v5621_v54 }
 0x4cf   : > { %6386 = vmatmul.mubr.f32.gmra.mrb[126].mxu1 %v5986_v21  ;;  %5321 = vst.msk [vmem:[#allocation3 + $0x2d8] sm:$0xff] %vm721_vm3, %v5244_v19  ;;  %v4992_v23 = vpop.permute.xlu1 %4991  ;;  %v6001_v32 = vld [vmem:[#allocation3 + $0x2d0] sm:$0xff] }
 0x4d0   : > { %5495 = vrot.lane.b32.xlu1 %v13590_v40, %s10827_s25  ;;  %6390 = vmatprep.mubr.f32.mxu1 %v5992_v22  ;;  %5067 = vst.msk [vmem:[#allocation3 + $0x320] sm:$0xff] %vm721_vm3, %v4992_v23  ;;  %v5429_v22 = vld [vmem:[#allocation2 + $0x182] sm:$0xff] }
 0x4d1   : > { %9999 = vmatpush1.bf16.msra.mxu1 %v9998_v15 }
 0x4d2   : > { %5749 = vrot.lane.b32.xlu0 %v13597_v14, %s10827_s25  ;;  %v5246_v61 = vpop.permute.xlu0 %5245  ;;  %v5997_v16 = vld [vmem:[#allocation3 + $0x2b0] sm:$0xff] }
 0x4d3   : > { %6391 = vmatmul.mubr.f32.gmra.mrb[128].mxu1 %v5991_v7  ;;  %5322 = vst.msk [vmem:[#allocation3 + $0x300] sm:$0xff] %vm721_vm3, %v5246_v61  ;;  %v4994_v40 = vpop.permute.xlu1 %4993  ;;  %v6006_v17 = vld [vmem:[#allocation3 + $0x2f8] sm:$0xff] }
 0x4d4   : > { %5497 = vrot.lane.b32.xlu1 %v13602_v44, %s10827_s25  ;;  %6395 = vmatprep.mubr.f32.mxu1 %v5997_v16  ;;  %5068 = vst.msk [vmem:[#allocation3 + $0x348] sm:$0xff] %vm721_vm3, %v4994_v40  ;;  %v5430_v40 = vld [vmem:[#allocation2 + $0x18a] sm:$0xff] }
 0x4d6   : > { %5751 = vrot.lane.b32.xlu0 %v13613_v41, %s10827_s25  ;;  %v5248_v14 = vpop.permute.xlu0 %5247  ;;  %v6002_v62 = vld [vmem:[#allocation3 + $0x2d8] sm:$0xff] }
 0x4d7   : > { %6396 = vmatmul.mubr.f32.gmra.mrb[130].mxu1 %v5996_v27  ;;  %5323 = vst.msk [vmem:[#allocation3 + $0x328] sm:$0xff] %vm721_vm3, %v5248_v14  ;;  %v4996_v44 = vpop.permute.xlu1 %4995  ;;  %v6011_v50 = vld [vmem:[#allocation3 + $0x320] sm:$0xff]  ;;  %v5685_v14 = vld [vmem:[#allocation2 + $0x199] sm:$0xff] }
 0x4d8   : > { %5499 = vrot.lane.b32.xlu1 %v13627_v60, %s10827_s25  ;;  %6400 = vmatprep.mubr.f32.mxu1 %v6002_v62  ;;  %5069 = vst.msk [vmem:[#allocation3 + $0x370] sm:$0xff] %vm721_vm3, %v4996_v44  ;;  %v6065_v62 = vld [vmem:[#allocation3 + $0x4d0] sm:$0xff] }
 0x4d9   : > { %v8039_v44 = vld [vmem:[#allocation2 + $0x19a] sm:$0xff]  ;;  %9677 = vmatprep.mubr.msk.f32.mxu0 %vm375_vm0, %v6065_v62 }
 0x4da   : > { %5753 = vrot.lane.b32.xlu0 %v13629_v12, %s10827_s25  ;;  %v5250_v41 = vpop.permute.xlu0 %5249  ;;  %v6007_v35 = vld [vmem:[#allocation3 + $0x300] sm:$0xff]  ;;  %8071 = vst.msk [vmem:[#allocation3 + $0x4d0] sm:$0xff] %vm375_vm0, %v8039_v44 }
 0x4db   : > { %6401 = vmatmul.mubr.f32.gmra.mrb[132].mxu1 %v6001_v32  ;;  %5324 = vst.msk [vmem:[#allocation3 + $0x350] sm:$0xff] %vm721_vm3, %v5250_v41  ;;  %v4998_v60 = vpop.permute.xlu1 %4997  ;;  %v6016_v45 = vld [vmem:[#allocation3 + $0x348] sm:$0xff]  ;;  %v6070_v32 = vld [vmem:[#allocation3 + $0x4f8] sm:$0xff] }
 0x4dc   : > { %5501 = vrot.lane.b32.xlu1 %v13636_v53, %s10827_s25  ;;  %6405 = vmatprep.mubr.f32.mxu1 %v6007_v35  ;;  %5070 = vst.msk [vmem:[#allocation3 + $0x398] sm:$0xff] %vm721_vm3, %v4998_v60  ;;  %v8040_v60 = vld [vmem:[#allocation2 + $0x1a2] sm:$0xff] }
 0x4dd   : > { %9678 = vmatmul.mubr.msk.f32.gmra.mrb[126].mxu0 %vm375_vm0, %v6070_v32  ;;  %8072 = vst.msk [vmem:[#allocation3 + $0x4f8] sm:$0xff] %vm375_vm0, %v8040_v60 }
 0x4de   : > { %5755 = vrot.lane.b32.xlu0 %v13647_v1, %s10827_s25  ;;  %v5252_v12 = vpop.permute.xlu0 %5251  ;;  %v6012_v4 = vld [vmem:[#allocation3 + $0x328] sm:$0xff] }
 0x4df   : > { %6406 = vmatmul.mubr.f32.gmra.mrb[134].mxu1 %v6006_v17  ;;  %5325 = vst.msk [vmem:[#allocation3 + $0x378] sm:$0xff] %vm721_vm3, %v5252_v12  ;;  %v5000_v53 = vpop.permute.xlu1 %4999  ;;  %v6021_v33 = vld [vmem:[#allocation3 + $0x370] sm:$0xff] }
 0x4e0   : > { %5503 = vrot.lane.b32.xlu1 %v13662_v18, %s10827_s25  ;;  %6410 = vmatprep.mubr.f32.mxu1 %v6012_v4  ;;  %5071 = vst.msk [vmem:[#allocation3 + $0x3c0] sm:$0xff] %vm721_vm3, %v5000_v53  ;;  %v5686_v53 = vld [vmem:[#allocation2 + $0x1a1] sm:$0xff] }
 0x4e2   : > { %5757 = vrot.lane.b32.xlu0 %v13664_v10, %s10827_s25  ;;  %v5254_v1 = vpop.permute.xlu0 %5253  ;;  %v6017_v63 = vld [vmem:[#allocation3 + $0x350] sm:$0xff] }
 0x4e3   : > { %6411 = vmatmul.mubr.f32.gmra.mrb[136].mxu1 %v6011_v50  ;;  %5326 = vst.msk [vmem:[#allocation3 + $0x3a0] sm:$0xff] %vm721_vm3, %v5254_v1  ;;  %v5002_v18 = vpop.permute.xlu1 %5001  ;;  %v6026_v26 = vld [vmem:[#allocation3 + $0x398] sm:$0xff] }
 0x4e4   : > { %5505 = vrot.lane.b32.xlu1 %v13670_v2, %s10827_s25  ;;  %6415 = vmatprep.mubr.f32.mxu1 %v6017_v63  ;;  %5072 = vst.msk [vmem:[#allocation3 + $0x3e8] sm:$0xff] %vm721_vm3, %v5002_v18 }
 0x4e6   : > { %5759 = vrot.lane.b32.xlu0 %v13681_v37, %s10827_s25  ;;  %v6022_v29 = vld [vmem:[#allocation3 + $0x378] sm:$0xff] }
 0x4e7   : > { %6416 = vmatmul.mubr.f32.gmra.mrb[138].mxu1 %v6016_v45  ;;  %v5256_v10 = vpop.permute.xlu0 %5255  ;;  %v6031_v47 = vld [vmem:[#allocation3 + $0x3c0] sm:$0xff] }
 0x4e8   : > { %5507 = vrot.lane.b32.xlu1 %v13695_v52, %s10827_s25  ;;  %5327 = vst.msk [vmem:[#allocation3 + $0x3c8] sm:$0xff] %vm721_vm3, %v5256_v10  ;;  %v5004_v2 = vpop.permute.xlu1 %5003  ;;  %6420 = vmatprep.mubr.f32.mxu1 %v6022_v29 }
 0x4e9   : > { %5073 = vst.msk [vmem:[#allocation3 + $0x410] sm:$0xff] %vm721_vm3, %v5004_v2 }
 0x4ea   : > { %5761 = vrot.lane.b32.xlu0 %v13697_v5, %s10827_s25  ;;  %v6027_v20 = vld [vmem:[#allocation3 + $0x3a0] sm:$0xff] }
 0x4eb   : > { %6421 = vmatmul.mubr.f32.gmra.mrb[140].mxu1 %v6021_v33  ;;  %v5258_v37 = vpop.permute.xlu0 %5257  ;;  %v6036_v8 = vld [vmem:[#allocation3 + $0x3e8] sm:$0xff] }
 0x4ec   : > { %5509 = vrot.lane.b32.xlu1 %v13709_v49, %s10827_s25  ;;  %5328 = vst.msk [vmem:[#allocation3 + $0x3f0] sm:$0xff] %vm721_vm3, %v5258_v37  ;;  %v5006_v52 = vpop.permute.xlu1 %5005  ;;  %6425 = vmatprep.mubr.f32.mxu1 %v6027_v20 }
 0x4ed   : > { %5074 = vst.msk [vmem:[#allocation3 + $0x438] sm:$0xff] %vm721_vm3, %v5006_v52 }
 0x4ee   : > { %5763 = vrot.lane.b32.xlu0 %v13720_v51, %s10827_s25 }
 0x4ef   : > { %6426 = vmatmul.mubr.f32.gmra.mrb[142].mxu1 %v6026_v26  ;;  %v5260_v5 = vpop.permute.xlu0 %5259  ;;  %v6032_v13 = vld [vmem:[#allocation3 + $0x3c8] sm:$0xff] }
 0x4f0   : > { %5511 = vrot.lane.b32.xlu1 %v13735_v43, %s10827_s25  ;;  %5329 = vst.msk [vmem:[#allocation3 + $0x418] sm:$0xff] %vm721_vm3, %v5260_v5  ;;  %v5008_v49 = vpop.permute.xlu1 %5007  ;;  %6430 = vmatprep.mubr.f32.mxu1 %v6032_v13  ;;  %v6041_v59 = vld [vmem:[#allocation3 + $0x410] sm:$0xff] }
 0x4f1   : > { %5075 = vst.msk [vmem:[#allocation3 + $0x460] sm:$0xff] %vm721_vm3, %v5008_v49 }
 0x4f2   : > { %5765 = vrot.lane.b32.xlu0 %v13737_v31, %s10827_s25 }
 0x4f3   : > { %6431 = vmatmul.mubr.f32.gmra.mrb[144].mxu1 %v6031_v47  ;;  %v5262_v51 = vpop.permute.xlu0 %5261  ;;  %v6037_v42 = vld [vmem:[#allocation3 + $0x3f0] sm:$0xff] }
 0x4f4   : > { %5513 = vrot.lane.b32.xlu1 %v13743_v36, %s10827_s25  ;;  %5330 = vst.msk [vmem:[#allocation3 + $0x440] sm:$0xff] %vm721_vm3, %v5262_v51  ;;  %v5010_v43 = vpop.permute.xlu1 %5009  ;;  %6435 = vmatprep.mubr.f32.mxu1 %v6037_v42  ;;  %v6046_v9 = vld [vmem:[#allocation3 + $0x438] sm:$0xff] }
 0x4f5   : > { %5076 = vst.msk [vmem:[#allocation3 + $0x488] sm:$0xff] %vm721_vm3, %v5010_v43 }
 0x4f6   : > { %5767 = vrot.lane.b32.xlu0 %v13754_v58, %s10827_s25 }
 0x4f7   : > { %6436 = vmatmul.mubr.f32.gmra.mrb[146].mxu1 %v6036_v8  ;;  %v5264_v31 = vpop.permute.xlu0 %5263  ;;  %v6042_v39 = vld [vmem:[#allocation3 + $0x418] sm:$0xff] }
 0x4f8   : > { %5515 = vrot.lane.b32.xlu1 %v13768_v56, %s10827_s25  ;;  %5331 = vst.msk [vmem:[#allocation3 + $0x468] sm:$0xff] %vm721_vm3, %v5264_v31  ;;  %v5012_v36 = vpop.permute.xlu1 %5011  ;;  %6440 = vmatprep.mubr.f32.mxu1 %v6042_v39  ;;  %v6051_v30 = vld [vmem:[#allocation3 + $0x460] sm:$0xff] }
 0x4f9   : > { %5077 = vst.msk [vmem:[#allocation3 + $0x4b0] sm:$0xff] %vm721_vm3, %v5012_v36 }
 0x4fa   : > { %5769 = vrot.lane.b32.xlu0 %v13770_v34, %s10827_s25 }
 0x4fb   : > { %6441 = vmatmul.mubr.f32.gmra.mrb[148].mxu1 %v6041_v59  ;;  %v5266_v58 = vpop.permute.xlu0 %5265  ;;  %v6047_v38 = vld [vmem:[#allocation3 + $0x440] sm:$0xff] }
 0x4fc   : > { %5517 = vrot.lane.b32.xlu1 %v13777_v48, %s10827_s25  ;;  %5332 = vst.msk [vmem:[#allocation3 + $0x490] sm:$0xff] %vm721_vm3, %v5266_v58  ;;  %v5014_v56 = vpop.permute.xlu1 %5013  ;;  %6445 = vmatprep.mubr.f32.mxu1 %v6047_v38  ;;  %v6056_v21 = vld [vmem:[#allocation3 + $0x488] sm:$0xff] }
 0x4fd   : > { %5078 = vst.msk [vmem:[#allocation3 + $0x4d8] sm:$0xff] %vm721_vm3, %v5014_v56  ;;  %v14106_v11 = vpop.f32.mrb[96].mxu0 }
 0x4fe   : > { %5771 = vrot.lane.b32.xlu0 %v13788_v24, %s10827_s25  ;;  %v14110_v34 = vpop.f32.mrb[97].mxu0  ;;  %v15147_v24 = vld [vmem:[#allocation7_spill] sm:$0xff] }
 0x4ff   : > { %6446 = vmatmul.mubr.f32.gmra.mrb[150].mxu1 %v6046_v9  ;;  %v6052_v0 = vld [vmem:[#allocation3 + $0x468] sm:$0xff] }
 0x500   : > { %5519 = vrot.lane.b32.xlu1 %v13803_v3, %s10827_s25  ;;  %v5268_v48 = vpop.permute.xlu0 %5267  ;;  %v5464_v46 = vpop.permute.xlu1 %5463  ;;  %6450 = vmatprep.mubr.f32.mxu1 %v6052_v0  ;;  %v6061_v27 = vld [vmem:[#allocation3 + $0x4b0] sm:$0xff] }
 0x501   : > { %5333 = vst.msk [vmem:[#allocation3 + $0x4b8] sm:$0xff] %vm721_vm3, %v5268_v48  ;;  %5559 = vst.msk [vmem:[#allocation3 + $0x10] sm:$0xff] %vm721_vm3, %v5464_v46 }
 0x502   : > { %5773 = vrot.lane.b32.xlu0 %v15147_v24, %s10827_s25 }
 0x503   : > { %6451 = vmatmul.mubr.f32.gmra.mrb[152].mxu1 %v6051_v30  ;;  %v6057_v55 = vld [vmem:[#allocation3 + $0x490] sm:$0xff] }
 0x504   : > { %5521 = vrot.lane.b32.xlu1 %v15148_v25, %s10827_s25  ;;  %v5270_v3 = vpop.permute.xlu0 %5269  ;;  %6455 = vmatprep.mubr.f32.mxu1 %v6057_v55  ;;  %v6066_v12 = vld [vmem:[#allocation3 + $0x4d8] sm:$0xff] }
 0x505   : > { %5334 = vst.msk [vmem:[#allocation3 + $0x4e0] sm:$0xff] %vm721_vm3, %v5270_v3  ;;  %v5466_v15 = vpop.permute.xlu1 %5465 }
 0x506   : > { %5775 = vrot.lane.b32.xlu0 %v15149_v57, %s10827_s25  ;;  %5560 = vst.msk [vmem:[#allocation3 + $0x38] sm:$0xff] %vm721_vm3, %v5466_v15  ;;  %v14126_v19 = vpop.f32.mrb[98].mxu0 }
 0x507   : > { %6456 = vmatmul.mubr.f32.gmra.mrb[154].mxu1 %v6056_v21  ;;  %v14129_v23 = vpop.f32.mrb[99].mxu0 }
 0x508   : > { %5523 = vrot.lane.b32.xlu1 %v5429_v22, %s10827_s25  ;;  %v5720_v7 = vpop.permute.xlu0 %5719  ;;  %v6062_v61 = vld [vmem:[#allocation3 + $0x4b8] sm:$0xff]  ;;  %v5913_v18 = vld [vmem:[#allocation3 + $0x10] sm:$0xff] }
 0x509   : > { %5815 = vst.msk [vmem:[#allocation3 + $0x18] sm:$0xff] %vm721_vm3, %v5720_v7  ;;  %6460 = vmatprep.mubr.f32.mxu1 %v6062_v61  ;;  %v5468_v16 = vpop.permute.xlu1 %5467 }
 0x50a   : > { %5777 = vrot.lane.b32.xlu0 %v13845_v6, %s10827_s25  ;;  %5561 = vst.msk [vmem:[#allocation3 + $0x60] sm:$0xff] %vm721_vm3, %v5468_v16 }
 0x50b   : > { %6461 = vmatmul.mubr.f32.gmra.mrb[156].mxu1 %v6061_v27 }
 0x50c   : > { %5525 = vrot.lane.b32.xlu1 %v5430_v40, %s10827_s25  ;;  %v5722_v41 = vpop.permute.xlu0 %5721  ;;  %v6067_v35 = vld [vmem:[#allocation3 + $0x4e0] sm:$0xff] }
 0x50d   : > { %5816 = vst.msk [vmem:[#allocation3 + $0x40] sm:$0xff] %vm721_vm3, %v5722_v41  ;;  %6465 = vmatprep.mubr.f32.mxu1 %v6067_v35  ;;  %v14141_v17 = vpop.f32.mrb[100].mxu0  ;;  %v5918_v2 = vld [vmem:[#allocation3 + $0x38] sm:$0xff] }
 0x50e   : > { %v5470_v6 = vpop.permute.xlu1 %5469  ;;  %5779 = vrot.lane.b32.xlu0 %v5685_v14, %s10827_s25  ;;  %v14145_v4 = vpop.f32.mrb[101].mxu0 }
 0x50f   : > { %5562 = vst.msk [vmem:[#allocation3 + $0x88] sm:$0xff] %vm721_vm3, %v5470_v6  ;;  %6466 = vmatmul.mubr.f32.gmra.mrb[158].mxu1 %v6066_v12 }
 0x510   : > { %v5724_v50 = vpop.permute.xlu0 %5723  ;;  %v5914_v1 = vld [vmem:[#allocation3 + $0x18] sm:$0xff] }
 0x511   : > { %5817 = vst.msk [vmem:[#allocation3 + $0x68] sm:$0xff] %vm721_vm3, %v5724_v50  ;;  %6535 = vmatprep.mubr.f32.mxu1 %v5914_v1  ;;  %v5923_v5 = vld [vmem:[#allocation3 + $0x60] sm:$0xff] }
 0x512   : > { %v5472_v63 = vpop.permute.xlu1 %5471  ;;  %5781 = vrot.lane.b32.xlu0 %v5686_v53, %s10827_s25 }
 0x513   : > { %5563 = vst.msk [vmem:[#allocation3 + $0xb0] sm:$0xff] %vm721_vm3, %v5472_v63  ;;  %6536 = vmatmul.mubr.f32.vlgmr.msra.gmra.mrb[96].mxu1 %v5913_v18 }
 0x514   : > { %v5726_v45 = vpop.permute.xlu0 %5725  ;;  %v5919_v10 = vld [vmem:[#allocation3 + $0x40] sm:$0xff] }
 0x515   : > { %5818 = vst.msk [vmem:[#allocation3 + $0x90] sm:$0xff] %vm721_vm3, %v5726_v45  ;;  %6540 = vmatprep.mubr.f32.mxu1 %v5919_v10  ;;  %v14152_v33 = vpop.f32.mrb[102].mxu0 }
 0x516   : > { %v5474_v29 = vpop.permute.xlu1 %5473  ;;  %v14154_v37 = vpop.f32.mrb[103].mxu0  ;;  %v5928_v51 = vld [vmem:[#allocation3 + $0x88] sm:$0xff] }
 0x517   : > { %5564 = vst.msk [vmem:[#allocation3 + $0xd8] sm:$0xff] %vm721_vm3, %v5474_v29  ;;  %6541 = vmatmul.mubr.f32.gmra.mrb[98].mxu1 %v5918_v2 }
 0x518   : > { %v5728_v20 = vpop.permute.xlu0 %5727  ;;  %v5924_v52 = vld [vmem:[#allocation3 + $0x68] sm:$0xff] }
 0x519   : > { %5819 = vst.msk [vmem:[#allocation3 + $0xb8] sm:$0xff] %vm721_vm3, %v5728_v20  ;;  %6545 = vmatprep.mubr.f32.mxu1 %v5924_v52 }
 0x51a   : > { %v5476_v26 = vpop.permute.xlu1 %5475  ;;  %v5933_v36 = vld [vmem:[#allocation3 + $0xb0] sm:$0xff] }
 0x51b   : > { %5565 = vst.msk [vmem:[#allocation3 + $0x100] sm:$0xff] %vm721_vm3, %v5476_v26  ;;  %6546 = vmatmul.mubr.f32.gmra.mrb[100].mxu1 %v5923_v5 }
 0x51c   : > { %v5730_v13 = vpop.permute.xlu0 %5729  ;;  %v5929_v49 = vld [vmem:[#allocation3 + $0x90] sm:$0xff] }
 0x51d   : > { %5820 = vst.msk [vmem:[#allocation3 + $0xe0] sm:$0xff] %vm721_vm3, %v5730_v13  ;;  %6550 = vmatprep.mubr.f32.mxu1 %v5929_v49  ;;  %v14159_v42 = vpop.f32.mrb[104].mxu0 }
 0x51e   : > { %v5478_v47 = vpop.permute.xlu1 %5477  ;;  %v14162_v43 = vpop.f32.mrb[105].mxu0  ;;  %v5938_v56 = vld [vmem:[#allocation3 + $0xd8] sm:$0xff] }
 0x51f   : > { %5566 = vst.msk [vmem:[#allocation3 + $0x128] sm:$0xff] %vm721_vm3, %v5478_v47  ;;  %6551 = vmatmul.mubr.f32.gmra.mrb[102].mxu1 %v5928_v51 }
 0x520   : > { %v5732_v8 = vpop.permute.xlu0 %5731  ;;  %v5934_v31 = vld [vmem:[#allocation3 + $0xb8] sm:$0xff] }
 0x521   : > { %5821 = vst.msk [vmem:[#allocation3 + $0x108] sm:$0xff] %vm721_vm3, %v5732_v8  ;;  %6555 = vmatprep.mubr.f32.mxu1 %v5934_v31 }
 0x522   : > { %v5480_v39 = vpop.permute.xlu1 %5479  ;;  %v5943_v24 = vld [vmem:[#allocation3 + $0x100] sm:$0xff] }
 0x523   : > { %5567 = vst.msk [vmem:[#allocation3 + $0x150] sm:$0xff] %vm721_vm3, %v5480_v39  ;;  %6556 = vmatmul.mubr.f32.gmra.mrb[104].mxu1 %v5933_v36 }
 0x524   : > { %v5734_v59 = vpop.permute.xlu0 %5733  ;;  %v5939_v58 = vld [vmem:[#allocation3 + $0xe0] sm:$0xff] }
 0x525   : > { %5822 = vst.msk [vmem:[#allocation3 + $0x130] sm:$0xff] %vm721_vm3, %v5734_v59  ;;  %6560 = vmatprep.mubr.f32.mxu1 %v5939_v58 }
 0x526   : > { %v5482_v38 = vpop.permute.xlu1 %5481  ;;  %v14168_v9 = vpop.f32.mrb[106].mxu0  ;;  %v5948_v3 = vld [vmem:[#allocation3 + $0x128] sm:$0xff] }
 0x527   : > { %5568 = vst.msk [vmem:[#allocation3 + $0x178] sm:$0xff] %vm721_vm3, %v5482_v38  ;;  %6561 = vmatmul.mubr.f32.gmra.mrb[106].mxu1 %v5938_v56  ;;  %v14170_v54 = vpop.f32.mrb[107].mxu0 }
 0x528   : > { %v5736_v48 = vpop.permute.xlu0 %5735  ;;  %v5944_v0 = vld [vmem:[#allocation3 + $0x108] sm:$0xff] }
 0x529   : > { %5823 = vst.msk [vmem:[#allocation3 + $0x158] sm:$0xff] %vm721_vm3, %v5736_v48  ;;  %6565 = vmatprep.mubr.f32.mxu1 %v5944_v0 }
 0x52a   : > { %v5484_v46 = vpop.permute.xlu1 %5483  ;;  %v5953_v7 = vld [vmem:[#allocation3 + $0x150] sm:$0xff] }
 0x52b   : > { %5569 = vst.msk [vmem:[#allocation3 + $0x1a0] sm:$0xff] %vm721_vm3, %v5484_v46  ;;  %6566 = vmatmul.mubr.f32.gmra.mrb[108].mxu1 %v5943_v24 }
 0x52c   : > { %v5738_v30 = vpop.permute.xlu0 %5737  ;;  %v5949_v28 = vld [vmem:[#allocation3 + $0x130] sm:$0xff] }
 0x52d   : > { %5824 = vst.msk [vmem:[#allocation3 + $0x180] sm:$0xff] %vm721_vm3, %v5738_v30  ;;  %6570 = vmatprep.mubr.f32.mxu1 %v5949_v28  ;;  %v14175_v55 = vpop.f32.mrb[108].mxu0 }
 0x52e   : > { %v5486_v25 = vpop.permute.xlu1 %5485  ;;  %v14178_v15 = vpop.f32.mrb[109].mxu0  ;;  %v5958_v27 = vld [vmem:[#allocation3 + $0x178] sm:$0xff] }
 0x52f   : > { %5570 = vst.msk [vmem:[#allocation3 + $0x1c8] sm:$0xff] %vm721_vm3, %v5486_v25  ;;  %6571 = vmatmul.mubr.f32.gmra.mrb[110].mxu1 %v5948_v3 }
 0x530   : > { %v5740_v57 = vpop.permute.xlu0 %5739  ;;  %v5954_v21 = vld [vmem:[#allocation3 + $0x158] sm:$0xff] }
 0x531   : > { %5825 = vst.msk [vmem:[#allocation3 + $0x1a8] sm:$0xff] %vm721_vm3, %v5740_v57  ;;  %6575 = vmatprep.mubr.f32.mxu1 %v5954_v21 }
 0x532   : > { %v5488_v22 = vpop.permute.xlu1 %5487  ;;  %v5963_v35 = vld [vmem:[#allocation3 + $0x1a0] sm:$0xff] }
 0x533   : > { %5571 = vst.msk [vmem:[#allocation3 + $0x1f0] sm:$0xff] %vm721_vm3, %v5488_v22  ;;  %6576 = vmatmul.mubr.f32.gmra.mrb[112].mxu1 %v5953_v7 }
 0x534   : > { %v5742_v61 = vpop.permute.xlu0 %5741  ;;  %v5959_v16 = vld [vmem:[#allocation3 + $0x180] sm:$0xff] }
 0x535   : > { %5826 = vst.msk [vmem:[#allocation3 + $0x1d0] sm:$0xff] %vm721_vm3, %v5742_v61  ;;  %6580 = vmatprep.mubr.f32.mxu1 %v5959_v16  ;;  %v14184_v14 = vpop.f32.mrb[110].mxu0 }
 0x536   : > { %v5490_v40 = vpop.permute.xlu1 %5489  ;;  %v14186_v62 = vpop.f32.mrb[111].mxu0  ;;  %v5968_v53 = vld [vmem:[#allocation3 + $0x1c8] sm:$0xff] }
 0x537   : > { %5572 = vst.msk [vmem:[#allocation3 + $0x218] sm:$0xff] %vm721_vm3, %v5490_v40  ;;  %6581 = vmatmul.mubr.f32.gmra.mrb[114].mxu1 %v5958_v27 }
 0x538   : > { %v5744_v44 = vpop.permute.xlu0 %5743  ;;  %v5964_v32 = vld [vmem:[#allocation3 + $0x1a8] sm:$0xff] }
 0x539   : > { %5827 = vst.msk [vmem:[#allocation3 + $0x1f8] sm:$0xff] %vm721_vm3, %v5744_v44  ;;  %6585 = vmatprep.mubr.f32.mxu1 %v5964_v32 }
 0x53a   : > { %v5492_v41 = vpop.permute.xlu1 %5491  ;;  %v5973_v10 = vld [vmem:[#allocation3 + $0x1f0] sm:$0xff] }
 0x53b   : > { %5573 = vst.msk [vmem:[#allocation3 + $0x240] sm:$0xff] %vm721_vm3, %v5492_v41  ;;  %6586 = vmatmul.mubr.f32.gmra.mrb[116].mxu1 %v5963_v35 }
 0x53c   : > { %v5746_v60 = vpop.permute.xlu0 %5745  ;;  %v5969_v6 = vld [vmem:[#allocation3 + $0x1d0] sm:$0xff] }
 0x53d   : > { %5828 = vst.msk [vmem:[#allocation3 + $0x220] sm:$0xff] %vm721_vm3, %v5746_v60  ;;  %6590 = vmatprep.mubr.f32.mxu1 %v5969_v6  ;;  %v14191_v50 = vpop.f32.mrb[112].mxu0 }
 0x53e   : > { %v5494_v12 = vpop.permute.xlu1 %5493  ;;  %v14194_v1 = vpop.f32.mrb[113].mxu0  ;;  %v5978_v52 = vld [vmem:[#allocation3 + $0x218] sm:$0xff] }
 0x53f   : > { %5574 = vst.msk [vmem:[#allocation3 + $0x268] sm:$0xff] %vm721_vm3, %v5494_v12  ;;  %6591 = vmatmul.mubr.f32.gmra.mrb[118].mxu1 %v5968_v53 }
 0x540   : > { %v5748_v63 = vpop.permute.xlu0 %5747  ;;  %v5974_v18 = vld [vmem:[#allocation3 + $0x1f8] sm:$0xff] }
 0x541   : > { %5829 = vst.msk [vmem:[#allocation3 + $0x248] sm:$0xff] %vm721_vm3, %v5748_v63  ;;  %6595 = vmatprep.mubr.f32.mxu1 %v5974_v18 }
 0x542   : > { %v5496_v45 = vpop.permute.xlu1 %5495  ;;  %v5983_v51 = vld [vmem:[#allocation3 + $0x240] sm:$0xff] }
 0x543   : > { %5575 = vst.msk [vmem:[#allocation3 + $0x290] sm:$0xff] %vm721_vm3, %v5496_v45  ;;  %6596 = vmatmul.mubr.f32.gmra.mrb[120].mxu1 %v5973_v10 }
 0x544   : > { %v5750_v29 = vpop.permute.xlu0 %5749  ;;  %v5979_v2 = vld [vmem:[#allocation3 + $0x220] sm:$0xff] }
 0x545   : > { %5830 = vst.msk [vmem:[#allocation3 + $0x270] sm:$0xff] %vm721_vm3, %v5750_v29  ;;  %6600 = vmatprep.mubr.f32.mxu1 %v5979_v2 }
 0x546   : > { %v5498_v20 = vpop.permute.xlu1 %5497  ;;  %v14200_v26 = vpop.f32.mrb[114].mxu0  ;;  %v5988_v36 = vld [vmem:[#allocation3 + $0x268] sm:$0xff] }
 0x547   : > { %5576 = vst.msk [vmem:[#allocation3 + $0x2b8] sm:$0xff] %vm721_vm3, %v5498_v20  ;;  %6601 = vmatmul.mubr.f32.gmra.mrb[122].mxu1 %v5978_v52  ;;  %v14202_v5 = vpop.f32.mrb[115].mxu0 }
 0x548   : > { %v5752_v13 = vpop.permute.xlu0 %5751  ;;  %v5984_v49 = vld [vmem:[#allocation3 + $0x248] sm:$0xff] }
 0x549   : > { %5831 = vst.msk [vmem:[#allocation3 + $0x298] sm:$0xff] %vm721_vm3, %v5752_v13  ;;  %6605 = vmatprep.mubr.f32.mxu1 %v5984_v49 }
 0x54a   : > { %v5500_v47 = vpop.permute.xlu1 %5499  ;;  %v5993_v0 = vld [vmem:[#allocation3 + $0x290] sm:$0xff] }
 0x54b   : > { %5577 = vst.msk [vmem:[#allocation3 + $0x2e0] sm:$0xff] %vm721_vm3, %v5500_v47  ;;  %6606 = vmatmul.mubr.f32.gmra.mrb[124].mxu1 %v5983_v51 }
 0x54c   : > { %v5754_v8 = vpop.permute.xlu0 %5753  ;;  %v5989_v31 = vld [vmem:[#allocation3 + $0x270] sm:$0xff] }
 0x54d   : > { %5832 = vst.msk [vmem:[#allocation3 + $0x2c0] sm:$0xff] %vm721_vm3, %v5754_v8  ;;  %6610 = vmatprep.mubr.f32.mxu1 %v5989_v31  ;;  %v14207_v59 = vpop.f32.mrb[116].mxu0 }
 0x54e   : > { %v5502_v39 = vpop.permute.xlu1 %5501  ;;  %v14210_v58 = vpop.f32.mrb[117].mxu0  ;;  %v5998_v28 = vld [vmem:[#allocation3 + $0x2b8] sm:$0xff] }
 0x54f   : > { %5578 = vst.msk [vmem:[#allocation3 + $0x308] sm:$0xff] %vm721_vm3, %v5502_v39  ;;  %6611 = vmatmul.mubr.f32.gmra.mrb[126].mxu1 %v5988_v36 }
 0x550   : > { %v5756_v38 = vpop.permute.xlu0 %5755  ;;  %v5994_v56 = vld [vmem:[#allocation3 + $0x298] sm:$0xff] }
 0x551   : > { %5833 = vst.msk [vmem:[#allocation3 + $0x2e8] sm:$0xff] %vm721_vm3, %v5756_v38  ;;  %6615 = vmatprep.mubr.f32.mxu1 %v5994_v56 }
 0x552   : > { %v5504_v48 = vpop.permute.xlu1 %5503  ;;  %v6003_v7 = vld [vmem:[#allocation3 + $0x2e0] sm:$0xff] }
 0x553   : > { %5579 = vst.msk [vmem:[#allocation3 + $0x330] sm:$0xff] %vm721_vm3, %v5504_v48  ;;  %6616 = vmatmul.mubr.f32.gmra.mrb[128].mxu1 %v5993_v0 }
 0x554   : > { %v5758_v46 = vpop.permute.xlu0 %5757  ;;  %v5999_v24 = vld [vmem:[#allocation3 + $0x2c0] sm:$0xff] }
 0x555   : > { %5834 = vst.msk [vmem:[#allocation3 + $0x310] sm:$0xff] %vm721_vm3, %v5758_v46  ;;  %6620 = vmatprep.mubr.f32.mxu1 %v5999_v24 }
 0x556   : > { %v5506_v30 = vpop.permute.xlu1 %5505  ;;  %v6008_v27 = vld [vmem:[#allocation3 + $0x308] sm:$0xff] }
 0x557   : > { %5580 = vst.msk [vmem:[#allocation3 + $0x358] sm:$0xff] %vm721_vm3, %v5506_v30  ;;  %6621 = vmatmul.mubr.f32.gmra.mrb[130].mxu1 %v5998_v28  ;;  %v14216_v25 = vpop.f32.mrb[118].mxu0 }
 0x558   : > { %v14218_v3 = vpop.f32.mrb[119].mxu0  ;;  %v5760_v57 = vpop.permute.xlu0 %5759  ;;  %v6004_v21 = vld [vmem:[#allocation3 + $0x2e8] sm:$0xff] }
 0x559   : > { %5835 = vst.msk [vmem:[#allocation3 + $0x338] sm:$0xff] %vm721_vm3, %v5760_v57  ;;  %6625 = vmatprep.mubr.f32.mxu1 %v6004_v21 }
 0x55a   : > { %v5508_v22 = vpop.permute.xlu1 %5507  ;;  %v6013_v6 = vld [vmem:[#allocation3 + $0x330] sm:$0xff] }
 0x55b   : > { %5581 = vst.msk [vmem:[#allocation3 + $0x380] sm:$0xff] %vm721_vm3, %v5508_v22  ;;  %6626 = vmatmul.mubr.f32.gmra.mrb[132].mxu1 %v6003_v7 }
 0x55c   : > { %v5762_v61 = vpop.permute.xlu0 %5761  ;;  %v6009_v16 = vld [vmem:[#allocation3 + $0x310] sm:$0xff] }
 0x55d   : > { %5836 = vst.msk [vmem:[#allocation3 + $0x360] sm:$0xff] %vm721_vm3, %v5762_v61  ;;  %6630 = vmatprep.mubr.f32.mxu1 %v6009_v16 }
 0x55e   : > { %v5510_v40 = vpop.permute.xlu1 %5509  ;;  %v14223_v44 = vpop.f32.mrb[120].mxu0  ;;  %v6018_v18 = vld [vmem:[#allocation3 + $0x358] sm:$0xff] }
 0x55f   : > { %5582 = vst.msk [vmem:[#allocation3 + $0x3a8] sm:$0xff] %vm721_vm3, %v5510_v40  ;;  %6631 = vmatmul.mubr.f32.gmra.mrb[134].mxu1 %v6008_v27  ;;  %v14226_v32 = vpop.f32.mrb[121].mxu0 }
 0x560   : > { %v5764_v41 = vpop.permute.xlu0 %5763  ;;  %v6014_v35 = vld [vmem:[#allocation3 + $0x338] sm:$0xff] }
 0x561   : > { %5837 = vst.msk [vmem:[#allocation3 + $0x388] sm:$0xff] %vm721_vm3, %v5764_v41  ;;  %6635 = vmatprep.mubr.f32.mxu1 %v6014_v35 }
 0x562   : > { %v5512_v60 = vpop.permute.xlu1 %5511  ;;  %v6023_v52 = vld [vmem:[#allocation3 + $0x380] sm:$0xff] }
 0x563   : > { %5583 = vst.msk [vmem:[#allocation3 + $0x3d0] sm:$0xff] %vm721_vm3, %v5512_v60  ;;  %6636 = vmatmul.mubr.f32.gmra.mrb[136].mxu1 %v6013_v6 }
 0x564   : > { %v5766_v12 = vpop.permute.xlu0 %5765  ;;  %v6019_v53 = vld [vmem:[#allocation3 + $0x360] sm:$0xff] }
 0x565   : > { %5838 = vst.msk [vmem:[#allocation3 + $0x3b0] sm:$0xff] %vm721_vm3, %v5766_v12  ;;  %6640 = vmatprep.mubr.f32.mxu1 %v6019_v53 }
 0x566   : > { %v5514_v63 = vpop.permute.xlu1 %5513  ;;  %v6028_v51 = vld [vmem:[#allocation3 + $0x3a8] sm:$0xff] }
 0x567   : > { %5584 = vst.msk [vmem:[#allocation3 + $0x3f8] sm:$0xff] %vm721_vm3, %v5514_v63  ;;  %6641 = vmatmul.mubr.f32.gmra.mrb[138].mxu1 %v6018_v18 }
 0x568   : > { %v14232_v45 = vpop.f32.mrb[122].mxu0  ;;  %v5768_v29 = vpop.permute.xlu0 %5767  ;;  %v6024_v2 = vld [vmem:[#allocation3 + $0x388] sm:$0xff] }
 0x569   : > { %v14234_v10 = vpop.f32.mrb[123].mxu0  ;;  %5839 = vst.msk [vmem:[#allocation3 + $0x3d8] sm:$0xff] %vm721_vm3, %v5768_v29  ;;  %6645 = vmatprep.mubr.f32.mxu1 %v6024_v2 }
 0x56a   : > { %v5516_v20 = vpop.permute.xlu1 %5515  ;;  %v6033_v56 = vld [vmem:[#allocation3 + $0x3d0] sm:$0xff] }
 0x56b   : > { %5585 = vst.msk [vmem:[#allocation3 + $0x420] sm:$0xff] %vm721_vm3, %v5516_v20  ;;  %6646 = vmatmul.mubr.f32.gmra.mrb[140].mxu1 %v6023_v52  ;;  %v14261_v20 = vld [vmem:[%s15113_s6] ss:$0 sm:$0xff] }
 0x56c   : > { %v5770_v13 = vpop.permute.xlu0 %5769  ;;  %v6029_v49 = vld [vmem:[#allocation3 + $0x3b0] sm:$0xff] }
 0x56d   : > { %5840 = vst.msk [vmem:[#allocation3 + $0x400] sm:$0xff] %vm721_vm3, %v5770_v13  ;;  %6650 = vmatprep.mubr.f32.mxu1 %v6029_v49 }
 0x56e   : > { %v5518_v47 = vpop.permute.xlu1 %5517  ;;  %v6038_v24 = vld [vmem:[#allocation3 + $0x3f8] sm:$0xff] }
 0x56f   : > { %v14239_v8 = vpop.f32.mrb[124].mxu0  ;;  %5586 = vst.msk [vmem:[#allocation3 + $0x448] sm:$0xff] %vm721_vm3, %v5518_v47  ;;  %6651 = vmatmul.mubr.f32.gmra.mrb[142].mxu1 %v6028_v51  ;;  %v7241_v51 = vld [vmem:[#allocation2 + $0x2] sm:$0xff] }
 0x570   : > { %v14242_v31 = vpop.f32.mrb[125].mxu0  ;;  %v5772_v39 = vpop.permute.xlu0 %5771  ;;  %v6034_v36 = vld [vmem:[#allocation3 + $0x3d8] sm:$0xff]  ;;  %7273 = vst.msk [vmem:[#allocation3 + $0x8] sm:$0xff] %vm375_vm0, %v7241_v51 }
 0x571   : > { %5841 = vst.msk [vmem:[#allocation3 + $0x428] sm:$0xff] %vm721_vm3, %v5772_v39  ;;  %6655 = vmatprep.mubr.f32.mxu1 %v6034_v36  ;;  %v7242_v39 = vld [vmem:[#allocation2 + $0xa] sm:$0xff] }
 0x572   : > { %v5520_v38 = vpop.permute.xlu1 %5519  ;;  %v6043_v21 = vld [vmem:[#allocation3 + $0x420] sm:$0xff]  ;;  %7274 = vst.msk [vmem:[#allocation3 + $0x30] sm:$0xff] %vm375_vm0, %v7242_v39 }
 0x573   : > { %5587 = vst.msk [vmem:[#allocation3 + $0x470] sm:$0xff] %vm721_vm3, %v5520_v38  ;;  %6656 = vmatmul.mubr.f32.gmra.mrb[144].mxu1 %v6033_v56 }
 0x574   : > { %v5774_v48 = vpop.permute.xlu0 %5773  ;;  %v6039_v0 = vld [vmem:[#allocation3 + $0x400] sm:$0xff] }
 0x575   : > { %5842 = vst.msk [vmem:[#allocation3 + $0x450] sm:$0xff] %vm721_vm3, %v5774_v48  ;;  %6660 = vmatprep.mubr.f32.mxu1 %v6039_v0  ;;  %v6985_v0 = vld [vmem:[#allocation2] sm:$0xff] }
 0x576   : > { %v5522_v46 = vpop.permute.xlu1 %5521  ;;  %v6048_v16 = vld [vmem:[#allocation3 + $0x448] sm:$0xff]  ;;  %7017 = vst.msk [vmem:[#allocation3] sm:$0xff] %vm375_vm0, %v6985_v0 }
 0x577   : > { %5588 = vst.msk [vmem:[#allocation3 + $0x498] sm:$0xff] %vm721_vm3, %v5522_v46  ;;  %6661 = vmatmul.mubr.f32.gmra.mrb[146].mxu1 %v6038_v24  ;;  %v6986_v24 = vld [vmem:[#allocation2 + $0x8] sm:$0xff] }
 0x578   : > { %v5776_v30 = vpop.permute.xlu0 %5775  ;;  %v6044_v28 = vld [vmem:[#allocation3 + $0x428] sm:$0xff]  ;;  %7018 = vst.msk [vmem:[#allocation3 + $0x28] sm:$0xff] %vm375_vm0, %v6986_v24 }
 0x579   : > { %5843 = vst.msk [vmem:[#allocation3 + $0x478] sm:$0xff] %vm721_vm3, %v5776_v30  ;;  %6665 = vmatprep.mubr.f32.mxu1 %v6044_v28 }
 0x57a   : > { %v5524_v57 = vpop.permute.xlu1 %5523  ;;  %v6053_v41 = vld [vmem:[#allocation3 + $0x470] sm:$0xff] }
 0x57b   : > { %5589 = vst.msk [vmem:[#allocation3 + $0x4c0] sm:$0xff] %vm721_vm3, %v5524_v57  ;;  %6666 = vmatmul.mubr.f32.gmra.mrb[148].mxu1 %v6043_v21 }
 0x57c   : > { %v5778_v22 = vpop.permute.xlu0 %5777  ;;  %v6049_v7 = vld [vmem:[#allocation3 + $0x450] sm:$0xff] }
 0x57d   : > { %5844 = vst.msk [vmem:[#allocation3 + $0x4a0] sm:$0xff] %vm721_vm3, %v5778_v22  ;;  %6670 = vmatprep.mubr.f32.mxu1 %v6049_v7 }
 0x57e   : > { %v5526_v61 = vpop.permute.xlu1 %5525  ;;  %v6058_v6 = vld [vmem:[#allocation3 + $0x498] sm:$0xff] }
 0x57f   : > { %5590 = vst.msk [vmem:[#allocation3 + $0x4e8] sm:$0xff] %vm721_vm3, %v5526_v61  ;;  %6671 = vmatmul.mubr.f32.gmra.mrb[150].mxu1 %v6048_v16 }
 0x580   : > { %v5780_v40 = vpop.permute.xlu0 %5779  ;;  %v6054_v27 = vld [vmem:[#allocation3 + $0x478] sm:$0xff] }
 0x581   : > { %5845 = vst.msk [vmem:[#allocation3 + $0x4c8] sm:$0xff] %vm721_vm3, %v5780_v40  ;;  %6675 = vmatprep.mubr.f32.mxu1 %v6054_v27 }
 0x582   : > { %v6063_v53 = vld [vmem:[#allocation3 + $0x4c0] sm:$0xff] }
 0x583   : > { %6676 = vmatmul.mubr.f32.gmra.mrb[152].mxu1 %v6053_v41 }
 0x584   : > { %v5782_v35 = vpop.permute.xlu0 %5781  ;;  %v6059_v60 = vld [vmem:[#allocation3 + $0x4a0] sm:$0xff] }
 0x585   : > { %5846 = vst.msk [vmem:[#allocation3 + $0x4f0] sm:$0xff] %vm721_vm3, %v5782_v35  ;;  %6680 = vmatprep.mubr.f32.mxu1 %v6059_v60  ;;  %v7049_v35 = vld [vmem:[#allocation2 + $0x1] sm:$0xff] }
 0x586   : > { %v6068_v18 = vld [vmem:[#allocation3 + $0x4e8] sm:$0xff] }
 0x587   : > { %6681 = vmatmul.mubr.f32.gmra.mrb[154].mxu1 %v6058_v6 }
 0x588   : > { %v6064_v12 = vld [vmem:[#allocation3 + $0x4c8] sm:$0xff] }
 0x589   : > { %6685 = vmatprep.mubr.f32.mxu1 %v6064_v12 }
 0x58b   : > { %6686 = vmatmul.mubr.f32.gmra.mrb[156].mxu1 %v6063_v53 }
 0x58c   : > { %v6069_v63 = vld [vmem:[#allocation3 + $0x4f0] sm:$0xff] }
 0x58d   : > { %6690 = vmatprep.mubr.f32.mxu1 %v6069_v63 }
 0x58f   : > { %6691 = vmatmul.mubr.f32.gmra.mrb[158].mxu1 %v6068_v18 }
 0x5b0   : > { %v14254_v29 = vpop.f32.mrb[126].mxu0 }
 0x5b1   : > { %v14256_v2 = vpop.f32.mrb[127].mxu0 }
 0x5e6   : > { %v6537_v52 = vpop.f32.mrb[96].mxu1 }
 0x5e7   : > { %v10512_v13 = vadd.f32 %v14261_v20, %v6537_v52  ;;  %v6539_v49 = vpop.f32.mrb[97].mxu1 }
 0x5e9   : > { %v6763_v47 = vadd.f32 %v10512_v13, %v14110_v34  ;;  %v7050_v13 = vld [vmem:[#allocation2 + $0x9] sm:$0xff] }
 0x5ea   : > { %v6542_v36 = vpop.f32.mrb[98].mxu1 }
 0x5eb   : > { %v6921_v38 = vmax.f32 %v6763_v47, 0.0  ;;  %v10513_v56 = vadd.f32 %v14261_v20, %v6542_v36  ;;  %v6544_v48 = vpop.f32.mrb[99].mxu1 }
 0x5ed   : > { %6953 = vst.msk [vmem:[#allocation2 + $0x19] sm:$0xff] %vm375_vm0, %v6921_v38  ;;  %v6768_v46 = vadd.f32 %v10513_v56, %v14106_v11 }
 0x5ee   : > { %v6547_v34 = vpop.f32.mrb[100].mxu1 }
 0x5ef   : > { %v6922_v30 = vmax.f32 %v6768_v46, 0.0  ;;  %v10514_v28 = vadd.f32 %v14261_v20, %v6547_v34  ;;  %v6549_v57 = vpop.f32.mrb[101].mxu1 }
 0x5f1   : > { %6954 = vst.msk [vmem:[#allocation2 + $0x21] sm:$0xff] %vm375_vm0, %v6922_v30  ;;  %v6773_v21 = vadd.f32 %v10514_v28, %v14129_v23 }
 0x5f2   : > { %v6552_v22 = vpop.f32.mrb[102].mxu1 }
 0x5f3   : > { %v6923_v7 = vmax.f32 %v6773_v21, 0.0  ;;  %v10515_v61 = vadd.f32 %v14261_v20, %v6552_v22  ;;  %v6554_v16 = vpop.f32.mrb[103].mxu1 }
 0x5f4   : > { %v7305_v11 = vld [vmem:[#allocation2 + $0x18] sm:$0xff] }
 0x5f5   : > { %v7497_v40 = vld [vmem:[#allocation2 + $0x19] sm:$0xff]  ;;  %6955 = vst.msk [vmem:[#allocation2 + $0x31] sm:$0xff] %vm375_vm0, %v6923_v7  ;;  %v6778_v27 = vadd.f32 %v10515_v61, %v14126_v19  ;;  %7369 = vrot.lane.b32.xlu0 %v7305_v11, %s10827_s25  ;;  %7019 = vst.msk [vmem:[#allocation3 + $0x50] sm:$0xff] %vm375_vm0, %v7305_v11 }
 0x5f6   : > { %7529 = vst.msk [vmem:[#allocation3 + $0x10] sm:$0xff] %vm375_vm0, %v7497_v40  ;;  %v6557_v41 = vpop.f32.mrb[104].mxu1  ;;  %v7051_v34 = vld [vmem:[#allocation2 + $0x19] sm:$0xff] }
 0x5f7   : > { %v6924_v23 = vmax.f32 %v6778_v27, 0.0  ;;  %v10516_v60 = vadd.f32 %v14261_v20, %v6557_v41  ;;  %v6559_v6 = vpop.f32.mrb[105].mxu1 }
 0x5f8   : > { %v7306_v12 = vld [vmem:[#allocation2 + $0x20] sm:$0xff] }
 0x5f9   : > { %v14282_v53 = vld [vmem:[#allocation2 + $0x1a] sm:$0xff]  ;;  %6956 = vst.msk [vmem:[#allocation2 + $0x39] sm:$0xff] %vm375_vm0, %v6924_v23  ;;  %v6783_v63 = vadd.f32 %v10516_v60, %v14145_v4  ;;  %7371 = vrot.lane.b32.xlu1 %v7306_v12, %s10827_s25  ;;  %7113 = vrot.lane.b32.xlu0 %v7049_v35, %s10827_s25  ;;  %v14290_v19 = vld [vmem:[#allocation2 + $0x22] sm:$0xff]  ;;  %7020 = vst.msk [vmem:[#allocation3 + $0x78] sm:$0xff] %vm375_vm0, %v7306_v12 }
 0x5fa   : > { %7275 = vst.msk [vmem:[#allocation3 + $0x58] sm:$0xff] %vm375_vm0, %v14282_v53  ;;  %v7498_v18 = vld [vmem:[#allocation2 + $0x21] sm:$0xff]  ;;  %v6562_v52 = vpop.f32.mrb[106].mxu1  ;;  %7276 = vst.msk [vmem:[#allocation3 + $0x80] sm:$0xff] %vm375_vm0, %v14290_v19 }
 0x5fb   : > { %7530 = vst.msk [vmem:[#allocation3 + $0x38] sm:$0xff] %vm375_vm0, %v7498_v18  ;;  %v6925_v4 = vmax.f32 %v6783_v63, 0.0  ;;  %v10517_v49 = vadd.f32 %v14261_v20, %v6562_v52  ;;  %v6564_v47 = vpop.f32.mrb[107].mxu1  ;;  %v7052_v40 = vld [vmem:[#allocation2 + $0x21] sm:$0xff] }
 0x5fc   : > { %v7307_v51 = vld [vmem:[#allocation2 + $0x30] sm:$0xff] }
 0x5fd   : > { %v7753_v39 = vld [vmem:[#allocation2 + $0x30] sm:$0xff]  ;;  %6957 = vst.msk [vmem:[#allocation2 + $0x49] sm:$0xff] %vm375_vm0, %v6925_v4  ;;  %v6788_v36 = vadd.f32 %v10517_v49, %v14141_v17  ;;  %7115 = vrot.lane.b32.xlu1 %v7050_v13, %s10827_s25  ;;  %7373 = vrot.lane.b32.xlu0 %v7307_v51, %s10827_s25  ;;  %7021 = vst.msk [vmem:[#allocation3 + $0xa0] sm:$0xff] %vm375_vm0, %v7307_v51 }
 0x5fe   : > { %7785 = vst.msk [vmem:[#allocation3 + $0x18] sm:$0xff] %vm375_vm0, %v7753_v39  ;;  %v7499_v38 = vld [vmem:[#allocation2 + $0x31] sm:$0xff]  ;;  %v6567_v56 = vpop.f32.mrb[108].mxu1 }
 0x5ff   : > { %7531 = vst.msk [vmem:[#allocation3 + $0x60] sm:$0xff] %vm375_vm0, %v7499_v38  ;;  %v6926_v48 = vmax.f32 %v6788_v36, 0.0  ;;  %v10518_v0 = vadd.f32 %v14261_v20, %v6567_v56  ;;  %v6569_v46 = vpop.f32.mrb[109].mxu1  ;;  %v14331_v52 = vld [vmem:[#allocation2 + $0x31] sm:$0xff] }
 0x600   : > { %v7308_v24 = vld [vmem:[#allocation2 + $0x38] sm:$0xff] }
 0x601   : > { %v14305_v30 = vld [vmem:[#allocation2 + $0x32] sm:$0xff]  ;;  %6958 = vst.msk [vmem:[#allocation2 + $0x51] sm:$0xff] %vm375_vm0, %v6926_v48  ;;  %v6793_v17 = vadd.f32 %v10518_v0, %v14154_v37  ;;  %7375 = vrot.lane.b32.xlu1 %v7308_v24, %s10827_s25  ;;  %7117 = vrot.lane.b32.xlu0 %v7051_v34, %s10827_s25  ;;  %v14313_v28 = vld [vmem:[#allocation2 + $0x3a] sm:$0xff]  ;;  %7022 = vst.msk [vmem:[#allocation3 + $0xc8] sm:$0xff] %vm375_vm0, %v7308_v24 }
 0x602   : > { %7277 = vst.msk [vmem:[#allocation3 + $0xa8] sm:$0xff] %vm375_vm0, %v14305_v30  ;;  %v7754_v57 = vld [vmem:[#allocation2 + $0x38] sm:$0xff]  ;;  %v6572_v22 = vpop.f32.mrb[110].mxu1  ;;  %7278 = vst.msk [vmem:[#allocation3 + $0xd0] sm:$0xff] %vm375_vm0, %v14313_v28 }
 0x603   : > { %v7500_v21 = vld [vmem:[#allocation2 + $0x39] sm:$0xff]  ;;  %7786 = vst.msk [vmem:[#allocation3 + $0x40] sm:$0xff] %vm375_vm0, %v7754_v57  ;;  %v6927_v61 = vmax.f32 %v6793_v17, 0.0  ;;  %v10519_v16 = vadd.f32 %v14261_v20, %v6572_v22  ;;  %v6574_v11 = vpop.f32.mrb[111].mxu1 }
 0x604   : > { %7532 = vst.msk [vmem:[#allocation3 + $0x88] sm:$0xff] %vm375_vm0, %v7500_v21  ;;  %v8009_v37 = vld [vmem:[#allocation2 + $0x32] sm:$0xff]  ;;  %v8010_v7 = vld [vmem:[#allocation2 + $0x3a] sm:$0xff]  ;;  %v7309_v27 = vld [vmem:[#allocation2 + $0x48] sm:$0xff] }
 0x605   : > { %8041 = vst.msk [vmem:[#allocation3 + $0x20] sm:$0xff] %vm375_vm0, %v8009_v37  ;;  %8042 = vst.msk [vmem:[#allocation3 + $0x48] sm:$0xff] %vm375_vm0, %v8010_v7  ;;  %v7755_v41 = vld [vmem:[#allocation2 + $0x48] sm:$0xff]  ;;  %v6798_v35 = vadd.f32 %v10519_v16, %v14152_v33  ;;  %7119 = vrot.lane.b32.xlu1 %v7052_v40, %s10827_s25  ;;  %7377 = vrot.lane.b32.xlu0 %v7309_v27, %s10827_s25  ;;  %v14351_v48 = vld [vmem:[#allocation2 + $0x39] sm:$0xff] }
 0x606   : > { %6959 = vst.msk [vmem:[#allocation2 + $0x61] sm:$0xff] %vm375_vm0, %v6927_v61  ;;  %7023 = vst.msk [vmem:[#allocation3 + $0xf0] sm:$0xff] %vm375_vm0, %v7309_v27  ;;  %v7501_v23 = vld [vmem:[#allocation2 + $0x49] sm:$0xff]  ;;  %v6577_v60 = vpop.f32.mrb[112].mxu1 }
 0x607   : > { %7787 = vst.msk [vmem:[#allocation3 + $0x68] sm:$0xff] %vm375_vm0, %v7755_v41  ;;  %7533 = vst.msk [vmem:[#allocation3 + $0xb0] sm:$0xff] %vm375_vm0, %v7501_v23  ;;  %v6928_v6 = vmax.f32 %v6798_v35, 0.0  ;;  %v10520_v12 = vadd.f32 %v14261_v20, %v6577_v60  ;;  %v6579_v63 = vpop.f32.mrb[113].mxu1  ;;  %v14363_v7 = vld [vmem:[#allocation2 + $0x49] sm:$0xff] }
 0x608   : > { %v7310_v18 = vld [vmem:[#allocation2 + $0x50] sm:$0xff] }
 0x609   : > { %v14333_v33 = vld [vmem:[#allocation2 + $0x4a] sm:$0xff]  ;;  %6960 = vst.msk [vmem:[#allocation2 + $0x69] sm:$0xff] %vm375_vm0, %v6928_v6  ;;  %v6803_v13 = vadd.f32 %v10520_v12, %v14162_v43  ;;  %7379 = vrot.lane.b32.xlu1 %v7310_v18, %s10827_s25  ;;  %7121 = vrot.lane.b32.xlu0 %v14331_v52, %s10827_s25  ;;  %v14342_v4 = vld [vmem:[#allocation2 + $0x52] sm:$0xff]  ;;  %7024 = vst.msk [vmem:[#allocation3 + $0x118] sm:$0xff] %vm375_vm0, %v7310_v18 }
 0x60a   : > { %7279 = vst.msk [vmem:[#allocation3 + $0xf8] sm:$0xff] %vm375_vm0, %v14333_v33  ;;  %v7756_v49 = vld [vmem:[#allocation2 + $0x50] sm:$0xff]  ;;  %v6582_v51 = vpop.f32.mrb[114].mxu1  ;;  %7280 = vst.msk [vmem:[#allocation3 + $0x120] sm:$0xff] %vm375_vm0, %v14342_v4 }
 0x60b   : > { %v7502_v47 = vld [vmem:[#allocation2 + $0x51] sm:$0xff]  ;;  %7788 = vst.msk [vmem:[#allocation3 + $0x90] sm:$0xff] %vm375_vm0, %v7756_v49  ;;  %v6929_v39 = vmax.f32 %v6803_v13, 0.0  ;;  %v10521_v36 = vadd.f32 %v14261_v20, %v6582_v51  ;;  %v6584_v38 = vpop.f32.mrb[115].mxu1 }
 0x60c   : > { %7534 = vst.msk [vmem:[#allocation3 + $0xd8] sm:$0xff] %vm375_vm0, %v7502_v47  ;;  %v8011_v43 = vld [vmem:[#allocation2 + $0x4a] sm:$0xff]  ;;  %v8012_v56 = vld [vmem:[#allocation2 + $0x52] sm:$0xff] }
 0x60d   : > { %8043 = vst.msk [vmem:[#allocation3 + $0x70] sm:$0xff] %vm375_vm0, %v8011_v43  ;;  %v7311_v0 = vld [vmem:[#allocation2 + $0x60] sm:$0xff]  ;;  %8044 = vst.msk [vmem:[#allocation3 + $0x98] sm:$0xff] %vm375_vm0, %v8012_v56  ;;  %v6808_v24 = vadd.f32 %v10521_v36, %v14159_v42  ;;  %7123 = vrot.lane.b32.xlu1 %v14351_v48, %s10827_s25  ;;  %v14384_v6 = vld [vmem:[#allocation2 + $0x51] sm:$0xff] }
 0x60e   : > { %v7757_v46 = vld [vmem:[#allocation2 + $0x60] sm:$0xff]  ;;  %6961 = vst.msk [vmem:[#allocation2 + $0x79] sm:$0xff] %vm375_vm0, %v6929_v39  ;;  %7381 = vrot.lane.b32.xlu0 %v7311_v0, %s10827_s25  ;;  %7025 = vst.msk [vmem:[#allocation3 + $0x140] sm:$0xff] %vm375_vm0, %v7311_v0  ;;  %v6587_v17 = vpop.f32.mrb[116].mxu1 }
 0x60f   : > { %7789 = vst.msk [vmem:[#allocation3 + $0xb8] sm:$0xff] %vm375_vm0, %v7757_v46  ;;  %v7503_v34 = vld [vmem:[#allocation2 + $0x61] sm:$0xff]  ;;  %v6930_v57 = vmax.f32 %v6808_v24, 0.0  ;;  %v10522_v21 = vadd.f32 %v14261_v20, %v6587_v17  ;;  %v6589_v22 = vpop.f32.mrb[117].mxu1 }
 0x610   : > { %7535 = vst.msk [vmem:[#allocation3 + $0x100] sm:$0xff] %vm375_vm0, %v7503_v34  ;;  %v7312_v37 = vld [vmem:[#allocation2 + $0x68] sm:$0xff] }
 0x611   : > { %v14365_v42 = vld [vmem:[#allocation2 + $0x62] sm:$0xff]  ;;  %6962 = vst.msk [vmem:[#allocation2 + $0x81] sm:$0xff] %vm375_vm0, %v6930_v57  ;;  %v6813_v61 = vadd.f32 %v10522_v21, %v14170_v54  ;;  %7383 = vrot.lane.b32.xlu1 %v7312_v37, %s10827_s25  ;;  %v14374_v16 = vld [vmem:[#allocation2 + $0x6a] sm:$0xff]  ;;  %7026 = vst.msk [vmem:[#allocation3 + $0x168] sm:$0xff] %vm375_vm0, %v7312_v37 }
 0x612   : > { %7125 = vrot.lane.b32.xlu0 %v14363_v7, %s10827_s25  ;;  %7281 = vst.msk [vmem:[#allocation3 + $0x148] sm:$0xff] %vm375_vm0, %v14365_v42  ;;  %v7758_v11 = vld [vmem:[#allocation2 + $0x68] sm:$0xff]  ;;  %v6592_v27 = vpop.f32.mrb[118].mxu1  ;;  %7282 = vst.msk [vmem:[#allocation3 + $0x170] sm:$0xff] %vm375_vm0, %v14374_v16 }
 0x613   : > { %v7504_v40 = vld [vmem:[#allocation2 + $0x69] sm:$0xff]  ;;  %7790 = vst.msk [vmem:[#allocation3 + $0xe0] sm:$0xff] %vm375_vm0, %v7758_v11  ;;  %v6931_v35 = vmax.f32 %v6813_v61, 0.0  ;;  %v10523_v23 = vadd.f32 %v14261_v20, %v6592_v27  ;;  %v6594_v60 = vpop.f32.mrb[119].mxu1  ;;  %v14395_v36 = vld [vmem:[#allocation2 + $0x61] sm:$0xff] }
 0x614   : > { %7536 = vst.msk [vmem:[#allocation3 + $0x128] sm:$0xff] %vm375_vm0, %v7504_v40  ;;  %v8013_v54 = vld [vmem:[#allocation2 + $0x62] sm:$0xff]  ;;  %v8014_v41 = vld [vmem:[#allocation2 + $0x6a] sm:$0xff] }
 0x615   : > { %8045 = vst.msk [vmem:[#allocation3 + $0xc0] sm:$0xff] %vm375_vm0, %v8013_v54  ;;  %8046 = vst.msk [vmem:[#allocation3 + $0xe8] sm:$0xff] %vm375_vm0, %v8014_v41  ;;  %v7313_v12 = vld [vmem:[#allocation2 + $0x78] sm:$0xff]  ;;  %v6818_v18 = vadd.f32 %v10523_v23, %v14168_v9  ;;  %7127 = vrot.lane.b32.xlu1 %v14384_v6, %s10827_s25  ;;  %v14415_v22 = vld [vmem:[#allocation2 + $0x69] sm:$0xff] }
 0x616   : > { %v7759_v63 = vld [vmem:[#allocation2 + $0x78] sm:$0xff]  ;;  %6963 = vst.msk [vmem:[#allocation2 + $0x91] sm:$0xff] %vm375_vm0, %v6931_v35  ;;  %7385 = vrot.lane.b32.xlu0 %v7313_v12, %s10827_s25  ;;  %7027 = vst.msk [vmem:[#allocation3 + $0x190] sm:$0xff] %vm375_vm0, %v7313_v12  ;;  %v6597_v49 = vpop.f32.mrb[120].mxu1 }
 0x617   : > { %7791 = vst.msk [vmem:[#allocation3 + $0x108] sm:$0xff] %vm375_vm0, %v7759_v63  ;;  %v7505_v13 = vld [vmem:[#allocation2 + $0x79] sm:$0xff]  ;;  %v6932_v47 = vmax.f32 %v6818_v18, 0.0  ;;  %v10524_v51 = vadd.f32 %v14261_v20, %v6597_v49  ;;  %v6599_v43 = vpop.f32.mrb[121].mxu1 }
 0x618   : > { %7537 = vst.msk [vmem:[#allocation3 + $0x150] sm:$0xff] %vm375_vm0, %v7505_v13  ;;  %v7314_v39 = vld [vmem:[#allocation2 + $0x80] sm:$0xff] }
 0x619   : > { %v14397_v9 = vld [vmem:[#allocation2 + $0x7a] sm:$0xff]  ;;  %6964 = vst.msk [vmem:[#allocation2 + $0x99] sm:$0xff] %vm375_vm0, %v6932_v47  ;;  %v6823_v38 = vadd.f32 %v10524_v51, %v14178_v15  ;;  %7387 = vrot.lane.b32.xlu1 %v7314_v39, %s10827_s25  ;;  %v14406_v56 = vld [vmem:[#allocation2 + $0x82] sm:$0xff]  ;;  %7028 = vst.msk [vmem:[#allocation3 + $0x1b8] sm:$0xff] %vm375_vm0, %v7314_v39 }
 0x61a   : > { %7129 = vrot.lane.b32.xlu0 %v14395_v36, %s10827_s25  ;;  %7283 = vst.msk [vmem:[#allocation3 + $0x198] sm:$0xff] %vm375_vm0, %v14397_v9  ;;  %v7760_v0 = vld [vmem:[#allocation2 + $0x80] sm:$0xff]  ;;  %v6602_v24 = vpop.f32.mrb[122].mxu1  ;;  %7284 = vst.msk [vmem:[#allocation3 + $0x1c0] sm:$0xff] %vm375_vm0, %v14406_v56 }
 0x61b   : > { %v7506_v46 = vld [vmem:[#allocation2 + $0x81] sm:$0xff]  ;;  %7792 = vst.msk [vmem:[#allocation3 + $0x130] sm:$0xff] %vm375_vm0, %v7760_v0  ;;  %v6933_v34 = vmax.f32 %v6823_v38, 0.0  ;;  %v10525_v17 = vadd.f32 %v14261_v20, %v6602_v24  ;;  %v6604_v57 = vpop.f32.mrb[123].mxu1  ;;  %v14427_v60 = vld [vmem:[#allocation2 + $0x79] sm:$0xff] }
 0x61c   : > { %7538 = vst.msk [vmem:[#allocation3 + $0x178] sm:$0xff] %vm375_vm0, %v7506_v46  ;;  %v8015_v15 = vld [vmem:[#allocation2 + $0x7a] sm:$0xff]  ;;  %v8016_v21 = vld [vmem:[#allocation2 + $0x82] sm:$0xff] }
 0x61d   : > { %8047 = vst.msk [vmem:[#allocation3 + $0x110] sm:$0xff] %vm375_vm0, %v8015_v15  ;;  %v7315_v37 = vld [vmem:[#allocation2 + $0x90] sm:$0xff]  ;;  %8048 = vst.msk [vmem:[#allocation3 + $0x138] sm:$0xff] %vm375_vm0, %v8016_v21  ;;  %v6828_v11 = vadd.f32 %v10525_v17, %v14175_v55  ;;  %7131 = vrot.lane.b32.xlu1 %v14415_v22, %s10827_s25  ;;  %v14448_v38 = vld [vmem:[#allocation2 + $0x81] sm:$0xff] }
 0x61e   : > { %v7761_v61 = vld [vmem:[#allocation2 + $0x90] sm:$0xff]  ;;  %6965 = vst.msk [vmem:[#allocation2 + $0xa9] sm:$0xff] %vm375_vm0, %v6933_v34  ;;  %7389 = vrot.lane.b32.xlu0 %v7315_v37, %s10827_s25  ;;  %7029 = vst.msk [vmem:[#allocation3 + $0x1e0] sm:$0xff] %vm375_vm0, %v7315_v37  ;;  %v6607_v27 = vpop.f32.mrb[124].mxu1 }
 0x61f   : > { %7793 = vst.msk [vmem:[#allocation3 + $0x158] sm:$0xff] %vm375_vm0, %v7761_v61  ;;  %v7507_v40 = vld [vmem:[#allocation2 + $0x91] sm:$0xff]  ;;  %v6934_v54 = vmax.f32 %v6828_v11, 0.0  ;;  %v10526_v41 = vadd.f32 %v14261_v20, %v6607_v27  ;;  %v6609_v35 = vpop.f32.mrb[125].mxu1 }
 0x620   : > { %7539 = vst.msk [vmem:[#allocation3 + $0x1a0] sm:$0xff] %vm375_vm0, %v7507_v40  ;;  %v7316_v23 = vld [vmem:[#allocation2 + $0x98] sm:$0xff] }
 0x621   : > { %v14429_v55 = vld [vmem:[#allocation2 + $0x92] sm:$0xff]  ;;  %6966 = vst.msk [vmem:[#allocation2 + $0xb1] sm:$0xff] %vm375_vm0, %v6934_v54  ;;  %v6833_v12 = vadd.f32 %v10526_v41, %v14186_v62  ;;  %7391 = vrot.lane.b32.xlu1 %v7316_v23, %s10827_s25  ;;  %v14438_v63 = vld [vmem:[#allocation2 + $0x9a] sm:$0xff]  ;;  %7030 = vst.msk [vmem:[#allocation3 + $0x208] sm:$0xff] %vm375_vm0, %v7316_v23 }
 0x622   : > { %7133 = vrot.lane.b32.xlu0 %v14427_v60, %s10827_s25  ;;  %7285 = vst.msk [vmem:[#allocation3 + $0x1e8] sm:$0xff] %vm375_vm0, %v14429_v55  ;;  %v7762_v18 = vld [vmem:[#allocation2 + $0x98] sm:$0xff]  ;;  %v6612_v49 = vpop.f32.mrb[126].mxu1  ;;  %7286 = vst.msk [vmem:[#allocation3 + $0x210] sm:$0xff] %vm375_vm0, %v14438_v63 }
 0x623   : > { %v7508_v13 = vld [vmem:[#allocation2 + $0x99] sm:$0xff]  ;;  %7794 = vst.msk [vmem:[#allocation3 + $0x180] sm:$0xff] %vm375_vm0, %v7762_v18  ;;  %v6935_v51 = vmax.f32 %v6833_v12, 0.0  ;;  %v10527_v43 = vadd.f32 %v14261_v20, %v6612_v49  ;;  %v6614_v39 = vpop.f32.mrb[127].mxu1  ;;  %v14459_v61 = vld [vmem:[#allocation2 + $0x91] sm:$0xff] }
 0x624   : > { %7540 = vst.msk [vmem:[#allocation3 + $0x1c8] sm:$0xff] %vm375_vm0, %v7508_v13  ;;  %v8017_v62 = vld [vmem:[#allocation2 + $0x92] sm:$0xff]  ;;  %v8018_v47 = vld [vmem:[#allocation2 + $0x9a] sm:$0xff] }
 0x625   : > { %8049 = vst.msk [vmem:[#allocation3 + $0x160] sm:$0xff] %vm375_vm0, %v8017_v62  ;;  %8050 = vst.msk [vmem:[#allocation3 + $0x188] sm:$0xff] %vm375_vm0, %v8018_v47  ;;  %v7317_v0 = vld [vmem:[#allocation2 + $0xa8] sm:$0xff]  ;;  %v6838_v24 = vadd.f32 %v10527_v43, %v14184_v14  ;;  %7135 = vrot.lane.b32.xlu1 %v14448_v38, %s10827_s25  ;;  %v14479_v13 = vld [vmem:[#allocation2 + $0x99] sm:$0xff] }
 0x626   : > { %v7763_v46 = vld [vmem:[#allocation2 + $0xa8] sm:$0xff]  ;;  %6967 = vst.msk [vmem:[#allocation2 + $0xc1] sm:$0xff] %vm375_vm0, %v6935_v51  ;;  %7393 = vrot.lane.b32.xlu0 %v7317_v0, %s10827_s25  ;;  %7031 = vst.msk [vmem:[#allocation3 + $0x230] sm:$0xff] %vm375_vm0, %v7317_v0  ;;  %v6617_v34 = vpop.f32.mrb[128].mxu1 }
 0x627   : > { %7795 = vst.msk [vmem:[#allocation3 + $0x1a8] sm:$0xff] %vm375_vm0, %v7763_v46  ;;  %v7509_v15 = vld [vmem:[#allocation2 + $0xa9] sm:$0xff]  ;;  %v6936_v17 = vmax.f32 %v6838_v24, 0.0  ;;  %v10528_v57 = vadd.f32 %v14261_v20, %v6617_v34  ;;  %v6619_v21 = vpop.f32.mrb[129].mxu1 }
 0x628   : > { %7541 = vst.msk [vmem:[#allocation3 + $0x1f0] sm:$0xff] %vm375_vm0, %v7509_v15  ;;  %v7318_v37 = vld [vmem:[#allocation2 + $0xb0] sm:$0xff] }
 0x629   : > { %v14461_v14 = vld [vmem:[#allocation2 + $0xaa] sm:$0xff]  ;;  %6968 = vst.msk [vmem:[#allocation2 + $0xc9] sm:$0xff] %vm375_vm0, %v6936_v17  ;;  %v6843_v11 = vadd.f32 %v10528_v57, %v14194_v1  ;;  %7395 = vrot.lane.b32.xlu1 %v7318_v37, %s10827_s25  ;;  %v14470_v40 = vld [vmem:[#allocation2 + $0xb2] sm:$0xff]  ;;  %7032 = vst.msk [vmem:[#allocation3 + $0x258] sm:$0xff] %vm375_vm0, %v7318_v37 }
 0x62a   : > { %7137 = vrot.lane.b32.xlu0 %v14459_v61, %s10827_s25  ;;  %7287 = vst.msk [vmem:[#allocation3 + $0x238] sm:$0xff] %vm375_vm0, %v14461_v14  ;;  %v7764_v27 = vld [vmem:[#allocation2 + $0xb0] sm:$0xff]  ;;  %v6622_v41 = vpop.f32.mrb[130].mxu1  ;;  %7288 = vst.msk [vmem:[#allocation3 + $0x260] sm:$0xff] %vm375_vm0, %v14470_v40 }
 0x62b   : > { %v7510_v54 = vld [vmem:[#allocation2 + $0xb1] sm:$0xff]  ;;  %7796 = vst.msk [vmem:[#allocation3 + $0x1d0] sm:$0xff] %vm375_vm0, %v7764_v27  ;;  %v6937_v35 = vmax.f32 %v6843_v11, 0.0  ;;  %v10529_v23 = vadd.f32 %v14261_v20, %v6622_v41  ;;  %v6624_v12 = vpop.f32.mrb[131].mxu1  ;;  %v14491_v15 = vld [vmem:[#allocation2 + $0xa9] sm:$0xff] }
 0x62c   : > { %7542 = vst.msk [vmem:[#allocation3 + $0x218] sm:$0xff] %vm375_vm0, %v7510_v54  ;;  %v8019_v1 = vld [vmem:[#allocation2 + $0xaa] sm:$0xff]  ;;  %v8020_v18 = vld [vmem:[#allocation2 + $0xb2] sm:$0xff] }
 0x62d   : > { %8051 = vst.msk [vmem:[#allocation3 + $0x1b0] sm:$0xff] %vm375_vm0, %v8019_v1  ;;  %v7319_v49 = vld [vmem:[#allocation2 + $0xc0] sm:$0xff]  ;;  %8052 = vst.msk [vmem:[#allocation3 + $0x1d8] sm:$0xff] %vm375_vm0, %v8020_v18  ;;  %v6848_v47 = vadd.f32 %v10529_v23, %v14191_v50  ;;  %7139 = vrot.lane.b32.xlu1 %v14479_v13, %s10827_s25  ;;  %v14512_v1 = vld [vmem:[#allocation2 + $0xb1] sm:$0xff] }
 0x62e   : > { %v7765_v62 = vld [vmem:[#allocation2 + $0xc0] sm:$0xff]  ;;  %6969 = vst.msk [vmem:[#allocation2 + $0xd9] sm:$0xff] %vm375_vm0, %v6937_v35  ;;  %7397 = vrot.lane.b32.xlu0 %v7319_v49, %s10827_s25  ;;  %7033 = vst.msk [vmem:[#allocation3 + $0x280] sm:$0xff] %vm375_vm0, %v7319_v49  ;;  %v6627_v43 = vpop.f32.mrb[132].mxu1 }
 0x62f   : > { %7797 = vst.msk [vmem:[#allocation3 + $0x1f8] sm:$0xff] %vm375_vm0, %v7765_v62  ;;  %v7511_v51 = vld [vmem:[#allocation2 + $0xc1] sm:$0xff]  ;;  %v6938_v39 = vmax.f32 %v6848_v47, 0.0  ;;  %v10530_v0 = vadd.f32 %v14261_v20, %v6627_v43  ;;  %v6629_v46 = vpop.f32.mrb[133].mxu1 }
 0x630   : > { %7543 = vst.msk [vmem:[#allocation3 + $0x240] sm:$0xff] %vm375_vm0, %v7511_v51  ;;  %v7320_v24 = vld [vmem:[#allocation2 + $0xc8] sm:$0xff] }
 0x631   : > { %v14493_v50 = vld [vmem:[#allocation2 + $0xc2] sm:$0xff]  ;;  %6970 = vst.msk [vmem:[#allocation2 + $0xe1] sm:$0xff] %vm375_vm0, %v6938_v39  ;;  %v6853_v34 = vadd.f32 %v10530_v0, %v14202_v5  ;;  %7399 = vrot.lane.b32.xlu1 %v7320_v24, %s10827_s25  ;;  %v14502_v17 = vld [vmem:[#allocation2 + $0xca] sm:$0xff]  ;;  %7034 = vst.msk [vmem:[#allocation3 + $0x2a8] sm:$0xff] %vm375_vm0, %v7320_v24 }
 0x632   : > { %7141 = vrot.lane.b32.xlu0 %v14491_v15, %s10827_s25  ;;  %7289 = vst.msk [vmem:[#allocation3 + $0x288] sm:$0xff] %vm375_vm0, %v14493_v50  ;;  %v7766_v57 = vld [vmem:[#allocation2 + $0xc8] sm:$0xff]  ;;  %v6632_v37 = vpop.f32.mrb[134].mxu1  ;;  %7290 = vst.msk [vmem:[#allocation3 + $0x2b0] sm:$0xff] %vm375_vm0, %v14502_v17 }
 0x633   : > { %v7512_v21 = vld [vmem:[#allocation2 + $0xc9] sm:$0xff]  ;;  %7798 = vst.msk [vmem:[#allocation3 + $0x220] sm:$0xff] %vm375_vm0, %v7766_v57  ;;  %v6939_v27 = vmax.f32 %v6853_v34, 0.0  ;;  %v10531_v54 = vadd.f32 %v14261_v20, %v6632_v37  ;;  %v6634_v41 = vpop.f32.mrb[135].mxu1  ;;  %v14523_v39 = vld [vmem:[#allocation2 + $0xc1] sm:$0xff] }
 0x634   : > { %7544 = vst.msk [vmem:[#allocation3 + $0x268] sm:$0xff] %vm375_vm0, %v7512_v21  ;;  %v8021_v5 = vld [vmem:[#allocation2 + $0xc2] sm:$0xff]  ;;  %v8022_v11 = vld [vmem:[#allocation2 + $0xca] sm:$0xff] }
 0x635   : > { %8053 = vst.msk [vmem:[#allocation3 + $0x200] sm:$0xff] %vm375_vm0, %v8021_v5  ;;  %8054 = vst.msk [vmem:[#allocation3 + $0x228] sm:$0xff] %vm375_vm0, %v8022_v11  ;;  %v7321_v35 = vld [vmem:[#allocation2 + $0xd8] sm:$0xff]  ;;  %v6858_v12 = vadd.f32 %v10531_v54, %v14200_v26  ;;  %7143 = vrot.lane.b32.xlu1 %v14512_v1, %s10827_s25 }
 0x636   : > { %v7767_v23 = vld [vmem:[#allocation2 + $0xd8] sm:$0xff]  ;;  %6971 = vst.msk [vmem:[#allocation2 + $0xf1] sm:$0xff] %vm375_vm0, %v6939_v27  ;;  %7401 = vrot.lane.b32.xlu0 %v7321_v35, %s10827_s25  ;;  %7035 = vst.msk [vmem:[#allocation3 + $0x2d0] sm:$0xff] %vm375_vm0, %v7321_v35  ;;  %v6637_v49 = vpop.f32.mrb[136].mxu1  ;;  %v14543_v27 = vld [vmem:[#allocation2 + $0xc9] sm:$0xff] }
 0x637   : > { %7799 = vst.msk [vmem:[#allocation3 + $0x248] sm:$0xff] %vm375_vm0, %v7767_v23  ;;  %v7513_v18 = vld [vmem:[#allocation2 + $0xd9] sm:$0xff]  ;;  %v6940_v62 = vmax.f32 %v6858_v12, 0.0  ;;  %v10532_v47 = vadd.f32 %v14261_v20, %v6637_v49  ;;  %v6639_v51 = vpop.f32.mrb[137].mxu1 }
 0x638   : > { %7545 = vst.msk [vmem:[#allocation3 + $0x290] sm:$0xff] %vm375_vm0, %v7513_v18  ;;  %v7322_v43 = vld [vmem:[#allocation2 + $0xe0] sm:$0xff] }
 0x639   : > { %v14525_v26 = vld [vmem:[#allocation2 + $0xda] sm:$0xff]  ;;  %6972 = vst.msk [vmem:[#allocation2 + $0xf9] sm:$0xff] %vm375_vm0, %v6940_v62  ;;  %v6863_v0 = vadd.f32 %v10532_v47, %v14210_v58  ;;  %7403 = vrot.lane.b32.xlu1 %v7322_v43, %s10827_s25  ;;  %v14534_v46 = vld [vmem:[#allocation2 + $0xe2] sm:$0xff]  ;;  %7036 = vst.msk [vmem:[#allocation3 + $0x2f8] sm:$0xff] %vm375_vm0, %v7322_v43 }
 0x63a   : > { %7145 = vrot.lane.b32.xlu0 %v14523_v39, %s10827_s25  ;;  %7291 = vst.msk [vmem:[#allocation3 + $0x2d8] sm:$0xff] %vm375_vm0, %v14525_v26  ;;  %v7768_v24 = vld [vmem:[#allocation2 + $0xe0] sm:$0xff]  ;;  %v6642_v57 = vpop.f32.mrb[138].mxu1  ;;  %7292 = vst.msk [vmem:[#allocation3 + $0x300] sm:$0xff] %vm375_vm0, %v14534_v46 }
 0x63b   : > { %v7514_v34 = vld [vmem:[#allocation2 + $0xe1] sm:$0xff]  ;;  %7800 = vst.msk [vmem:[#allocation3 + $0x270] sm:$0xff] %vm375_vm0, %v7768_v24  ;;  %v6941_v21 = vmax.f32 %v6863_v0, 0.0  ;;  %v10533_v37 = vadd.f32 %v14261_v20, %v6642_v57  ;;  %v6644_v5 = vpop.f32.mrb[139].mxu1  ;;  %v14555_v51 = vld [vmem:[#allocation2 + $0xd9] sm:$0xff] }
 0x63c   : > { %7546 = vst.msk [vmem:[#allocation3 + $0x2b8] sm:$0xff] %vm375_vm0, %v7514_v34  ;;  %v8023_v58 = vld [vmem:[#allocation2 + $0xda] sm:$0xff]  ;;  %v8024_v11 = vld [vmem:[#allocation2 + $0xe2] sm:$0xff] }
 0x63d   : > { %8055 = vst.msk [vmem:[#allocation3 + $0x250] sm:$0xff] %vm375_vm0, %v8023_v58  ;;  %v7323_v54 = vld [vmem:[#allocation2 + $0xf0] sm:$0xff]  ;;  %8056 = vst.msk [vmem:[#allocation3 + $0x278] sm:$0xff] %vm375_vm0, %v8024_v11  ;;  %v6868_v35 = vadd.f32 %v10533_v37, %v14207_v59  ;;  %7147 = vrot.lane.b32.xlu1 %v14543_v27, %s10827_s25  ;;  %v14576_v11 = vld [vmem:[#allocation2 + $0xe1] sm:$0xff] }
 0x63e   : > { %v7769_v41 = vld [vmem:[#allocation2 + $0xf0] sm:$0xff]  ;;  %6973 = vst.msk [vmem:[#allocation2 + $0x109] sm:$0xff] %vm375_vm0, %v6941_v21  ;;  %7405 = vrot.lane.b32.xlu0 %v7323_v54, %s10827_s25  ;;  %7037 = vst.msk [vmem:[#allocation3 + $0x320] sm:$0xff] %vm375_vm0, %v7323_v54  ;;  %v6647_v12 = vpop.f32.mrb[140].mxu1 }
 0x63f   : > { %7801 = vst.msk [vmem:[#allocation3 + $0x298] sm:$0xff] %vm375_vm0, %v7769_v41  ;;  %v7515_v23 = vld [vmem:[#allocation2 + $0xf1] sm:$0xff]  ;;  %v6942_v18 = vmax.f32 %v6868_v35, 0.0  ;;  %v10534_v49 = vadd.f32 %v14261_v20, %v6647_v12  ;;  %v6649_v62 = vpop.f32.mrb[141].mxu1 }
 0x640   : > { %7547 = vst.msk [vmem:[#allocation3 + $0x2e0] sm:$0xff] %vm375_vm0, %v7515_v23  ;;  %v7324_v47 = vld [vmem:[#allocation2 + $0xf8] sm:$0xff] }
 0x641   : > { %v14557_v59 = vld [vmem:[#allocation2 + $0xf2] sm:$0xff]  ;;  %6974 = vst.msk [vmem:[#allocation2 + $0x111] sm:$0xff] %vm375_vm0, %v6942_v18  ;;  %v6873_v43 = vadd.f32 %v10534_v49, %v14218_v3  ;;  %7407 = vrot.lane.b32.xlu1 %v7324_v47, %s10827_s25  ;;  %v14566_v0 = vld [vmem:[#allocation2 + $0xfa] sm:$0xff]  ;;  %7038 = vst.msk [vmem:[#allocation3 + $0x348] sm:$0xff] %vm375_vm0, %v7324_v47 }
 0x642   : > { %7149 = vrot.lane.b32.xlu0 %v14555_v51, %s10827_s25  ;;  %7293 = vst.msk [vmem:[#allocation3 + $0x328] sm:$0xff] %vm375_vm0, %v14557_v59  ;;  %v7770_v24 = vld [vmem:[#allocation2 + $0xf8] sm:$0xff]  ;;  %v6652_v57 = vpop.f32.mrb[142].mxu1  ;;  %7294 = vst.msk [vmem:[#allocation3 + $0x350] sm:$0xff] %vm375_vm0, %v14566_v0 }
 0x643   : > { %v7516_v34 = vld [vmem:[#allocation2 + $0xf9] sm:$0xff]  ;;  %7802 = vst.msk [vmem:[#allocation3 + $0x2c0] sm:$0xff] %vm375_vm0, %v7770_v24  ;;  %v6943_v21 = vmax.f32 %v6873_v43, 0.0  ;;  %v10535_v37 = vadd.f32 %v14261_v20, %v6652_v57  ;;  %v6654_v5 = vpop.f32.mrb[143].mxu1  ;;  %v14587_v43 = vld [vmem:[#allocation2 + $0xf1] sm:$0xff] }
 0x644   : > { %7548 = vst.msk [vmem:[#allocation3 + $0x308] sm:$0xff] %vm375_vm0, %v7516_v34  ;;  %v8025_v3 = vld [vmem:[#allocation2 + $0xf2] sm:$0xff]  ;;  %v8026_v58 = vld [vmem:[#allocation2 + $0xfa] sm:$0xff] }
 0x645   : > { %8057 = vst.msk [vmem:[#allocation3 + $0x2a0] sm:$0xff] %vm375_vm0, %v8025_v3  ;;  %8058 = vst.msk [vmem:[#allocation3 + $0x2c8] sm:$0xff] %vm375_vm0, %v8026_v58  ;;  %v7325_v54 = vld [vmem:[#allocation2 + $0x108] sm:$0xff]  ;;  %v6878_v35 = vadd.f32 %v10535_v37, %v14216_v25  ;;  %7151 = vrot.lane.b32.xlu1 %v14576_v11, %s10827_s25 }
 0x646   : > { %v7771_v41 = vld [vmem:[#allocation2 + $0x108] sm:$0xff]  ;;  %6975 = vst.msk [vmem:[#allocation2 + $0x121] sm:$0xff] %vm375_vm0, %v6943_v21  ;;  %7409 = vrot.lane.b32.xlu0 %v7325_v54, %s10827_s25  ;;  %7039 = vst.msk [vmem:[#allocation3 + $0x370] sm:$0xff] %vm375_vm0, %v7325_v54  ;;  %v6657_v12 = vpop.f32.mrb[144].mxu1 }
 0x647   : > { %7803 = vst.msk [vmem:[#allocation3 + $0x2e8] sm:$0xff] %vm375_vm0, %v7771_v41  ;;  %v7517_v23 = vld [vmem:[#allocation2 + $0x109] sm:$0xff]  ;;  %v6944_v18 = vmax.f32 %v6878_v35, 0.0  ;;  %v10536_v49 = vadd.f32 %v14261_v20, %v6657_v12  ;;  %v6659_v62 = vpop.f32.mrb[145].mxu1  ;;  %v14607_v41 = vld [vmem:[#allocation2 + $0xf9] sm:$0xff] }
 0x648   : > { %7549 = vst.msk [vmem:[#allocation3 + $0x330] sm:$0xff] %vm375_vm0, %v7517_v23  ;;  %v7326_v47 = vld [vmem:[#allocation2 + $0x110] sm:$0xff] }
 0x649   : > { %v14589_v25 = vld [vmem:[#allocation2 + $0x10a] sm:$0xff]  ;;  %6976 = vst.msk [vmem:[#allocation2 + $0x129] sm:$0xff] %vm375_vm0, %v6944_v18  ;;  %v6883_v24 = vadd.f32 %v10536_v49, %v14226_v32  ;;  %7411 = vrot.lane.b32.xlu1 %v7326_v47, %s10827_s25  ;;  %v14598_v34 = vld [vmem:[#allocation2 + $0x112] sm:$0xff]  ;;  %7040 = vst.msk [vmem:[#allocation3 + $0x398] sm:$0xff] %vm375_vm0, %v7326_v47 }
 0x64a   : > { %7153 = vrot.lane.b32.xlu0 %v14587_v43, %s10827_s25  ;;  %7295 = vst.msk [vmem:[#allocation3 + $0x378] sm:$0xff] %vm375_vm0, %v14589_v25  ;;  %v7772_v57 = vld [vmem:[#allocation2 + $0x110] sm:$0xff]  ;;  %v6662_v58 = vpop.f32.mrb[146].mxu1  ;;  %7296 = vst.msk [vmem:[#allocation3 + $0x3a0] sm:$0xff] %vm375_vm0, %v14598_v34 }
 0x64b   : > { %v7518_v3 = vld [vmem:[#allocation2 + $0x111] sm:$0xff]  ;;  %7804 = vst.msk [vmem:[#allocation3 + $0x310] sm:$0xff] %vm375_vm0, %v7772_v57  ;;  %v6945_v21 = vmax.f32 %v6883_v24, 0.0  ;;  %v10537_v37 = vadd.f32 %v14261_v20, %v6662_v58  ;;  %v6664_v5 = vpop.f32.mrb[147].mxu1 }
 0x64c   : > { %7550 = vst.msk [vmem:[#allocation3 + $0x358] sm:$0xff] %vm375_vm0, %v7518_v3  ;;  %v8027_v32 = vld [vmem:[#allocation2 + $0x10a] sm:$0xff]  ;;  %v8028_v54 = vld [vmem:[#allocation2 + $0x112] sm:$0xff] }
 0x64d   : > { %8059 = vst.msk [vmem:[#allocation3 + $0x2f0] sm:$0xff] %vm375_vm0, %v8027_v32  ;;  %v7327_v35 = vld [vmem:[#allocation2 + $0x120] sm:$0xff]  ;;  %8060 = vst.msk [vmem:[#allocation3 + $0x318] sm:$0xff] %vm375_vm0, %v8028_v54  ;;  %v6888_v12 = vadd.f32 %v10537_v37, %v14223_v44  ;;  %7155 = vrot.lane.b32.xlu1 %v14607_v41, %s10827_s25  ;;  %v14619_v3 = vld [vmem:[#allocation2 + $0x109] sm:$0xff] }
 0x64e   : > { %v7773_v23 = vld [vmem:[#allocation2 + $0x120] sm:$0xff]  ;;  %6977 = vst.msk [vmem:[#allocation2 + $0x139] sm:$0xff] %vm375_vm0, %v6945_v21  ;;  %7413 = vrot.lane.b32.xlu0 %v7327_v35, %s10827_s25  ;;  %7041 = vst.msk [vmem:[#allocation3 + $0x3c0] sm:$0xff] %vm375_vm0, %v7327_v35  ;;  %v6667_v49 = vpop.f32.mrb[148].mxu1 }
 0x64f   : > { %7805 = vst.msk [vmem:[#allocation3 + $0x338] sm:$0xff] %vm375_vm0, %v7773_v23  ;;  %v7519_v18 = vld [vmem:[#allocation2 + $0x121] sm:$0xff]  ;;  %v6946_v62 = vmax.f32 %v6888_v12, 0.0  ;;  %v10538_v47 = vadd.f32 %v14261_v20, %v6667_v49  ;;  %v6669_v24 = vpop.f32.mrb[149].mxu1 }
 0x650   : > { %7551 = vst.msk [vmem:[#allocation3 + $0x380] sm:$0xff] %vm375_vm0, %v7519_v18  ;;  %v7328_v57 = vld [vmem:[#allocation2 + $0x128] sm:$0xff]  ;;  %v14640_v18 = vld [vmem:[#allocation2 + $0x111] sm:$0xff] }
 0x651   : > { %v14621_v44 = vld [vmem:[#allocation2 + $0x122] sm:$0xff]  ;;  %6978 = vst.msk [vmem:[#allocation2 + $0x141] sm:$0xff] %vm375_vm0, %v6946_v62  ;;  %v6893_v58 = vadd.f32 %v10538_v47, %v14234_v10  ;;  %7415 = vrot.lane.b32.xlu1 %v7328_v57, %s10827_s25  ;;  %v14630_v32 = vld [vmem:[#allocation2 + $0x12a] sm:$0xff]  ;;  %7042 = vst.msk [vmem:[#allocation3 + $0x3e8] sm:$0xff] %vm375_vm0, %v7328_v57 }
 0x652   : > { %7157 = vrot.lane.b32.xlu0 %v14619_v3, %s10827_s25  ;;  %7297 = vst.msk [vmem:[#allocation3 + $0x3c8] sm:$0xff] %vm375_vm0, %v14621_v44  ;;  %v7774_v21 = vld [vmem:[#allocation2 + $0x128] sm:$0xff]  ;;  %v6672_v5 = vpop.f32.mrb[150].mxu1  ;;  %7298 = vst.msk [vmem:[#allocation3 + $0x3f0] sm:$0xff] %vm375_vm0, %v14630_v32 }
 0x653   : > { %v7520_v37 = vld [vmem:[#allocation2 + $0x129] sm:$0xff]  ;;  %7806 = vst.msk [vmem:[#allocation3 + $0x360] sm:$0xff] %vm375_vm0, %v7774_v21  ;;  %v6947_v35 = vmax.f32 %v6893_v58, 0.0  ;;  %v10539_v23 = vadd.f32 %v14261_v20, %v6672_v5  ;;  %v6674_v12 = vpop.f32.mrb[151].mxu1 }
 0x654   : > { %7552 = vst.msk [vmem:[#allocation3 + $0x3a8] sm:$0xff] %vm375_vm0, %v7520_v37  ;;  %v8029_v10 = vld [vmem:[#allocation2 + $0x122] sm:$0xff]  ;;  %v8030_v54 = vld [vmem:[#allocation2 + $0x12a] sm:$0xff] }
 0x655   : > { %8061 = vst.msk [vmem:[#allocation3 + $0x340] sm:$0xff] %vm375_vm0, %v8029_v10  ;;  %8062 = vst.msk [vmem:[#allocation3 + $0x368] sm:$0xff] %vm375_vm0, %v8030_v54  ;;  %v7329_v49 = vld [vmem:[#allocation2 + $0x138] sm:$0xff]  ;;  %v6898_v47 = vadd.f32 %v10539_v23, %v14232_v45  ;;  %7159 = vrot.lane.b32.xlu1 %v14640_v18, %s10827_s25  ;;  %v14651_v10 = vld [vmem:[#allocation2 + $0x121] sm:$0xff] }
 0x656   : > { %v7775_v62 = vld [vmem:[#allocation2 + $0x138] sm:$0xff]  ;;  %6979 = vst.msk [vmem:[#allocation2 + $0x151] sm:$0xff] %vm375_vm0, %v6947_v35  ;;  %7417 = vrot.lane.b32.xlu0 %v7329_v49, %s10827_s25  ;;  %7043 = vst.msk [vmem:[#allocation3 + $0x410] sm:$0xff] %vm375_vm0, %v7329_v49  ;;  %v6677_v57 = vpop.f32.mrb[152].mxu1 }
 0x657   : > { %7807 = vst.msk [vmem:[#allocation3 + $0x388] sm:$0xff] %vm375_vm0, %v7775_v62  ;;  %v7521_v24 = vld [vmem:[#allocation2 + $0x139] sm:$0xff]  ;;  %v6948_v58 = vmax.f32 %v6898_v47, 0.0  ;;  %v10540_v21 = vadd.f32 %v14261_v20, %v6677_v57  ;;  %v6679_v37 = vpop.f32.mrb[153].mxu1 }
 0x658   : > { %7553 = vst.msk [vmem:[#allocation3 + $0x3d0] sm:$0xff] %vm375_vm0, %v7521_v24  ;;  %v7330_v5 = vld [vmem:[#allocation2 + $0x140] sm:$0xff] }
 0x659   : > { %v14653_v45 = vld [vmem:[#allocation2 + $0x13a] sm:$0xff]  ;;  %6980 = vst.msk [vmem:[#allocation2 + $0x159] sm:$0xff] %vm375_vm0, %v6948_v58  ;;  %v6903_v54 = vadd.f32 %v10540_v21, %v14242_v31  ;;  %7419 = vrot.lane.b32.xlu1 %v7330_v5, %s10827_s25  ;;  %v14662_v35 = vld [vmem:[#allocation2 + $0x142] sm:$0xff]  ;;  %7044 = vst.msk [vmem:[#allocation3 + $0x438] sm:$0xff] %vm375_vm0, %v7330_v5 }
 0x65a   : > { %7161 = vrot.lane.b32.xlu0 %v14651_v10, %s10827_s25  ;;  %7299 = vst.msk [vmem:[#allocation3 + $0x418] sm:$0xff] %vm375_vm0, %v14653_v45  ;;  %v7776_v23 = vld [vmem:[#allocation2 + $0x140] sm:$0xff]  ;;  %v6682_v49 = vpop.f32.mrb[154].mxu1  ;;  %7300 = vst.msk [vmem:[#allocation3 + $0x440] sm:$0xff] %vm375_vm0, %v14662_v35  ;;  %v14671_v58 = vld [vmem:[#allocation2 + $0x129] sm:$0xff] }
 0x65b   : > { %v7522_v12 = vld [vmem:[#allocation2 + $0x141] sm:$0xff]  ;;  %7808 = vst.msk [vmem:[#allocation3 + $0x3b0] sm:$0xff] %vm375_vm0, %v7776_v23  ;;  %v6949_v62 = vmax.f32 %v6903_v54, 0.0  ;;  %v10541_v47 = vadd.f32 %v14261_v20, %v6682_v49  ;;  %v6684_v24 = vpop.f32.mrb[155].mxu1 }
 0x65c   : > { %7554 = vst.msk [vmem:[#allocation3 + $0x3f8] sm:$0xff] %vm375_vm0, %v7522_v12  ;;  %v8031_v31 = vld [vmem:[#allocation2 + $0x13a] sm:$0xff]  ;;  %v8032_v57 = vld [vmem:[#allocation2 + $0x142] sm:$0xff] }
 0x65d   : > { %8063 = vst.msk [vmem:[#allocation3 + $0x390] sm:$0xff] %vm375_vm0, %v8031_v31  ;;  %v7331_v21 = vld [vmem:[#allocation2 + $0x150] sm:$0xff]  ;;  %8064 = vst.msk [vmem:[#allocation3 + $0x3b8] sm:$0xff] %vm375_vm0, %v8032_v57  ;;  %v6908_v5 = vadd.f32 %v10541_v47, %v14239_v8  ;;  %7163 = vrot.lane.b32.xlu1 %v14671_v58, %s10827_s25  ;;  %v10781_v12 = vld [vmem:[%s15113_s6] ss:$0 sm:$0xff] }
 0x65e   : > { %v7777_v37 = vld [vmem:[#allocation2 + $0x150] sm:$0xff]  ;;  %6981 = vst.msk [vmem:[#allocation2 + $0x169] sm:$0xff] %vm375_vm0, %v6949_v62  ;;  %7421 = vrot.lane.b32.xlu0 %v7331_v21, %s10827_s25  ;;  %7045 = vst.msk [vmem:[#allocation3 + $0x460] sm:$0xff] %vm375_vm0, %v7331_v21  ;;  %v6687_v54 = vpop.f32.mrb[156].mxu1  ;;  %v14685_v62 = vld [vmem:[#allocation2 + $0x139] sm:$0xff] }
 0x65f   : > { %7809 = vst.msk [vmem:[#allocation3 + $0x3d8] sm:$0xff] %vm375_vm0, %v7777_v37  ;;  %v7523_v20 = vld [vmem:[#allocation2 + $0x151] sm:$0xff]  ;;  %v6950_v23 = vmax.f32 %v6908_v5, 0.0  ;;  %v10542_v49 = vadd.f32 %v10781_v12, %v6687_v54  ;;  %v6689_v8 = vpop.f32.mrb[157].mxu1 }
 0x660   : > { %7555 = vst.msk [vmem:[#allocation3 + $0x420] sm:$0xff] %vm375_vm0, %v7523_v20  ;;  %v7332_v31 = vld [vmem:[#allocation2 + $0x158] sm:$0xff]  ;;  %v14705_v8 = vld [vmem:[#allocation2 + $0x141] sm:$0xff] }
 0x661   : > { %v14687_v47 = vld [vmem:[#allocation2 + $0x152] sm:$0xff]  ;;  %6982 = vst.msk [vmem:[#allocation2 + $0x171] sm:$0xff] %vm375_vm0, %v6950_v23  ;;  %v6913_v24 = vadd.f32 %v10542_v49, %v14256_v2  ;;  %7423 = vrot.lane.b32.xlu1 %v7332_v31, %s10827_s25  ;;  %v14696_v57 = vld [vmem:[#allocation2 + $0x15a] sm:$0xff]  ;;  %7046 = vst.msk [vmem:[#allocation3 + $0x488] sm:$0xff] %vm375_vm0, %v7332_v31 }
 0x662   : > { %15150 = vst [vmem:[#allocation7_spill] sm:$0xff] %v14687_v47  ;;  %7165 = vrot.lane.b32.xlu0 %v14685_v62, %s10827_s25  ;;  %7301 = vst.msk [vmem:[#allocation3 + $0x468] sm:$0xff] %vm375_vm0, %v14687_v47  ;;  %v7778_v21 = vld [vmem:[#allocation2 + $0x158] sm:$0xff]  ;;  %v6692_v5 = vpop.f32.mrb[158].mxu1 }
 0x663   : > { %15151 = vst [vmem:[#allocation8_spill] sm:$0xff] %v14696_v57  ;;  %v7524_v37 = vld [vmem:[#allocation2 + $0x159] sm:$0xff]  ;;  %7302 = vst.msk [vmem:[#allocation3 + $0x490] sm:$0xff] %vm375_vm0, %v14696_v57  ;;  %v6951_v54 = vmax.f32 %v6913_v24, 0.0  ;;  %v10543_v23 = vadd.f32 %v10781_v12, %v6692_v5  ;;  %v6694_v49 = vpop.f32.mrb[159].mxu1  ;;  %v14716_v5 = vld [vmem:[#allocation2 + $0x151] sm:$0xff] }
 0x664   : > { %7810 = vst.msk [vmem:[#allocation3 + $0x400] sm:$0xff] %vm375_vm0, %v7778_v21  ;;  %7556 = vst.msk [vmem:[#allocation3 + $0x448] sm:$0xff] %vm375_vm0, %v7524_v37  ;;  %v8033_v2 = vld [vmem:[#allocation2 + $0x152] sm:$0xff]  ;;  %v8034_v20 = vld [vmem:[#allocation2 + $0x15a] sm:$0xff] }
 0x665   : > { %8065 = vst.msk [vmem:[#allocation3 + $0x3e0] sm:$0xff] %vm375_vm0, %v8033_v2  ;;  %8066 = vst.msk [vmem:[#allocation3 + $0x408] sm:$0xff] %vm375_vm0, %v8034_v20  ;;  %v7333_v31 = vld [vmem:[#allocation2 + $0x168] sm:$0xff]  ;;  %v6918_v57 = vadd.f32 %v10543_v23, %v14254_v29  ;;  %7167 = vrot.lane.b32.xlu1 %v14705_v8, %s10827_s25  ;;  %v14733_v49 = vld [vmem:[#allocation2 + $0x159] sm:$0xff] }
 0x666   : > { %v7779_v47 = vld [vmem:[#allocation2 + $0x168] sm:$0xff]  ;;  %6983 = vst.msk [vmem:[#allocation2 + $0x181] sm:$0xff] %vm375_vm0, %v6951_v54  ;;  %7425 = vrot.lane.b32.xlu0 %v7333_v31, %s10827_s25  ;;  %7047 = vst.msk [vmem:[#allocation3 + $0x4b0] sm:$0xff] %vm375_vm0, %v7333_v31 }
 0x667   : > { %7811 = vst.msk [vmem:[#allocation3 + $0x428] sm:$0xff] %vm375_vm0, %v7779_v47  ;;  %v7525_v12 = vld [vmem:[#allocation2 + $0x169] sm:$0xff]  ;;  %v6952_v24 = vmax.f32 %v6918_v57, 0.0  ;;  %v7370_v21 = vpop.permute.xlu0 %7369 }
 0x668   : > { %7557 = vst.msk [vmem:[#allocation3 + $0x470] sm:$0xff] %vm375_vm0, %v7525_v12  ;;  %v7334_v37 = vld [vmem:[#allocation2 + $0x170] sm:$0xff] }
 0x669   : > { %7465 = vst.msk [vmem:[#allocation3 + $0x8] sm:$0xff] %vm721_vm3, %v7370_v21  ;;  %v14718_v29 = vld [vmem:[#allocation2 + $0x16a] sm:$0xff]  ;;  %7427 = vrot.lane.b32.xlu1 %v7334_v37, %s10827_s25  ;;  %v14726_v47 = vld [vmem:[#allocation2 + $0x172] sm:$0xff] }
 0x66a   : > { %15152 = vst [vmem:[#allocation9_spill] sm:$0xff] %v14718_v29  ;;  %6984 = vst.msk [vmem:[#allocation2 + $0x189] sm:$0xff] %vm375_vm0, %v6952_v24  ;;  %7169 = vrot.lane.b32.xlu0 %v14716_v5, %s10827_s25  ;;  %v7780_v57 = vld [vmem:[#allocation2 + $0x170] sm:$0xff] }
 0x66b   : > { %7303 = vst.msk [vmem:[#allocation3 + $0x4b8] sm:$0xff] %vm375_vm0, %v14718_v29  ;;  %15153 = vst [vmem:[#allocation10_spill] sm:$0xff] %v14726_v47  ;;  %v7526_v2 = vld [vmem:[#allocation2 + $0x171] sm:$0xff]  ;;  %v7372_v54 = vpop.permute.xlu1 %7371  ;;  %v7114_v23 = vpop.permute.xlu0 %7113 }
 0x66c   : > { %7048 = vst.msk [vmem:[#allocation3 + $0x4d8] sm:$0xff] %vm375_vm0, %v7334_v37  ;;  %7304 = vst.msk [vmem:[#allocation3 + $0x4e0] sm:$0xff] %vm375_vm0, %v14726_v47  ;;  %v8035_v20 = vld [vmem:[#allocation2 + $0x16a] sm:$0xff]  ;;  %v8036_v31 = vld [vmem:[#allocation2 + $0x172] sm:$0xff] }
 0x66d   : > { %7812 = vst.msk [vmem:[#allocation3 + $0x450] sm:$0xff] %vm375_vm0, %v7780_v57  ;;  %7558 = vst.msk [vmem:[#allocation3 + $0x498] sm:$0xff] %vm375_vm0, %v7526_v2  ;;  %v7335_v12 = vld [vmem:[#allocation2 + $0x180] sm:$0xff]  ;;  %7171 = vrot.lane.b32.xlu1 %v14733_v49, %s10827_s25  ;;  %v14769_v47 = vld [vmem:[#allocation2 + $0x171] sm:$0xff] }
 0x66e   : > { %8067 = vst.msk [vmem:[#allocation3 + $0x430] sm:$0xff] %vm375_vm0, %v8035_v20  ;;  %v14738_v24 = vld [vmem:[#allocation2 + $0x181] sm:$0xff]  ;;  %8068 = vst.msk [vmem:[#allocation3 + $0x458] sm:$0xff] %vm375_vm0, %v8036_v31  ;;  %7429 = vrot.lane.b32.xlu0 %v7335_v12, %s10827_s25  ;;  %v14749_v20 = vld [vmem:[#allocation2 + $0x169] sm:$0xff] }
 0x66f   : > { %7466 = vst.msk [vmem:[#allocation3 + $0x30] sm:$0xff] %vm721_vm3, %v7372_v54  ;;  %7209 = vst.msk [vmem:[#allocation3] sm:$0xff] %vm721_vm3, %v7114_v23  ;;  %v7781_v21 = vld [vmem:[#allocation2 + $0x180] sm:$0xff]  ;;  %v7116_v37 = vpop.permute.xlu1 %7115  ;;  %v7374_v57 = vpop.permute.xlu0 %7373 }
 0x670   : > { %7813 = vst.msk [vmem:[#allocation3 + $0x478] sm:$0xff] %vm375_vm0, %v7781_v21  ;;  %7559 = vst.msk [vmem:[#allocation3 + $0x4c0] sm:$0xff] %vm375_vm0, %v14738_v24 }
 0x671   : > { %7210 = vst.msk [vmem:[#allocation3 + $0x28] sm:$0xff] %vm721_vm3, %v7116_v37  ;;  %7467 = vst.msk [vmem:[#allocation3 + $0x58] sm:$0xff] %vm721_vm3, %v7374_v57  ;;  %v7336_v2 = vld [vmem:[#allocation2 + $0x188] sm:$0xff]  ;;  %v8077_v57 = vld [vmem:[#allocation3 + $0x8] sm:$0xff] }
 0x672   : > { %v14751_v54 = vld [vmem:[#allocation2 + $0x189] sm:$0xff]  ;;  %7431 = vrot.lane.b32.xlu1 %v7336_v2, %s10827_s25  ;;  %7173 = vrot.lane.b32.xlu0 %v14749_v20, %s10827_s25 }
 0x673   : > { %15154 = vst [vmem:[#allocation11_spill] sm:$0xff] %v14751_v54  ;;  %v14756_v23 = vld [vmem:[#allocation2 + $0x182] sm:$0xff]  ;;  %v14758_v31 = vld [vmem:[#allocation2 + $0x18a] sm:$0xff]  ;;  %7560 = vst.msk [vmem:[#allocation3 + $0x4e8] sm:$0xff] %vm375_vm0, %v14751_v54  ;;  %v7376_v21 = vpop.permute.xlu1 %7375  ;;  %v7118_v37 = vpop.permute.xlu0 %7117 }
 0x674   : > { %15155 = vst [vmem:[#allocation12_spill] sm:$0xff] %v14756_v23  ;;  %15156 = vst [vmem:[#allocation13_spill] sm:$0xff] %v14758_v31  ;;  %v7782_v12 = vld [vmem:[#allocation2 + $0x188] sm:$0xff] }
 0x675   : > { %7814 = vst.msk [vmem:[#allocation3 + $0x4a0] sm:$0xff] %vm375_vm0, %v7782_v12  ;;  %8069 = vst.msk [vmem:[#allocation3 + $0x480] sm:$0xff] %vm375_vm0, %v14756_v23 }
 0x676   : > { %8070 = vst.msk [vmem:[#allocation3 + $0x4a8] sm:$0xff] %vm375_vm0, %v14758_v31  ;;  %v8082_v2 = vld [vmem:[#allocation3 + $0x30] sm:$0xff]  ;;  %7175 = vrot.lane.b32.xlu1 %v14769_v47, %s10827_s25  ;;  %7881 = vrot.lane.b32.xlu0 %v14331_v52, %s10827_s25  ;;  %v8076_v12 = vld [vmem:[#allocation3] sm:$0xff] }
 0x677   : > { %7468 = vst.msk [vmem:[#allocation3 + $0x80] sm:$0xff] %vm721_vm3, %v7376_v21  ;;  %7211 = vst.msk [vmem:[#allocation3 + $0x50] sm:$0xff] %vm721_vm3, %v7118_v37  ;;  %v10016_v29 = vpack.c.bf16 %v8082_v2, %v8077_v57  ;;  %v7120_v31 = vpop.permute.xlu1 %7119  ;;  %v7378_v23 = vpop.permute.xlu0 %7377  ;;  %v14780_v37 = vld [vmem:[%s15114_s7] sm:$0x77] }
 0x678   : > { %v8081_v54 = vld [vmem:[#allocation3 + $0x28] sm:$0xff]  ;;  %7212 = vst.msk [vmem:[#allocation3 + $0x78] sm:$0xff] %vm721_vm3, %v7120_v31  ;;  %7469 = vst.msk [vmem:[#allocation3 + $0xa8] sm:$0xff] %vm721_vm3, %v7378_v23  ;;  %v8245_v52 = vcombine.high %v14780_v37, %v14780_v37  ;;  %v8087_v57 = vld [vmem:[#allocation3 + $0x58] sm:$0xff] }
 0x679   : > { %10017 = vmatprep.subr.bf16.mxu0 %v10016_v29  ;;  %v10018_v21 = vpack.c.bf16 %v8081_v54, %v8076_v12 }
 0x67a   : > { %7883 = vrot.lane.b32.xlu1 %v14351_v48, %s10827_s25  ;;  %7625 = vrot.lane.b32.xlu0 %v14282_v53, %s10827_s25 }
 0x67b   : > { %10019 = vmatpush1.bf16.xpose.msra.mxu0 %v10018_v21  ;;  %v7380_v29 = vpop.permute.xlu1 %7379  ;;  %v7122_v31 = vpop.permute.xlu0 %7121  ;;  %8411 = vmatprep.mubr.f32.mxu0 %v8245_v52 }
 0x67c   : > { %7470 = vst.msk [vmem:[#allocation3 + $0xd0] sm:$0xff] %vm721_vm3, %v7380_v29  ;;  %7213 = vst.msk [vmem:[#allocation3 + $0xa0] sm:$0xff] %vm721_vm3, %v7122_v31 }
 0x67e   : > { %v8092_v23 = vld [vmem:[#allocation3 + $0x80] sm:$0xff]  ;;  %7627 = vrot.lane.b32.xlu1 %v14290_v19, %s10827_s25  ;;  %7885 = vrot.lane.b32.xlu0 %v14363_v7, %s10827_s25  ;;  %v8086_v2 = vld [vmem:[#allocation3 + $0x50] sm:$0xff] }
 0x67f   : > { %v10020_v54 = vpack.c.bf16 %v8092_v23, %v8087_v57  ;;  %v7124_v53 = vpop.permute.xlu1 %7123  ;;  %v8091_v12 = vld [vmem:[#allocation3 + $0x78] sm:$0xff]  ;;  %v8097_v7 = vld [vmem:[#allocation3 + $0xa8] sm:$0xff] }
 0x680   : > { %v7382_v48 = vpop.permute.xlu0 %7381  ;;  %7214 = vst.msk [vmem:[#allocation3 + $0xc8] sm:$0xff] %vm721_vm3, %v7124_v53  ;;  %v10022_v21 = vpack.c.bf16 %v8091_v12, %v8086_v2 }
 0x681   : > { %10021 = vmatprep.subr.bf16.mxu0 %v10020_v54  ;;  %7471 = vst.msk [vmem:[#allocation3 + $0xf8] sm:$0xff] %vm721_vm3, %v7382_v48 }
 0x682   : > { %7887 = vrot.lane.b32.xlu1 %v14384_v6, %s10827_s25  ;;  %7629 = vrot.lane.b32.xlu0 %v14305_v30, %s10827_s25 }
 0x683   : > { %10023 = vmatpush1.bf16.xpose.msra.mxu0 %v10022_v21  ;;  %v7384_v19 = vpop.permute.xlu1 %7383  ;;  %v8102_v29 = vld [vmem:[#allocation3 + $0xd0] sm:$0xff]  ;;  %v8096_v30 = vld [vmem:[#allocation3 + $0xa0] sm:$0xff] }
 0x684   : > { %v7126_v52 = vpop.permute.xlu0 %7125  ;;  %7472 = vst.msk [vmem:[#allocation3 + $0x120] sm:$0xff] %vm721_vm3, %v7384_v19  ;;  %v10024_v31 = vpack.c.bf16 %v8102_v29, %v8097_v7 }
 0x685   : > { %7215 = vst.msk [vmem:[#allocation3 + $0xf0] sm:$0xff] %vm721_vm3, %v7126_v52 }
 0x686   : > { %7631 = vrot.lane.b32.xlu1 %v14313_v28, %s10827_s25  ;;  %7889 = vrot.lane.b32.xlu0 %v14395_v36, %s10827_s25 }
 0x687   : > { %10025 = vmatprep.subr.bf16.mxu0 %v10024_v31  ;;  %v7128_v6 = vpop.permute.xlu1 %7127  ;;  %v8101_v23 = vld [vmem:[#allocation3 + $0xc8] sm:$0xff] }
 0x688   : > { %v7386_v57 = vpop.permute.xlu0 %7385  ;;  %7216 = vst.msk [vmem:[#allocation3 + $0x118] sm:$0xff] %vm721_vm3, %v7128_v6  ;;  %v10026_v54 = vpack.c.bf16 %v8101_v23, %v8096_v30  ;;  %v8107_v36 = vld [vmem:[#allocation3 + $0xf8] sm:$0xff] }
 0x689   : > { %7473 = vst.msk [vmem:[#allocation3 + $0x148] sm:$0xff] %vm721_vm3, %v7386_v57 }
 0x68a   : > { %7891 = vrot.lane.b32.xlu1 %v14415_v22, %s10827_s25  ;;  %7633 = vrot.lane.b32.xlu0 %v14333_v33, %s10827_s25 }
 0x68b   : > { %10027 = vmatpush1.bf16.xpose.msra.mxu0 %v10026_v54  ;;  %v7388_v28 = vpop.permute.xlu1 %7387  ;;  %v8112_v48 = vld [vmem:[#allocation3 + $0x120] sm:$0xff] }
 0x68c   : > { %v7130_v53 = vpop.permute.xlu0 %7129  ;;  %7474 = vst.msk [vmem:[#allocation3 + $0x170] sm:$0xff] %vm721_vm3, %v7388_v28  ;;  %v10028_v2 = vpack.c.bf16 %v8112_v48, %v8107_v36  ;;  %v8106_v33 = vld [vmem:[#allocation3 + $0xf0] sm:$0xff] }
 0x68d   : > { %7217 = vst.msk [vmem:[#allocation3 + $0x140] sm:$0xff] %vm721_vm3, %v7130_v53 }
 0x68e   : > { %7635 = vrot.lane.b32.xlu1 %v14342_v4, %s10827_s25  ;;  %7893 = vrot.lane.b32.xlu0 %v14427_v60, %s10827_s25 }
 0x68f   : > { %10029 = vmatprep.subr.bf16.mxu0 %v10028_v2  ;;  %v7132_v22 = vpop.permute.xlu1 %7131  ;;  %v8111_v21 = vld [vmem:[#allocation3 + $0x118] sm:$0xff] }
 0x690   : > { %v7390_v12 = vpop.permute.xlu0 %7389  ;;  %7218 = vst.msk [vmem:[#allocation3 + $0x168] sm:$0xff] %vm721_vm3, %v7132_v22  ;;  %v10030_v19 = vpack.c.bf16 %v8111_v21, %v8106_v33  ;;  %v8117_v60 = vld [vmem:[#allocation3 + $0x148] sm:$0xff] }
 0x691   : > { %7475 = vst.msk [vmem:[#allocation3 + $0x198] sm:$0xff] %vm721_vm3, %v7390_v12 }
 0x692   : > { %7895 = vrot.lane.b32.xlu1 %v14448_v38, %s10827_s25  ;;  %7637 = vrot.lane.b32.xlu0 %v14365_v42, %s10827_s25 }
 0x693   : > { %10031 = vmatpush1.bf16.xpose.msra.mxu0 %v10030_v19  ;;  %v7392_v4 = vpop.permute.xlu1 %7391  ;;  %v8122_v7 = vld [vmem:[#allocation3 + $0x170] sm:$0xff] }
 0x694   : > { %v7134_v52 = vpop.permute.xlu0 %7133  ;;  %7476 = vst.msk [vmem:[#allocation3 + $0x1c0] sm:$0xff] %vm721_vm3, %v7392_v4  ;;  %v10032_v29 = vpack.c.bf16 %v8122_v7, %v8117_v60  ;;  %v8116_v42 = vld [vmem:[#allocation3 + $0x140] sm:$0xff] }
 0x695   : > { %7219 = vst.msk [vmem:[#allocation3 + $0x190] sm:$0xff] %vm721_vm3, %v7134_v52 }
 0x696   : > { %7639 = vrot.lane.b32.xlu1 %v14374_v16, %s10827_s25  ;;  %7897 = vrot.lane.b32.xlu0 %v14459_v61, %s10827_s25 }
 0x697   : > { %10033 = vmatprep.subr.bf16.mxu0 %v10032_v29  ;;  %v7136_v38 = vpop.permute.xlu1 %7135  ;;  %v8121_v6 = vld [vmem:[#allocation3 + $0x168] sm:$0xff] }
 0x698   : > { %v7394_v31 = vpop.permute.xlu0 %7393  ;;  %7220 = vst.msk [vmem:[#allocation3 + $0x1b8] sm:$0xff] %vm721_vm3, %v7136_v38  ;;  %v10034_v57 = vpack.c.bf16 %v8121_v6, %v8116_v42  ;;  %v8127_v61 = vld [vmem:[#allocation3 + $0x198] sm:$0xff] }
 0x699   : > { %7477 = vst.msk [vmem:[#allocation3 + $0x1e8] sm:$0xff] %vm721_vm3, %v7394_v31 }
 0x69a   : > { %7899 = vrot.lane.b32.xlu1 %v14479_v13, %s10827_s25  ;;  %7641 = vrot.lane.b32.xlu0 %v14397_v9, %s10827_s25 }
 0x69b   : > { %10035 = vmatpush1.bf16.xpose.msra.mxu0 %v10034_v57  ;;  %v7396_v16 = vpop.permute.xlu1 %7395  ;;  %v8132_v23 = vld [vmem:[#allocation3 + $0x1c0] sm:$0xff] }
 0x69c   : > { %v7138_v30 = vpop.permute.xlu0 %7137  ;;  %7478 = vst.msk [vmem:[#allocation3 + $0x210] sm:$0xff] %vm721_vm3, %v7396_v16  ;;  %v10036_v54 = vpack.c.bf16 %v8132_v23, %v8127_v61  ;;  %v8126_v9 = vld [vmem:[#allocation3 + $0x190] sm:$0xff] }
 0x69d   : > { %7221 = vst.msk [vmem:[#allocation3 + $0x1e0] sm:$0xff] %vm721_vm3, %v7138_v30 }
 0x69e   : > { %7643 = vrot.lane.b32.xlu1 %v14406_v56, %s10827_s25  ;;  %7901 = vrot.lane.b32.xlu0 %v14491_v15, %s10827_s25 }
 0x69f   : > { %10037 = vmatprep.subr.bf16.mxu0 %v10036_v54  ;;  %v7140_v13 = vpop.permute.xlu1 %7139  ;;  %v8131_v53 = vld [vmem:[#allocation3 + $0x1b8] sm:$0xff] }
 0x6a0   : > { %v7398_v28 = vpop.permute.xlu0 %7397  ;;  %7222 = vst.msk [vmem:[#allocation3 + $0x208] sm:$0xff] %vm721_vm3, %v7140_v13  ;;  %v10038_v36 = vpack.c.bf16 %v8131_v53, %v8126_v9  ;;  %v8137_v15 = vld [vmem:[#allocation3 + $0x1e8] sm:$0xff] }
 0x6a1   : > { %7479 = vst.msk [vmem:[#allocation3 + $0x238] sm:$0xff] %vm721_vm3, %v7398_v28 }
 0x6a2   : > { %7903 = vrot.lane.b32.xlu1 %v14512_v1, %s10827_s25  ;;  %7645 = vrot.lane.b32.xlu0 %v14429_v55, %s10827_s25 }
 0x6a3   : > { %10039 = vmatpush1.bf16.xpose.msra.mxu0 %v10038_v36  ;;  %v7400_v56 = vpop.permute.xlu1 %7399  ;;  %v8142_v2 = vld [vmem:[#allocation3 + $0x210] sm:$0xff] }
 0x6a4   : > { %v7142_v48 = vpop.permute.xlu0 %7141  ;;  %7480 = vst.msk [vmem:[#allocation3 + $0x260] sm:$0xff] %vm721_vm3, %v7400_v56  ;;  %v10040_v22 = vpack.c.bf16 %v8142_v2, %v8137_v15  ;;  %v8136_v55 = vld [vmem:[#allocation3 + $0x1e0] sm:$0xff] }
 0x6a5   : > { %7223 = vst.msk [vmem:[#allocation3 + $0x230] sm:$0xff] %vm721_vm3, %v7142_v48 }
 0x6a6   : > { %7647 = vrot.lane.b32.xlu1 %v14438_v63, %s10827_s25  ;;  %7905 = vrot.lane.b32.xlu0 %v14523_v39, %s10827_s25 }
 0x6a7   : > { %10041 = vmatprep.subr.bf16.mxu0 %v10040_v22  ;;  %v7144_v1 = vpop.permute.xlu1 %7143  ;;  %v8141_v33 = vld [vmem:[#allocation3 + $0x208] sm:$0xff] }
 0x6a8   : > { %v7402_v12 = vpop.permute.xlu0 %7401  ;;  %7224 = vst.msk [vmem:[#allocation3 + $0x258] sm:$0xff] %vm721_vm3, %v7144_v1  ;;  %v10042_v21 = vpack.c.bf16 %v8141_v33, %v8136_v55  ;;  %v8147_v39 = vld [vmem:[#allocation3 + $0x238] sm:$0xff] }
 0x6a9   : > { %7481 = vst.msk [vmem:[#allocation3 + $0x288] sm:$0xff] %vm721_vm3, %v7402_v12 }
 0x6aa   : > { %7907 = vrot.lane.b32.xlu1 %v14543_v27, %s10827_s25  ;;  %7649 = vrot.lane.b32.xlu0 %v14461_v14, %s10827_s25 }
 0x6ab   : > { %10043 = vmatpush1.bf16.xpose.msra.mxu0 %v10042_v21  ;;  %v7404_v63 = vpop.permute.xlu1 %7403  ;;  %v8152_v4 = vld [vmem:[#allocation3 + $0x260] sm:$0xff] }
 0x6ac   : > { %v7146_v19 = vpop.permute.xlu0 %7145  ;;  %7482 = vst.msk [vmem:[#allocation3 + $0x2b0] sm:$0xff] %vm721_vm3, %v7404_v63  ;;  %v10044_v52 = vpack.c.bf16 %v8152_v4, %v8147_v39  ;;  %v8146_v14 = vld [vmem:[#allocation3 + $0x230] sm:$0xff] }
 0x6ad   : > { %7225 = vst.msk [vmem:[#allocation3 + $0x280] sm:$0xff] %vm721_vm3, %v7146_v19 }
 0x6ae   : > { %7651 = vrot.lane.b32.xlu1 %v14470_v40, %s10827_s25  ;;  %7909 = vrot.lane.b32.xlu0 %v14555_v51, %s10827_s25 }
 0x6af   : > { %10045 = vmatprep.subr.bf16.mxu0 %v10044_v52  ;;  %v7148_v27 = vpop.permute.xlu1 %7147  ;;  %v8151_v7 = vld [vmem:[#allocation3 + $0x258] sm:$0xff] }
 0x6b0   : > { %v7406_v60 = vpop.permute.xlu0 %7405  ;;  %7226 = vst.msk [vmem:[#allocation3 + $0x2a8] sm:$0xff] %vm721_vm3, %v7148_v27  ;;  %v10046_v29 = vpack.c.bf16 %v8151_v7, %v8146_v14  ;;  %v8157_v51 = vld [vmem:[#allocation3 + $0x288] sm:$0xff] }
 0x6b1   : > { %7483 = vst.msk [vmem:[#allocation3 + $0x2d8] sm:$0xff] %vm721_vm3, %v7406_v60 }
 0x6b2   : > { %7911 = vrot.lane.b32.xlu1 %v14576_v11, %s10827_s25  ;;  %7653 = vrot.lane.b32.xlu0 %v14493_v50, %s10827_s25 }
 0x6b3   : > { %10047 = vmatpush1.bf16.xpose.msra.mxu0 %v10046_v29  ;;  %v7408_v40 = vpop.permute.xlu1 %7407  ;;  %v8162_v31 = vld [vmem:[#allocation3 + $0x2b0] sm:$0xff] }
 0x6b4   : > { %v7150_v38 = vpop.permute.xlu0 %7149  ;;  %7484 = vst.msk [vmem:[#allocation3 + $0x300] sm:$0xff] %vm721_vm3, %v7408_v40  ;;  %v10048_v42 = vpack.c.bf16 %v8162_v31, %v8157_v51  ;;  %v8156_v50 = vld [vmem:[#allocation3 + $0x280] sm:$0xff] }
 0x6b5   : > { %7227 = vst.msk [vmem:[#allocation3 + $0x2d0] sm:$0xff] %vm721_vm3, %v7150_v38  ;;  %v7783_v38 = vld [vmem:[#allocation2 + $0x198] sm:$0xff]  ;;  %v15157_v51 = vld [vmem:[#allocation7_spill] sm:$0xff] }
 0x6b6   : > { %7655 = vrot.lane.b32.xlu1 %v14502_v17, %s10827_s25  ;;  %7913 = vrot.lane.b32.xlu0 %v14587_v43, %s10827_s25  ;;  %7815 = vst.msk [vmem:[#allocation3 + $0x4c8] sm:$0xff] %vm375_vm0, %v7783_v38 }
 0x6b7   : > { %10049 = vmatprep.subr.bf16.mxu0 %v10048_v42  ;;  %v7152_v11 = vpop.permute.xlu1 %7151  ;;  %v8161_v57 = vld [vmem:[#allocation3 + $0x2a8] sm:$0xff] }
 0x6b8   : > { %v7410_v6 = vpop.permute.xlu0 %7409  ;;  %7228 = vst.msk [vmem:[#allocation3 + $0x2f8] sm:$0xff] %vm721_vm3, %v7152_v11  ;;  %v10050_v16 = vpack.c.bf16 %v8161_v57, %v8156_v50  ;;  %v8167_v43 = vld [vmem:[#allocation3 + $0x2d8] sm:$0xff] }
 0x6b9   : > { %7485 = vst.msk [vmem:[#allocation3 + $0x328] sm:$0xff] %vm721_vm3, %v7410_v6 }
 0x6ba   : > { %7915 = vrot.lane.b32.xlu1 %v14607_v41, %s10827_s25  ;;  %7657 = vrot.lane.b32.xlu0 %v14525_v26, %s10827_s25 }
 0x6bb   : > { %10051 = vmatpush1.bf16.xpose.msra.mxu0 %v10050_v16  ;;  %v7412_v17 = vpop.permute.xlu1 %7411  ;;  %v8172_v61 = vld [vmem:[#allocation3 + $0x300] sm:$0xff] }
 0x6bc   : > { %v7154_v30 = vpop.permute.xlu0 %7153  ;;  %7486 = vst.msk [vmem:[#allocation3 + $0x350] sm:$0xff] %vm721_vm3, %v7412_v17  ;;  %v10052_v23 = vpack.c.bf16 %v8172_v61, %v8167_v43  ;;  %v8166_v26 = vld [vmem:[#allocation3 + $0x2d0] sm:$0xff]  ;;  %v15159_v43 = vld [vmem:[#allocation11_spill] sm:$0xff] }
 0x6bd   : > { %7229 = vst.msk [vmem:[#allocation3 + $0x320] sm:$0xff] %vm721_vm3, %v7154_v30  ;;  %v15160_v61 = vld [vmem:[#allocation9_spill] sm:$0xff] }
 0x6be   : > { %7659 = vrot.lane.b32.xlu1 %v14534_v46, %s10827_s25  ;;  %7917 = vrot.lane.b32.xlu0 %v14619_v3, %s10827_s25 }
 0x6bf   : > { %10053 = vmatprep.subr.bf16.mxu0 %v10052_v23  ;;  %v7156_v41 = vpop.permute.xlu1 %7155  ;;  %v8171_v13 = vld [vmem:[#allocation3 + $0x2f8] sm:$0xff]  ;;  %v7847_v23 = vld [vmem:[#allocation2 + $0x199] sm:$0xff] }
 0x6c0   : > { %v7414_v54 = vpop.permute.xlu0 %7413  ;;  %7230 = vst.msk [vmem:[#allocation3 + $0x348] sm:$0xff] %vm721_vm3, %v7156_v41  ;;  %v10054_v28 = vpack.c.bf16 %v8171_v13, %v8166_v26  ;;  %v8177_v3 = vld [vmem:[#allocation3 + $0x328] sm:$0xff] }
 0x6c1   : > { %7487 = vst.msk [vmem:[#allocation3 + $0x378] sm:$0xff] %vm721_vm3, %v7414_v54 }
 0x6c2   : > { %7919 = vrot.lane.b32.xlu1 %v14640_v18, %s10827_s25  ;;  %7661 = vrot.lane.b32.xlu0 %v14557_v59, %s10827_s25 }
 0x6c3   : > { %10055 = vmatpush1.bf16.xpose.msra.mxu0 %v10054_v28  ;;  %v7416_v46 = vpop.permute.xlu1 %7415  ;;  %v8182_v53 = vld [vmem:[#allocation3 + $0x350] sm:$0xff]  ;;  %v15161_v28 = vld [vmem:[#allocation10_spill] sm:$0xff] }
 0x6c4   : > { %v7158_v9 = vpop.permute.xlu0 %7157  ;;  %7488 = vst.msk [vmem:[#allocation3 + $0x3a0] sm:$0xff] %vm721_vm3, %v7416_v46  ;;  %v10056_v36 = vpack.c.bf16 %v8182_v53, %v8177_v3  ;;  %v8176_v59 = vld [vmem:[#allocation3 + $0x320] sm:$0xff]  ;;  %v7848_v46 = vld [vmem:[#allocation2 + $0x1a1] sm:$0xff] }
 0x6c5   : > { %7231 = vst.msk [vmem:[#allocation3 + $0x370] sm:$0xff] %vm721_vm3, %v7158_v9 }
 0x6c6   : > { %7663 = vrot.lane.b32.xlu1 %v14566_v0, %s10827_s25  ;;  %7921 = vrot.lane.b32.xlu0 %v14651_v10, %s10827_s25 }
 0x6c7   : > { %10057 = vmatprep.subr.bf16.mxu0 %v10056_v36  ;;  %v7160_v18 = vpop.permute.xlu1 %7159  ;;  %v8181_v48 = vld [vmem:[#allocation3 + $0x348] sm:$0xff] }
 0x6c8   : > { %v7418_v56 = vpop.permute.xlu0 %7417  ;;  %7232 = vst.msk [vmem:[#allocation3 + $0x398] sm:$0xff] %vm721_vm3, %v7160_v18  ;;  %v10058_v15 = vpack.c.bf16 %v8181_v48, %v8176_v59  ;;  %v8187_v10 = vld [vmem:[#allocation3 + $0x378] sm:$0xff] }
 0x6c9   : > { %7489 = vst.msk [vmem:[#allocation3 + $0x3c8] sm:$0xff] %vm721_vm3, %v7418_v56  ;;  %v15162_v56 = vld [vmem:[#allocation12_spill] sm:$0xff] }
 0x6ca   : > { %7923 = vrot.lane.b32.xlu1 %v14671_v58, %s10827_s25  ;;  %7665 = vrot.lane.b32.xlu0 %v14589_v25, %s10827_s25 }
 0x6cb   : > { %10059 = vmatpush1.bf16.xpose.msra.mxu0 %v10058_v15  ;;  %v7420_v0 = vpop.permute.xlu1 %7419  ;;  %v8192_v22 = vld [vmem:[#allocation3 + $0x3a0] sm:$0xff] }
 0x6cc   : > { %v7162_v2 = vpop.permute.xlu0 %7161  ;;  %7490 = vst.msk [vmem:[#allocation3 + $0x3f0] sm:$0xff] %vm721_vm3, %v7420_v0  ;;  %v10060_v1 = vpack.c.bf16 %v8192_v22, %v8187_v10  ;;  %v8186_v25 = vld [vmem:[#allocation3 + $0x370] sm:$0xff] }
 0x6cd   : > { %7233 = vst.msk [vmem:[#allocation3 + $0x3c0] sm:$0xff] %vm721_vm3, %v7162_v2  ;;  %v14971_v2 = vld [vmem:[%s15114_s7 + $0x8] sm:$0x77]  ;;  %v15163_v22 = vld [vmem:[#allocation13_spill] sm:$0xff] }
 0x6ce   : > { %7667 = vrot.lane.b32.xlu1 %v14598_v34, %s10827_s25  ;;  %7925 = vrot.lane.b32.xlu0 %v14685_v62, %s10827_s25 }
 0x6cf   : > { %10061 = vmatprep.subr.bf16.mxu0 %v10060_v1  ;;  %v7164_v58 = vpop.permute.xlu1 %7163  ;;  %v8191_v55 = vld [vmem:[#allocation3 + $0x398] sm:$0xff]  ;;  %v8246_v1 = vcombine.high %v14971_v2, %v14971_v2 }
 0x6d0   : > { %v7422_v12 = vpop.permute.xlu0 %7421  ;;  %7234 = vst.msk [vmem:[#allocation3 + $0x3e8] sm:$0xff] %vm721_vm3, %v7164_v58  ;;  %v10062_v33 = vpack.c.bf16 %v8191_v55, %v8186_v25  ;;  %v8197_v62 = vld [vmem:[#allocation3 + $0x3c8] sm:$0xff] }
 0x6d1   : > { %7491 = vst.msk [vmem:[#allocation3 + $0x418] sm:$0xff] %vm721_vm3, %v7422_v12 }
 0x6d2   : > { %7927 = vrot.lane.b32.xlu1 %v14705_v8, %s10827_s25  ;;  %7669 = vrot.lane.b32.xlu0 %v14621_v44, %s10827_s25 }
 0x6d3   : > { %10063 = vmatpush1.bf16.xpose.msra.mxu0 %v10062_v33  ;;  %v7424_v34 = vpop.permute.xlu1 %7423  ;;  %v8202_v63 = vld [vmem:[#allocation3 + $0x3f0] sm:$0xff] }
 0x6d4   : > { %v7166_v21 = vpop.permute.xlu0 %7165  ;;  %7492 = vst.msk [vmem:[#allocation3 + $0x440] sm:$0xff] %vm721_vm3, %v7424_v34  ;;  %v10064_v19 = vpack.c.bf16 %v8202_v63, %v8197_v62  ;;  %v8196_v44 = vld [vmem:[#allocation3 + $0x3c0] sm:$0xff] }
 0x6d5   : > { %7235 = vst.msk [vmem:[#allocation3 + $0x410] sm:$0xff] %vm721_vm3, %v7166_v21 }
 0x6d6   : > { %7671 = vrot.lane.b32.xlu1 %v14630_v32, %s10827_s25  ;;  %7929 = vrot.lane.b32.xlu0 %v14716_v5, %s10827_s25 }
 0x6d7   : > { %10065 = vmatprep.subr.bf16.mxu0 %v10064_v19  ;;  %v7168_v8 = vpop.permute.xlu1 %7167  ;;  %v8201_v4 = vld [vmem:[#allocation3 + $0x3e8] sm:$0xff] }
 0x6d8   : > { %v7426_v39 = vpop.permute.xlu0 %7425  ;;  %7236 = vst.msk [vmem:[#allocation3 + $0x438] sm:$0xff] %vm721_vm3, %v7168_v8  ;;  %v10066_v52 = vpack.c.bf16 %v8201_v4, %v8196_v44  ;;  %v8207_v5 = vld [vmem:[#allocation3 + $0x418] sm:$0xff] }
 0x6d9   : > { %7493 = vst.msk [vmem:[#allocation3 + $0x468] sm:$0xff] %vm721_vm3, %v7426_v39 }
 0x6da   : > { %7931 = vrot.lane.b32.xlu1 %v14733_v49, %s10827_s25  ;;  %7673 = vrot.lane.b32.xlu0 %v14653_v45, %s10827_s25 }
 0x6db   : > { %10067 = vmatpush1.bf16.xpose.msra.mxu0 %v10066_v52  ;;  %v7428_v32 = vpop.permute.xlu1 %7427  ;;  %v8212_v60 = vld [vmem:[#allocation3 + $0x440] sm:$0xff] }
 0x6dc   : > { %v7170_v27 = vpop.permute.xlu0 %7169  ;;  %7494 = vst.msk [vmem:[#allocation3 + $0x490] sm:$0xff] %vm721_vm3, %v7428_v32  ;;  %v10068_v14 = vpack.c.bf16 %v8212_v60, %v8207_v5  ;;  %v8206_v45 = vld [vmem:[#allocation3 + $0x410] sm:$0xff] }
 0x6dd   : > { %7237 = vst.msk [vmem:[#allocation3 + $0x460] sm:$0xff] %vm721_vm3, %v7170_v27 }
 0x6de   : > { %7675 = vrot.lane.b32.xlu1 %v14662_v35, %s10827_s25  ;;  %7933 = vrot.lane.b32.xlu0 %v14749_v20, %s10827_s25  ;;  %v7784_v35 = vld [vmem:[#allocation2 + $0x1a0] sm:$0xff] }
 0x6df   : > { %10069 = vmatprep.subr.bf16.mxu0 %v10068_v14  ;;  %v7172_v49 = vpop.permute.xlu1 %7171  ;;  %v8211_v29 = vld [vmem:[#allocation3 + $0x438] sm:$0xff]  ;;  %7816 = vst.msk [vmem:[#allocation3 + $0x4f0] sm:$0xff] %vm375_vm0, %v7784_v35 }
 0x6e0   : > { %v7430_v7 = vpop.permute.xlu0 %7429  ;;  %7238 = vst.msk [vmem:[#allocation3 + $0x488] sm:$0xff] %vm721_vm3, %v7172_v49  ;;  %v10070_v40 = vpack.c.bf16 %v8211_v29, %v8206_v45  ;;  %v8217_v42 = vld [vmem:[#allocation3 + $0x468] sm:$0xff] }
 0x6e1   : > { %7495 = vst.msk [vmem:[#allocation3 + $0x4b8] sm:$0xff] %vm721_vm3, %v7430_v7 }
 0x6e2   : > { %7935 = vrot.lane.b32.xlu1 %v14769_v47, %s10827_s25  ;;  %7677 = vrot.lane.b32.xlu0 %v15157_v51, %s10827_s25  ;;  %v15158_v47 = vld [vmem:[#allocation8_spill] sm:$0xff] }
 0x6e3   : > { %10071 = vmatpush1.bf16.xpose.msra.mxu0 %v10070_v40  ;;  %v8222_v11 = vld [vmem:[#allocation3 + $0x490] sm:$0xff] }
 0x6e4   : > { %v7432_v20 = vpop.permute.xlu1 %7431  ;;  %v7174_v31 = vpop.permute.xlu0 %7173  ;;  %v10072_v6 = vpack.c.bf16 %v8222_v11, %v8217_v42  ;;  %v8216_v16 = vld [vmem:[#allocation3 + $0x460] sm:$0xff] }
 0x6e5   : > { %7496 = vst.msk [vmem:[#allocation3 + $0x4e0] sm:$0xff] %vm721_vm3, %v7432_v20  ;;  %7239 = vst.msk [vmem:[#allocation3 + $0x4b0] sm:$0xff] %vm721_vm3, %v7174_v31 }
 0x6e6   : > { %7679 = vrot.lane.b32.xlu1 %v15158_v47, %s10827_s25  ;;  %7937 = vrot.lane.b32.xlu0 %v14738_v24, %s10827_s25 }
 0x6e7   : > { %10073 = vmatprep.subr.bf16.mxu0 %v10072_v6  ;;  %v8221_v17 = vld [vmem:[#allocation3 + $0x488] sm:$0xff] }
 0x6e8   : > { %v7176_v50 = vpop.permute.xlu1 %7175  ;;  %v7882_v57 = vpop.permute.xlu0 %7881  ;;  %v10074_v30 = vpack.c.bf16 %v8221_v17, %v8216_v16  ;;  %v8227_v54 = vld [vmem:[#allocation3 + $0x4b8] sm:$0xff] }
 0x6e9   : > { %7240 = vst.msk [vmem:[#allocation3 + $0x4d8] sm:$0xff] %vm721_vm3, %v7176_v50  ;;  %7977 = vst.msk [vmem:[#allocation3 + $0x18] sm:$0xff] %vm721_vm3, %v7882_v57 }
 0x6ea   : > { %7939 = vrot.lane.b32.xlu1 %v15159_v43, %s10827_s25  ;;  %7681 = vrot.lane.b32.xlu0 %v15160_v61, %s10827_s25 }
 0x6eb   : > { %10075 = vmatpush1.bf16.xpose.msra.mxu0 %v10074_v30 }
 0x6ec   : > { %v7884_v41 = vpop.permute.xlu1 %7883  ;;  %v7626_v24 = vpop.permute.xlu0 %7625  ;;  %v8232_v26 = vld [vmem:[#allocation3 + $0x4e0] sm:$0xff]  ;;  %v8226_v53 = vld [vmem:[#allocation3 + $0x4b0] sm:$0xff] }
 0x6ed   : > { %7978 = vst.msk [vmem:[#allocation3 + $0x40] sm:$0xff] %vm721_vm3, %v7884_v41  ;;  %7721 = vst.msk [vmem:[#allocation3 + $0x10] sm:$0xff] %vm721_vm3, %v7626_v24  ;;  %v10076_v13 = vpack.c.bf16 %v8232_v26, %v8227_v54 }
 0x6ee   : > { %7683 = vrot.lane.b32.xlu1 %v15161_v28, %s10827_s25  ;;  %7941 = vrot.lane.b32.xlu0 %v7847_v23, %s10827_s25 }
 0x6ef   : > { %10077 = vmatprep.subr.bf16.mxu0 %v10076_v13 }
 0x6f0   : > { %v7628_v9 = vpop.permute.xlu1 %7627  ;;  %v7886_v3 = vpop.permute.xlu0 %7885  ;;  %v8231_v36 = vld [vmem:[#allocation3 + $0x4d8] sm:$0xff] }
 0x6f1   : > { %7722 = vst.msk [vmem:[#allocation3 + $0x38] sm:$0xff] %vm721_vm3, %v7628_v9  ;;  %7979 = vst.msk [vmem:[#allocation3 + $0x68] sm:$0xff] %vm721_vm3, %v7886_v3  ;;  %v10078_v18 = vpack.c.bf16 %v8231_v36, %v8226_v53  ;;  %v8079_v15 = vld [vmem:[#allocation3 + $0x18] sm:$0xff] }
 0x6f2   : > { %7943 = vrot.lane.b32.xlu1 %v7848_v46, %s10827_s25  ;;  %7685 = vrot.lane.b32.xlu0 %v15162_v56, %s10827_s25 }
 0x6f3   : > { %10079 = vmatpush1.bf16.xpose.msra.mxu0 %v10078_v18 }
 0x6f4   : > { %v7888_v59 = vpop.permute.xlu1 %7887  ;;  %v7630_v48 = vpop.permute.xlu0 %7629  ;;  %v8084_v0 = vld [vmem:[#allocation3 + $0x40] sm:$0xff]  ;;  %v8078_v25 = vld [vmem:[#allocation3 + $0x10] sm:$0xff] }
 0x6f5   : > { %7980 = vst.msk [vmem:[#allocation3 + $0x90] sm:$0xff] %vm721_vm3, %v7888_v59  ;;  %7723 = vst.msk [vmem:[#allocation3 + $0x60] sm:$0xff] %vm721_vm3, %v7630_v48  ;;  %v10080_v10 = vpack.c.bf16 %v8084_v0, %v8079_v15 }
 0x6f6   : > { %7687 = vrot.lane.b32.xlu1 %v15163_v22, %s10827_s25 }
 0x6f7   : > { %10081 = vmatprep.subr.bf16.mxu0 %v10080_v10 }
 0x6f8   : > { %v7632_v58 = vpop.permute.xlu1 %7631  ;;  %v7890_v12 = vpop.permute.xlu0 %7889  ;;  %v8083_v55 = vld [vmem:[#allocation3 + $0x38] sm:$0xff]  ;;  %v8089_v62 = vld [vmem:[#allocation3 + $0x68] sm:$0xff] }
 0x6f9   : > { %7724 = vst.msk [vmem:[#allocation3 + $0x88] sm:$0xff] %vm721_vm3, %v7632_v58  ;;  %7981 = vst.msk [vmem:[#allocation3 + $0xb8] sm:$0xff] %vm721_vm3, %v7890_v12  ;;  %v10082_v33 = vpack.c.bf16 %v8083_v55, %v8078_v25 }
 0x6fa   : > { %8412 = vmatmul.mubr.f32.vlgmr.msra.gmra.mrb[128].mxu0 %v14780_v37 }
 0x6fb   : > { %10083 = vmatpush1.bf16.xpose.msra.mxu0 %v10082_v33  ;;  %8482 = vmatprep.mubr.f32.mxu0 %v8246_v1 }
 0x6fc   : > { %v7892_v34 = vpop.permute.xlu1 %7891  ;;  %v7634_v21 = vpop.permute.xlu0 %7633  ;;  %v8094_v63 = vld [vmem:[#allocation3 + $0x90] sm:$0xff]  ;;  %v8088_v44 = vld [vmem:[#allocation3 + $0x60] sm:$0xff] }
 0x6fd   : > { %7982 = vst.msk [vmem:[#allocation3 + $0xe0] sm:$0xff] %vm721_vm3, %v7892_v34  ;;  %7725 = vst.msk [vmem:[#allocation3 + $0xb0] sm:$0xff] %vm721_vm3, %v7634_v21  ;;  %v10084_v19 = vpack.c.bf16 %v8094_v63, %v8089_v62 }
 0x6ff   : > { %10085 = vmatprep.subr.bf16.mxu0 %v10084_v19 }
 0x700   : > { %v7636_v8 = vpop.permute.xlu1 %7635  ;;  %v7894_v39 = vpop.permute.xlu0 %7893  ;;  %v8093_v4 = vld [vmem:[#allocation3 + $0x88] sm:$0xff]  ;;  %v8099_v27 = vld [vmem:[#allocation3 + $0xb8] sm:$0xff] }
 0x701   : > { %7726 = vst.msk [vmem:[#allocation3 + $0xd8] sm:$0xff] %vm721_vm3, %v7636_v8  ;;  %7983 = vst.msk [vmem:[#allocation3 + $0x108] sm:$0xff] %vm721_vm3, %v7894_v39  ;;  %v10086_v37 = vpack.c.bf16 %v8093_v4, %v8088_v44 }
 0x703   : > { %10087 = vmatpush1.bf16.xpose.msra.mxu0 %v10086_v37 }
 0x704   : > { %v7896_v52 = vpop.permute.xlu1 %7895  ;;  %v7638_v32 = vpop.permute.xlu0 %7637  ;;  %v8104_v5 = vld [vmem:[#allocation3 + $0xe0] sm:$0xff]  ;;  %v8098_v7 = vld [vmem:[#allocation3 + $0xb0] sm:$0xff] }
 0x705   : > { %7984 = vst.msk [vmem:[#allocation3 + $0x130] sm:$0xff] %vm721_vm3, %v7896_v52  ;;  %7727 = vst.msk [vmem:[#allocation3 + $0x100] sm:$0xff] %vm721_vm3, %v7638_v32  ;;  %v10088_v60 = vpack.c.bf16 %v8104_v5, %v8099_v27 }
 0x707   : > { %10089 = vmatprep.subr.bf16.mxu0 %v10088_v60 }
 0x708   : > { %v7640_v14 = vpop.permute.xlu1 %7639  ;;  %v7898_v49 = vpop.permute.xlu0 %7897  ;;  %v8103_v45 = vld [vmem:[#allocation3 + $0xd8] sm:$0xff]  ;;  %v8109_v51 = vld [vmem:[#allocation3 + $0x108] sm:$0xff] }
 0x709   : > { %7728 = vst.msk [vmem:[#allocation3 + $0x128] sm:$0xff] %vm721_vm3, %v7640_v14  ;;  %7985 = vst.msk [vmem:[#allocation3 + $0x158] sm:$0xff] %vm721_vm3, %v7898_v49  ;;  %v10090_v29 = vpack.c.bf16 %v8103_v45, %v8098_v7  ;;  %v8236_v7 = vld [vmem:[%s15115_s8] sm:$0x7]  ;;  %v8561_v45 = vld [vmem:[#allocation4 + $0x8] sm:$0xff] }
 0x70b   : > { %10091 = vmatpush1.bf16.xpose.msra.mxu0 %v10090_v29  ;;  %v8569_v29 = vld [vmem:[#allocation4 + $0x48] sm:$0xff] }
 0x70c   : > { %v7900_v40 = vpop.permute.xlu1 %7899  ;;  %v7642_v38 = vpop.permute.xlu0 %7641  ;;  %v8114_v35 = vld [vmem:[#allocation3 + $0x130] sm:$0xff]  ;;  %v8108_v11 = vld [vmem:[#allocation3 + $0x100] sm:$0xff] }
 0x70d   : > { %7986 = vst.msk [vmem:[#allocation3 + $0x180] sm:$0xff] %vm721_vm3, %v7900_v40  ;;  %7729 = vst.msk [vmem:[#allocation3 + $0x150] sm:$0xff] %vm721_vm3, %v7642_v38  ;;  %v10092_v20 = vpack.c.bf16 %v8114_v35, %v8109_v51  ;;  %v10828_v40 = vmov 0   ;;  %v10192_v38 = vpack.c.bf16 %v8569_v29, %v8561_v45  ;;  %v8560_v51 = vld [vmem:[#allocation4] sm:$0xff] }
 0x70e   : > { %10767 = vset.pattern.permute.xlu0 %v10828_v40  ;;  %v8568_v35 = vld [vmem:[#allocation4 + $0x40] sm:$0xff] }
 0x70f   : > { %10093 = vmatprep.subr.bf16.mxu0 %v10092_v20  ;;  %v8577_v20 = vld [vmem:[#allocation4 + $0x88] sm:$0xff]  ;;  %8239 = vperm.xlu0 %10767, %v8236_v7   ;;  %v8656_v40 = vld [vmem:[#allocation4 + $0x300] sm:$0xff] }
 0x710   : > { %v7644_v31 = vpop.permute.xlu1 %7643  ;;  %v7902_v42 = vpop.permute.xlu0 %7901  ;;  %v8113_v6 = vld [vmem:[#allocation3 + $0x128] sm:$0xff]  ;;  %v8119_v16 = vld [vmem:[#allocation3 + $0x158] sm:$0xff]  ;;  %10193 = vmatprep.subr.bf16.mxu1 %v10192_v38  ;;  %v8664_v38 = vld [vmem:[#allocation4 + $0x340] sm:$0xff] }
 0x711   : > { %7730 = vst.msk [vmem:[#allocation3 + $0x178] sm:$0xff] %vm721_vm3, %v7644_v31  ;;  %7987 = vst.msk [vmem:[#allocation3 + $0x1a8] sm:$0xff] %vm721_vm3, %v7902_v42  ;;  %v10094_v47 = vpack.c.bf16 %v8113_v6, %v8108_v11 }
 0x713   : > { %10095 = vmatpush1.bf16.xpose.msra.mxu0 %v10094_v47  ;;  %v10194_v47 = vpack.c.bf16 %v8568_v35, %v8560_v51  ;;  %v8673_v51 = vld [vmem:[#allocation4 + $0x388] sm:$0xff] }
 0x714   : > { %v7904_v50 = vpop.permute.xlu1 %7903  ;;  %v7646_v57 = vpop.permute.xlu0 %7645  ;;  %v8124_v17 = vld [vmem:[#allocation3 + $0x180] sm:$0xff]  ;;  %v8118_v23 = vld [vmem:[#allocation3 + $0x150] sm:$0xff] }
 0x715   : > { %7988 = vst.msk [vmem:[#allocation3 + $0x1d0] sm:$0xff] %vm721_vm3, %v7904_v50  ;;  %7731 = vst.msk [vmem:[#allocation3 + $0x1a0] sm:$0xff] %vm721_vm3, %v7646_v57  ;;  %v10096_v30 = vpack.c.bf16 %v8124_v17, %v8119_v16  ;;  %v8585_v50 = vld [vmem:[#allocation4 + $0xc8] sm:$0xff]  ;;  %v8576_v17 = vld [vmem:[#allocation4 + $0x80] sm:$0xff]  ;;  %10195 = vmatpush1.bf16.msra.mxu1 %v10194_v47  ;;  %v10218_v47 = vpack.c.bf16 %v8664_v38, %v8656_v40 }
 0x716   : > { %v10196_v16 = vpack.c.bf16 %v8585_v50, %v8577_v20 }
 0x717   : > { %10097 = vmatprep.subr.bf16.mxu0 %v10096_v30  ;;  %v8584_v30 = vld [vmem:[#allocation4 + $0xc0] sm:$0xff] }
 0x718   : > { %v7648_v43 = vpop.permute.xlu1 %7647  ;;  %v7906_v61 = vpop.permute.xlu0 %7905  ;;  %v8123_v41 = vld [vmem:[#allocation3 + $0x178] sm:$0xff]  ;;  %v8129_v13 = vld [vmem:[#allocation3 + $0x1a8] sm:$0xff]  ;;  %10197 = vmatprep.subr.bf16.mxu1 %v10196_v16  ;;  %v8680_v16 = vld [vmem:[#allocation4 + $0x3c0] sm:$0xff] }
 0x719   : > { %7732 = vst.msk [vmem:[#allocation3 + $0x1c8] sm:$0xff] %vm721_vm3, %v7648_v43  ;;  %7989 = vst.msk [vmem:[#allocation3 + $0x1f8] sm:$0xff] %vm721_vm3, %v7906_v61  ;;  %v10098_v24 = vpack.c.bf16 %v8123_v41, %v8118_v23  ;;  %v8593_v43 = vld [vmem:[#allocation4 + $0x108] sm:$0xff]  ;;  %v10198_v61 = vpack.c.bf16 %v8584_v30, %v8576_v17 }
 0x71a   : > { %v8601_v23 = vld [vmem:[#allocation4 + $0x148] sm:$0xff] }
 0x71b   : > { %10099 = vmatpush1.bf16.xpose.msra.mxu0 %v10098_v24  ;;  %v10200_v24 = vpack.c.bf16 %v8601_v23, %v8593_v43  ;;  %10199 = vmatpush1.bf16.msra.mxu1 %v10198_v61  ;;  %v8689_v17 = vld [vmem:[#allocation4 + $0x408] sm:$0xff] }
 0x71c   : > { %v7908_v54 = vpop.permute.xlu1 %7907  ;;  %v7650_v26 = vpop.permute.xlu0 %7649  ;;  %v8134_v28 = vld [vmem:[#allocation3 + $0x1d0] sm:$0xff]  ;;  %v8128_v53 = vld [vmem:[#allocation3 + $0x1a0] sm:$0xff] }
 0x71d   : > { %7990 = vst.msk [vmem:[#allocation3 + $0x220] sm:$0xff] %vm721_vm3, %v7908_v54  ;;  %7733 = vst.msk [vmem:[#allocation3 + $0x1f0] sm:$0xff] %vm721_vm3, %v7650_v26  ;;  %v10100_v46 = vpack.c.bf16 %v8134_v28, %v8129_v13  ;;  %v8592_v54 = vld [vmem:[#allocation4 + $0x100] sm:$0xff]  ;;  %10201 = vmatprep.subr.bf16.mxu1 %v10200_v24 }
 0x71e   : > { %v8600_v26 = vld [vmem:[#allocation4 + $0x140] sm:$0xff] }
 0x71f   : > { %10101 = vmatprep.subr.bf16.mxu0 %v10100_v46 }
 0x720   : > { %v7652_v9 = vpop.permute.xlu1 %7651  ;;  %v7910_v3 = vpop.permute.xlu0 %7909  ;;  %v8133_v36 = vld [vmem:[#allocation3 + $0x1c8] sm:$0xff]  ;;  %v8139_v48 = vld [vmem:[#allocation3 + $0x1f8] sm:$0xff] }
 0x721   : > { %7734 = vst.msk [vmem:[#allocation3 + $0x218] sm:$0xff] %vm721_vm3, %v7652_v9  ;;  %7991 = vst.msk [vmem:[#allocation3 + $0x248] sm:$0xff] %vm721_vm3, %v7910_v3  ;;  %v10102_v18 = vpack.c.bf16 %v8133_v36, %v8128_v53  ;;  %v8609_v9 = vld [vmem:[#allocation4 + $0x188] sm:$0xff]  ;;  %v10202_v36 = vpack.c.bf16 %v8600_v26, %v8592_v54 }
 0x722   : > { %v8617_v3 = vld [vmem:[#allocation4 + $0x1c8] sm:$0xff] }
 0x723   : > { %10103 = vmatpush1.bf16.xpose.msra.mxu0 %v10102_v18  ;;  %10203 = vmatpush1.bf16.msra.mxu1 %v10202_v36 }
 0x724   : > { %v7912_v56 = vpop.permute.xlu1 %7911  ;;  %v7654_v59 = vpop.permute.xlu0 %7653  ;;  %v8144_v15 = vld [vmem:[#allocation3 + $0x220] sm:$0xff]  ;;  %v8138_v1 = vld [vmem:[#allocation3 + $0x1f0] sm:$0xff] }
 0x725   : > { %7992 = vst.msk [vmem:[#allocation3 + $0x270] sm:$0xff] %vm721_vm3, %v7912_v56  ;;  %7735 = vst.msk [vmem:[#allocation3 + $0x240] sm:$0xff] %vm721_vm3, %v7654_v59  ;;  %v10104_v0 = vpack.c.bf16 %v8144_v15, %v8139_v48  ;;  %v10204_v56 = vpack.c.bf16 %v8617_v3, %v8609_v9  ;;  %v8608_v59 = vld [vmem:[#allocation4 + $0x180] sm:$0xff] }
 0x726   : > { %v8616_v48 = vld [vmem:[#allocation4 + $0x1c0] sm:$0xff] }
 0x727   : > { %10105 = vmatprep.subr.bf16.mxu0 %v10104_v0  ;;  %10205 = vmatprep.subr.bf16.mxu1 %v10204_v56 }
 0x728   : > { %v7656_v10 = vpop.permute.xlu1 %7655  ;;  %v7914_v22 = vpop.permute.xlu0 %7913  ;;  %v8143_v58 = vld [vmem:[#allocation3 + $0x218] sm:$0xff]  ;;  %v8149_v33 = vld [vmem:[#allocation3 + $0x248] sm:$0xff] }
 0x729   : > { %7736 = vst.msk [vmem:[#allocation3 + $0x268] sm:$0xff] %vm721_vm3, %v7656_v10  ;;  %7993 = vst.msk [vmem:[#allocation3 + $0x298] sm:$0xff] %vm721_vm3, %v7914_v22  ;;  %v10106_v12 = vpack.c.bf16 %v8143_v58, %v8138_v1  ;;  %v8625_v22 = vld [vmem:[#allocation4 + $0x208] sm:$0xff] }
 0x72a   : > { %v8633_v1 = vld [vmem:[#allocation4 + $0x248] sm:$0xff] }
 0x72b   : > { %10107 = vmatpush1.bf16.xpose.msra.mxu0 %v10106_v12  ;;  %v10206_v12 = vpack.c.bf16 %v8616_v48, %v8608_v59 }
 0x72c   : > { %v7916_v25 = vpop.permute.xlu1 %7915  ;;  %v7658_v55 = vpop.permute.xlu0 %7657  ;;  %v8154_v34 = vld [vmem:[#allocation3 + $0x270] sm:$0xff]  ;;  %v8148_v19 = vld [vmem:[#allocation3 + $0x240] sm:$0xff] }
 0x72d   : > { %7994 = vst.msk [vmem:[#allocation3 + $0x2c0] sm:$0xff] %vm721_vm3, %v7916_v25  ;;  %7737 = vst.msk [vmem:[#allocation3 + $0x290] sm:$0xff] %vm721_vm3, %v7658_v55  ;;  %v10108_v21 = vpack.c.bf16 %v8154_v34, %v8149_v33  ;;  %v10208_v25 = vpack.c.bf16 %v8633_v1, %v8625_v22  ;;  %v8624_v55 = vld [vmem:[#allocation4 + $0x200] sm:$0xff]  ;;  %v8641_v34 = vld [vmem:[#allocation4 + $0x288] sm:$0xff]  ;;  %10207 = vmatpush1.bf16.msra.mxu1 %v10206_v12 }
 0x72e   : > { %v8632_v33 = vld [vmem:[#allocation4 + $0x240] sm:$0xff] }
 0x72f   : > { %10109 = vmatprep.subr.bf16.mxu0 %v10108_v21  ;;  %10209 = vmatprep.subr.bf16.mxu1 %v10208_v25  ;;  %v8729_v25 = vld [vmem:[#allocation4 + $0x548] sm:$0xff] }
 0x730   : > { %v7660_v62 = vpop.permute.xlu1 %7659  ;;  %v7918_v63 = vpop.permute.xlu0 %7917  ;;  %v8153_v8 = vld [vmem:[#allocation3 + $0x268] sm:$0xff]  ;;  %v8159_v37 = vld [vmem:[#allocation3 + $0x298] sm:$0xff] }
 0x731   : > { %7738 = vst.msk [vmem:[#allocation3 + $0x2b8] sm:$0xff] %vm721_vm3, %v7660_v62  ;;  %7995 = vst.msk [vmem:[#allocation3 + $0x2e8] sm:$0xff] %vm721_vm3, %v7918_v63  ;;  %v10110_v39 = vpack.c.bf16 %v8153_v8, %v8148_v19  ;;  %v8649_v8 = vld [vmem:[#allocation4 + $0x2c8] sm:$0xff] }
 0x733   : > { %10111 = vmatpush1.bf16.xpose.msra.mxu0 %v10110_v39 }
 0x734   : > { %v7920_v44 = vpop.permute.xlu1 %7919  ;;  %v7662_v4 = vpop.permute.xlu0 %7661  ;;  %v8164_v52 = vld [vmem:[#allocation3 + $0x2c0] sm:$0xff]  ;;  %v8158_v60 = vld [vmem:[#allocation3 + $0x290] sm:$0xff] }
 0x735   : > { %7996 = vst.msk [vmem:[#allocation3 + $0x310] sm:$0xff] %vm721_vm3, %v7920_v44  ;;  %7739 = vst.msk [vmem:[#allocation3 + $0x2e0] sm:$0xff] %vm721_vm3, %v7662_v4  ;;  %v10112_v32 = vpack.c.bf16 %v8164_v52, %v8159_v37  ;;  %v10210_v44 = vpack.c.bf16 %v8632_v33, %v8624_v55  ;;  %v10212_v4 = vpack.c.bf16 %v8649_v8, %v8641_v34  ;;  %v8640_v37 = vld [vmem:[#allocation4 + $0x280] sm:$0xff] }
 0x736   : > { %v8648_v52 = vld [vmem:[#allocation4 + $0x2c0] sm:$0xff] }
 0x737   : > { %10113 = vmatprep.subr.bf16.mxu0 %v10112_v32  ;;  %v8657_v32 = vld [vmem:[#allocation4 + $0x308] sm:$0xff]  ;;  %10211 = vmatpush1.bf16.msra.mxu1 %v10210_v44  ;;  %v10214_v45 = vpack.c.bf16 %v8648_v52, %v8640_v37 }
 0x738   : > { %v7664_v27 = vpop.permute.xlu1 %7663  ;;  %v7922_v5 = vpop.permute.xlu0 %7921  ;;  %v8163_v14 = vld [vmem:[#allocation3 + $0x2b8] sm:$0xff]  ;;  %v8169_v11 = vld [vmem:[#allocation3 + $0x2e8] sm:$0xff]  ;;  %10213 = vmatprep.subr.bf16.mxu1 %v10212_v4 }
 0x739   : > { %7740 = vst.msk [vmem:[#allocation3 + $0x308] sm:$0xff] %vm721_vm3, %v7664_v27  ;;  %7997 = vst.msk [vmem:[#allocation3 + $0x338] sm:$0xff] %vm721_vm3, %v7922_v5  ;;  %v10114_v49 = vpack.c.bf16 %v8163_v14, %v8158_v60  ;;  %v8745_v4 = vld [vmem:[#allocation4 + $0x5c8] sm:$0xff] }
 0x73b   : > { %10115 = vmatpush1.bf16.xpose.msra.mxu0 %v10114_v49  ;;  %v8665_v49 = vld [vmem:[#allocation4 + $0x348] sm:$0xff]  ;;  %10215 = vmatpush1.bf16.msra.mxu1 %v10214_v45 }
 0x73c   : > { %v7924_v31 = vpop.permute.xlu1 %7923  ;;  %v7666_v42 = vpop.permute.xlu0 %7665  ;;  %v8174_v6 = vld [vmem:[#allocation3 + $0x310] sm:$0xff]  ;;  %v8168_v41 = vld [vmem:[#allocation3 + $0x2e0] sm:$0xff]  ;;  %v10216_v29 = vpack.c.bf16 %v8665_v49, %v8657_v32 }
 0x73d   : > { %7998 = vst.msk [vmem:[#allocation3 + $0x360] sm:$0xff] %vm721_vm3, %v7924_v31  ;;  %7741 = vst.msk [vmem:[#allocation3 + $0x330] sm:$0xff] %vm721_vm3, %v7666_v42  ;;  %v10116_v57 = vpack.c.bf16 %v8174_v6, %v8169_v11  ;;  %v8681_v11 = vld [vmem:[#allocation4 + $0x3c8] sm:$0xff] }
 0x73e   : > { %10217 = vmatprep.subr.bf16.mxu1 %v10216_v29  ;;  %v10220_v50 = vpack.c.bf16 %v8681_v11, %v8673_v51  ;;  %v8761_v29 = vld [vmem:[#allocation4 + $0x648] sm:$0xff] }
 0x73f   : > { %10117 = vmatprep.subr.bf16.mxu0 %v10116_v57  ;;  %v8672_v57 = vld [vmem:[#allocation4 + $0x380] sm:$0xff]  ;;  %10219 = vmatpush1.bf16.msra.mxu1 %v10218_v47  ;;  %v8777_v47 = vld [vmem:[#allocation4 + $0x6c8] sm:$0xff] }
 0x740   : > { %v7668_v13 = vpop.permute.xlu1 %7667  ;;  %v7926_v28 = vpop.permute.xlu0 %7925  ;;  %v8173_v46 = vld [vmem:[#allocation3 + $0x308] sm:$0xff]  ;;  %v8179_v18 = vld [vmem:[#allocation3 + $0x338] sm:$0xff]  ;;  %v10222_v54 = vpack.c.bf16 %v8680_v16, %v8672_v57  ;;  %10221 = vmatprep.subr.bf16.mxu1 %v10220_v50 }
 0x741   : > { %7742 = vst.msk [vmem:[#allocation3 + $0x358] sm:$0xff] %vm721_vm3, %v7668_v13  ;;  %7999 = vst.msk [vmem:[#allocation3 + $0x388] sm:$0xff] %vm721_vm3, %v7926_v28  ;;  %v10118_v53 = vpack.c.bf16 %v8173_v46, %v8168_v41  ;;  %v8697_v41 = vld [vmem:[#allocation4 + $0x448] sm:$0xff]  ;;  %v8688_v13 = vld [vmem:[#allocation4 + $0x400] sm:$0xff] }
 0x742   : > { %v10224_v26 = vpack.c.bf16 %v8697_v41, %v8689_v17  ;;  %v8696_v28 = vld [vmem:[#allocation4 + $0x440] sm:$0xff]  ;;  %v8705_v46 = vld [vmem:[#allocation4 + $0x488] sm:$0xff] }
 0x743   : > { %10119 = vmatpush1.bf16.xpose.msra.mxu0 %v10118_v53  ;;  %10223 = vmatpush1.bf16.msra.mxu1 %v10222_v54  ;;  %v10226_v59 = vpack.c.bf16 %v8696_v28, %v8688_v13  ;;  %v8793_v41 = vld [vmem:[#allocation4 + $0x748] sm:$0xff]  ;;  %v8160_v54 = vld [vmem:[#allocation3 + $0x2a0] sm:$0xff] }
 0x744   : > { %v7928_v15 = vpop.permute.xlu1 %7927  ;;  %v7670_v0 = vpop.permute.xlu0 %7669  ;;  %v8184_v10 = vld [vmem:[#allocation3 + $0x360] sm:$0xff]  ;;  %v8178_v63 = vld [vmem:[#allocation3 + $0x330] sm:$0xff]  ;;  %10225 = vmatprep.subr.bf16.mxu1 %v10224_v26  ;;  %v8165_v26 = vld [vmem:[#allocation3 + $0x2c8] sm:$0xff] }
 0x745   : > { %8000 = vst.msk [vmem:[#allocation3 + $0x3b0] sm:$0xff] %vm721_vm3, %v7928_v15  ;;  %7743 = vst.msk [vmem:[#allocation3 + $0x380] sm:$0xff] %vm721_vm3, %v7670_v0  ;;  %v10120_v58 = vpack.c.bf16 %v8184_v10, %v8179_v18  ;;  %v8713_v18 = vld [vmem:[#allocation4 + $0x4c8] sm:$0xff]  ;;  %v8704_v15 = vld [vmem:[#allocation4 + $0x480] sm:$0xff] }
 0x746   : > { %v10228_v48 = vpack.c.bf16 %v8713_v18, %v8705_v46  ;;  %v8712_v0 = vld [vmem:[#allocation4 + $0x4c0] sm:$0xff]  ;;  %v8721_v10 = vld [vmem:[#allocation4 + $0x508] sm:$0xff] }
 0x747   : > { %10121 = vmatprep.subr.bf16.mxu0 %v10120_v58  ;;  %10227 = vmatpush1.bf16.msra.mxu1 %v10226_v59  ;;  %v10230_v33 = vpack.c.bf16 %v8712_v0, %v8704_v15  ;;  %v10232_v34 = vpack.c.bf16 %v8729_v25, %v8721_v10  ;;  %v8809_v18 = vld [vmem:[#allocation4 + $0x7c8] sm:$0xff]  ;;  %v8800_v10 = vld [vmem:[#allocation4 + $0x780] sm:$0xff]  ;;  %v8170_v25 = vld [vmem:[#allocation3 + $0x2f0] sm:$0xff] }
 0x748   : > { %v7672_v21 = vpop.permute.xlu1 %7671  ;;  %v7930_v62 = vpop.permute.xlu0 %7929  ;;  %v8183_v19 = vld [vmem:[#allocation3 + $0x358] sm:$0xff]  ;;  %v8189_v60 = vld [vmem:[#allocation3 + $0x388] sm:$0xff]  ;;  %10229 = vmatprep.subr.bf16.mxu1 %v10228_v48  ;;  %v10144_v48 = vpack.c.bf16 %v8165_v26, %v8160_v54  ;;  %v8598_v59 = vld [vmem:[#allocation4 + $0x130] sm:$0xff] }
 0x749   : > { %7744 = vst.msk [vmem:[#allocation3 + $0x3a8] sm:$0xff] %vm721_vm3, %v7672_v21  ;;  %8001 = vst.msk [vmem:[#allocation3 + $0x3d8] sm:$0xff] %vm721_vm3, %v7930_v62  ;;  %v10122_v39 = vpack.c.bf16 %v8183_v19, %v8178_v63  ;;  %v8720_v21 = vld [vmem:[#allocation4 + $0x500] sm:$0xff]  ;;  %v8737_v63 = vld [vmem:[#allocation4 + $0x588] sm:$0xff] }
 0x74a   : > { %v8728_v62 = vld [vmem:[#allocation4 + $0x540] sm:$0xff]  ;;  %v10236_v32 = vpack.c.bf16 %v8745_v4, %v8737_v63  ;;  %v8095_v63 = vld [vmem:[#allocation3 + $0x98] sm:$0xff]  ;;  %v8105_v4 = vld [vmem:[#allocation3 + $0xe8] sm:$0xff] }
 0x74b   : > { %10123 = vmatpush1.bf16.xpose.msra.mxu0 %v10122_v39  ;;  %10231 = vmatpush1.bf16.msra.mxu1 %v10230_v33  ;;  %v10234_v52 = vpack.c.bf16 %v8728_v62, %v8720_v21  ;;  %v15051_v33 = vld [vmem:[%s15114_s7 + $0x10] sm:$0x7]  ;;  %v8090_v62 = vld [vmem:[#allocation3 + $0x70] sm:$0xff]  ;;  %v8155_v54 = vld [vmem:[#allocation3 + $0x278] sm:$0xff] }
 0x74c   : > { %v7932_v27 = vpop.permute.xlu1 %7931  ;;  %v7674_v5 = vpop.permute.xlu0 %7673  ;;  %v8194_v14 = vld [vmem:[#allocation3 + $0x3b0] sm:$0xff]  ;;  %v8188_v31 = vld [vmem:[#allocation3 + $0x380] sm:$0xff]  ;;  %10233 = vmatprep.subr.bf16.mxu1 %v10232_v34 }
 0x74d   : > { %8002 = vst.msk [vmem:[#allocation3 + $0x400] sm:$0xff] %vm721_vm3, %v7932_v27  ;;  %7745 = vst.msk [vmem:[#allocation3 + $0x3d0] sm:$0xff] %vm721_vm3, %v7674_v5  ;;  %v10124_v7 = vpack.c.bf16 %v8194_v14, %v8189_v60  ;;  %v8736_v27 = vld [vmem:[#allocation4 + $0x580] sm:$0xff]  ;;  %v8753_v60 = vld [vmem:[#allocation4 + $0x608] sm:$0xff] }
 0x74e   : > { %v8744_v5 = vld [vmem:[#allocation4 + $0x5c0] sm:$0xff]  ;;  %v10240_v51 = vpack.c.bf16 %v8761_v29, %v8753_v60  ;;  %v8115_v60 = vld [vmem:[#allocation3 + $0x138] sm:$0xff] }
 0x74f   : > { %10125 = vmatprep.subr.bf16.mxu0 %v10124_v7  ;;  %10235 = vmatpush1.bf16.msra.mxu1 %v10234_v52  ;;  %v10238_v38 = vpack.c.bf16 %v8744_v5, %v8736_v27  ;;  %v8195_v52 = vld [vmem:[#allocation3 + $0x3b8] sm:$0xff]  ;;  %v8110_v5 = vld [vmem:[#allocation3 + $0x110] sm:$0xff]  ;;  %v8120_v29 = vld [vmem:[#allocation3 + $0x160] sm:$0xff] }
 0x750   : > { %v7676_v35 = vpop.permute.xlu1 %7675  ;;  %v7934_v20 = vpop.permute.xlu0 %7933  ;;  %v8193_v42 = vld [vmem:[#allocation3 + $0x3a8] sm:$0xff]  ;;  %v8199_v61 = vld [vmem:[#allocation3 + $0x3d8] sm:$0xff]  ;;  %10237 = vmatprep.subr.bf16.mxu1 %v10236_v32 }
 0x751   : > { %7746 = vst.msk [vmem:[#allocation3 + $0x3f8] sm:$0xff] %vm721_vm3, %v7676_v35  ;;  %8003 = vst.msk [vmem:[#allocation3 + $0x428] sm:$0xff] %vm721_vm3, %v7934_v20  ;;  %v10126_v6 = vpack.c.bf16 %v8193_v42, %v8188_v31  ;;  %v8752_v35 = vld [vmem:[#allocation4 + $0x600] sm:$0xff]  ;;  %v8769_v31 = vld [vmem:[#allocation4 + $0x688] sm:$0xff] }
 0x752   : > { %v8760_v20 = vld [vmem:[#allocation4 + $0x640] sm:$0xff]  ;;  %v10244_v17 = vpack.c.bf16 %v8777_v47, %v8769_v31  ;;  %v8130_v31 = vld [vmem:[#allocation3 + $0x1b0] sm:$0xff] }
 0x753   : > { %10127 = vmatpush1.bf16.xpose.msra.mxu0 %v10126_v6  ;;  %10239 = vmatpush1.bf16.msra.mxu1 %v10238_v38  ;;  %v10242_v16 = vpack.c.bf16 %v8760_v20, %v8752_v35  ;;  %v8210_v38 = vld [vmem:[#allocation3 + $0x430] sm:$0xff] }
 0x754   : > { %v7936_v30 = vpop.permute.xlu1 %7935  ;;  %v7678_v43 = vpop.permute.xlu0 %7677  ;;  %v8204_v23 = vld [vmem:[#allocation3 + $0x400] sm:$0xff]  ;;  %v8198_v53 = vld [vmem:[#allocation3 + $0x3d0] sm:$0xff]  ;;  %10241 = vmatprep.subr.bf16.mxu1 %v10240_v51  ;;  %v8215_v51 = vld [vmem:[#allocation3 + $0x458] sm:$0xff] }
 0x755   : > { %8004 = vst.msk [vmem:[#allocation3 + $0x450] sm:$0xff] %vm721_vm3, %v7936_v30  ;;  %7747 = vst.msk [vmem:[#allocation3 + $0x420] sm:$0xff] %vm721_vm3, %v7678_v43  ;;  %v10128_v24 = vpack.c.bf16 %v8204_v23, %v8199_v61  ;;  %v8768_v30 = vld [vmem:[#allocation4 + $0x680] sm:$0xff]  ;;  %v8785_v23 = vld [vmem:[#allocation4 + $0x708] sm:$0xff]  ;;  %v10174_v20 = vpack.c.bf16 %v8215_v51, %v8210_v38 }
 0x756   : > { %v8776_v43 = vld [vmem:[#allocation4 + $0x6c0] sm:$0xff]  ;;  %v10248_v46 = vpack.c.bf16 %v8793_v41, %v8785_v23  ;;  %v8567_v23 = vld [vmem:[#allocation4 + $0x38] sm:$0xff]  ;;  %v8678_v38 = vld [vmem:[#allocation4 + $0x3b0] sm:$0xff] }
 0x757   : > { %10129 = vmatprep.subr.bf16.mxu0 %v10128_v24  ;;  %10243 = vmatpush1.bf16.msra.mxu1 %v10242_v16  ;;  %v10246_v13 = vpack.c.bf16 %v8776_v43, %v8768_v30  ;;  %v8235_v16 = vld [vmem:[#allocation3 + $0x4f8] sm:$0xff]  ;;  %v8145_v30 = vld [vmem:[#allocation3 + $0x228] sm:$0xff]  ;;  %v8686_v51 = vld [vmem:[#allocation4 + $0x3f0] sm:$0xff] }
 0x758   : > { %v7680_v9 = vpop.permute.xlu1 %7679  ;;  %v7938_v3 = vpop.permute.xlu0 %7937  ;;  %v8203_v36 = vld [vmem:[#allocation3 + $0x3f8] sm:$0xff]  ;;  %v8209_v58 = vld [vmem:[#allocation3 + $0x428] sm:$0xff]  ;;  %10245 = vmatprep.subr.bf16.mxu1 %v10244_v17  ;;  %v8140_v17 = vld [vmem:[#allocation3 + $0x200] sm:$0xff] }
 0x759   : > { %7748 = vst.msk [vmem:[#allocation3 + $0x448] sm:$0xff] %vm721_vm3, %v7680_v9  ;;  %8005 = vst.msk [vmem:[#allocation3 + $0x478] sm:$0xff] %vm721_vm3, %v7938_v3  ;;  %v10130_v56 = vpack.c.bf16 %v8203_v36, %v8198_v53  ;;  %v8784_v9 = vld [vmem:[#allocation4 + $0x700] sm:$0xff]  ;;  %v8801_v36 = vld [vmem:[#allocation4 + $0x788] sm:$0xff] }
 0x75a   : > { %v8792_v3 = vld [vmem:[#allocation4 + $0x740] sm:$0xff]  ;;  %v10252_v0 = vpack.c.bf16 %v8809_v18, %v8801_v36  ;;  %v8575_v41 = vld [vmem:[#allocation4 + $0x78] sm:$0xff]  ;;  %v8582_v18 = vld [vmem:[#allocation4 + $0xb0] sm:$0xff] }
 0x75b   : > { %10131 = vmatpush1.bf16.xpose.msra.mxu0 %v10130_v56  ;;  %10247 = vmatpush1.bf16.msra.mxu1 %v10246_v13  ;;  %v10250_v15 = vpack.c.bf16 %v8792_v3, %v8784_v9  ;;  %v10384_v26 = vpack.c.bf16 %v8575_v41, %v8567_v23  ;;  %v8583_v9 = vld [vmem:[#allocation4 + $0xb8] sm:$0xff] }
 0x75c   : > { %v7940_v22 = vpop.permute.xlu1 %7939  ;;  %v7682_v1 = vpop.permute.xlu0 %7681  ;;  %v8214_v12 = vld [vmem:[#allocation3 + $0x450] sm:$0xff]  ;;  %v8208_v39 = vld [vmem:[#allocation3 + $0x420] sm:$0xff]  ;;  %10249 = vmatprep.subr.bf16.mxu1 %v10248_v46  ;;  %v8591_v3 = vld [vmem:[#allocation4 + $0xf8] sm:$0xff] }
 0x75d   : > { %8006 = vst.msk [vmem:[#allocation3 + $0x4a0] sm:$0xff] %vm721_vm3, %v7940_v22  ;;  %7749 = vst.msk [vmem:[#allocation3 + $0x470] sm:$0xff] %vm721_vm3, %v7682_v1  ;;  %v10132_v55 = vpack.c.bf16 %v8214_v12, %v8209_v58  ;;  %v8808_v22 = vld [vmem:[#allocation4 + $0x7c0] sm:$0xff]  ;;  %v8085_v58 = vld [vmem:[#allocation3 + $0x48] sm:$0xff]  ;;  %v10388_v36 = vpack.c.bf16 %v8591_v3, %v8583_v9 }
 0x75e   : > { %v8080_v1 = vld [vmem:[#allocation3 + $0x20] sm:$0xff]  ;;  %v10254_v12 = vpack.c.bf16 %v8808_v22, %v8800_v10  ;;  %v8574_v46 = vld [vmem:[#allocation4 + $0x70] sm:$0xff] }
 0x75f   : > { %10133 = vmatprep.subr.bf16.mxu0 %v10132_v55  ;;  %10251 = vmatpush1.bf16.msra.mxu1 %v10250_v15  ;;  %v8175_v55 = vld [vmem:[#allocation3 + $0x318] sm:$0xff]  ;;  %v10147_v34 = vpack.c.bf16 %v8085_v58, %v8080_v1  ;;  %v8606_v22 = vld [vmem:[#allocation4 + $0x170] sm:$0xff] }
 0x760   : > { %v7684_v19 = vpop.permute.xlu1 %7683  ;;  %v7942_v8 = vpop.permute.xlu0 %7941  ;;  %v8213_v44 = vld [vmem:[#allocation3 + $0x448] sm:$0xff]  ;;  %v8219_v7 = vld [vmem:[#allocation3 + $0x478] sm:$0xff]  ;;  %10253 = vmatprep.subr.bf16.mxu1 %v10252_v0  ;;  %v10150_v21 = vpack.c.bf16 %v8175_v55, %v8170_v25  ;;  %v8614_v55 = vld [vmem:[#allocation4 + $0x1b0] sm:$0xff] }
 0x761   : > { %7750 = vst.msk [vmem:[#allocation3 + $0x498] sm:$0xff] %vm721_vm3, %v7684_v19  ;;  %8007 = vst.msk [vmem:[#allocation3 + $0x4c8] sm:$0xff] %vm721_vm3, %v7942_v8  ;;  %v10134_v37 = vpack.c.bf16 %v8213_v44, %v8208_v39  ;;  %v8180_v19 = vld [vmem:[#allocation3 + $0x340] sm:$0xff]  ;;  %v8185_v8 = vld [vmem:[#allocation3 + $0x368] sm:$0xff]  ;;  %v10153_v39 = vpack.c.bf16 %v8095_v63, %v8090_v62 }
 0x762   : > { %v10156_v44 = vpack.c.bf16 %v8185_v8, %v8180_v19  ;;  %v8607_v15 = vld [vmem:[#allocation4 + $0x178] sm:$0xff]  ;;  %v8630_v19 = vld [vmem:[#allocation4 + $0x230] sm:$0xff] }
 0x763   : > { %10135 = vmatpush1.bf16.xpose.msra.mxu0 %v10134_v37  ;;  %10255 = vmatpush1.bf16.msra.mxu1 %v10254_v12  ;;  %v8190_v37 = vld [vmem:[#allocation3 + $0x390] sm:$0xff]  ;;  %v8615_v1 = vld [vmem:[#allocation4 + $0x1b8] sm:$0xff]  ;;  %v10394_v12 = vpack.c.bf16 %v8606_v22, %v8598_v59 }
 0x764   : > { %v7944_v14 = vpop.permute.xlu1 %7943  ;;  %v7686_v49 = vpop.permute.xlu0 %7685  ;;  %v8224_v45 = vld [vmem:[#allocation3 + $0x4a0] sm:$0xff]  ;;  %v8218_v11 = vld [vmem:[#allocation3 + $0x470] sm:$0xff]  ;;  %v10162_v27 = vpack.c.bf16 %v8195_v52, %v8190_v37  ;;  %v8623_v58 = vld [vmem:[#allocation4 + $0x1f8] sm:$0xff] }
 0x765   : > { %8008 = vst.msk [vmem:[#allocation3 + $0x4f0] sm:$0xff] %vm721_vm3, %v7944_v14  ;;  %7751 = vst.msk [vmem:[#allocation3 + $0x4c0] sm:$0xff] %vm721_vm3, %v7686_v49  ;;  %v10136_v40 = vpack.c.bf16 %v8224_v45, %v8219_v7  ;;  %v8200_v14 = vld [vmem:[#allocation3 + $0x3e0] sm:$0xff]  ;;  %v8205_v49 = vld [vmem:[#allocation3 + $0x408] sm:$0xff]  ;;  %v10165_v7 = vpack.c.bf16 %v8115_v60, %v8110_v5  ;;  %v10396_v25 = vpack.c.bf16 %v8623_v58, %v8615_v1 }
 0x766   : > { %v10168_v45 = vpack.c.bf16 %v8205_v49, %v8200_v14  ;;  %v8639_v62 = vld [vmem:[#allocation4 + $0x278] sm:$0xff]  ;;  %v8638_v8 = vld [vmem:[#allocation4 + $0x270] sm:$0xff] }
 0x767   : > { %10137 = vmatprep.subr.bf16.mxu0 %v10136_v40  ;;  %v8125_v40 = vld [vmem:[#allocation3 + $0x188] sm:$0xff]  ;;  %v8646_v37 = vld [vmem:[#allocation4 + $0x2b0] sm:$0xff] }
 0x768   : > { %v7688_v42 = vpop.permute.xlu1 %7687  ;;  %v8223_v6 = vld [vmem:[#allocation3 + $0x498] sm:$0xff]  ;;  %v8229_v57 = vld [vmem:[#allocation3 + $0x4c8] sm:$0xff]  ;;  %v10171_v35 = vpack.c.bf16 %v8125_v40, %v8120_v29  ;;  %v8654_v52 = vld [vmem:[#allocation4 + $0x2f0] sm:$0xff] }
 0x769   : > { %7752 = vst.msk [vmem:[#allocation3 + $0x4e8] sm:$0xff] %vm721_vm3, %v7688_v42  ;;  %v10138_v50 = vpack.c.bf16 %v8223_v6, %v8218_v11  ;;  %v8135_v42 = vld [vmem:[#allocation3 + $0x1d8] sm:$0xff]  ;;  %v8220_v11 = vld [vmem:[#allocation3 + $0x480] sm:$0xff]  ;;  %v8225_v6 = vld [vmem:[#allocation3 + $0x4a8] sm:$0xff]  ;;  %v10406_v5 = vpack.c.bf16 %v8654_v52, %v8646_v37 }
 0x76a   : > { %v10177_v47 = vpack.c.bf16 %v8135_v42, %v8130_v31  ;;  %v8662_v14 = vld [vmem:[#allocation4 + $0x330] sm:$0xff]  ;;  %v10414_v31 = vpack.c.bf16 %v8686_v51, %v8678_v38  ;;  %v8571_v37 = vld [vmem:[#allocation4 + $0x58] sm:$0xff] }
 0x76b   : > { %10139 = vmatpush1.bf16.xpose.msra.mxu0 %v10138_v50  ;;  %v10180_v50 = vpack.c.bf16 %v8225_v6, %v8220_v11  ;;  %v8670_v49 = vld [vmem:[#allocation4 + $0x370] sm:$0xff] }
 0x76c   : > { %v8234_v61 = vld [vmem:[#allocation3 + $0x4f0] sm:$0xff]  ;;  %v8228_v28 = vld [vmem:[#allocation3 + $0x4c0] sm:$0xff]  ;;  %v10410_v29 = vpack.c.bf16 %v8670_v49, %v8662_v14  ;;  %v8579_v14 = vld [vmem:[#allocation4 + $0x98] sm:$0xff] }
 0x76d   : > { %v10140_v24 = vpack.c.bf16 %v8234_v61, %v8229_v57  ;;  %v8230_v57 = vld [vmem:[#allocation3 + $0x4d0] sm:$0xff]  ;;  %v10183_v61 = vpack.c.bf16 %v8145_v30, %v8140_v17  ;;  %v8587_v49 = vld [vmem:[#allocation4 + $0xd8] sm:$0xff] }
 0x76e   : > { %v10186_v43 = vpack.c.bf16 %v8235_v16, %v8230_v57  ;;  %v8694_v11 = vld [vmem:[#allocation4 + $0x430] sm:$0xff]  ;;  %v10260_v38 = vpack.c.bf16 %v8587_v49, %v8579_v14  ;;  %v8747_v14 = vld [vmem:[#allocation4 + $0x5d8] sm:$0xff] }
 0x76f   : > { %10141 = vmatprep.subr.bf16.mxu0 %v10140_v24  ;;  %v8150_v24 = vld [vmem:[#allocation3 + $0x250] sm:$0xff] }
 0x770   : > { %v8233_v53 = vld [vmem:[#allocation3 + $0x4e8] sm:$0xff]  ;;  %v10189_v13 = vpack.c.bf16 %v8155_v54, %v8150_v24  ;;  %v8702_v6 = vld [vmem:[#allocation4 + $0x470] sm:$0xff] }
 0x771   : > { %v10142_v56 = vpack.c.bf16 %v8233_v53, %v8228_v28  ;;  %v8566_v28 = vld [vmem:[#allocation4 + $0x30] sm:$0xff]  ;;  %v10418_v57 = vpack.c.bf16 %v8702_v6, %v8694_v11 }
 0x772   : > { %v10386_v53 = vpack.c.bf16 %v8574_v46, %v8566_v28  ;;  %v8710_v17 = vld [vmem:[#allocation4 + $0x4b0] sm:$0xff] }
 0x773   : > { %10143 = vmatpush1.bf16.xpose.msra.mxu0 %v10142_v56  ;;  %v8590_v56 = vld [vmem:[#allocation4 + $0xf0] sm:$0xff] }
 0x774   : > { %10146 = vmatprep.subr.msk.bf16.mxu0 %vm15042_vm4, %v10144_v48  ;;  %v8599_v48 = vld [vmem:[#allocation4 + $0x138] sm:$0xff]  ;;  %v10390_v0 = vpack.c.bf16 %v8590_v56, %v8582_v18  ;;  %v8718_v30 = vld [vmem:[#allocation4 + $0x4f0] sm:$0xff] }
 0x775   : > { %v10392_v10 = vpack.c.bf16 %v8607_v15, %v8599_v48  ;;  %v10422_v23 = vpack.c.bf16 %v8718_v30, %v8710_v17  ;;  %v8726_v24 = vld [vmem:[#allocation4 + $0x530] sm:$0xff] }
 0x776   : > { %v8734_v54 = vld [vmem:[#allocation4 + $0x570] sm:$0xff] }
 0x777   : > { %v10426_v28 = vpack.c.bf16 %v8734_v54, %v8726_v24  ;;  %v8742_v9 = vld [vmem:[#allocation4 + $0x5b0] sm:$0xff] }
 0x778   : > { %v8750_v3 = vld [vmem:[#allocation4 + $0x5f0] sm:$0xff] }
 0x779   : > { %v10430_v18 = vpack.c.bf16 %v8750_v3, %v8742_v9  ;;  %v8758_v48 = vld [vmem:[#allocation4 + $0x630] sm:$0xff] }
 0x77a   : > { %8483 = vmatmul.mubr.f32.vlgmr.msra.gmra.mrb[128].mxu0 %v14971_v2  ;;  %v8100_v2 = vld [vmem:[#allocation3 + $0xc0] sm:$0xff]  ;;  %v8766_v15 = vld [vmem:[#allocation4 + $0x670] sm:$0xff] }
 0x77b   : > { %10149 = vmatpush3.bf16.xpose.msk.msra.mxu0 %vm15042_vm4, %v10147_v34  ;;  %9486 = vmatprep.mubr.msk.f32.mxu0 %vm375_vm0, %v15051_v33  ;;  %v10159_v32 = vpack.c.bf16 %v8105_v4, %v8100_v2  ;;  %v8622_v34 = vld [vmem:[#allocation4 + $0x1f0] sm:$0xff]  ;;  %v10402_v2 = vpack.c.bf16 %v8638_v8, %v8630_v19  ;;  %v10434_v59 = vpack.c.bf16 %v8766_v15, %v8758_v48  ;;  %v8815_v19 = vld [vmem:[#allocation4 + $0x7f8] sm:$0xff] }
 0x77c   : > { %10152 = vmatprep.subr.msk.bf16.mxu0 %vm15042_vm4, %v10150_v21  ;;  %v8631_v21 = vld [vmem:[#allocation4 + $0x238] sm:$0xff]  ;;  %v10398_v63 = vpack.c.bf16 %v8622_v34, %v8614_v55  ;;  %v8774_v1 = vld [vmem:[#allocation4 + $0x6b0] sm:$0xff] }
 0x77d   : > { %v8782_v58 = vld [vmem:[#allocation4 + $0x6f0] sm:$0xff] }
 0x77e   : > { %v10438_v55 = vpack.c.bf16 %v8782_v58, %v8774_v1  ;;  %v8578_v51 = vld [vmem:[#allocation4 + $0x90] sm:$0xff] }
 0x77f   : > { %v8594_v6 = vld [vmem:[#allocation4 + $0x110] sm:$0xff] }
 0x780   : > { %v8610_v30 = vld [vmem:[#allocation4 + $0x190] sm:$0xff] }
 0x781   : > { %v8626_v54 = vld [vmem:[#allocation4 + $0x210] sm:$0xff] }
 0x782   : > { %v8642_v3 = vld [vmem:[#allocation4 + $0x290] sm:$0xff] }
 0x783   : > { %10155 = vmatpush3.bf16.xpose.msk.msra.mxu0 %vm15042_vm4, %v10153_v39  ;;  %v8647_v39 = vld [vmem:[#allocation4 + $0x2b8] sm:$0xff]  ;;  %v8658_v15 = vld [vmem:[#allocation4 + $0x310] sm:$0xff] }
 0x784   : > { %10158 = vmatprep.subr.msk.bf16.mxu0 %vm15042_vm4, %v10156_v44  ;;  %v8655_v44 = vld [vmem:[#allocation4 + $0x2f8] sm:$0xff]  ;;  %v8674_v58 = vld [vmem:[#allocation4 + $0x390] sm:$0xff] }
 0x785   : > { %v10404_v4 = vpack.c.bf16 %v8655_v44, %v8647_v39  ;;  %v8806_v39 = vld [vmem:[#allocation4 + $0x7b0] sm:$0xff] }
 0x786   : > { %v8814_v44 = vld [vmem:[#allocation4 + $0x7f0] sm:$0xff] }
 0x78b   : > { %10161 = vmatpush3.bf16.xpose.msk.msra.mxu0 %vm15042_vm4, %v10159_v32  ;;  %v8663_v32 = vld [vmem:[#allocation4 + $0x338] sm:$0xff] }
 0x78c   : > { %10164 = vmatprep.subr.msk.bf16.mxu0 %vm15042_vm4, %v10162_v27  ;;  %v8671_v27 = vld [vmem:[#allocation4 + $0x378] sm:$0xff] }
 0x78d   : > { %v10408_v60 = vpack.c.bf16 %v8671_v27, %v8663_v32  ;;  %v8562_v27 = vld [vmem:[#allocation4 + $0x10] sm:$0xff] }
 0x78e   : > { %v8240_v32 = vpop.permute.xlu0 %8239 }
 0x793   : > { %10167 = vmatpush3.bf16.xpose.msk.msra.mxu0 %vm15042_vm4, %v10165_v7  ;;  %v8679_v7 = vld [vmem:[#allocation4 + $0x3b8] sm:$0xff] }
 0x794   : > { %10170 = vmatprep.subr.msk.bf16.mxu0 %vm15042_vm4, %v10168_v45  ;;  %v8687_v45 = vld [vmem:[#allocation4 + $0x3f8] sm:$0xff] }
 0x795   : > { %v10412_v40 = vpack.c.bf16 %v8687_v45, %v8679_v7 }
 0x79b   : > { %10173 = vmatpush3.bf16.xpose.msk.msra.mxu0 %vm15042_vm4, %v10171_v35  ;;  %v8695_v35 = vld [vmem:[#allocation4 + $0x438] sm:$0xff] }
 0x79c   : > { %10176 = vmatprep.subr.msk.bf16.mxu0 %vm15042_vm4, %v10174_v20  ;;  %v8703_v20 = vld [vmem:[#allocation4 + $0x478] sm:$0xff] }
 0x79d   : > { %v10416_v42 = vpack.c.bf16 %v8703_v20, %v8695_v35  ;;  %v8586_v35 = vld [vmem:[#allocation4 + $0xd0] sm:$0xff]  ;;  %v8595_v20 = vld [vmem:[#allocation4 + $0x118] sm:$0xff] }
 0x7a3   : > { %10179 = vmatpush3.bf16.xpose.msk.msra.mxu0 %vm15042_vm4, %v10177_v47  ;;  %v8711_v47 = vld [vmem:[#allocation4 + $0x4b8] sm:$0xff] }
 0x7a4   : > { %10182 = vmatprep.subr.msk.bf16.mxu0 %vm15042_vm4, %v10180_v50  ;;  %v8719_v50 = vld [vmem:[#allocation4 + $0x4f8] sm:$0xff] }
 0x7a5   : > { %v10420_v16 = vpack.c.bf16 %v8719_v50, %v8711_v47  ;;  %v8602_v47 = vld [vmem:[#allocation4 + $0x150] sm:$0xff]  ;;  %v8611_v50 = vld [vmem:[#allocation4 + $0x198] sm:$0xff] }
 0x7ab   : > { %10185 = vmatpush3.bf16.xpose.msk.msra.mxu0 %vm15042_vm4, %v10183_v61  ;;  %v8735_v61 = vld [vmem:[#allocation4 + $0x578] sm:$0xff] }
 0x7ac   : > { %10188 = vmatprep.subr.msk.bf16.mxu0 %vm15042_vm4, %v10186_v43  ;;  %v8727_v43 = vld [vmem:[#allocation4 + $0x538] sm:$0xff] }
 0x7ad   : > { %v10424_v41 = vpack.c.bf16 %v8735_v61, %v8727_v43  ;;  %v8618_v43 = vld [vmem:[#allocation4 + $0x1d0] sm:$0xff]  ;;  %v8627_v61 = vld [vmem:[#allocation4 + $0x218] sm:$0xff] }
 0x7b3   : > { %10191 = vmatpush3.bf16.xpose.msk.msra.mxu0 %vm15042_vm4, %v10189_v13  ;;  %v8751_v13 = vld [vmem:[#allocation4 + $0x5f8] sm:$0xff] }
 0x7b4   : > { %10385 = vmatprep.subr.bf16.mxu0 %v10384_v26  ;;  %v8743_v26 = vld [vmem:[#allocation4 + $0x5b8] sm:$0xff] }
 0x7b5   : > { %v10428_v46 = vpack.c.bf16 %v8751_v13, %v8743_v26  ;;  %v8634_v26 = vld [vmem:[#allocation4 + $0x250] sm:$0xff]  ;;  %v8643_v13 = vld [vmem:[#allocation4 + $0x298] sm:$0xff] }
 0x7ba   : > { %9487 = vmatmul.mubr.msk.f32.vlgmr.msra.gmra.mrb[128].mxu0 %vm375_vm0, %v15051_v33  ;;  %v10400_v33 = vpack.c.bf16 %v8639_v62, %v8631_v21  ;;  %v8790_v21 = vld [vmem:[#allocation4 + $0x730] sm:$0xff] }
 0x7bb   : > { %10387 = vmatpush1.bf16.msra.mxu0 %v10386_v53  ;;  %v8759_v53 = vld [vmem:[#allocation4 + $0x638] sm:$0xff]  ;;  %v8798_v62 = vld [vmem:[#allocation4 + $0x770] sm:$0xff] }
 0x7bc   : > { %10389 = vmatprep.subr.bf16.mxu0 %v10388_v36  ;;  %v8767_v36 = vld [vmem:[#allocation4 + $0x678] sm:$0xff] }
 0x7bd   : > { %v10432_v56 = vpack.c.bf16 %v8767_v36, %v8759_v53  ;;  %v8650_v53 = vld [vmem:[#allocation4 + $0x2d0] sm:$0xff]  ;;  %v8659_v36 = vld [vmem:[#allocation4 + $0x318] sm:$0xff] }
 0x7bf   : > { %10391 = vmatpush1.bf16.msra.mxu0 %v10390_v0  ;;  %v8775_v0 = vld [vmem:[#allocation4 + $0x6b8] sm:$0xff] }
 0x7c0   : > { %10393 = vmatprep.subr.bf16.mxu0 %v10392_v10  ;;  %v8783_v10 = vld [vmem:[#allocation4 + $0x6f8] sm:$0xff] }
 0x7c1   : > { %v10436_v22 = vpack.c.bf16 %v8783_v10, %v8775_v0  ;;  %v8666_v0 = vld [vmem:[#allocation4 + $0x350] sm:$0xff]  ;;  %v8675_v10 = vld [vmem:[#allocation4 + $0x398] sm:$0xff] }
 0x7c3   : > { %10395 = vmatpush1.bf16.msra.mxu0 %v10394_v12  ;;  %v8791_v12 = vld [vmem:[#allocation4 + $0x738] sm:$0xff] }
 0x7c4   : > { %10397 = vmatprep.subr.bf16.mxu0 %v10396_v25  ;;  %v8799_v25 = vld [vmem:[#allocation4 + $0x778] sm:$0xff] }
 0x7c5   : > { %v10440_v34 = vpack.c.bf16 %v8799_v25, %v8791_v12  ;;  %v8682_v12 = vld [vmem:[#allocation4 + $0x3d0] sm:$0xff]  ;;  %v8691_v25 = vld [vmem:[#allocation4 + $0x418] sm:$0xff] }
 0x7c7   : > { %10399 = vmatpush1.bf16.msra.mxu0 %v10398_v63  ;;  %v10442_v63 = vpack.c.bf16 %v8798_v62, %v8790_v21  ;;  %v8690_v62 = vld [vmem:[#allocation4 + $0x410] sm:$0xff] }
 0x7c8   : > { %10401 = vmatprep.subr.bf16.mxu0 %v10400_v33  ;;  %v8807_v33 = vld [vmem:[#allocation4 + $0x7b8] sm:$0xff] }
 0x7c9   : > { %v10444_v8 = vpack.c.bf16 %v8815_v19, %v8807_v33  ;;  %v8707_v33 = vld [vmem:[#allocation4 + $0x498] sm:$0xff] }
 0x7ca   : > { %v8715_v19 = vld [vmem:[#allocation4 + $0x4d8] sm:$0xff] }
 0x7cb   : > { %10403 = vmatpush1.bf16.msra.mxu0 %v10402_v2  ;;  %v10446_v2 = vpack.c.bf16 %v8814_v44, %v8806_v39  ;;  %v10292_v39 = vpack.c.bf16 %v8715_v19, %v8707_v33  ;;  %v8706_v44 = vld [vmem:[#allocation4 + $0x490] sm:$0xff] }
 0x7cc   : > { %10405 = vmatprep.subr.bf16.mxu0 %v10404_v4  ;;  %v8563_v4 = vld [vmem:[#allocation4 + $0x18] sm:$0xff] }
 0x7cd   : > { %v10256_v52 = vpack.c.bf16 %v8571_v37, %v8563_v4  ;;  %v8723_v4 = vld [vmem:[#allocation4 + $0x518] sm:$0xff] }
 0x7ce   : > { %v8731_v37 = vld [vmem:[#allocation4 + $0x558] sm:$0xff] }
 0x7cf   : > { %10407 = vmatpush1.bf16.msra.mxu0 %v10406_v5  ;;  %10257 = vmatprep.subr.bf16.mxu1 %v10256_v52  ;;  %v8570_v5 = vld [vmem:[#allocation4 + $0x50] sm:$0xff] }
 0x7d0   : > { %10409 = vmatprep.subr.bf16.mxu0 %v10408_v60 }
 0x7d3   : > { %10411 = vmatpush1.bf16.msra.mxu0 %v10410_v29  ;;  %v10258_v29 = vpack.c.bf16 %v8570_v5, %v8562_v27  ;;  %v8722_v27 = vld [vmem:[#allocation4 + $0x510] sm:$0xff] }
 0x7d4   : > { %10413 = vmatprep.subr.bf16.mxu0 %v10412_v40  ;;  %v8730_v5 = vld [vmem:[#allocation4 + $0x550] sm:$0xff] }
 0x7d5   : > { %v10298_v49 = vpack.c.bf16 %v8730_v5, %v8722_v27  ;;  %v8653_v27 = vld [vmem:[#allocation4 + $0x2e8] sm:$0xff] }
 0x7d7   : > { %10415 = vmatpush1.bf16.msra.mxu0 %v10414_v31  ;;  %v8603_v31 = vld [vmem:[#allocation4 + $0x158] sm:$0xff] }
 0x7d8   : > { %10417 = vmatprep.subr.bf16.mxu0 %v10416_v42  ;;  %v10262_v42 = vpack.c.bf16 %v8586_v35, %v8578_v51  ;;  %v10264_v11 = vpack.c.bf16 %v8603_v31, %v8595_v20  ;;  %v8755_v51 = vld [vmem:[#allocation4 + $0x618] sm:$0xff] }
 0x7d9   : > { %v8763_v35 = vld [vmem:[#allocation4 + $0x658] sm:$0xff] }
 0x7da   : > { %v10304_v31 = vpack.c.bf16 %v8763_v35, %v8755_v51  ;;  %v8660_v35 = vld [vmem:[#allocation4 + $0x320] sm:$0xff] }
 0x7db   : > { %10419 = vmatpush1.bf16.msra.mxu0 %v10418_v57  ;;  %v8619_v57 = vld [vmem:[#allocation4 + $0x1d8] sm:$0xff] }
 0x7dc   : > { %10421 = vmatprep.subr.bf16.mxu0 %v10420_v16  ;;  %v10266_v16 = vpack.c.bf16 %v8602_v47, %v8594_v6  ;;  %v10268_v17 = vpack.c.bf16 %v8619_v57, %v8611_v50  ;;  %v8771_v6 = vld [vmem:[#allocation4 + $0x698] sm:$0xff] }
 0x7dd   : > { %v8779_v47 = vld [vmem:[#allocation4 + $0x6d8] sm:$0xff] }
 0x7de   : > { %v10308_v57 = vpack.c.bf16 %v8779_v47, %v8771_v6  ;;  %v8676_v47 = vld [vmem:[#allocation4 + $0x3a0] sm:$0xff] }
 0x7df   : > { %10423 = vmatpush1.bf16.msra.mxu0 %v10422_v23  ;;  %v8635_v23 = vld [vmem:[#allocation4 + $0x258] sm:$0xff] }
 0x7e0   : > { %10425 = vmatprep.subr.bf16.mxu0 %v10424_v41  ;;  %v10270_v41 = vpack.c.bf16 %v8618_v43, %v8610_v30  ;;  %v10272_v24 = vpack.c.bf16 %v8635_v23, %v8627_v61  ;;  %v8787_v30 = vld [vmem:[#allocation4 + $0x718] sm:$0xff] }
 0x7e1   : > { %v8795_v43 = vld [vmem:[#allocation4 + $0x758] sm:$0xff] }
 0x7e2   : > { %v10312_v23 = vpack.c.bf16 %v8795_v43, %v8787_v30  ;;  %v8692_v43 = vld [vmem:[#allocation4 + $0x420] sm:$0xff] }
 0x7e3   : > { %10427 = vmatpush1.bf16.msra.mxu0 %v10426_v28  ;;  %v8651_v28 = vld [vmem:[#allocation4 + $0x2d8] sm:$0xff] }
 0x7e4   : > { %10429 = vmatprep.subr.bf16.mxu0 %v10428_v46  ;;  %v10274_v46 = vpack.c.bf16 %v8634_v26, %v8626_v54  ;;  %v10276_v9 = vpack.c.bf16 %v8651_v28, %v8643_v13  ;;  %v8803_v54 = vld [vmem:[#allocation4 + $0x798] sm:$0xff] }
 0x7e5   : > { %v8811_v26 = vld [vmem:[#allocation4 + $0x7d8] sm:$0xff] }
 0x7e6   : > { %v10316_v28 = vpack.c.bf16 %v8811_v26, %v8803_v54  ;;  %v8708_v26 = vld [vmem:[#allocation4 + $0x4a0] sm:$0xff] }
 0x7e7   : > { %10431 = vmatpush1.bf16.msra.mxu0 %v10430_v18  ;;  %v8667_v18 = vld [vmem:[#allocation4 + $0x358] sm:$0xff] }
 0x7e8   : > { %10433 = vmatprep.subr.bf16.mxu0 %v10432_v56  ;;  %v10278_v56 = vpack.c.bf16 %v8650_v53, %v8642_v3  ;;  %v10280_v48 = vpack.c.bf16 %v8667_v18, %v8659_v36  ;;  %v8565_v3 = vld [vmem:[#allocation4 + $0x28] sm:$0xff] }
 0x7e9   : > { %v8573_v53 = vld [vmem:[#allocation4 + $0x68] sm:$0xff] }
 0x7ea   : > { %v10320_v18 = vpack.c.bf16 %v8573_v53, %v8565_v3  ;;  %v8724_v53 = vld [vmem:[#allocation4 + $0x520] sm:$0xff] }
 0x7eb   : > { %10435 = vmatpush1.bf16.msra.mxu0 %v10434_v59  ;;  %v8683_v59 = vld [vmem:[#allocation4 + $0x3d8] sm:$0xff] }
 0x7ec   : > { %10437 = vmatprep.subr.bf16.mxu0 %v10436_v22  ;;  %v10282_v22 = vpack.c.bf16 %v8666_v0, %v8658_v15  ;;  %v10284_v1 = vpack.c.bf16 %v8683_v59, %v8675_v10  ;;  %v8581_v15 = vld [vmem:[#allocation4 + $0xa8] sm:$0xff] }
 0x7ed   : > { %v8589_v0 = vld [vmem:[#allocation4 + $0xe8] sm:$0xff] }
 0x7ee   : > { %v10324_v59 = vpack.c.bf16 %v8589_v0, %v8581_v15  ;;  %v8740_v0 = vld [vmem:[#allocation4 + $0x5a0] sm:$0xff] }
 0x7ef   : > { %10439 = vmatpush1.bf16.msra.mxu0 %v10438_v55  ;;  %v8699_v55 = vld [vmem:[#allocation4 + $0x458] sm:$0xff] }
 0x7f0   : > { %10441 = vmatprep.subr.bf16.mxu0 %v10440_v34  ;;  %v10286_v34 = vpack.c.bf16 %v8682_v12, %v8674_v58  ;;  %v10288_v21 = vpack.c.bf16 %v8699_v55, %v8691_v25  ;;  %v8597_v58 = vld [vmem:[#allocation4 + $0x128] sm:$0xff] }
 0x7f1   : > { %v8605_v12 = vld [vmem:[#allocation4 + $0x168] sm:$0xff] }
 0x7f2   : > { %v10328_v55 = vpack.c.bf16 %v8605_v12, %v8597_v58  ;;  %v8756_v12 = vld [vmem:[#allocation4 + $0x620] sm:$0xff] }
 0x7f3   : > { %10443 = vmatpush1.bf16.msra.mxu0 %v10442_v63  ;;  %v8698_v63 = vld [vmem:[#allocation4 + $0x450] sm:$0xff] }
 0x7f4   : > { %10445 = vmatprep.subr.bf16.mxu0 %v10444_v8  ;;  %v10290_v8 = vpack.c.bf16 %v8698_v63, %v8690_v62  ;;  %v8613_v62 = vld [vmem:[#allocation4 + $0x1a8] sm:$0xff] }
 0x7f5   : > { %v8621_v63 = vld [vmem:[#allocation4 + $0x1e8] sm:$0xff] }
 0x7f6   : > { %v10332_v19 = vpack.c.bf16 %v8621_v63, %v8613_v62  ;;  %v8772_v63 = vld [vmem:[#allocation4 + $0x6a0] sm:$0xff] }
 0x7f7   : > { %10447 = vmatpush1.bf16.msra.mxu0 %v10446_v2  ;;  %v8714_v2 = vld [vmem:[#allocation4 + $0x4d0] sm:$0xff] }
 0x7f8   : > { %v10294_v52 = vpack.c.bf16 %v8714_v2, %v8706_v44  ;;  %v8629_v44 = vld [vmem:[#allocation4 + $0x228] sm:$0xff] }
 0x7f9   : > { %v8637_v2 = vld [vmem:[#allocation4 + $0x268] sm:$0xff] }
 0x88d   : > { %v8555_v60 = vpop.f32.mrb[128].mxu0 }
 0x88e   : > { %v8557_v7 = vpop.f32.mrb[129].mxu0  ;;  %v15090_v40 = vadd.f32 %v8555_v60, %v8240_v32  ;;  %v8739_v60 = vld [vmem:[#allocation4 + $0x598] sm:$0xff] }
 0x88f   : > { %v15088_v45 = vadd.f32 %v8557_v7, %v8240_v32  ;;  %v10296_v32 = vpack.c.bf16 %v8731_v37, %v8723_v4  ;;  %v10300_v7 = vpack.c.bf16 %v8747_v14, %v8739_v60  ;;  %v10336_v37 = vpack.c.bf16 %v8637_v2, %v8629_v44  ;;  %v8644_v14 = vld [vmem:[#allocation4 + $0x2a0] sm:$0xff] }
 0x890   : > { %v8788_v2 = vld [vmem:[#allocation4 + $0x720] sm:$0xff] }
 0x891   : > { %8880 = vmatprep.mubr.f32.mxu1 %v15088_v45  ;;  %9093 = vmatprep.mubr.f32.mxu0 %v15088_v45 }
 0x892   : > { %8881 = vmatmul.mubr.f32.vlgmr.msra.gmra.mrb[160].mxu1 %v15090_v40  ;;  %9094 = vmatmul.mubr.f32.vlgmr.msra.gmra.mrb[130].mxu0 %v15090_v40 }
 0x893   : > { %10259 = vmatpush1.bf16.msra.mxu1 %v10258_v29  ;;  %8951 = vmatprep.mubr.f32.mxu1 %v15088_v45  ;;  %v8738_v29 = vld [vmem:[#allocation4 + $0x590] sm:$0xff] }
 0x894   : > { %10261 = vmatprep.subr.bf16.mxu1 %v10260_v38  ;;  %v8746_v38 = vld [vmem:[#allocation4 + $0x5d0] sm:$0xff] }
 0x895   : > { %v10302_v20 = vpack.c.bf16 %v8746_v38, %v8738_v29  ;;  %v8669_v29 = vld [vmem:[#allocation4 + $0x368] sm:$0xff] }
 0x897   : > { %10263 = vmatpush1.bf16.msra.mxu1 %v10262_v42  ;;  %v8754_v42 = vld [vmem:[#allocation4 + $0x610] sm:$0xff] }
 0x898   : > { %10265 = vmatprep.subr.bf16.mxu1 %v10264_v11  ;;  %v8762_v11 = vld [vmem:[#allocation4 + $0x650] sm:$0xff] }
 0x899   : > { %v10306_v50 = vpack.c.bf16 %v8762_v11, %v8754_v42  ;;  %v8685_v42 = vld [vmem:[#allocation4 + $0x3e8] sm:$0xff] }
 0x89b   : > { %10267 = vmatpush1.bf16.msra.mxu1 %v10266_v16  ;;  %v8770_v16 = vld [vmem:[#allocation4 + $0x690] sm:$0xff] }
 0x89c   : > { %10269 = vmatprep.subr.bf16.mxu1 %v10268_v17  ;;  %v8778_v17 = vld [vmem:[#allocation4 + $0x6d0] sm:$0xff] }
 0x89d   : > { %v10310_v61 = vpack.c.bf16 %v8778_v17, %v8770_v16  ;;  %v8701_v16 = vld [vmem:[#allocation4 + $0x468] sm:$0xff] }
 0x89f   : > { %10271 = vmatpush1.bf16.msra.mxu1 %v10270_v41  ;;  %v8786_v41 = vld [vmem:[#allocation4 + $0x710] sm:$0xff] }
 0x8a0   : > { %10273 = vmatprep.subr.bf16.mxu1 %v10272_v24  ;;  %v8794_v24 = vld [vmem:[#allocation4 + $0x750] sm:$0xff] }
 0x8a1   : > { %v10314_v13 = vpack.c.bf16 %v8794_v24, %v8786_v41  ;;  %v8717_v41 = vld [vmem:[#allocation4 + $0x4e8] sm:$0xff] }
 0x8a3   : > { %10275 = vmatpush1.bf16.msra.mxu1 %v10274_v46  ;;  %v8802_v46 = vld [vmem:[#allocation4 + $0x790] sm:$0xff] }
 0x8a4   : > { %10277 = vmatprep.subr.bf16.mxu1 %v10276_v9  ;;  %v8810_v9 = vld [vmem:[#allocation4 + $0x7d0] sm:$0xff] }
 0x8a5   : > { %v10318_v36 = vpack.c.bf16 %v8810_v9, %v8802_v46  ;;  %v8733_v46 = vld [vmem:[#allocation4 + $0x568] sm:$0xff] }
 0x8a7   : > { %10279 = vmatpush1.bf16.msra.mxu1 %v10278_v56  ;;  %v8564_v56 = vld [vmem:[#allocation4 + $0x20] sm:$0xff] }
 0x8a8   : > { %10281 = vmatprep.subr.bf16.mxu1 %v10280_v48  ;;  %v8572_v48 = vld [vmem:[#allocation4 + $0x60] sm:$0xff] }
 0x8a9   : > { %v10322_v10 = vpack.c.bf16 %v8572_v48, %v8564_v56  ;;  %v8749_v56 = vld [vmem:[#allocation4 + $0x5e8] sm:$0xff] }
 0x8ab   : > { %10283 = vmatpush1.bf16.msra.mxu1 %v10282_v22  ;;  %v8580_v22 = vld [vmem:[#allocation4 + $0xa0] sm:$0xff] }
 0x8ac   : > { %10285 = vmatprep.subr.bf16.mxu1 %v10284_v1  ;;  %v8588_v1 = vld [vmem:[#allocation4 + $0xe0] sm:$0xff] }
 0x8ad   : > { %v10326_v25 = vpack.c.bf16 %v8588_v1, %v8580_v22  ;;  %v8765_v22 = vld [vmem:[#allocation4 + $0x668] sm:$0xff] }
 0x8af   : > { %10287 = vmatpush1.bf16.msra.mxu1 %v10286_v34  ;;  %v8596_v34 = vld [vmem:[#allocation4 + $0x120] sm:$0xff] }
 0x8b0   : > { %10289 = vmatprep.subr.bf16.mxu1 %v10288_v21  ;;  %v8604_v21 = vld [vmem:[#allocation4 + $0x160] sm:$0xff] }
 0x8b1   : > { %v10330_v33 = vpack.c.bf16 %v8604_v21, %v8596_v34  ;;  %v8781_v34 = vld [vmem:[#allocation4 + $0x6e8] sm:$0xff] }
 0x8b3   : > { %10291 = vmatpush1.bf16.msra.mxu1 %v10290_v8  ;;  %v8612_v8 = vld [vmem:[#allocation4 + $0x1a0] sm:$0xff] }
 0x8b4   : > { %10293 = vmatprep.subr.bf16.mxu1 %v10292_v39  ;;  %v8620_v39 = vld [vmem:[#allocation4 + $0x1e0] sm:$0xff] }
 0x8b5   : > { %v10334_v4 = vpack.c.bf16 %v8620_v39, %v8612_v8  ;;  %v8797_v8 = vld [vmem:[#allocation4 + $0x768] sm:$0xff] }
 0x8b7   : > { %10295 = vmatpush1.bf16.msra.mxu1 %v10294_v52  ;;  %v8636_v52 = vld [vmem:[#allocation4 + $0x260] sm:$0xff] }
 0x8b8   : > { %10297 = vmatprep.subr.bf16.mxu1 %v10296_v32  ;;  %v8645_v32 = vld [vmem:[#allocation4 + $0x2a8] sm:$0xff] }
 0x8b9   : > { %v10340_v60 = vpack.c.bf16 %v8653_v27, %v8645_v32  ;;  %v8804_v27 = vld [vmem:[#allocation4 + $0x7a0] sm:$0xff] }
 0x8bb   : > { %10299 = vmatpush1.bf16.msra.mxu1 %v10298_v49  ;;  %v8652_v49 = vld [vmem:[#allocation4 + $0x2e0] sm:$0xff] }
 0x8bc   : > { %10301 = vmatprep.subr.bf16.mxu1 %v10300_v7  ;;  %v8661_v7 = vld [vmem:[#allocation4 + $0x328] sm:$0xff]  ;;  %v10342_v38 = vpack.c.bf16 %v8652_v49, %v8644_v14 }
 0x8bd   : > { %v10344_v51 = vpack.c.bf16 %v8669_v29, %v8661_v7 }
 0x8bf   : > { %10303 = vmatpush1.bf16.msra.mxu1 %v10302_v20  ;;  %v8668_v20 = vld [vmem:[#allocation4 + $0x360] sm:$0xff] }
 0x8c0   : > { %10305 = vmatprep.subr.bf16.mxu1 %v10304_v31  ;;  %v8677_v31 = vld [vmem:[#allocation4 + $0x3a8] sm:$0xff]  ;;  %v10346_v11 = vpack.c.bf16 %v8668_v20, %v8660_v35 }
 0x8c1   : > { %v10348_v6 = vpack.c.bf16 %v8685_v42, %v8677_v31 }
 0x8c3   : > { %10307 = vmatpush1.bf16.msra.mxu1 %v10306_v50  ;;  %v8684_v50 = vld [vmem:[#allocation4 + $0x3e0] sm:$0xff] }
 0x8c4   : > { %10309 = vmatprep.subr.bf16.mxu1 %v10308_v57  ;;  %v8693_v57 = vld [vmem:[#allocation4 + $0x428] sm:$0xff]  ;;  %v10350_v17 = vpack.c.bf16 %v8684_v50, %v8676_v47 }
 0x8c5   : > { %v10352_v30 = vpack.c.bf16 %v8701_v16, %v8693_v57 }
 0x8c7   : > { %10311 = vmatpush1.bf16.msra.mxu1 %v10310_v61  ;;  %v8700_v61 = vld [vmem:[#allocation4 + $0x460] sm:$0xff] }
 0x8c8   : > { %10313 = vmatprep.subr.bf16.mxu1 %v10312_v23  ;;  %v8709_v23 = vld [vmem:[#allocation4 + $0x4a8] sm:$0xff]  ;;  %v10354_v24 = vpack.c.bf16 %v8700_v61, %v8692_v43 }
 0x8c9   : > { %v10356_v54 = vpack.c.bf16 %v8717_v41, %v8709_v23 }
 0x8cb   : > { %10315 = vmatpush1.bf16.msra.mxu1 %v10314_v13  ;;  %v8716_v13 = vld [vmem:[#allocation4 + $0x4e0] sm:$0xff] }
 0x8cc   : > { %10317 = vmatprep.subr.bf16.mxu1 %v10316_v28  ;;  %v8725_v28 = vld [vmem:[#allocation4 + $0x528] sm:$0xff]  ;;  %v10358_v9 = vpack.c.bf16 %v8716_v13, %v8708_v26 }
 0x8cd   : > { %v10360_v3 = vpack.c.bf16 %v8733_v46, %v8725_v28 }
 0x8cf   : > { %10319 = vmatpush1.bf16.msra.mxu1 %v10318_v36  ;;  %v8732_v36 = vld [vmem:[#allocation4 + $0x560] sm:$0xff] }
 0x8d0   : > { %10321 = vmatprep.subr.bf16.mxu1 %v10320_v18  ;;  %v8741_v18 = vld [vmem:[#allocation4 + $0x5a8] sm:$0xff]  ;;  %v10362_v48 = vpack.c.bf16 %v8732_v36, %v8724_v53 }
 0x8d1   : > { %v10364_v15 = vpack.c.bf16 %v8749_v56, %v8741_v18 }
 0x8d2   : > { %8952 = vmatmul.mubr.f32.vlgmr.msra.gmra.mrb[162].mxu1 %v15090_v40 }
 0x8d3   : > { %10323 = vmatpush1.bf16.msra.mxu1 %v10322_v10  ;;  %9022 = vmatprep.mubr.f32.mxu1 %v15088_v45  ;;  %v8628_v45 = vld [vmem:[#allocation4 + $0x220] sm:$0xff] }
 0x8d4   : > { %10325 = vmatprep.subr.bf16.mxu1 %v10324_v59  ;;  %v10338_v5 = vpack.c.bf16 %v8636_v52, %v8628_v45  ;;  %v8748_v10 = vld [vmem:[#allocation4 + $0x5e0] sm:$0xff]  ;;  %v8757_v59 = vld [vmem:[#allocation4 + $0x628] sm:$0xff] }
 0x8d5   : > { %v10366_v1 = vpack.c.bf16 %v8748_v10, %v8740_v0  ;;  %v10368_v58 = vpack.c.bf16 %v8765_v22, %v8757_v59  ;;  %v8813_v45 = vld [vmem:[#allocation4 + $0x7e8] sm:$0xff] }
 0x8d7   : > { %10327 = vmatpush1.bf16.msra.mxu1 %v10326_v25  ;;  %v8764_v25 = vld [vmem:[#allocation4 + $0x660] sm:$0xff] }
 0x8d8   : > { %10329 = vmatprep.subr.bf16.mxu1 %v10328_v55  ;;  %v8773_v55 = vld [vmem:[#allocation4 + $0x6a8] sm:$0xff]  ;;  %v10370_v21 = vpack.c.bf16 %v8764_v25, %v8756_v12 }
 0x8d9   : > { %v10372_v62 = vpack.c.bf16 %v8781_v34, %v8773_v55 }
 0x8db   : > { %10331 = vmatpush1.bf16.msra.mxu1 %v10330_v33  ;;  %v8780_v33 = vld [vmem:[#allocation4 + $0x6e0] sm:$0xff] }
 0x8dc   : > { %10333 = vmatprep.subr.bf16.mxu1 %v10332_v19  ;;  %v8789_v19 = vld [vmem:[#allocation4 + $0x728] sm:$0xff]  ;;  %v10374_v39 = vpack.c.bf16 %v8780_v33, %v8772_v63 }
 0x8dd   : > { %v10376_v44 = vpack.c.bf16 %v8797_v8, %v8789_v19 }
 0x8df   : > { %10335 = vmatpush1.bf16.msra.mxu1 %v10334_v4  ;;  %v8796_v4 = vld [vmem:[#allocation4 + $0x760] sm:$0xff] }
 0x8e0   : > { %10337 = vmatprep.subr.bf16.mxu1 %v10336_v37  ;;  %v8805_v37 = vld [vmem:[#allocation4 + $0x7a8] sm:$0xff]  ;;  %v10378_v52 = vpack.c.bf16 %v8796_v4, %v8788_v2 }
 0x8e1   : > { %v10380_v32 = vpack.c.bf16 %v8813_v45, %v8805_v37 }
 0x8e3   : > { %10339 = vmatpush1.bf16.msra.mxu1 %v10338_v5  ;;  %v8812_v5 = vld [vmem:[#allocation4 + $0x7e0] sm:$0xff] }
 0x8e4   : > { %10341 = vmatprep.subr.bf16.mxu1 %v10340_v60  ;;  %v10382_v60 = vpack.c.bf16 %v8812_v5, %v8804_v27 }
 0x8e7   : > { %10343 = vmatpush1.bf16.msra.mxu1 %v10342_v38 }
 0x8e8   : > { %10345 = vmatprep.subr.bf16.mxu1 %v10344_v51 }
 0x8eb   : > { %10347 = vmatpush1.bf16.msra.mxu1 %v10346_v11 }
 0x8ec   : > { %10349 = vmatprep.subr.bf16.mxu1 %v10348_v6 }
 0x8ef   : > { %10351 = vmatpush1.bf16.msra.mxu1 %v10350_v17 }
 0x8f0   : > { %10353 = vmatprep.subr.bf16.mxu1 %v10352_v30 }
 0x8f3   : > { %10355 = vmatpush1.bf16.msra.mxu1 %v10354_v24 }
 0x8f4   : > { %10357 = vmatprep.subr.bf16.mxu1 %v10356_v54 }
 0x8f7   : > { %10359 = vmatpush1.bf16.msra.mxu1 %v10358_v9 }
 0x8f8   : > { %10361 = vmatprep.subr.bf16.mxu1 %v10360_v3 }
 0x8fb   : > { %10363 = vmatpush1.bf16.msra.mxu1 %v10362_v48 }
 0x8fc   : > { %10365 = vmatprep.subr.bf16.mxu1 %v10364_v15 }
 0x8ff   : > { %10367 = vmatpush1.bf16.msra.mxu1 %v10366_v1 }
 0x900   : > { %10369 = vmatprep.subr.bf16.mxu1 %v10368_v58 }
 0x903   : > { %10371 = vmatpush1.bf16.msra.mxu1 %v10370_v21 }
 0x904   : > { %10373 = vmatprep.subr.bf16.mxu1 %v10372_v62 }
 0x907   : > { %10375 = vmatpush1.bf16.msra.mxu1 %v10374_v39 }
 0x908   : > { %10377 = vmatprep.subr.bf16.mxu1 %v10376_v44 }
 0x90b   : > { %10379 = vmatpush1.bf16.msra.mxu1 %v10378_v52 }
 0x90c   : > { %10381 = vmatprep.subr.bf16.mxu1 %v10380_v32 }
 0x90f   : > { %10383 = vmatpush1.bf16.msra.mxu1 %v10382_v60 }
 0x912   : > { %9023 = vmatmul.mubr.f32.vlgmr.msra.gmra.mrb[164].mxu1 %v15090_v40 }
 0x965   : > { %v8882_v14 = vpop.f32.mrb[160].mxu1  ;;  %v9095_v49 = vpop.f32.mrb[130].mxu0 }
 0x966   : > { %v8884_v7 = vpop.f32.mrb[161].mxu1  ;;  %v9097_v29 = vpop.f32.mrb[131].mxu0 }
 0x967   : > { %v9108_v38 = vcombine.low %v8882_v14, %v8884_v7  ;;  %v9111_v51 = vcombine.low %v9095_v49, %v9097_v29 }
 0x969   : > { %9116 = vst [vmem:[%s374_s11] sm:$0x77] %v9108_v38  ;;  %9119 = vst [vmem:[%s374_s11 + $0x18] sm:$0x77] %v9111_v51 }
 0x9a5   : > { %v8953_v35 = vpop.f32.mrb[162].mxu1 }
 0x9a6   : > { %v8955_v20 = vpop.f32.mrb[163].mxu1 }
 0x9a7   : > { %v9109_v31 = vcombine.low %v8953_v35, %v8955_v20 }
 0x9a9   : > { %9117 = vst [vmem:[%s374_s11 + $0x8] sm:$0x77] %v9109_v31 }
 0x9e5   : > { %v9024_v42 = vpop.f32.mrb[164].mxu1 }
 0x9e6   : > { %v9026_v11 = vpop.f32.mrb[165].mxu1 }
 0x9e7   : > { %v9110_v40 = vcombine.low %v9024_v42, %v9026_v11 }
 0x9e9   : > { %9118 = vst [vmem:[%s374_s11 + $0x10] sm:$0x77] %v9110_v40 }
 0x9ea PF: > { %s21_s13 = sadd.s32 1, %s10820_s13  }
 0x9eb   : > { %p18_p2 = scmp.ge.s32.totalorder %s21_s13, 4  }
 0x9ed   :  { %20 = sbr.rel (!%p18_p2) target bundleno = 1 (0x1), region = 97 }
 0x9f4   :  { %9141 = vsyncpa [#allocation5], 1 }
 0x9f5   :  { %9143 = vsyncpa [#allocation5 + $0x1], 1 }

</bundles_post_ra>
